<compile_context>
chip_gen: v7x
topology: tpu7x:2x2x1
jax: 0.10.0
libtpu: 0.0.40
codegen_flags: <defaults>
</compile_context>

<pallas_src>
import functools

import jax
import jax.numpy as jnp
from jax import lax
from jax.experimental import pallas as pl
from jax.experimental.pallas import tpu as pltpu

CPAD = 128  # channel padding -> lane-dense MXU outputs / VPU ops / stores


def _round_up(v, m):
    return (v + m - 1) // m * m


# ----------------------------------------------------------------------------
# Kernel 1: 3x3 conv (SAME) + folded-BN shift + ReLU, halo handled in-kernel.
# Consumes a ring-2 zero-padded input, emits a ring-1 zero-padded activation
# so the next conv stage reads it directly (no XLA pass in between).
# ----------------------------------------------------------------------------

def _conv_pad_kernel(x_ref, w_ref, shift_ref, o_ref, acc_ref,
                     *, hc, wc, h_img, w_img):
    """Grid (N,); one whole image per grid step.

      x_ref    : (H+4, Wp+2, Kin)  bf16  ring-2 zero-padded input
      w_ref    : (9, Kin, CPAD)    bf16  conv weights (BN scale folded in)
      shift_ref: (1, CPAD)         f32   folded BN shift
      o_ref    : (H+2, Wp, CPAD)   bf16  ring-1 zero-padded output activation
      acc_ref  : ((H+2)*Wp, CPAD)  f32   VMEM accumulator scratch
    """
    kin = w_ref.shape[1]
    acc_ref[...] = jnp.zeros_like(acc_ref)
    for dy in range(3):
        for dx in range(3):
            win = x_ref[pl.ds(dy, hc), pl.ds(dx, wc), :]           # (hc, wc, kin)
            acc_ref[...] += jnp.dot(win.reshape(hc * wc, kin),
                                    w_ref[dy * 3 + dx],
                                    preferred_element_type=jnp.float32)
    y = jnp.maximum(acc_ref[...] + shift_ref[...], 0.0)           # BN shift + ReLU
    y = y.reshape(hc, wc, CPAD)
    # Zero the ring / right-fill columns so this tensor is valid SAME-padding
    # for the next conv stage.
    row = lax.broadcasted_iota(jnp.int32, (hc, wc, CPAD), 0)
    col = lax.broadcasted_iota(jnp.int32, (hc, wc, CPAD), 1)
    interior = (row >= 1) & (row <= h_img) & (col >= 1) & (col <= w_img)
    o_ref[...] = jnp.where(interior, y, 0.0).astype(o_ref.dtype)


# ----------------------------------------------------------------------------
# Kernel 2: last conv stage + fully fused SE + transposed final store.
# ----------------------------------------------------------------------------

def _conv_se_kernel(x_ref, w_ref, shift_ref, w1_ref, b1_ref, w2_ref, b2_ref,
                    o_ref, acc_ref, *, h_img, w_img, cout, inv_hw):
    """Grid (N,); one whole image per grid step.

      x_ref : (H+2, Wp, CPAD) bf16   ring-1 padded activation from prev stage
      w_ref : (9, CPAD, CPAD) bf16   conv weights (BN scale folded in)
      shift : (1, CPAD) f32          folded BN shift
      w1/b1/w2/b2 : SE weights, zero-padded to CPAD, f32
      o_ref : (cout, H*W) f32        final output, NCHW-flat (transpose fused)
      acc   : (H*W, CPAD) f32        VMEM accumulator scratch
    """
    acc_ref[...] = jnp.zeros_like(acc_ref)
    for dy in range(3):
        for dx in range(3):
            win = x_ref[pl.ds(dy, h_img), pl.ds(dx, w_img), :]     # (H, W, CPAD)
            acc_ref[...] += jnp.dot(win.reshape(h_img * w_img, CPAD),
                                    w_ref[dy * 3 + dx],
                                    preferred_element_type=jnp.float32)
    y = jnp.maximum(acc_ref[...] + shift_ref[...], 0.0)            # (HW, CPAD) f32

    # --- fused SE: pool -> FC1 -> ReLU -> FC2 -> sigmoid -> channel scale ---
    pooled = jnp.sum(y, axis=0, keepdims=True) * inv_hw            # (1, CPAD)
    hidden = jnp.maximum(
        jnp.dot(pooled, w1_ref[...], preferred_element_type=jnp.float32)
        + b1_ref[...], 0.0)
    gate = jax.nn.sigmoid(
        jnp.dot(hidden, w2_ref[...], preferred_element_type=jnp.float32)
        + b2_ref[...])
    gated = y * gate                                               # (HW, CPAD)

    # Fused channel slice + NHWC->NCHW transpose: lane-dense (cout, H*W) store.
    o_ref[...] = jnp.transpose(gated)[:cout, :]


# ----------------------------------------------------------------------------
# pallas_call wrappers
# ----------------------------------------------------------------------------

def conv_pad_pallas(x_pad2, w, shift, h_img, w_img, wp):
    n, hin, win_w, kin = x_pad2.shape
    hc = h_img + 2
    assert hin == h_img + 4 and win_w == wp + 2
    kernel = functools.partial(_conv_pad_kernel, hc=hc, wc=wp,
                               h_img=h_img, w_img=w_img)
    return pl.pallas_call(
        kernel,
        out_shape=jax.ShapeDtypeStruct((n, hc, wp, CPAD), jnp.bfloat16),
        grid=(n,),
        in_specs=[
            pl.BlockSpec((None, hin, win_w, kin), lambda i: (i, 0, 0, 0)),
            pl.BlockSpec((9, kin, CPAD), lambda i: (0, 0, 0)),
            pl.BlockSpec((1, CPAD), lambda i: (0, 0)),
        ],
        out_specs=pl.BlockSpec((None, hc, wp, CPAD), lambda i: (i, 0, 0, 0)),
        scratch_shapes=[pltpu.VMEM((hc * wp, CPAD), jnp.float32)],
        compiler_params=pltpu.CompilerParams(
            dimension_semantics=("parallel",),
            vmem_limit_bytes=32 * 1024 * 1024),
    )(x_pad2, w, shift)


def conv_se_pallas(act, w, shift, w1, b1, w2, b2, h_img, w_img, cout):
    n, hin, wp, c = act.shape
    assert hin == h_img + 2 and c == CPAD
    hw = h_img * w_img
    kernel = functools.partial(_conv_se_kernel, h_img=h_img, w_img=w_img,
                               cout=cout, inv_hw=1.0 / hw)
    return pl.pallas_call(
        kernel,
        out_shape=jax.ShapeDtypeStruct((n, cout, hw), jnp.float32),
        grid=(n,),
        in_specs=[
            pl.BlockSpec((None, hin, wp, CPAD), lambda i: (i, 0, 0, 0)),
            pl.BlockSpec((9, CPAD, CPAD), lambda i: (0, 0, 0)),
            pl.BlockSpec((1, CPAD), lambda i: (0, 0)),
            pl.BlockSpec((CPAD, CPAD), lambda i: (0, 0)),
            pl.BlockSpec((1, CPAD), lambda i: (0, 0)),
            pl.BlockSpec((CPAD, CPAD), lambda i: (0, 0)),
            pl.BlockSpec((1, CPAD), lambda i: (0, 0)),
        ],
        out_specs=pl.BlockSpec((None, cout, hw), lambda i: (i, 0, 0)),
        scratch_shapes=[pltpu.VMEM((hw, CPAD), jnp.float32)],
        compiler_params=pltpu.CompilerParams(
            dimension_semantics=("parallel",),
            vmem_limit_bytes=32 * 1024 * 1024),
    )(act, w, shift, w1, b1, w2, b2)


# ----------------------------------------------------------------------------
# Parameter folding / padding glue
# ----------------------------------------------------------------------------

def _fold_stage(stage, kin_pad, eps=1e-5):
    """Fold BN scale into conv weights; pad to (9, kin_pad, CPAD) bf16 + shift."""
    w = stage["w"]                                   # (9*cin, cout)
    cin = w.shape[0] // 9
    cout = w.shape[1]
    scale = stage["bn_gamma"] / jnp.sqrt(stage["bn_var"] + eps)
    shift = stage["bn_beta"] + (stage["bias"] - stage["bn_mean"]) * scale
    w3 = w.reshape(9, cin, cout) * scale[None, None, :]
    w_p = jnp.zeros((9, kin_pad, CPAD), jnp.float32).at[:, :cin, :cout].set(w3)
    shift_p = jnp.zeros((1, CPAD), jnp.float32).at[0, :cout].set(shift)
    return w_p.astype(jnp.bfloat16), shift_p


def _pad2d(a, rows, cols):
    out = jnp.zeros((rows, cols), jnp.float32)
    return out.at[:a.shape[0], :a.shape[1]].set(a.astype(jnp.float32))


def init_sspin_params(key, cin=4, c_body=(32, 32), se_reduction=4):
    """Deterministic synthetic body + SE parameters (unpadded, f32)."""
    params = {"body": [], "se": {}}
    ks = list(jax.random.split(key, 2 * len(c_body) + 4))
    prev = cin
    for i, cout in enumerate(c_body):
        kw, kb = ks[2 * i], ks[2 * i + 1]
        fan_in = 9 * prev
        params["body"].append({
            "w": jax.random.normal(kw, (9 * prev, cout), jnp.float32)
                 * jnp.sqrt(2.0 / fan_in),
            "bias": jnp.zeros((cout,), jnp.float32),
            "bn_gamma": jnp.ones((cout,), jnp.float32),
            "bn_beta": jnp.zeros((cout,), jnp.float32),
            "bn_mean": 0.1 * jax.random.normal(kb, (cout,), jnp.float32),
            "bn_var": jnp.ones((cout,), jnp.float32),
        })
        prev = cout
    c = c_body[-1]
    cr = max(1, c // se_reduction)
    k1, k2, _, _ = ks[-4:]
    params["se"] = {
        "w1": jax.random.normal(k1, (c, cr), jnp.float32) * jnp.sqrt(2.0 / c),
        "b1": jnp.zeros((1, cr), jnp.float32),
        "w2": jax.random.normal(k2, (cr, c), jnp.float32) * jnp.sqrt(2.0 / cr),
        "b2": jnp.zeros((1, c), jnp.float32),
    }
    return params


@jax.jit
def sspin_forward(x_nchw, params):
    """SSPIN.forward: x = body(x); x = se(x). Input/output NCHW (PyTorch conv)."""
    x = jnp.transpose(x_nchw, (0, 2, 3, 1))                 # NHWC
    n, h, w, cin = x.shape
    assert w % 8 == 0, "TODO(synk): general widths need a relayout-friendly packing"
    n_stages = len(params["body"])
    assert n_stages >= 2

    wp = _round_up(w + 2, 16)      # 16-aligned padded width -> clean bf16 reshapes
    kin_cur = _round_up(cin, 8)

    # Ring-2 zero-padded, channel-padded, bf16 input (one tiny XLA pass on raw x).
    x_pad2 = jnp.zeros((n, h + 4, wp + 2, kin_cur), jnp.bfloat16)
    x_pad2 = x_pad2.at[:, 2:h + 2, 2:w + 2, :cin].set(x.astype(jnp.bfloat16))

    act = x_pad2
    out = None
    for si, stage in enumerate(params["body"]):
        w_p, shift_p = _fold_stage(stage, kin_pad=kin_cur)
        is_last = si == n_stages - 1
        if is_last:
            se = params["se"]
            cout = stage["w"].shape[1]
            w1_p = _pad2d(se["w1"], CPAD, CPAD)
            b1_p = _pad2d(se["b1"], 1, CPAD)
            w2_p = _pad2d(se["w2"], CPAD, CPAD)
            b2_p = _pad2d(se["b2"], 1, CPAD)
            out = conv_se_pallas(act, w_p, shift_p, w1_p, b1_p, w2_p, b2_p,
                                 h, w, cout)                 # (N, cout, H*W) f32
        else:
            act = conv_pad_pallas(act, w_p, shift_p, h, w, wp)  # ring-1 padded, CPAD lanes
            if si + 1 < n_stages - 1:
                # TODO(synk): middle stages (3+ conv bodies) re-pad ring-1 -> ring-2
                # via one XLA pad; could be fused into the producing kernel's store.
                act = jnp.pad(act, ((0, 0), (1, 1), (1, 1), (0, 0)))
            kin_cur = CPAD

    return out.reshape(n, -1, h, w)                          # (N, cout, H, W)


# ----------------------------------------------------------------------------
# Pure-JAX f32 reference (sanity check of the Pallas path)
# ----------------------------------------------------------------------------

def _im2col_3x3_same(x_nhwc):
    N, H, W, Cin = x_nhwc.shape
    xp = jnp.pad(x_nhwc, ((0, 0), (1, 1), (1, 1), (0, 0)))
    cols = [xp[:, dy:dy + H, dx:dx + W, :] for dy in range(3) for dx in range(3)]
    patches = jnp.stack(cols, axis=3)                        # (N, H, W, 9, Cin)
    return patches.reshape(N, H * W, 9 * Cin)


def _reference_forward(x_nchw, params):
    x = jnp.transpose(x_nchw, (0, 2, 3, 1)).astype(jnp.float32)
    N, H, W, _ = x.shape
    for stage in params["body"]:
        patches = _im2col_3x3_same(x).reshape(N * H * W, -1)
        scale = stage["bn_gamma"] / jnp.sqrt(stage["bn_var"] + 1e-5)
        shift = stage["bn_beta"] + (stage["bias"] - stage["bn_mean"]) * scale
        y = patches @ stage["w"] * scale + shift
        x = jnp.maximum(y, 0.0).reshape(N, H, W, -1)
    C = x.shape[-1]
    feat = x.reshape(N, H * W, C)
    se = params["se"]
    pooled = feat.mean(axis=1)
    hidden = jnp.maximum(pooled @ se["w1"] + se["b1"], 0.0)
    gate = jax.nn.sigmoid(hidden @ se["w2"] + se["b2"])
    out = (feat * gate[:, None, :]).reshape(N, H, W, C)
    return jnp.transpose(out, (0, 3, 1, 2))


if __name__ == "__main__":
    key = jax.random.PRNGKey(0)
    kx, kp = jax.random.split(key)

    N, Cin, H, W = 2, 4, 16, 16
    x = jax.random.normal(kx, (N, Cin, H, W), jnp.float32)
    params = init_sspin_params(kp, cin=Cin, c_body=(32, 32), se_reduction=4)

    out = jax.block_until_ready(sspin_forward(x, params))
    ref = _reference_forward(x, params)

    assert out.shape == (N, 32, H, W), out.shape
    assert out.dtype == jnp.float32, out.dtype
    max_err = float(jnp.max(jnp.abs(out - ref)))
    # bf16 MXU operands -> loosened tolerance vs the f32 reference.
    assert jnp.allclose(out, ref, atol=1e-1, rtol=1e-1), \
        f"mismatch vs reference (max abs err {max_err})"

    print("KERNEL_OK")
</pallas_src>

<mosaic_0001>
module attributes {stable_mosaic.version = 11 : i64} {
  func.func @_conv_pad_kernel(%arg0: i32, %arg1: memref<1x20x34x8xbf16, #tpu.memory_space<vmem>>, %arg2: memref<9x8x128xbf16, #tpu.memory_space<vmem>>, %arg3: memref<1x128xf32, #tpu.memory_space<vmem>>, %arg4: memref<1x18x32x128xbf16, #tpu.memory_space<vmem>>, %arg5: memref<576x128xf32, #tpu.memory_space<vmem>>) attributes {dimension_semantics = [#tpu.dimension_semantics<parallel>], iteration_bounds = array<i64: 2>, scalar_prefetch = 0 : i64, scratch_operands = 1 : i64, tpu.core_type = #tpu.core_type<tc>, window_params = [{transform_indices = @transform_0, window_bounds = array<i64: 1, 20, 34, 8>}, {pipeline_mode = #tpu.pipeline_mode<synchronous>, transform_indices = @transform_1, window_bounds = array<i64: 9, 8, 128>}, {pipeline_mode = #tpu.pipeline_mode<synchronous>, transform_indices = @transform_2, window_bounds = array<i64: 1, 128>}, {transform_indices = @transform_3, window_bounds = array<i64: 1, 18, 32, 128>}]} {
    %cst = arith.constant 0.000000e+00 : f32
    %0 = vector.broadcast %cst : f32 to vector<576x128xf32>
    %c0 = arith.constant 0 : index
    %c0_0 = arith.constant 0 : index
    %1 = vector.load %arg5[%c0, %c0_0] : memref<576x128xf32, #tpu.memory_space<vmem>>, vector<576x128xf32>
    tpu.vector_store %arg5[%c0, %c0_0], %0 {strides = array<i32>} : memref<576x128xf32, #tpu.memory_space<vmem>>, vector<576x128xf32>,
    %c0_1 = arith.constant 0 : index
    %c0_2 = arith.constant 0 : index
    %c0_3 = arith.constant 0 : index
    %c0_4 = arith.constant 0 : index
    %2 = vector.load %arg1[%c0_1, %c0_2, %c0_3, %c0_4] : memref<1x20x34x8xbf16, #tpu.memory_space<vmem>>, vector<1x18x32x8xbf16>
    %3 = vector.shape_cast %2 : vector<1x18x32x8xbf16> to vector<18x32x8xbf16>
    %c0_5 = arith.constant 0 : index
    %c0_6 = arith.constant 0 : index
    %4 = vector.load %arg5[%c0_5, %c0_6] : memref<576x128xf32, #tpu.memory_space<vmem>>, vector<576x128xf32>
    %5 = vector.shape_cast %3 : vector<18x32x8xbf16> to vector<576x8xbf16>
    %c0_7 = arith.constant 0 : index
    %c0_8 = arith.constant 0 : index
    %c0_9 = arith.constant 0 : index
    %6 = vector.load %arg2[%c0_7, %c0_8, %c0_9] : memref<9x8x128xbf16, #tpu.memory_space<vmem>>, vector<1x8x128xbf16>
    %7 = vector.shape_cast %6 : vector<1x8x128xbf16> to vector<8x128xbf16>
    %cst_10 = arith.constant dense<0.000000e+00> : vector<576x128xf32>
    %8 = tpu.matmul %5, %7, %cst_10 {dimension_numbers = #tpu.dot_dimension_numbers<[1], [0], [0], [1], [0, 0, 1, 1], [], []>} : vector<576x8xbf16>, vector<8x128xbf16>, vector<576x128xf32> -> vector<576x128xf32>
    %9 = arith.addf %4, %8 : vector<576x128xf32>
    %c0_11 = arith.constant 0 : index
    %c0_12 = arith.constant 0 : index
    %10 = vector.load %arg5[%c0_11, %c0_12] : memref<576x128xf32, #tpu.memory_space<vmem>>, vector<576x128xf32>
    tpu.vector_store %arg5[%c0_11, %c0_12], %9 {strides = array<i32>} : memref<576x128xf32, #tpu.memory_space<vmem>>, vector<576x128xf32>,
    %c0_13 = arith.constant 0 : index
    %c0_14 = arith.constant 0 : index
    %c1 = arith.constant 1 : index
    %c0_15 = arith.constant 0 : index
    %11 = vector.load %arg1[%c0_13, %c0_14, %c1, %c0_15] : memref<1x20x34x8xbf16, #tpu.memory_space<vmem>>, vector<1x18x32x8xbf16>
    %12 = vector.shape_cast %11 : vector<1x18x32x8xbf16> to vector<18x32x8xbf16>
    %c0_16 = arith.constant 0 : index
    %c0_17 = arith.constant 0 : index
    %13 = vector.load %arg5[%c0_16, %c0_17] : memref<576x128xf32, #tpu.memory_space<vmem>>, vector<576x128xf32>
    %14 = vector.shape_cast %12 : vector<18x32x8xbf16> to vector<576x8xbf16>
    %c1_18 = arith.constant 1 : index
    %c0_19 = arith.constant 0 : index
    %c0_20 = arith.constant 0 : index
    %15 = vector.load %arg2[%c1_18, %c0_19, %c0_20] : memref<9x8x128xbf16, #tpu.memory_space<vmem>>, vector<1x8x128xbf16>
    %16 = vector.shape_cast %15 : vector<1x8x128xbf16> to vector<8x128xbf16>
    %cst_21 = arith.constant dense<0.000000e+00> : vector<576x128xf32>
    %17 = tpu.matmul %14, %16, %cst_21 {dimension_numbers = #tpu.dot_dimension_numbers<[1], [0], [0], [1], [0, 0, 1, 1], [], []>} : vector<576x8xbf16>, vector<8x128xbf16>, vector<576x128xf32> -> vector<576x128xf32>
    %18 = arith.addf %13, %17 : vector<576x128xf32>
    %c0_22 = arith.constant 0 : index
    %c0_23 = arith.constant 0 : index
    %19 = vector.load %arg5[%c0_22, %c0_23] : memref<576x128xf32, #tpu.memory_space<vmem>>, vector<576x128xf32>
    tpu.vector_store %arg5[%c0_22, %c0_23], %18 {strides = array<i32>} : memref<576x128xf32, #tpu.memory_space<vmem>>, vector<576x128xf32>,
    %c0_24 = arith.constant 0 : index
    %c0_25 = arith.constant 0 : index
    %c2 = arith.constant 2 : index
    %c0_26 = arith.constant 0 : index
    %20 = vector.load %arg1[%c0_24, %c0_25, %c2, %c0_26] : memref<1x20x34x8xbf16, #tpu.memory_space<vmem>>, vector<1x18x32x8xbf16>
    %21 = vector.shape_cast %20 : vector<1x18x32x8xbf16> to vector<18x32x8xbf16>
    %c0_27 = arith.constant 0 : index
    %c0_28 = arith.constant 0 : index
    %22 = vector.load %arg5[%c0_27, %c0_28] : memref<576x128xf32, #tpu.memory_space<vmem>>, vector<576x128xf32>
    %23 = vector.shape_cast %21 : vector<18x32x8xbf16> to vector<576x8xbf16>
    %c2_29 = arith.constant 2 : index
    %c0_30 = arith.constant 0 : index
    %c0_31 = arith.constant 0 : index
    %24 = vector.load %arg2[%c2_29, %c0_30, %c0_31] : memref<9x8x128xbf16, #tpu.memory_space<vmem>>, vector<1x8x128xbf16>
    %25 = vector.shape_cast %24 : vector<1x8x128xbf16> to vector<8x128xbf16>
    %cst_32 = arith.constant dense<0.000000e+00> : vector<576x128xf32>
    %26 = tpu.matmul %23, %25, %cst_32 {dimension_numbers = #tpu.dot_dimension_numbers<[1], [0], [0], [1], [0, 0, 1, 1], [], []>} : vector<576x8xbf16>, vector<8x128xbf16>, vector<576x128xf32> -> vector<576x128xf32>
    %27 = arith.addf %22, %26 : vector<576x128xf32>
    %c0_33 = arith.constant 0 : index
    %c0_34 = arith.constant 0 : index
    %28 = vector.load %arg5[%c0_33, %c0_34] : memref<576x128xf32, #tpu.memory_space<vmem>>, vector<576x128xf32>
    tpu.vector_store %arg5[%c0_33, %c0_34], %27 {strides = array<i32>} : memref<576x128xf32, #tpu.memory_space<vmem>>, vector<576x128xf32>,
    %c0_35 = arith.constant 0 : index
    %c1_36 = arith.constant 1 : index
    %c0_37 = arith.constant 0 : index
    %c0_38 = arith.constant 0 : index
    %29 = vector.load %arg1[%c0_35, %c1_36, %c0_37, %c0_38] : memref<1x20x34x8xbf16, #tpu.memory_space<vmem>>, vector<1x18x32x8xbf16>
    %30 = vector.shape_cast %29 : vector<1x18x32x8xbf16> to vector<18x32x8xbf16>
    %c0_39 = arith.constant 0 : index
    %c0_40 = arith.constant 0 : index
    %31 = vector.load %arg5[%c0_39, %c0_40] : memref<576x128xf32, #tpu.memory_space<vmem>>, vector<576x128xf32>
    %32 = vector.shape_cast %30 : vector<18x32x8xbf16> to vector<576x8xbf16>
    %c3 = arith.constant 3 : index
    %c0_41 = arith.constant 0 : index
    %c0_42 = arith.constant 0 : index
    %33 = vector.load %arg2[%c3, %c0_41, %c0_42] : memref<9x8x128xbf16, #tpu.memory_space<vmem>>, vector<1x8x128xbf16>
    %34 = vector.shape_cast %33 : vector<1x8x128xbf16> to vector<8x128xbf16>
    %cst_43 = arith.constant dense<0.000000e+00> : vector<576x128xf32>
    %35 = tpu.matmul %32, %34, %cst_43 {dimension_numbers = #tpu.dot_dimension_numbers<[1], [0], [0], [1], [0, 0, 1, 1], [], []>} : vector<576x8xbf16>, vector<8x128xbf16>, vector<576x128xf32> -> vector<576x128xf32>
    %36 = arith.addf %31, %35 : vector<576x128xf32>
    %c0_44 = arith.constant 0 : index
    %c0_45 = arith.constant 0 : index
    %37 = vector.load %arg5[%c0_44, %c0_45] : memref<576x128xf32, #tpu.memory_space<vmem>>, vector<576x128xf32>
    tpu.vector_store %arg5[%c0_44, %c0_45], %36 {strides = array<i32>} : memref<576x128xf32, #tpu.memory_space<vmem>>, vector<576x128xf32>,
    %c0_46 = arith.constant 0 : index
    %c1_47 = arith.constant 1 : index
    %c1_48 = arith.constant 1 : index
    %c0_49 = arith.constant 0 : index
    %38 = vector.load %arg1[%c0_46, %c1_47, %c1_48, %c0_49] : memref<1x20x34x8xbf16, #tpu.memory_space<vmem>>, vector<1x18x32x8xbf16>
    %39 = vector.shape_cast %38 : vector<1x18x32x8xbf16> to vector<18x32x8xbf16>
    %c0_50 = arith.constant 0 : index
    %c0_51 = arith.constant 0 : index
    %40 = vector.load %arg5[%c0_50, %c0_51] : memref<576x128xf32, #tpu.memory_space<vmem>>, vector<576x128xf32>
    %41 = vector.shape_cast %39 : vector<18x32x8xbf16> to vector<576x8xbf16>
    %c4 = arith.constant 4 : index
    %c0_52 = arith.constant 0 : index
    %c0_53 = arith.constant 0 : index
    %42 = vector.load %arg2[%c4, %c0_52, %c0_53] : memref<9x8x128xbf16, #tpu.memory_space<vmem>>, vector<1x8x128xbf16>
    %43 = vector.shape_cast %42 : vector<1x8x128xbf16> to vector<8x128xbf16>
    %cst_54 = arith.constant dense<0.000000e+00> : vector<576x128xf32>
    %44 = tpu.matmul %41, %43, %cst_54 {dimension_numbers = #tpu.dot_dimension_numbers<[1], [0], [0], [1], [0, 0, 1, 1], [], []>} : vector<576x8xbf16>, vector<8x128xbf16>, vector<576x128xf32> -> vector<576x128xf32>
    %45 = arith.addf %40, %44 : vector<576x128xf32>
    %c0_55 = arith.constant 0 : index
    %c0_56 = arith.constant 0 : index
    %46 = vector.load %arg5[%c0_55, %c0_56] : memref<576x128xf32, #tpu.memory_space<vmem>>, vector<576x128xf32>
    tpu.vector_store %arg5[%c0_55, %c0_56], %45 {strides = array<i32>} : memref<576x128xf32, #tpu.memory_space<vmem>>, vector<576x128xf32>,
    %c0_57 = arith.constant 0 : index
    %c1_58 = arith.constant 1 : index
    %c2_59 = arith.constant 2 : index
    %c0_60 = arith.constant 0 : index
    %47 = vector.load %arg1[%c0_57, %c1_58, %c2_59, %c0_60] : memref<1x20x34x8xbf16, #tpu.memory_space<vmem>>, vector<1x18x32x8xbf16>
    %48 = vector.shape_cast %47 : vector<1x18x32x8xbf16> to vector<18x32x8xbf16>
    %c0_61 = arith.constant 0 : index
    %c0_62 = arith.constant 0 : index
    %49 = vector.load %arg5[%c0_61, %c0_62] : memref<576x128xf32, #tpu.memory_space<vmem>>, vector<576x128xf32>
    %50 = vector.shape_cast %48 : vector<18x32x8xbf16> to vector<576x8xbf16>
    %c5 = arith.constant 5 : index
    %c0_63 = arith.constant 0 : index
    %c0_64 = arith.constant 0 : index
    %51 = vector.load %arg2[%c5, %c0_63, %c0_64] : memref<9x8x128xbf16, #tpu.memory_space<vmem>>, vector<1x8x128xbf16>
    %52 = vector.shape_cast %51 : vector<1x8x128xbf16> to vector<8x128xbf16>
    %cst_65 = arith.constant dense<0.000000e+00> : vector<576x128xf32>
    %53 = tpu.matmul %50, %52, %cst_65 {dimension_numbers = #tpu.dot_dimension_numbers<[1], [0], [0], [1], [0, 0, 1, 1], [], []>} : vector<576x8xbf16>, vector<8x128xbf16>, vector<576x128xf32> -> vector<576x128xf32>
    %54 = arith.addf %49, %53 : vector<576x128xf32>
    %c0_66 = arith.constant 0 : index
    %c0_67 = arith.constant 0 : index
    %55 = vector.load %arg5[%c0_66, %c0_67] : memref<576x128xf32, #tpu.memory_space<vmem>>, vector<576x128xf32>
    tpu.vector_store %arg5[%c0_66, %c0_67], %54 {strides = array<i32>} : memref<576x128xf32, #tpu.memory_space<vmem>>, vector<576x128xf32>,
    %c0_68 = arith.constant 0 : index
    %c2_69 = arith.constant 2 : index
    %c0_70 = arith.constant 0 : index
    %c0_71 = arith.constant 0 : index
    %56 = vector.load %arg1[%c0_68, %c2_69, %c0_70, %c0_71] : memref<1x20x34x8xbf16, #tpu.memory_space<vmem>>, vector<1x18x32x8xbf16>
    %57 = vector.shape_cast %56 : vector<1x18x32x8xbf16> to vector<18x32x8xbf16>
    %c0_72 = arith.constant 0 : index
    %c0_73 = arith.constant 0 : index
    %58 = vector.load %arg5[%c0_72, %c0_73] : memref<576x128xf32, #tpu.memory_space<vmem>>, vector<576x128xf32>
    %59 = vector.shape_cast %57 : vector<18x32x8xbf16> to vector<576x8xbf16>
    %c6 = arith.constant 6 : index
    %c0_74 = arith.constant 0 : index
    %c0_75 = arith.constant 0 : index
    %60 = vector.load %arg2[%c6, %c0_74, %c0_75] : memref<9x8x128xbf16, #tpu.memory_space<vmem>>, vector<1x8x128xbf16>
    %61 = vector.shape_cast %60 : vector<1x8x128xbf16> to vector<8x128xbf16>
    %cst_76 = arith.constant dense<0.000000e+00> : vector<576x128xf32>
    %62 = tpu.matmul %59, %61, %cst_76 {dimension_numbers = #tpu.dot_dimension_numbers<[1], [0], [0], [1], [0, 0, 1, 1], [], []>} : vector<576x8xbf16>, vector<8x128xbf16>, vector<576x128xf32> -> vector<576x128xf32>
    %63 = arith.addf %58, %62 : vector<576x128xf32>
    %c0_77 = arith.constant 0 : index
    %c0_78 = arith.constant 0 : index
    %64 = vector.load %arg5[%c0_77, %c0_78] : memref<576x128xf32, #tpu.memory_space<vmem>>, vector<576x128xf32>
    tpu.vector_store %arg5[%c0_77, %c0_78], %63 {strides = array<i32>} : memref<576x128xf32, #tpu.memory_space<vmem>>, vector<576x128xf32>,
    %c0_79 = arith.constant 0 : index
    %c2_80 = arith.constant 2 : index
    %c1_81 = arith.constant 1 : index
    %c0_82 = arith.constant 0 : index
    %65 = vector.load %arg1[%c0_79, %c2_80, %c1_81, %c0_82] : memref<1x20x34x8xbf16, #tpu.memory_space<vmem>>, vector<1x18x32x8xbf16>
    %66 = vector.shape_cast %65 : vector<1x18x32x8xbf16> to vector<18x32x8xbf16>
    %c0_83 = arith.constant 0 : index
    %c0_84 = arith.constant 0 : index
    %67 = vector.load %arg5[%c0_83, %c0_84] : memref<576x128xf32, #tpu.memory_space<vmem>>, vector<576x128xf32>
    %68 = vector.shape_cast %66 : vector<18x32x8xbf16> to vector<576x8xbf16>
    %c7 = arith.constant 7 : index
    %c0_85 = arith.constant 0 : index
    %c0_86 = arith.constant 0 : index
    %69 = vector.load %arg2[%c7, %c0_85, %c0_86] : memref<9x8x128xbf16, #tpu.memory_space<vmem>>, vector<1x8x128xbf16>
    %70 = vector.shape_cast %69 : vector<1x8x128xbf16> to vector<8x128xbf16>
    %cst_87 = arith.constant dense<0.000000e+00> : vector<576x128xf32>
    %71 = tpu.matmul %68, %70, %cst_87 {dimension_numbers = #tpu.dot_dimension_numbers<[1], [0], [0], [1], [0, 0, 1, 1], [], []>} : vector<576x8xbf16>, vector<8x128xbf16>, vector<576x128xf32> -> vector<576x128xf32>
    %72 = arith.addf %67, %71 : vector<576x128xf32>
    %c0_88 = arith.constant 0 : index
    %c0_89 = arith.constant 0 : index
    %73 = vector.load %arg5[%c0_88, %c0_89] : memref<576x128xf32, #tpu.memory_space<vmem>>, vector<576x128xf32>
    tpu.vector_store %arg5[%c0_88, %c0_89], %72 {strides = array<i32>} : memref<576x128xf32, #tpu.memory_space<vmem>>, vector<576x128xf32>,
    %c0_90 = arith.constant 0 : index
    %c2_91 = arith.constant 2 : index
    %c2_92 = arith.constant 2 : index
    %c0_93 = arith.constant 0 : index
    %74 = vector.load %arg1[%c0_90, %c2_91, %c2_92, %c0_93] : memref<1x20x34x8xbf16, #tpu.memory_space<vmem>>, vector<1x18x32x8xbf16>
    %75 = vector.shape_cast %74 : vector<1x18x32x8xbf16> to vector<18x32x8xbf16>
    %c0_94 = arith.constant 0 : index
    %c0_95 = arith.constant 0 : index
    %76 = vector.load %arg5[%c0_94, %c0_95] : memref<576x128xf32, #tpu.memory_space<vmem>>, vector<576x128xf32>
    %77 = vector.shape_cast %75 : vector<18x32x8xbf16> to vector<576x8xbf16>
    %c8 = arith.constant 8 : index
    %c0_96 = arith.constant 0 : index
    %c0_97 = arith.constant 0 : index
    %78 = vector.load %arg2[%c8, %c0_96, %c0_97] : memref<9x8x128xbf16, #tpu.memory_space<vmem>>, vector<1x8x128xbf16>
    %79 = vector.shape_cast %78 : vector<1x8x128xbf16> to vector<8x128xbf16>
    %cst_98 = arith.constant dense<0.000000e+00> : vector<576x128xf32>
    %80 = tpu.matmul %77, %79, %cst_98 {dimension_numbers = #tpu.dot_dimension_numbers<[1], [0], [0], [1], [0, 0, 1, 1], [], []>} : vector<576x8xbf16>, vector<8x128xbf16>, vector<576x128xf32> -> vector<576x128xf32>
    %81 = arith.addf %76, %80 : vector<576x128xf32>
    %c0_99 = arith.constant 0 : index
    %c0_100 = arith.constant 0 : index
    %82 = vector.load %arg5[%c0_99, %c0_100] : memref<576x128xf32, #tpu.memory_space<vmem>>, vector<576x128xf32>
    tpu.vector_store %arg5[%c0_99, %c0_100], %81 {strides = array<i32>} : memref<576x128xf32, #tpu.memory_space<vmem>>, vector<576x128xf32>,
    %c0_101 = arith.constant 0 : index
    %c0_102 = arith.constant 0 : index
    %83 = vector.load %arg5[%c0_101, %c0_102] : memref<576x128xf32, #tpu.memory_space<vmem>>, vector<576x128xf32>
    %c0_103 = arith.constant 0 : index
    %c0_104 = arith.constant 0 : index
    %84 = vector.load %arg3[%c0_103, %c0_104] : memref<1x128xf32, #tpu.memory_space<vmem>>, vector<1x128xf32>
    %85 = vector.broadcast %84 : vector<1x128xf32> to vector<576x128xf32>
    %86 = arith.addf %83, %85 : vector<576x128xf32>
    %cst_105 = arith.constant 0.000000e+00 : f32
    %87 = vector.broadcast %cst_105 : f32 to vector<576x128xf32>
    %88 = arith.maximumf %86, %87 : vector<576x128xf32>
    %89 = vector.shape_cast %88 : vector<576x128xf32> to vector<18x32x128xf32>
    %90 = tpu.iota {dimensions = array<i32: 0>} : vector<18x32x128xi32>
    %91 = tpu.iota {dimensions = array<i32: 1>} : vector<18x32x128xi32>
    %c1_i32 = arith.constant 1 : i32
    %92 = vector.broadcast %c1_i32 : i32 to vector<18x32x128xi32>
    %93 = arith.cmpi sge, %90, %92 : vector<18x32x128xi32>
    %c16_i32 = arith.constant 16 : i32
    %94 = vector.broadcast %c16_i32 : i32 to vector<18x32x128xi32>
    %95 = arith.cmpi sle, %90, %94 : vector<18x32x128xi32>
    %96 = arith.andi %93, %95 : vector<18x32x128xi1>
    %c1_i32_106 = arith.constant 1 : i32
    %97 = vector.broadcast %c1_i32_106 : i32 to vector<18x32x128xi32>
    %98 = arith.cmpi sge, %91, %97 : vector<18x32x128xi32>
    %99 = arith.andi %96, %98 : vector<18x32x128xi1>
    %c16_i32_107 = arith.constant 16 : i32
    %100 = vector.broadcast %c16_i32_107 : i32 to vector<18x32x128xi32>
    %101 = arith.cmpi sle, %91, %100 : vector<18x32x128xi32>
    %102 = arith.andi %99, %101 : vector<18x32x128xi1>
    %cst_108 = arith.constant 0.000000e+00 : f32
    %103 = vector.broadcast %cst_108 : f32 to vector<18x32x128xf32>
    %104 = arith.select %102, %89, %103 : vector<18x32x128xi1>, vector<18x32x128xf32>
    %105 = arith.truncf %104 : vector<18x32x128xf32> to vector<18x32x128xbf16>
    %c0_109 = arith.constant 0 : index
    %c0_110 = arith.constant 0 : index
    %c0_111 = arith.constant 0 : index
    %c0_112 = arith.constant 0 : index
    %106 = vector.load %arg4[%c0_109, %c0_110, %c0_111, %c0_112] : memref<1x18x32x128xbf16, #tpu.memory_space<vmem>>, vector<1x18x32x128xbf16>
    %107 = vector.shape_cast %106 : vector<1x18x32x128xbf16> to vector<18x32x128xbf16>
    %108 = vector.shape_cast %105 : vector<18x32x128xbf16> to vector<1x18x32x128xbf16>
    tpu.vector_store %arg4[%c0_109, %c0_110, %c0_111, %c0_112], %108 {strides = array<i32>} : memref<1x18x32x128xbf16, #tpu.memory_space<vmem>>, vector<1x18x32x128xbf16>,
    return
  }
  func.func @transform_0(%arg0: i32) -> (i32, i32, i32, i32) {
    %c0_i32 = arith.constant 0 : i32
    %c0_i32_0 = arith.constant 0 : i32
    %c0_i32_1 = arith.constant 0 : i32
    %c0_i32_2 = arith.constant 0 : i32
    return %arg0, %c0_i32, %c0_i32_0, %c0_i32_1 : i32, i32, i32, i32
  }
  func.func @transform_1(%arg0: i32) -> (i32, i32, i32) {
    %c0_i32 = arith.constant 0 : i32
    %c0_i32_0 = arith.constant 0 : i32
    %c0_i32_1 = arith.constant 0 : i32
    %c0_i32_2 = arith.constant 0 : i32
    return %c0_i32, %c0_i32_0, %c0_i32_1 : i32, i32, i32
  }
  func.func @transform_2(%arg0: i32) -> (i32, i32) {
    %c0_i32 = arith.constant 0 : i32
    %c0_i32_0 = arith.constant 0 : i32
    %c0_i32_1 = arith.constant 0 : i32
    return %c0_i32, %c0_i32_0 : i32, i32
  }
  func.func @transform_3(%arg0: i32) -> (i32, i32, i32, i32) {
    %c0_i32 = arith.constant 0 : i32
    %c0_i32_0 = arith.constant 0 : i32
    %c0_i32_1 = arith.constant 0 : i32
    %c0_i32_2 = arith.constant 0 : i32
    return %arg0, %c0_i32, %c0_i32_0, %c0_i32_1 : i32, i32, i32, i32
  }
}

module attributes {stable_mosaic.version = 11 : i64} {
  func.func @_conv_se_kernel(%arg0: i32, %arg1: memref<1x18x32x128xbf16, #tpu.memory_space<vmem>>, %arg2: memref<9x128x128xbf16, #tpu.memory_space<vmem>>, %arg3: memref<1x128xf32, #tpu.memory_space<vmem>>, %arg4: memref<128x128xf32, #tpu.memory_space<vmem>>, %arg5: memref<1x128xf32, #tpu.memory_space<vmem>>, %arg6: memref<128x128xf32, #tpu.memory_space<vmem>>, %arg7: memref<1x128xf32, #tpu.memory_space<vmem>>, %arg8: memref<1x32x256xf32, #tpu.memory_space<vmem>>, %arg9: memref<256x128xf32, #tpu.memory_space<vmem>>) attributes {dimension_semantics = [#tpu.dimension_semantics<parallel>], iteration_bounds = array<i64: 2>, scalar_prefetch = 0 : i64, scratch_operands = 1 : i64, tpu.core_type = #tpu.core_type<tc>, window_params = [{transform_indices = @transform_0, window_bounds = array<i64: 1, 18, 32, 128>}, {pipeline_mode = #tpu.pipeline_mode<synchronous>, transform_indices = @transform_1, window_bounds = array<i64: 9, 128, 128>}, {pipeline_mode = #tpu.pipeline_mode<synchronous>, transform_indices = @transform_2, window_bounds = array<i64: 1, 128>}, {pipeline_mode = #tpu.pipeline_mode<synchronous>, transform_indices = @transform_3, window_bounds = array<i64: 128, 128>}, {pipeline_mode = #tpu.pipeline_mode<synchronous>, transform_indices = @transform_4, window_bounds = array<i64: 1, 128>}, {pipeline_mode = #tpu.pipeline_mode<synchronous>, transform_indices = @transform_5, window_bounds = array<i64: 128, 128>}, {pipeline_mode = #tpu.pipeline_mode<synchronous>, transform_indices = @transform_6, window_bounds = array<i64: 1, 128>}, {transform_indices = @transform_7, window_bounds = array<i64: 1, 32, 256>}]} {
    %cst = arith.constant 0.000000e+00 : f32
    %0 = vector.broadcast %cst : f32 to vector<256x128xf32>
    %c0 = arith.constant 0 : index
    %c0_0 = arith.constant 0 : index
    %1 = vector.load %arg9[%c0, %c0_0] : memref<256x128xf32, #tpu.memory_space<vmem>>, vector<256x128xf32>
    tpu.vector_store %arg9[%c0, %c0_0], %0 {strides = array<i32>} : memref<256x128xf32, #tpu.memory_space<vmem>>, vector<256x128xf32>,
    %c0_1 = arith.constant 0 : index
    %c0_2 = arith.constant 0 : index
    %c0_3 = arith.constant 0 : index
    %c0_4 = arith.constant 0 : index
    %2 = vector.load %arg1[%c0_1, %c0_2, %c0_3, %c0_4] : memref<1x18x32x128xbf16, #tpu.memory_space<vmem>>, vector<1x16x16x128xbf16>
    %3 = vector.shape_cast %2 : vector<1x16x16x128xbf16> to vector<16x16x128xbf16>
    %c0_5 = arith.constant 0 : index
    %c0_6 = arith.constant 0 : index
    %4 = vector.load %arg9[%c0_5, %c0_6] : memref<256x128xf32, #tpu.memory_space<vmem>>, vector<256x128xf32>
    %5 = vector.shape_cast %3 : vector<16x16x128xbf16> to vector<256x128xbf16>
    %c0_7 = arith.constant 0 : index
    %c0_8 = arith.constant 0 : index
    %c0_9 = arith.constant 0 : index
    %6 = vector.load %arg2[%c0_7, %c0_8, %c0_9] : memref<9x128x128xbf16, #tpu.memory_space<vmem>>, vector<1x128x128xbf16>
    %7 = vector.shape_cast %6 : vector<1x128x128xbf16> to vector<128x128xbf16>
    %cst_10 = arith.constant dense<0.000000e+00> : vector<256x128xf32>
    %8 = tpu.matmul %5, %7, %cst_10 {dimension_numbers = #tpu.dot_dimension_numbers<[1], [0], [0], [1], [0, 0, 1, 1], [], []>} : vector<256x128xbf16>, vector<128x128xbf16>, vector<256x128xf32> -> vector<256x128xf32>
    %9 = arith.addf %4, %8 : vector<256x128xf32>
    %c0_11 = arith.constant 0 : index
    %c0_12 = arith.constant 0 : index
    %10 = vector.load %arg9[%c0_11, %c0_12] : memref<256x128xf32, #tpu.memory_space<vmem>>, vector<256x128xf32>
    tpu.vector_store %arg9[%c0_11, %c0_12], %9 {strides = array<i32>} : memref<256x128xf32, #tpu.memory_space<vmem>>, vector<256x128xf32>,
    %c0_13 = arith.constant 0 : index
    %c0_14 = arith.constant 0 : index
    %c1 = arith.constant 1 : index
    %c0_15 = arith.constant 0 : index
    %11 = vector.load %arg1[%c0_13, %c0_14, %c1, %c0_15] : memref<1x18x32x128xbf16, #tpu.memory_space<vmem>>, vector<1x16x16x128xbf16>
    %12 = vector.shape_cast %11 : vector<1x16x16x128xbf16> to vector<16x16x128xbf16>
    %c0_16 = arith.constant 0 : index
    %c0_17 = arith.constant 0 : index
    %13 = vector.load %arg9[%c0_16, %c0_17] : memref<256x128xf32, #tpu.memory_space<vmem>>, vector<256x128xf32>
    %14 = vector.shape_cast %12 : vector<16x16x128xbf16> to vector<256x128xbf16>
    %c1_18 = arith.constant 1 : index
    %c0_19 = arith.constant 0 : index
    %c0_20 = arith.constant 0 : index
    %15 = vector.load %arg2[%c1_18, %c0_19, %c0_20] : memref<9x128x128xbf16, #tpu.memory_space<vmem>>, vector<1x128x128xbf16>
    %16 = vector.shape_cast %15 : vector<1x128x128xbf16> to vector<128x128xbf16>
    %cst_21 = arith.constant dense<0.000000e+00> : vector<256x128xf32>
    %17 = tpu.matmul %14, %16, %cst_21 {dimension_numbers = #tpu.dot_dimension_numbers<[1], [0], [0], [1], [0, 0, 1, 1], [], []>} : vector<256x128xbf16>, vector<128x128xbf16>, vector<256x128xf32> -> vector<256x128xf32>
    %18 = arith.addf %13, %17 : vector<256x128xf32>
    %c0_22 = arith.constant 0 : index
    %c0_23 = arith.constant 0 : index
    %19 = vector.load %arg9[%c0_22, %c0_23] : memref<256x128xf32, #tpu.memory_space<vmem>>, vector<256x128xf32>
    tpu.vector_store %arg9[%c0_22, %c0_23], %18 {strides = array<i32>} : memref<256x128xf32, #tpu.memory_space<vmem>>, vector<256x128xf32>,
    %c0_24 = arith.constant 0 : index
    %c0_25 = arith.constant 0 : index
    %c2 = arith.constant 2 : index
    %c0_26 = arith.constant 0 : index
    %20 = vector.load %arg1[%c0_24, %c0_25, %c2, %c0_26] : memref<1x18x32x128xbf16, #tpu.memory_space<vmem>>, vector<1x16x16x128xbf16>
    %21 = vector.shape_cast %20 : vector<1x16x16x128xbf16> to vector<16x16x128xbf16>
    %c0_27 = arith.constant 0 : index
    %c0_28 = arith.constant 0 : index
    %22 = vector.load %arg9[%c0_27, %c0_28] : memref<256x128xf32, #tpu.memory_space<vmem>>, vector<256x128xf32>
    %23 = vector.shape_cast %21 : vector<16x16x128xbf16> to vector<256x128xbf16>
    %c2_29 = arith.constant 2 : index
    %c0_30 = arith.constant 0 : index
    %c0_31 = arith.constant 0 : index
    %24 = vector.load %arg2[%c2_29, %c0_30, %c0_31] : memref<9x128x128xbf16, #tpu.memory_space<vmem>>, vector<1x128x128xbf16>
    %25 = vector.shape_cast %24 : vector<1x128x128xbf16> to vector<128x128xbf16>
    %cst_32 = arith.constant dense<0.000000e+00> : vector<256x128xf32>
    %26 = tpu.matmul %23, %25, %cst_32 {dimension_numbers = #tpu.dot_dimension_numbers<[1], [0], [0], [1], [0, 0, 1, 1], [], []>} : vector<256x128xbf16>, vector<128x128xbf16>, vector<256x128xf32> -> vector<256x128xf32>
    %27 = arith.addf %22, %26 : vector<256x128xf32>
    %c0_33 = arith.constant 0 : index
    %c0_34 = arith.constant 0 : index
    %28 = vector.load %arg9[%c0_33, %c0_34] : memref<256x128xf32, #tpu.memory_space<vmem>>, vector<256x128xf32>
    tpu.vector_store %arg9[%c0_33, %c0_34], %27 {strides = array<i32>} : memref<256x128xf32, #tpu.memory_space<vmem>>, vector<256x128xf32>,
    %c0_35 = arith.constant 0 : index
    %c1_36 = arith.constant 1 : index
    %c0_37 = arith.constant 0 : index
    %c0_38 = arith.constant 0 : index
    %29 = vector.load %arg1[%c0_35, %c1_36, %c0_37, %c0_38] : memref<1x18x32x128xbf16, #tpu.memory_space<vmem>>, vector<1x16x16x128xbf16>
    %30 = vector.shape_cast %29 : vector<1x16x16x128xbf16> to vector<16x16x128xbf16>
    %c0_39 = arith.constant 0 : index
    %c0_40 = arith.constant 0 : index
    %31 = vector.load %arg9[%c0_39, %c0_40] : memref<256x128xf32, #tpu.memory_space<vmem>>, vector<256x128xf32>
    %32 = vector.shape_cast %30 : vector<16x16x128xbf16> to vector<256x128xbf16>
    %c3 = arith.constant 3 : index
    %c0_41 = arith.constant 0 : index
    %c0_42 = arith.constant 0 : index
    %33 = vector.load %arg2[%c3, %c0_41, %c0_42] : memref<9x128x128xbf16, #tpu.memory_space<vmem>>, vector<1x128x128xbf16>
    %34 = vector.shape_cast %33 : vector<1x128x128xbf16> to vector<128x128xbf16>
    %cst_43 = arith.constant dense<0.000000e+00> : vector<256x128xf32>
    %35 = tpu.matmul %32, %34, %cst_43 {dimension_numbers = #tpu.dot_dimension_numbers<[1], [0], [0], [1], [0, 0, 1, 1], [], []>} : vector<256x128xbf16>, vector<128x128xbf16>, vector<256x128xf32> -> vector<256x128xf32>
    %36 = arith.addf %31, %35 : vector<256x128xf32>
    %c0_44 = arith.constant 0 : index
    %c0_45 = arith.constant 0 : index
    %37 = vector.load %arg9[%c0_44, %c0_45] : memref<256x128xf32, #tpu.memory_space<vmem>>, vector<256x128xf32>
    tpu.vector_store %arg9[%c0_44, %c0_45], %36 {strides = array<i32>} : memref<256x128xf32, #tpu.memory_space<vmem>>, vector<256x128xf32>,
    %c0_46 = arith.constant 0 : index
    %c1_47 = arith.constant 1 : index
    %c1_48 = arith.constant 1 : index
    %c0_49 = arith.constant 0 : index
    %38 = vector.load %arg1[%c0_46, %c1_47, %c1_48, %c0_49] : memref<1x18x32x128xbf16, #tpu.memory_space<vmem>>, vector<1x16x16x128xbf16>
    %39 = vector.shape_cast %38 : vector<1x16x16x128xbf16> to vector<16x16x128xbf16>
    %c0_50 = arith.constant 0 : index
    %c0_51 = arith.constant 0 : index
    %40 = vector.load %arg9[%c0_50, %c0_51] : memref<256x128xf32, #tpu.memory_space<vmem>>, vector<256x128xf32>
    %41 = vector.shape_cast %39 : vector<16x16x128xbf16> to vector<256x128xbf16>
    %c4 = arith.constant 4 : index
    %c0_52 = arith.constant 0 : index
    %c0_53 = arith.constant 0 : index
    %42 = vector.load %arg2[%c4, %c0_52, %c0_53] : memref<9x128x128xbf16, #tpu.memory_space<vmem>>, vector<1x128x128xbf16>
    %43 = vector.shape_cast %42 : vector<1x128x128xbf16> to vector<128x128xbf16>
    %cst_54 = arith.constant dense<0.000000e+00> : vector<256x128xf32>
    %44 = tpu.matmul %41, %43, %cst_54 {dimension_numbers = #tpu.dot_dimension_numbers<[1], [0], [0], [1], [0, 0, 1, 1], [], []>} : vector<256x128xbf16>, vector<128x128xbf16>, vector<256x128xf32> -> vector<256x128xf32>
    %45 = arith.addf %40, %44 : vector<256x128xf32>
    %c0_55 = arith.constant 0 : index
    %c0_56 = arith.constant 0 : index
    %46 = vector.load %arg9[%c0_55, %c0_56] : memref<256x128xf32, #tpu.memory_space<vmem>>, vector<256x128xf32>
    tpu.vector_store %arg9[%c0_55, %c0_56], %45 {strides = array<i32>} : memref<256x128xf32, #tpu.memory_space<vmem>>, vector<256x128xf32>,
    %c0_57 = arith.constant 0 : index
    %c1_58 = arith.constant 1 : index
    %c2_59 = arith.constant 2 : index
    %c0_60 = arith.constant 0 : index
    %47 = vector.load %arg1[%c0_57, %c1_58, %c2_59, %c0_60] : memref<1x18x32x128xbf16, #tpu.memory_space<vmem>>, vector<1x16x16x128xbf16>
    %48 = vector.shape_cast %47 : vector<1x16x16x128xbf16> to vector<16x16x128xbf16>
    %c0_61 = arith.constant 0 : index
    %c0_62 = arith.constant 0 : index
    %49 = vector.load %arg9[%c0_61, %c0_62] : memref<256x128xf32, #tpu.memory_space<vmem>>, vector<256x128xf32>
    %50 = vector.shape_cast %48 : vector<16x16x128xbf16> to vector<256x128xbf16>
    %c5 = arith.constant 5 : index
    %c0_63 = arith.constant 0 : index
    %c0_64 = arith.constant 0 : index
    %51 = vector.load %arg2[%c5, %c0_63, %c0_64] : memref<9x128x128xbf16, #tpu.memory_space<vmem>>, vector<1x128x128xbf16>
    %52 = vector.shape_cast %51 : vector<1x128x128xbf16> to vector<128x128xbf16>
    %cst_65 = arith.constant dense<0.000000e+00> : vector<256x128xf32>
    %53 = tpu.matmul %50, %52, %cst_65 {dimension_numbers = #tpu.dot_dimension_numbers<[1], [0], [0], [1], [0, 0, 1, 1], [], []>} : vector<256x128xbf16>, vector<128x128xbf16>, vector<256x128xf32> -> vector<256x128xf32>
    %54 = arith.addf %49, %53 : vector<256x128xf32>
    %c0_66 = arith.constant 0 : index
    %c0_67 = arith.constant 0 : index
    %55 = vector.load %arg9[%c0_66, %c0_67] : memref<256x128xf32, #tpu.memory_space<vmem>>, vector<256x128xf32>
    tpu.vector_store %arg9[%c0_66, %c0_67], %54 {strides = array<i32>} : memref<256x128xf32, #tpu.memory_space<vmem>>, vector<256x128xf32>,
    %c0_68 = arith.constant 0 : index
    %c2_69 = arith.constant 2 : index
    %c0_70 = arith.constant 0 : index
    %c0_71 = arith.constant 0 : index
    %56 = vector.load %arg1[%c0_68, %c2_69, %c0_70, %c0_71] : memref<1x18x32x128xbf16, #tpu.memory_space<vmem>>, vector<1x16x16x128xbf16>
    %57 = vector.shape_cast %56 : vector<1x16x16x128xbf16> to vector<16x16x128xbf16>
    %c0_72 = arith.constant 0 : index
    %c0_73 = arith.constant 0 : index
    %58 = vector.load %arg9[%c0_72, %c0_73] : memref<256x128xf32, #tpu.memory_space<vmem>>, vector<256x128xf32>
    %59 = vector.shape_cast %57 : vector<16x16x128xbf16> to vector<256x128xbf16>
    %c6 = arith.constant 6 : index
    %c0_74 = arith.constant 0 : index
    %c0_75 = arith.constant 0 : index
    %60 = vector.load %arg2[%c6, %c0_74, %c0_75] : memref<9x128x128xbf16, #tpu.memory_space<vmem>>, vector<1x128x128xbf16>
    %61 = vector.shape_cast %60 : vector<1x128x128xbf16> to vector<128x128xbf16>
    %cst_76 = arith.constant dense<0.000000e+00> : vector<256x128xf32>
    %62 = tpu.matmul %59, %61, %cst_76 {dimension_numbers = #tpu.dot_dimension_numbers<[1], [0], [0], [1], [0, 0, 1, 1], [], []>} : vector<256x128xbf16>, vector<128x128xbf16>, vector<256x128xf32> -> vector<256x128xf32>
    %63 = arith.addf %58, %62 : vector<256x128xf32>
    %c0_77 = arith.constant 0 : index
    %c0_78 = arith.constant 0 : index
    %64 = vector.load %arg9[%c0_77, %c0_78] : memref<256x128xf32, #tpu.memory_space<vmem>>, vector<256x128xf32>
    tpu.vector_store %arg9[%c0_77, %c0_78], %63 {strides = array<i32>} : memref<256x128xf32, #tpu.memory_space<vmem>>, vector<256x128xf32>,
    %c0_79 = arith.constant 0 : index
    %c2_80 = arith.constant 2 : index
    %c1_81 = arith.constant 1 : index
    %c0_82 = arith.constant 0 : index
    %65 = vector.load %arg1[%c0_79, %c2_80, %c1_81, %c0_82] : memref<1x18x32x128xbf16, #tpu.memory_space<vmem>>, vector<1x16x16x128xbf16>
    %66 = vector.shape_cast %65 : vector<1x16x16x128xbf16> to vector<16x16x128xbf16>
    %c0_83 = arith.constant 0 : index
    %c0_84 = arith.constant 0 : index
    %67 = vector.load %arg9[%c0_83, %c0_84] : memref<256x128xf32, #tpu.memory_space<vmem>>, vector<256x128xf32>
    %68 = vector.shape_cast %66 : vector<16x16x128xbf16> to vector<256x128xbf16>
    %c7 = arith.constant 7 : index
    %c0_85 = arith.constant 0 : index
    %c0_86 = arith.constant 0 : index
    %69 = vector.load %arg2[%c7, %c0_85, %c0_86] : memref<9x128x128xbf16, #tpu.memory_space<vmem>>, vector<1x128x128xbf16>
    %70 = vector.shape_cast %69 : vector<1x128x128xbf16> to vector<128x128xbf16>
    %cst_87 = arith.constant dense<0.000000e+00> : vector<256x128xf32>
    %71 = tpu.matmul %68, %70, %cst_87 {dimension_numbers = #tpu.dot_dimension_numbers<[1], [0], [0], [1], [0, 0, 1, 1], [], []>} : vector<256x128xbf16>, vector<128x128xbf16>, vector<256x128xf32> -> vector<256x128xf32>
    %72 = arith.addf %67, %71 : vector<256x128xf32>
    %c0_88 = arith.constant 0 : index
    %c0_89 = arith.constant 0 : index
    %73 = vector.load %arg9[%c0_88, %c0_89] : memref<256x128xf32, #tpu.memory_space<vmem>>, vector<256x128xf32>
    tpu.vector_store %arg9[%c0_88, %c0_89], %72 {strides = array<i32>} : memref<256x128xf32, #tpu.memory_space<vmem>>, vector<256x128xf32>,
    %c0_90 = arith.constant 0 : index
    %c2_91 = arith.constant 2 : index
    %c2_92 = arith.constant 2 : index
    %c0_93 = arith.constant 0 : index
    %74 = vector.load %arg1[%c0_90, %c2_91, %c2_92, %c0_93] : memref<1x18x32x128xbf16, #tpu.memory_space<vmem>>, vector<1x16x16x128xbf16>
    %75 = vector.shape_cast %74 : vector<1x16x16x128xbf16> to vector<16x16x128xbf16>
    %c0_94 = arith.constant 0 : index
    %c0_95 = arith.constant 0 : index
    %76 = vector.load %arg9[%c0_94, %c0_95] : memref<256x128xf32, #tpu.memory_space<vmem>>, vector<256x128xf32>
    %77 = vector.shape_cast %75 : vector<16x16x128xbf16> to vector<256x128xbf16>
    %c8 = arith.constant 8 : index
    %c0_96 = arith.constant 0 : index
    %c0_97 = arith.constant 0 : index
    %78 = vector.load %arg2[%c8, %c0_96, %c0_97] : memref<9x128x128xbf16, #tpu.memory_space<vmem>>, vector<1x128x128xbf16>
    %79 = vector.shape_cast %78 : vector<1x128x128xbf16> to vector<128x128xbf16>
    %cst_98 = arith.constant dense<0.000000e+00> : vector<256x128xf32>
    %80 = tpu.matmul %77, %79, %cst_98 {dimension_numbers = #tpu.dot_dimension_numbers<[1], [0], [0], [1], [0, 0, 1, 1], [], []>} : vector<256x128xbf16>, vector<128x128xbf16>, vector<256x128xf32> -> vector<256x128xf32>
    %81 = arith.addf %76, %80 : vector<256x128xf32>
    %c0_99 = arith.constant 0 : index
    %c0_100 = arith.constant 0 : index
    %82 = vector.load %arg9[%c0_99, %c0_100] : memref<256x128xf32, #tpu.memory_space<vmem>>, vector<256x128xf32>
    tpu.vector_store %arg9[%c0_99, %c0_100], %81 {strides = array<i32>} : memref<256x128xf32, #tpu.memory_space<vmem>>, vector<256x128xf32>,
    %c0_101 = arith.constant 0 : index
    %c0_102 = arith.constant 0 : index
    %83 = vector.load %arg9[%c0_101, %c0_102] : memref<256x128xf32, #tpu.memory_space<vmem>>, vector<256x128xf32>
    %c0_103 = arith.constant 0 : index
    %c0_104 = arith.constant 0 : index
    %84 = vector.load %arg3[%c0_103, %c0_104] : memref<1x128xf32, #tpu.memory_space<vmem>>, vector<1x128xf32>
    %85 = vector.broadcast %84 : vector<1x128xf32> to vector<256x128xf32>
    %86 = arith.addf %83, %85 : vector<256x128xf32>
    %cst_105 = arith.constant 0.000000e+00 : f32
    %87 = vector.broadcast %cst_105 : f32 to vector<256x128xf32>
    %88 = arith.maximumf %86, %87 : vector<256x128xf32>
    %cst_106 = arith.constant dense<0.000000e+00> : vector<128xf32>
    %89 = vector.multi_reduction <add>, %88, %cst_106 [0] : vector<256x128xf32> to vector<128xf32>
    %90 = vector.shape_cast %89 : vector<128xf32> to vector<1x128xf32>
    %cst_107 = arith.constant 3.906250e-03 : f32
    %91 = vector.broadcast %cst_107 : f32 to vector<1x128xf32>
    %92 = arith.mulf %90, %91 : vector<1x128xf32>
    %c0_108 = arith.constant 0 : index
    %c0_109 = arith.constant 0 : index
    %93 = vector.load %arg4[%c0_108, %c0_109] : memref<128x128xf32, #tpu.memory_space<vmem>>, vector<128x128xf32>
    %cst_110 = arith.constant dense<0.000000e+00> : vector<1x128xf32>
    %94 = tpu.matmul %92, %93, %cst_110 {dimension_numbers = #tpu.dot_dimension_numbers<[1], [0], [0], [1], [0, 0, 1, 1], [], []>} : vector<1x128xf32>, vector<128x128xf32>, vector<1x128xf32> -> vector<1x128xf32>
    %c0_111 = arith.constant 0 : index
    %c0_112 = arith.constant 0 : index
    %95 = vector.load %arg5[%c0_111, %c0_112] : memref<1x128xf32, #tpu.memory_space<vmem>>, vector<1x128xf32>
    %96 = arith.addf %94, %95 : vector<1x128xf32>
    %cst_113 = arith.constant 0.000000e+00 : f32
    %97 = vector.broadcast %cst_113 : f32 to vector<1x128xf32>
    %98 = arith.maximumf %96, %97 : vector<1x128xf32>
    %c0_114 = arith.constant 0 : index
    %c0_115 = arith.constant 0 : index
    %99 = vector.load %arg6[%c0_114, %c0_115] : memref<128x128xf32, #tpu.memory_space<vmem>>, vector<128x128xf32>
    %cst_116 = arith.constant dense<0.000000e+00> : vector<1x128xf32>
    %100 = tpu.matmul %98, %99, %cst_116 {dimension_numbers = #tpu.dot_dimension_numbers<[1], [0], [0], [1], [0, 0, 1, 1], [], []>} : vector<1x128xf32>, vector<128x128xf32>, vector<1x128xf32> -> vector<1x128xf32>
    %c0_117 = arith.constant 0 : index
    %c0_118 = arith.constant 0 : index
    %101 = vector.load %arg7[%c0_117, %c0_118] : memref<1x128xf32, #tpu.memory_space<vmem>>, vector<1x128xf32>
    %102 = arith.addf %100, %101 : vector<1x128xf32>
    %103 = arith.negf %102 : vector<1x128xf32>
    %104 = math.exp %103 : vector<1x128xf32>
    %cst_119 = arith.constant 1.000000e+00 : f32
    %105 = vector.broadcast %cst_119 : f32 to vector<1x128xf32>
    %106 = arith.addf %105, %104 : vector<1x128xf32>
    %107 = arith.divf %105, %106 : vector<1x128xf32>
    %108 = vector.broadcast %107 : vector<1x128xf32> to vector<256x128xf32>
    %109 = arith.mulf %88, %108 : vector<256x128xf32>
    %110 = tpu.transpose %109, [1, 0] : vector<256x128xf32> -> vector<128x256xf32>
    %111 = vector.extract_strided_slice %110 {offsets = [0, 0], sizes = [32, 256], strides = [1, 1]} : vector<128x256xf32> to vector<32x256xf32>
    %c0_120 = arith.constant 0 : index
    %c0_121 = arith.constant 0 : index
    %c0_122 = arith.constant 0 : index
    %112 = vector.load %arg8[%c0_120, %c0_121, %c0_122] : memref<1x32x256xf32, #tpu.memory_space<vmem>>, vector<1x32x256xf32>
    %113 = vector.shape_cast %112 : vector<1x32x256xf32> to vector<32x256xf32>
    %114 = vector.shape_cast %111 : vector<32x256xf32> to vector<1x32x256xf32>
    tpu.vector_store %arg8[%c0_120, %c0_121, %c0_122], %114 {strides = array<i32>} : memref<1x32x256xf32, #tpu.memory_space<vmem>>, vector<1x32x256xf32>,
    return
  }
  func.func @transform_0(%arg0: i32) -> (i32, i32, i32, i32) {
    %c0_i32 = arith.constant 0 : i32
    %c0_i32_0 = arith.constant 0 : i32
    %c0_i32_1 = arith.constant 0 : i32
    %c0_i32_2 = arith.constant 0 : i32
    return %arg0, %c0_i32, %c0_i32_0, %c0_i32_1 : i32, i32, i32, i32
  }
  func.func @transform_1(%arg0: i32) -> (i32, i32, i32) {
    %c0_i32 = arith.constant 0 : i32
    %c0_i32_0 = arith.constant 0 : i32
    %c0_i32_1 = arith.constant 0 : i32
    %c0_i32_2 = arith.constant 0 : i32
    return %c0_i32, %c0_i32_0, %c0_i32_1 : i32, i32, i32
  }
  func.func @transform_2(%arg0: i32) -> (i32, i32) {
    %c0_i32 = arith.constant 0 : i32
    %c0_i32_0 = arith.constant 0 : i32
    %c0_i32_1 = arith.constant 0 : i32
    return %c0_i32, %c0_i32_0 : i32, i32
  }
  func.func @transform_3(%arg0: i32) -> (i32, i32) {
    %c0_i32 = arith.constant 0 : i32
    %c0_i32_0 = arith.constant 0 : i32
    %c0_i32_1 = arith.constant 0 : i32
    return %c0_i32, %c0_i32_0 : i32, i32
  }
  func.func @transform_4(%arg0: i32) -> (i32, i32) {
    %c0_i32 = arith.constant 0 : i32
    %c0_i32_0 = arith.constant 0 : i32
    %c0_i32_1 = arith.constant 0 : i32
    return %c0_i32, %c0_i32_0 : i32, i32
  }
  func.func @transform_5(%arg0: i32) -> (i32, i32) {
    %c0_i32 = arith.constant 0 : i32
    %c0_i32_0 = arith.constant 0 : i32
    %c0_i32_1 = arith.constant 0 : i32
    return %c0_i32, %c0_i32_0 : i32, i32
  }
  func.func @transform_6(%arg0: i32) -> (i32, i32) {
    %c0_i32 = arith.constant 0 : i32
    %c0_i32_0 = arith.constant 0 : i32
    %c0_i32_1 = arith.constant 0 : i32
    return %c0_i32, %c0_i32_0 : i32, i32
  }
  func.func @transform_7(%arg0: i32) -> (i32, i32, i32) {
    %c0_i32 = arith.constant 0 : i32
    %c0_i32_0 = arith.constant 0 : i32
    %c0_i32_1 = arith.constant 0 : i32
    return %arg0, %c0_i32, %c0_i32_0 : i32, i32, i32
  }
}

</mosaic_0001>

<bundles_post_ra>
// kernel: sspin_forward.3
= control target key start
LH: loop header
LB: loop body
LE: loop exit
PB: predicated region body
PF: predicated region fallthrough
CT: control target
= control target key end

     0   :  { %s8294_s24 = smov 0   ;;  %s9907_s0 = inlined_call_operand.vmem [shape: bf16[2,18,32,128], index: 0, kind: input, shape index: {}]   ;;  %s9908_s1 = inlined_call_operand.vmem [shape: bf16[9,128,128], index: 1, kind: input, shape index: {}]   ;;  %s9909_s2 = inlined_call_operand.vmem [shape: f32[1,128], index: 2, kind: input, shape index: {}]   ;;  %s9910_s3 = inlined_call_operand.vmem [shape: f32[128,128], index: 3, kind: input, shape index: {}]   ;;  %s9911_s4 = inlined_call_operand.vmem [shape: f32[1,128], index: 4, kind: input, shape index: {}]   ;;  %s9912_s5 = inlined_call_operand.vmem [shape: f32[128,128], index: 5, kind: input, shape index: {}]   ;;  %s9913_s6 = inlined_call_operand.vmem [shape: f32[1,128], index: 6, kind: input, shape index: {}]   ;;  %s9914_s7 = inlined_call_operand.vmem [shape: f32[2,32,256], index: 7, kind: output, shape index: {}]  }
   0x1 LB: > { %s6390_s25 = sadd.s32 4294967295, %s8249_s24   ;;  %p6394_p0 = scmp.ge.s32.totalorder %s8249_s24, 1  ;;  %s8249_s24 = sphi %s8294_s24, %s17_s24  }
   0x2   : > { %p237_p1 = scmp.lt.s32.totalorder %s8249_s24, 3 }
   0x4   : > { %p238_p2 = pnand %p6394_p0, %p237_p1 }
   0x5   : > { %v8119_v0 = vld [vmem:[%s9908_s1] sm:$0xff] (!%p238_p2)   ;;  %v8121_v2 = vld [vmem:[%s9908_s1 + $0x8] sm:$0xff] (!%p238_p2)   ;;  %p269_p3 = scmp.lt.s32.totalorder (!%p238_p2), %s6390_s25, 1  ;;  %v8123_v4 = vld [vmem:[%s9908_s1 + $0x10] sm:$0xff] (!%p238_p2)   ;;  %vm841_vm0 = vsmask.f32 (!%p238_p2), 3328 }
   0x6   : > { %241 = sbr.rel (%p238_p2) target bundleno = 1221 (0x4c5), region = 48  ;;  %v8120_v1 = vld [vmem:[%s9908_s1 + $0x100] sm:$0xff] (!%p238_p2)   ;;  %7301 = vmatprep.subr.bf16.mxu1 (!%p238_p2), %v8119_v0  ;;  %v8122_v3 = vld [vmem:[%s9908_s1 + $0x108] sm:$0xff] (!%p238_p2)   ;;  %v8124_v5 = vld [vmem:[%s9908_s1 + $0x110] sm:$0xff] (!%p238_p2)   ;;  %vm842_vm1 = vsmask.f32 (!%p238_p2), 7440 }
   0x7   : > { %7493 = vmatprep.subr.bf16.mxu0 (!%p238_p2), %v8120_v1  ;;  %7302 = vmatpush3.bf16.msra.mxu1 (!%p238_p2), %v8119_v0  ;;  %v8125_v6 = vld [vmem:[%s9908_s1 + $0x18] sm:$0xff] (!%p238_p2)   ;;  %v8127_v8 = vld [vmem:[%s9908_s1 + $0x20] sm:$0xff] (!%p238_p2)   ;;  %v8129_v10 = vld [vmem:[%s9908_s1 + $0x28] sm:$0xff] (!%p238_p2)   ;;  %vm1710_vm3 = vcmask (!%p238_p2), 1042432   ;;  %vm1711_vm4 = vcmask (!%p238_p2), 1046532   ;;  %vm8252_vm6 = vmmov (!%p238_p2), 0  }
   0x8   : > { %7494 = vmatpush3.bf16.msra.mxu0 (!%p238_p2), %v8120_v1  ;;  %7303 = vmatprep.subr.bf16.mxu1 (!%p238_p2), %v8121_v2  ;;  %v8126_v7 = vld [vmem:[%s9908_s1 + $0x118] sm:$0xff] (!%p238_p2)   ;;  %v8128_v9 = vld [vmem:[%s9908_s1 + $0x120] sm:$0xff] (!%p238_p2)   ;;  %v8130_v11 = vld [vmem:[%s9908_s1 + $0x128] sm:$0xff] (!%p238_p2)  }
   0x9   : > { %7495 = vmatprep.subr.bf16.mxu0 (!%p238_p2), %v8122_v3  ;;  %v8131_v14 = vld [vmem:[%s9908_s1 + $0x30] sm:$0xff] (!%p238_p2)   ;;  %v8133_v31 = vld [vmem:[%s9908_s1 + $0x38] sm:$0xff] (!%p238_p2)   ;;  %vm8364_vm2 = vmor (!%p238_p2), %vm841_vm0, %vm842_vm1 }
   0xa   : > { %v8132_v19 = vld [vmem:[%s9908_s1 + $0x130] sm:$0xff] (!%p238_p2)   ;;  %v8134_v45 = vld [vmem:[%s9908_s1 + $0x138] sm:$0xff] (!%p238_p2)   ;;  %v8137_v62 = vld [vmem:[%s9908_s1 + $0x140] sm:$0xff] (!%p238_p2)  }
   0xb   : > { %7304 = vmatpush3.bf16.msra.mxu1 (!%p238_p2), %v8121_v2  ;;  %vm8552_vm5 = vmor (!%p238_p2), %vm1710_vm3, %vm1711_vm4 }
   0xc   : > { %7496 = vmatpush3.bf16.msra.mxu0 (!%p238_p2), %v8122_v3  ;;  %7305 = vmatprep.subr.bf16.mxu1 (!%p238_p2), %v8123_v4 }
   0xd   : > { %s9952_s25 = smov (!%p269_p3, %s6390_s25), 1  ;;  %7497 = vmatprep.subr.bf16.mxu0 %v8124_v5 }
   0xe   : > { %s8107_s19 = smul.u32 288, %s9952_s25  ;;  %s7050_s16 = sshll.u32 %s9952_s25, 6 }
   0xf   : > { %7306 = vmatpush3.bf16.msra.mxu1 %v8123_v4 }
  0x10   : > { %7498 = vmatpush3.bf16.msra.mxu0 %v8124_v5  ;;  %7307 = vmatprep.subr.bf16.mxu1 %v8125_v6  ;;  %s8341_s30 = scalar_lea.vmem %s9907_s0, %s8107_s19  ;;  %s278_s19 = scalar_lea.vmem %s9914_s7, %s7050_s16 }
  0x11   : > { %7499 = vmatprep.subr.bf16.mxu0 %v8126_v7  ;;  %v8135_v12 = vld [vmem:[%s8341_s30] sm:$0xff]   ;;  %v6590_v13 = vld [vmem:[%s8341_s30 + $0x10] sm:$0xf]  ;;  %v6591_v15 = vld [vmem:[%s8341_s30 + $0x14] sm:$0xf] }
  0x12   : > { %7317 = vmatprep.mubr.bf16.mxu1 %v8135_v12  ;;  %v6592_v16 = vld [vmem:[%s8341_s30 + $0x18] sm:$0x1]  ;;  %v2711_v17 = vshrl.u32 %v6590_v13, 16  ;;  %v2714_v18 = vshll.u32 %v6590_v13, 16  ;;  %v2720_v20 = vshll.u32 %v6591_v15, 16  ;;  %v2724_v21 = vshrl.u32 %v6591_v15, 16 }
  0x13   : > { %7308 = vmatpush3.bf16.msra.mxu1 %v8125_v6  ;;  %v2730_v22 = vshll.u32 %v6592_v16, 16  ;;  %v6593_v25 = vld [vmem:[%s8341_s30 + $0x20] sm:$0xf]  ;;  %v6594_v29 = vld [vmem:[%s8341_s30 + $0x24] sm:$0xf]  ;;  %v8136_v59 = vld [vmem:[%s8341_s30 + $0x10] sm:$0xff]  }
  0x14   : > { %7500 = vmatpush3.bf16.msra.mxu0 %v8126_v7  ;;  %7309 = vmatprep.subr.bf16.mxu1 %v8127_v8  ;;  %v2713_v23 = vrot.slane %v2711_v17, 4  ;;  %v2716_v24 = vrot.slane %v2714_v18, 5  ;;  %v2722_v26 = vrot.slane %v2720_v20, 5  ;;  %v2726_v27 = vrot.slane %v2724_v21, 4  ;;  %v6595_v33 = vld [vmem:[%s8341_s30 + $0x28] sm:$0x1] }
  0x15   : > { %7501 = vmatprep.subr.bf16.mxu0 %v8128_v9  ;;  %v2732_v28 = vrot.slane %v2730_v22, 5  ;;  %v2735_v30 = vshrl.u32 %v6593_v25, 16  ;;  %v2738_v34 = vshll.u32 %v6593_v25, 16  ;;  %v2744_v35 = vshll.u32 %v6594_v29, 16  ;;  %v6596_v51 = vld [vmem:[%s8341_s30 + $0x30] sm:$0xf] }
  0x16   : > { %v2717_v32 = vor.u32 %v2716_v24, %v2713_v23  ;;  %v2748_v36 = vshrl.u32 %v6594_v29, 16  ;;  %v2727_v38 = vor.u32 %v2726_v27, %v2722_v26  ;;  %v2754_v40 = vshll.u32 %v6595_v33, 16  ;;  %v6597_v52 = vld [vmem:[%s8341_s30 + $0x34] sm:$0xf]  ;;  %v6598_v53 = vld [vmem:[%s8341_s30 + $0x38] sm:$0x1] }
  0x17   : > { %7310 = vmatpush3.bf16.msra.mxu1 %v8127_v8  ;;  %v2737_v39 = vrot.slane %v2735_v30, 4  ;;  %v2740_v42 = vrot.slane %v2738_v34, 5  ;;  %v2746_v43 = vrot.slane %v2744_v35, 5  ;;  %v2759_v55 = vshrl.u32 %v6596_v51, 16  ;;  %v8138_v0 = vld [vmem:[%s8341_s30 + $0x20] sm:$0xff]   ;;  %v8140_v23 = vld [vmem:[%s9908_s1 + $0x148] sm:$0xff]  }
  0x18   : > { %7502 = vmatpush3.bf16.msra.mxu0 %v8128_v9  ;;  %7311 = vmatprep.subr.bf16.mxu1 %v8129_v10  ;;  %v2718_v41 = vrot.slane %v2717_v32, 4  ;;  %v2750_v44 = vrot.slane %v2748_v36, 4  ;;  %v2728_v46 = vrot.slane %v2727_v38, 4  ;;  %v2756_v47 = vrot.slane %v2754_v40, 5  ;;  %v6599_v5 = vld [vmem:[%s8341_s30 + $0x40] sm:$0xf] }
  0x19   : > { %7503 = vmatprep.subr.bf16.mxu0 %v8130_v11  ;;  %v2741_v49 = vor.u32 %v2740_v42, %v2737_v39  ;;  %v2762_v56 = vshll.u32 %v6596_v51, 16  ;;  %v2768_v57 = vshll.u32 %v6597_v52, 16  ;;  %v2772_v63 = vshrl.u32 %v6597_v52, 16  ;;  %v6600_v9 = vld [vmem:[%s8341_s30 + $0x44] sm:$0xf]  ;;  %v8139_v35 = vld [vmem:[%s8341_s30 + $0x30] sm:$0xff]  }
  0x1a   : > { %v2723_v48 = vsel %vm8364_vm2, %v2718_v41, %v2722_v26  ;;  %v2751_v50 = vor.u32 %v2750_v44, %v2746_v43  ;;  %v2733_v54 = vsel %vm8364_vm2, %v2728_v46, %v2732_v28  ;;  %v2761_v1 = vrot.slane %v2759_v55, 4  ;;  %v6602_v27 = vld [vmem:[%s8341_s30 + $0x50] sm:$0xf]  ;;  %v6604_v32 = vld [vmem:[%s8341_s30 + $0x58] sm:$0x1]  ;;  %v8141_v42 = vld [vmem:[%s8341_s30 + $0x40] sm:$0xff]  }
  0x1b   : > { %7312 = vmatpush3.bf16.msra.mxu1 %v8129_v10  ;;  %v6654_v58 = vcombine.low %v2723_v48, %v2733_v54  ;;  %v2742_v60 = vrot.slane %v2741_v49, 4  ;;  %v2764_v2 = vrot.slane %v2762_v56, 5  ;;  %v2770_v3 = vrot.slane %v2768_v57, 5  ;;  %v6601_v10 = vld [vmem:[%s8341_s30 + $0x48] sm:$0x1]  ;;  %v8143_v46 = vld [vmem:[%s9908_s1 + $0x150] sm:$0xff]  }
  0x1c   : > { %7504 = vmatpush3.bf16.msra.mxu0 %v8130_v11  ;;  %7313 = vmatprep.subr.bf16.mxu1 %v8131_v14  ;;  %v2752_v61 = vrot.slane %v2751_v50, 4  ;;  %v2778_v4 = vshll.u32 %v6598_v53, 16  ;;  %v2774_v8 = vrot.slane %v2772_v63, 4  ;;  %v2783_v11 = vshrl.u32 %v6599_v5, 16  ;;  %v6606_v51 = vld [vmem:[%s8341_s30 + $0x64] sm:$0xf] }
  0x1d   : > { %7505 = vmatprep.subr.bf16.mxu0 %v8132_v19  ;;  %7509 = vmatprep.mubr.bf16.mxu0 %v6654_v58  ;;  %v2747_v6 = vsel %vm8364_vm2, %v2742_v60, %v2746_v43  ;;  %v2765_v13 = vor.u32 %v2764_v2, %v2761_v1  ;;  %v2786_v15 = vshll.u32 %v6599_v5, 16  ;;  %v2792_v18 = vshll.u32 %v6600_v9, 16  ;;  %v6607_v54 = vld [vmem:[%s8341_s30 + $0x68] sm:$0x1]  ;;  %v8146_v57 = vld [vmem:[%s9908_s1 + $0x158] sm:$0xff]  }
  0x1e   : > { %v2757_v7 = vsel %vm8364_vm2, %v2752_v61, %v2756_v47  ;;  %v2775_v16 = vor.u32 %v2774_v8, %v2770_v3  ;;  %v2785_v17 = vrot.slane %v2783_v11, 4  ;;  %v2802_v22 = vshll.u32 %v6601_v10, 16  ;;  %v6610_v10 = vld [vmem:[%s8341_s30 + $0x78] sm:$0x1] }
  0x1f   : > { %7314 = vmatpush3.bf16.msra.mxu1 %v8131_v14  ;;  %v6655_v12 = vcombine.low %v2747_v6, %v2757_v7  ;;  %v2780_v14 = vrot.slane %v2778_v4, 5  ;;  %v2766_v20 = vrot.slane %v2765_v13, 4  ;;  %v2788_v21 = vrot.slane %v2786_v15, 5  ;;  %v6608_v6 = vld [vmem:[%s8341_s30 + $0x70] sm:$0xf] }
  0x20   : > { %7506 = vmatpush3.bf16.msra.mxu0 %v8132_v19  ;;  %7315 = vmatprep.subr.bf16.mxu1 %v8133_v31  ;;  %v2796_v19 = vshrl.u32 %v6600_v9, 16  ;;  %v2776_v24 = vrot.slane %v2775_v16, 4  ;;  %v2794_v25 = vrot.slane %v2792_v18, 5  ;;  %v2804_v30 = vrot.slane %v2802_v22, 5  ;;  %v6609_v9 = vld [vmem:[%s8341_s30 + $0x74] sm:$0xf] }
  0x21   : > { %7507 = vmatprep.subr.bf16.mxu0 %v8134_v45  ;;  %v2771_v28 = vsel %vm8364_vm2, %v2766_v20, %v2770_v3  ;;  %v2789_v29 = vor.u32 %v2788_v21, %v2785_v17  ;;  %v2807_v33 = vshrl.u32 %v6602_v27, 16  ;;  %v2810_v38 = vshll.u32 %v6602_v27, 16  ;;  %v8142_v13 = vld [vmem:[%s8341_s30 + $0x50] sm:$0xff]   ;;  %v6612_v27 = vld [vmem:[%s8341_s30 + $0x84] sm:$0xf] }
  0x22   : > { %v2798_v26 = vrot.slane %v2796_v19, 4  ;;  %v2781_v34 = vsel %vm8364_vm2, %v2776_v24, %v2780_v14  ;;  %v2826_v50 = vshll.u32 %v6604_v32, 16  ;;  %v2840_v61 = vshll.u32 %v6606_v51, 16  ;;  %v8144_v19 = vld [vmem:[%s8341_s30 + $0x60] sm:$0xff]  }
  0x23   : > { %7316 = vmatpush3.bf16.msra.mxu1 %v8133_v31  ;;  %v6603_v31 = vld [vmem:[%s8341_s30 + $0x54] sm:$0xf]  ;;  %v6656_v40 = vcombine.low %v2771_v28, %v2781_v34  ;;  %v2790_v41 = vrot.slane %v2789_v29, 4  ;;  %v2809_v43 = vrot.slane %v2807_v33, 4  ;;  %v2812_v48 = vrot.slane %v2810_v38, 5  ;;  %v8149_v33 = vld [vmem:[%s9908_s1 + $0x40] sm:$0xff]  }
  0x24   : > { %7508 = vmatpush3.bf16.msra.mxu0 %v8134_v45  ;;  %v2799_v36 = vor.u32 %v2798_v26, %v2794_v25  ;;  %v2816_v39 = vshll.u32 %v6603_v31, 16  ;;  %v2820_v44 = vshrl.u32 %v6603_v31, 16  ;;  %v6605_v45 = vld [vmem:[%s8341_s30 + $0x60] sm:$0xf]  ;;  %v2828_v60 = vrot.slane %v2826_v50, 5  ;;  %7349 = vmatprep.subr.bf16.mxu1 %v8149_v33 }
  0x25   : > { %7541 = vmatprep.subr.bf16.mxu0 %v8137_v62  ;;  %v2795_v52 = vsel %vm8364_vm2, %v2790_v41, %v2794_v25  ;;  %v2831_v55 = vshrl.u32 %v6605_v45, 16  ;;  %v2834_v56 = vshll.u32 %v6605_v45, 16  ;;  %v2842_v3 = vrot.slane %v2840_v61, 5  ;;  %v6611_v26 = vld [vmem:[%s8341_s30 + $0x80] sm:$0xf] }
  0x26   : > { %7318 = vmatmul.mubr.bf16.vlgmr.msra.gmra.mrb[0].mxu1 %v8136_v59  ;;  %v2800_v47 = vrot.slane %v2799_v36, 4  ;;  %v2818_v49 = vrot.slane %v2816_v39, 5  ;;  %v2822_v53 = vrot.slane %v2820_v44, 4  ;;  %v2813_v59 = vor.u32 %v2812_v48, %v2809_v43  ;;  %v6613_v31 = vld [vmem:[%s8341_s30 + $0x88] sm:$0x1]  ;;  %v8150_v39 = vld [vmem:[%s9908_s1 + $0x160] sm:$0xff]  }
  0x27   : > { %7510 = vmatmul.mubr.bf16.vlgmr.msra.gmra.mrb[0].mxu0 %v6655_v12  ;;  %7321 = vmatprep.mubr.bf16.mxu1 %v8138_v0  ;;  %v2833_v0 = vrot.slane %v2831_v55, 4  ;;  %v2836_v1 = vrot.slane %v2834_v56, 5  ;;  %v2844_v4 = vshrl.u32 %v6606_v51, 16  ;;  %v2850_v5 = vshll.u32 %v6607_v54, 16 }
  0x28   : > { %7542 = vmatpush3.bf16.msra.mxu0 %v8137_v62  ;;  %7513 = vmatprep.mubr.bf16.mxu0 %v6656_v40  ;;  %v2805_v58 = vsel %vm8364_vm2, %v2800_v47, %v2804_v30  ;;  %v2823_v63 = vor.u32 %v2822_v53, %v2818_v49  ;;  %v2814_v2 = vrot.slane %v2813_v59, 4  ;;  %v2855_v11 = vshrl.u32 %v6608_v6, 16  ;;  %v8151_v53 = vld [vmem:[%s9908_s1 + $0x48] sm:$0xff]  }
  0x29   : > { %7543 = vmatprep.subr.bf16.mxu0 %v8140_v23  ;;  %v6657_v62 = vcombine.low %v2795_v52, %v2805_v58  ;;  %v2837_v8 = vor.u32 %v2836_v1, %v2833_v0  ;;  %v2846_v14 = vrot.slane %v2844_v4, 4  ;;  %v2852_v15 = vrot.slane %v2850_v5, 5  ;;  %v6614_v52 = vld [vmem:[%s8341_s30 + $0x90] sm:$0xf]  ;;  %7350 = vmatpush3.bf16.msra.mxu1 %v8149_v33  ;;  %v6616_v58 = vld [vmem:[%s8341_s30 + $0x98] sm:$0x1] }
  0x2a   : > { %v2824_v7 = vrot.slane %v2823_v63, 4  ;;  %v2819_v12 = vsel %vm8364_vm2, %v2814_v2, %v2818_v49  ;;  %v2858_v16 = vshll.u32 %v6608_v6, 16  ;;  %v2857_v20 = vrot.slane %v2855_v11, 4  ;;  %7351 = vmatprep.subr.bf16.mxu1 %v8151_v53  ;;  %v8155_v33 = vld [vmem:[%s9908_s1 + $0x168] sm:$0xff]  }
  0x2b   : > { %v2838_v18 = vrot.slane %v2837_v8, 4  ;;  %v2864_v21 = vshll.u32 %v6609_v9, 16  ;;  %v2868_v25 = vshrl.u32 %v6609_v9, 16  ;;  %v2874_v30 = vshll.u32 %v6610_v10, 16  ;;  %v8154_v10 = vld [vmem:[%s9908_s1 + $0x50] sm:$0xff]  }
  0x2c   : > { %7544 = vmatpush3.bf16.msra.mxu0 %v8140_v23  ;;  %v2829_v17 = vsel %vm8364_vm2, %v2824_v7, %v2828_v60  ;;  %v2847_v23 = vor.u32 %v2846_v14, %v2842_v3  ;;  %v2860_v24 = vrot.slane %v2858_v16, 5  ;;  %v2879_v32 = vshrl.u32 %v6611_v26, 16  ;;  %v8145_v60 = vld [vmem:[%s8341_s30 + $0x70] sm:$0xff]   ;;  %v6617_v14 = vld [vmem:[%s8341_s30 + $0xa0] sm:$0xf] }
  0x2d   : > { %7545 = vmatprep.subr.bf16.mxu0 %v8143_v46  ;;  %v6658_v22 = vcombine.low %v2819_v12, %v2829_v17  ;;  %v2843_v28 = vsel %vm8364_vm2, %v2838_v18, %v2842_v3  ;;  %v2866_v29 = vrot.slane %v2864_v21, 5  ;;  %v2870_v36 = vrot.slane %v2868_v25, 4  ;;  %v8147_v3 = vld [vmem:[%s8341_s30 + $0x80] sm:$0xff]   ;;  %7352 = vmatpush3.bf16.msra.mxu1 %v8151_v53  ;;  %v6619_v18 = vld [vmem:[%s8341_s30 + $0xa8] sm:$0x1] }
  0x2e   : > { %7322 = vmatmul.mubr.bf16.gmra.mrb[4].mxu1 %v8139_v35  ;;  %v2848_v34 = vrot.slane %v2847_v23, 4  ;;  %v2861_v35 = vor.u32 %v2860_v24, %v2857_v20  ;;  %v2882_v38 = vshll.u32 %v6611_v26, 16  ;;  %v2876_v40 = vrot.slane %v2874_v30, 5  ;;  %v6618_v17 = vld [vmem:[%s8341_s30 + $0xa4] sm:$0xf]  ;;  %7353 = vmatprep.subr.bf16.mxu1 %v8154_v10  ;;  %v8148_v30 = vld [vmem:[%s8341_s30 + $0x90] sm:$0xff]  }
  0x2f   : > { %7514 = vmatmul.mubr.bf16.gmra.mrb[4].mxu0 %v6657_v62  ;;  %7325 = vmatprep.mubr.bf16.mxu1 %v8141_v42  ;;  %v2881_v41 = vrot.slane %v2879_v32, 4  ;;  %v2888_v42 = vshll.u32 %v6612_v27, 16  ;;  %v2892_v43 = vshrl.u32 %v6612_v27, 16  ;;  %v2898_v51 = vshll.u32 %v6613_v31, 16 }
  0x30   : > { %7546 = vmatpush3.bf16.msra.mxu0 %v8143_v46  ;;  %7517 = vmatprep.mubr.bf16.mxu0 %v6658_v22  ;;  %v2853_v44 = vsel %vm8364_vm2, %v2848_v34, %v2852_v15  ;;  %v2862_v45 = vrot.slane %v2861_v35, 4  ;;  %v2871_v46 = vor.u32 %v2870_v36, %v2866_v29  ;;  %v2884_v47 = vrot.slane %v2882_v38, 5  ;;  %v8156_v38 = vld [vmem:[%s9908_s1 + $0x58] sm:$0xff]  }
  0x31   : > { %7547 = vmatprep.subr.bf16.mxu0 %v8146_v57  ;;  %v6659_v48 = vcombine.low %v2843_v28, %v2853_v44  ;;  %v2890_v49 = vrot.slane %v2888_v42, 5  ;;  %v2894_v50 = vrot.slane %v2892_v43, 4  ;;  %v2903_v59 = vshrl.u32 %v6614_v52, 16  ;;  %7354 = vmatpush3.bf16.msra.mxu1 %v8154_v10  ;;  %v6620_v42 = vld [vmem:[%s8341_s30 + $0xb0] sm:$0xf] }
  0x32   : > { %v2867_v54 = vsel %vm8364_vm2, %v2862_v45, %v2866_v29  ;;  %v2872_v55 = vrot.slane %v2871_v46, 4  ;;  %v2885_v56 = vor.u32 %v2884_v47, %v2881_v41  ;;  %v2900_v62 = vrot.slane %v2898_v51, 5  ;;  %v8152_v41 = vld [vmem:[%s8341_s30 + $0xa0] sm:$0xff]   ;;  %v6621_v43 = vld [vmem:[%s8341_s30 + $0xb4] sm:$0xf]  ;;  %7355 = vmatprep.subr.bf16.mxu1 %v8156_v38 }
  0x33   : > { %v2895_v61 = vor.u32 %v2894_v50, %v2890_v49  ;;  %v2906_v63 = vshll.u32 %v6614_v52, 16  ;;  %v2905_v4 = vrot.slane %v2903_v59, 4  ;;  %v2930_v20 = vshll.u32 %v6617_v14, 16  ;;  %v6622_v47 = vld [vmem:[%s8341_s30 + $0xb8] sm:$0x1] }
  0x34   : > { %7548 = vmatpush3.bf16.msra.mxu0 %v8146_v57  ;;  %v6615_v57 = vld [vmem:[%s8341_s30 + $0x94] sm:$0xf]  ;;  %v2877_v1 = vsel %vm8364_vm2, %v2872_v55, %v2876_v40  ;;  %v2886_v2 = vrot.slane %v2885_v56, 4  ;;  %v2936_v24 = vshll.u32 %v6618_v17, 16  ;;  %v2940_v28 = vshrl.u32 %v6618_v17, 16 }
  0x35   : > { %7549 = vmatprep.subr.bf16.mxu0 %v8150_v39  ;;  %v2912_v0 = vshll.u32 %v6615_v57, 16  ;;  %v2916_v5 = vshrl.u32 %v6615_v57, 16  ;;  %v6660_v6 = vcombine.low %v2867_v54, %v2877_v1  ;;  %v2896_v7 = vrot.slane %v2895_v61, 4  ;;  %7356 = vmatpush3.bf16.msra.mxu1 %v8156_v38 }
  0x36   : > { %7326 = vmatmul.mubr.bf16.gmra.mrb[8].mxu1 %v8142_v13  ;;  %v2908_v8 = vrot.slane %v2906_v63, 5  ;;  %v2891_v11 = vsel %vm8364_vm2, %v2886_v2, %v2890_v49  ;;  %v2922_v13 = vshll.u32 %v6616_v58, 16  ;;  %v2932_v27 = vrot.slane %v2930_v20, 5  ;;  %v6625_v63 = vld [vmem:[%s8341_s30 + $0xc8] sm:$0x1] }
  0x37   : > { %7329 = vmatprep.mubr.bf16.mxu1 %v8144_v19  ;;  %7518 = vmatmul.mubr.bf16.gmra.mrb[8].mxu0 %v6659_v48  ;;  %v2914_v9 = vrot.slane %v2912_v0, 5  ;;  %v2918_v12 = vrot.slane %v2916_v5, 4  ;;  %v2901_v15 = vsel %vm8364_vm2, %v2896_v7, %v2900_v62  ;;  %v2927_v19 = vshrl.u32 %v6617_v14, 16  ;;  %v6624_v62 = vld [vmem:[%s8341_s30 + $0xc4] sm:$0xf]  ;;  %v8153_v5 = vld [vmem:[%s8341_s30 + $0xb0] sm:$0xff]  }
  0x38   : > { %7550 = vmatpush3.bf16.msra.mxu0 %v8150_v39  ;;  %7521 = vmatprep.mubr.bf16.mxu0 %v6660_v6  ;;  %v2909_v16 = vor.u32 %v2908_v8, %v2905_v4  ;;  %v6661_v21 = vcombine.low %v2891_v11, %v2901_v15  ;;  %v2924_v23 = vrot.slane %v2922_v13, 5  ;;  %v2938_v31 = vrot.slane %v2936_v24, 5  ;;  %v8157_v11 = vld [vmem:[%s8341_s30 + $0xc0] sm:$0xff]  }
  0x39   : > { %v2919_v22 = vor.u32 %v2918_v12, %v2914_v9  ;;  %v2929_v26 = vrot.slane %v2927_v19, 4  ;;  %v2946_v32 = vshll.u32 %v6619_v18, 16  ;;  %v2942_v36 = vrot.slane %v2940_v28, 4  ;;  %7551 = vmatprep.subr.bf16.mxu0 %v8155_v33  ;;  %v8159_v15 = vld [vmem:[%s9908_s1 + $0x60] sm:$0xff]  }
  0x3a   : > { %v2910_v25 = vrot.slane %v2909_v16, 4  ;;  %v2951_v48 = vshrl.u32 %v6620_v42, 16  ;;  %v2954_v49 = vshll.u32 %v6620_v42, 16  ;;  %v2960_v50 = vshll.u32 %v6621_v43, 16  ;;  %7357 = vmatprep.subr.bf16.mxu1 %v8159_v15  ;;  %v6630_v42 = vld [vmem:[%s8341_s30 + $0xe4] sm:$0xf] }
  0x3b   : > { %v2920_v29 = vrot.slane %v2919_v22, 4  ;;  %v2933_v35 = vor.u32 %v2932_v27, %v2929_v26  ;;  %v2948_v40 = vrot.slane %v2946_v32, 5  ;;  %v2943_v46 = vor.u32 %v2942_v36, %v2938_v31  ;;  %v6627_v22 = vld [vmem:[%s8341_s30 + $0xd4] sm:$0xf]  ;;  %7358 = vmatpush3.bf16.msra.mxu1 %v8159_v15 }
  0x3c   : > { %v2915_v34 = vsel %vm8364_vm2, %v2910_v25, %v2914_v9  ;;  %7552 = vmatpush3.bf16.msra.mxu0 %v8155_v33  ;;  %v2964_v51 = vshrl.u32 %v6621_v43, 16  ;;  %v2970_v52 = vshll.u32 %v6622_v47, 16  ;;  %v2953_v55 = vrot.slane %v2951_v48, 4  ;;  %v8160_v48 = vld [vmem:[%s9908_s1 + $0x170] sm:$0xff]  }
  0x3d   : > { %v2925_v39 = vsel %vm8364_vm2, %v2920_v29, %v2924_v23  ;;  %v2934_v45 = vrot.slane %v2933_v35, 4  ;;  %v2944_v54 = vrot.slane %v2943_v46, 4  ;;  %v2956_v56 = vrot.slane %v2954_v49, 5  ;;  %v6628_v23 = vld [vmem:[%s8341_s30 + $0xd8] sm:$0x1]  ;;  %7553 = vmatprep.subr.bf16.mxu0 %v8160_v48  ;;  %v8163_v15 = vld [vmem:[%s8341_s30 + $0xf0] sm:$0xff]  }
  0x3e   : > { %7330 = vmatmul.mubr.bf16.gmra.mrb[12].mxu1 %v8145_v60  ;;  %v6662_v44 = vcombine.low %v2915_v34, %v2925_v39  ;;  %v2962_v57 = vrot.slane %v2960_v50, 5  ;;  %v2966_v58 = vrot.slane %v2964_v51, 4  ;;  %v2972_v59 = vrot.slane %v2970_v52, 5  ;;  %v6623_v60 = vld [vmem:[%s8341_s30 + $0xc0] sm:$0xf] }
  0x3f   : > { %7333 = vmatprep.mubr.bf16.mxu1 %v8147_v3  ;;  %7522 = vmatmul.mubr.bf16.gmra.mrb[12].mxu0 %v6661_v21  ;;  %v2939_v53 = vsel %vm8364_vm2, %v2934_v45, %v2938_v31  ;;  %v2949_v61 = vsel %vm8364_vm2, %v2944_v54, %v2948_v40  ;;  %v2975_v0 = vshrl.u32 %v6623_v60, 16  ;;  %v2978_v1 = vshll.u32 %v6623_v60, 16  ;;  %v6626_v21 = vld [vmem:[%s8341_s30 + $0xd0] sm:$0xf]  ;;  %v6629_v35 = vld [vmem:[%s8341_s30 + $0xe0] sm:$0xf] }
  0x40   : > { %7525 = vmatprep.mubr.bf16.mxu0 %v6662_v44  ;;  %v6663_v2 = vcombine.low %v2939_v53, %v2949_v61  ;;  %v2957_v3 = vor.u32 %v2956_v56, %v2953_v55  ;;  %v2967_v4 = vor.u32 %v2966_v58, %v2962_v57  ;;  %v2984_v6 = vshll.u32 %v6624_v62, 16  ;;  %v6631_v44 = vld [vmem:[%s8341_s30 + $0xe8] sm:$0x1]  ;;  %v8162_v61 = vld [vmem:[%s8341_s30 + $0xe0] sm:$0xff]   ;;  %7554 = vmatpush3.bf16.msra.mxu0 %v8160_v48 }
  0x41   : > { %v2977_v7 = vrot.slane %v2975_v0, 4  ;;  %v2980_v8 = vrot.slane %v2978_v1, 5  ;;  %v2988_v9 = vshrl.u32 %v6624_v62, 16  ;;  %v2994_v10 = vshll.u32 %v6625_v63, 16  ;;  %v8161_v53 = vld [vmem:[%s9908_s1 + $0x68] sm:$0xff]  }
  0x42   : > { %v2958_v12 = vrot.slane %v2957_v3, 4  ;;  %v2968_v13 = vrot.slane %v2967_v4, 4  ;;  %v2986_v14 = vrot.slane %v2984_v6, 5  ;;  %v2999_v27 = vshrl.u32 %v6626_v21, 16  ;;  %7359 = vmatprep.subr.bf16.mxu1 %v8161_v53  ;;  %v6632_v3 = vld [vmem:[%s8341_s30 + $0xf0] sm:$0xf] }
  0x43   : > { %v2981_v16 = vor.u32 %v2980_v8, %v2977_v7  ;;  %v2990_v17 = vrot.slane %v2988_v9, 4  ;;  %v2996_v18 = vrot.slane %v2994_v10, 5  ;;  %v3002_v28 = vshll.u32 %v6626_v21, 16  ;;  %7360 = vmatpush3.bf16.msra.mxu1 %v8161_v53  ;;  %v6633_v4 = vld [vmem:[%s8341_s30 + $0xf4] sm:$0xf] }
  0x44   : > { %v2963_v19 = vsel %vm8364_vm2, %v2958_v12, %v2962_v57  ;;  %v2973_v20 = vsel %vm8364_vm2, %v2968_v13, %v2972_v59  ;;  %v3008_v29 = vshll.u32 %v6627_v22, 16  ;;  %v3018_v31 = vshll.u32 %v6628_v23, 16  ;;  %v8164_v10 = vld [vmem:[%s9908_s1 + $0x70] sm:$0xff]   ;;  %v6635_v23 = vld [vmem:[%s8341_s30 + $0x100] sm:$0xf] }
  0x45   : > { %v6664_v24 = vcombine.low %v2963_v19, %v2973_v20  ;;  %v2982_v25 = vrot.slane %v2981_v16, 4  ;;  %v2991_v26 = vor.u32 %v2990_v17, %v2986_v14  ;;  %v3001_v34 = vrot.slane %v2999_v27, 4  ;;  %7361 = vmatprep.subr.bf16.mxu1 %v8164_v10  ;;  %v6636_v27 = vld [vmem:[%s8341_s30 + $0x104] sm:$0xf] }
  0x46   : > { %7334 = vmatmul.mubr.bf16.gmra.mrb[16].mxu1 %v8148_v30  ;;  %v3012_v30 = vshrl.u32 %v6627_v22, 16  ;;  %v3004_v36 = vrot.slane %v3002_v28, 5  ;;  %v3010_v38 = vrot.slane %v3008_v29, 5  ;;  %v3020_v40 = vrot.slane %v3018_v31, 5  ;;  %v6637_v28 = vld [vmem:[%s8341_s30 + $0x108] sm:$0x1] }
  0x47   : > { %7337 = vmatprep.mubr.bf16.mxu1 %v8152_v41  ;;  %7526 = vmatmul.mubr.bf16.gmra.mrb[16].mxu0 %v6663_v2  ;;  %v2987_v32 = vsel %vm8364_vm2, %v2982_v25, %v2986_v14  ;;  %v2992_v33 = vrot.slane %v2991_v26, 4  ;;  %v8158_v41 = vld [vmem:[%s8341_s30 + $0xd0] sm:$0xff]   ;;  %v3023_v45 = vshrl.u32 %v6629_v35, 16  ;;  %v3026_v46 = vshll.u32 %v6629_v35, 16  ;;  %v8166_v35 = vld [vmem:[%s9908_s1 + $0x78] sm:$0xff]  }
  0x48   : > { %7529 = vmatprep.mubr.bf16.mxu0 %v6664_v24  ;;  %v3014_v39 = vrot.slane %v3012_v30, 4  ;;  %v3032_v47 = vshll.u32 %v6630_v42, 16  ;;  %v3005_v50 = vor.u32 %v3004_v36, %v3001_v34  ;;  %v3036_v52 = vshrl.u32 %v6630_v42, 16  ;;  %v8165_v24 = vld [vmem:[%s9908_s1 + $0x178] sm:$0xff]   ;;  %7362 = vmatpush3.bf16.msra.mxu1 %v8164_v10  ;;  %v762_v48 = vld [vmem:[%s8341_s30 + $0x4] sm:$0xf] }
  0x49   : > { %v2997_v43 = vsel %vm8364_vm2, %v2992_v33, %v2996_v18  ;;  %v3025_v54 = vrot.slane %v3023_v45, 4  ;;  %v3028_v55 = vrot.slane %v3026_v46, 5  ;;  %v3042_v57 = vshll.u32 %v6631_v44, 16  ;;  %7555 = vmatprep.subr.bf16.mxu0 %v8165_v24  ;;  %7363 = vmatprep.subr.bf16.mxu1 %v8166_v35 }
  0x4a   : > { %v6665_v49 = vcombine.low %v2987_v32, %v2997_v43  ;;  %v3015_v51 = vor.u32 %v3014_v39, %v3010_v38  ;;  %v3034_v56 = vrot.slane %v3032_v47, 5  ;;  %v3006_v58 = vrot.slane %v3005_v50, 4  ;;  %7556 = vmatpush3.bf16.msra.mxu0 %v8165_v24  ;;  %v761_v47 = vld [vmem:[%s8341_s30] sm:$0xf] }
  0x4b   : > { %v3038_v60 = vrot.slane %v3036_v52, 4  ;;  %v3029_v62 = vor.u32 %v3028_v55, %v3025_v54  ;;  %v3044_v63 = vrot.slane %v3042_v57, 5  ;;  %v3047_v8 = vshrl.u32 %v6632_v3, 16  ;;  %v6678_v54 = vld [vmem:[%s8341_s30 + $0x10] sm:$0xe] }
  0x4c   : > { %v3016_v59 = vrot.slane %v3015_v51, 4  ;;  %v3011_v0 = vsel %vm8364_vm2, %v3006_v58, %v3010_v38  ;;  %v3050_v9 = vshll.u32 %v6632_v3, 16  ;;  %v3056_v12 = vshll.u32 %v6633_v4, 16  ;;  %7364 = vmatpush3.bf16.msra.mxu1 %v8166_v35  ;;  %v763_v51 = vld [vmem:[%s8341_s30 + $0x8] sm:$0x1] }
  0x4d   : > { %v3039_v2 = vor.u32 %v3038_v60, %v3034_v56  ;;  %v3030_v7 = vrot.slane %v3029_v62, 4  ;;  %v3060_v13 = vshrl.u32 %v6633_v4, 16  ;;  %v3049_v17 = vrot.slane %v3047_v8, 4  ;;  %v6048_v4 = vld [vmem:[%s9910_s3 + $0x10] sm:$0xff] }
  0x4e   : > { %7338 = vmatmul.mubr.bf16.gmra.mrb[20].mxu1 %v8153_v5  ;;  %v3021_v1 = vsel %vm8364_vm2, %v3016_v59, %v3020_v40  ;;  %v6634_v5 = vld [vmem:[%s8341_s30 + $0xf8] sm:$0x1]  ;;  %v3052_v18 = vrot.slane %v3050_v9, 5  ;;  %v3058_v20 = vrot.slane %v3056_v12, 5  ;;  %v3071_v29 = vshrl.u32 %v6635_v23, 16  ;;  %v8535_v40 = vld [vmem:[%s9908_s1 + $0x180] sm:$0xff]  }
  0x4f   : > { %7341 = vmatprep.mubr.bf16.mxu1 %v8157_v11  ;;  %7530 = vmatmul.mubr.bf16.gmra.mrb[20].mxu0 %v6665_v49  ;;  %v6666_v6 = vcombine.low %v3011_v0, %v3021_v1  ;;  %v3040_v11 = vrot.slane %v3039_v2, 4  ;;  %v3066_v14 = vshll.u32 %v6634_v5, 16  ;;  %v3035_v16 = vsel %vm8364_vm2, %v3030_v7, %v3034_v56  ;;  %v6679_v59 = vld [vmem:[%s8341_s30 + $0x14] sm:$0xf]  ;;  %v6680_v0 = vld [vmem:[%s8341_s30 + $0x18] sm:$0x1] }
  0x50   : > { %v3062_v21 = vrot.slane %v3060_v13, 4  ;;  %v3053_v26 = vor.u32 %v3052_v18, %v3049_v17  ;;  %v3074_v30 = vshll.u32 %v6635_v23, 16  ;;  %v3080_v32 = vshll.u32 %v6636_v27, 16  ;;  %7589 = vmatprep.subr.bf16.mxu0 %v8535_v40  ;;  %v6681_v17 = vld [vmem:[%s8341_s30 + $0x20] sm:$0xe] }
  0x51   : > { %7533 = vmatprep.mubr.bf16.mxu0 %v6666_v6  ;;  %v3045_v19 = vsel %vm8364_vm2, %v3040_v11, %v3044_v63  ;;  %v3068_v22 = vrot.slane %v3066_v14, 5  ;;  %v3084_v33 = vshrl.u32 %v6636_v27, 16  ;;  %v3090_v34 = vshll.u32 %v6637_v28, 16  ;;  %v764_v6 = vld [vmem:[%s8341_s30 + $0x10] sm:$0xf] }
  0x52   : > { %v6667_v25 = vcombine.low %v3035_v16, %v3045_v19  ;;  %v3063_v31 = vor.u32 %v3062_v21, %v3058_v20  ;;  %v3054_v36 = vrot.slane %v3053_v26, 4  ;;  %v3073_v38 = vrot.slane %v3071_v29, 4  ;;  %v765_v11 = vld [vmem:[%s8341_s30 + $0x14] sm:$0xf]  ;;  %v6683_v23 = vld [vmem:[%s8341_s30 + $0x28] sm:$0x1] }
  0x53   : > { %v3076_v39 = vrot.slane %v3074_v30, 5  ;;  %v3082_v42 = vrot.slane %v3080_v32, 5  ;;  %v3086_v43 = vrot.slane %v3084_v33, 4  ;;  %v3092_v44 = vrot.slane %v3090_v34, 5  ;;  %v767_v32 = vld [vmem:[%s8341_s30 + $0x20] sm:$0xf] }
  0x54   : > { %v3059_v45 = vsel %vm8364_vm2, %v3054_v36, %v3058_v20  ;;  %v845_v52 = vshrl.u32 %v761_v47, 16  ;;  %v848_v53 = vshll.u32 %v761_v47, 16  ;;  %v854_v57 = vshll.u32 %v762_v48, 16 }
  0x55   : > { %v3077_v46 = vor.u32 %v3076_v39, %v3073_v38  ;;  %v3087_v50 = vor.u32 %v3086_v43, %v3082_v42  ;;  %v858_v58 = vshrl.u32 %v762_v48, 16  ;;  %v864_v63 = vshll.u32 %v763_v51, 16  ;;  %v768_v38 = vld [vmem:[%s8341_s30 + $0x24] sm:$0xf] }
  0x56   : > { %7342 = vmatmul.mubr.bf16.gmra.mrb[24].mxu1 %v8158_v41  ;;  %v3064_v41 = vrot.slane %v3063_v31, 4  ;;  %v850_v62 = vrot.slane %v848_v53, 5  ;;  %v856_v2 = vrot.slane %v854_v57, 5  ;;  %v6726_v5 = vrot.slane %v6678_v54, 9 }
  0x57   : > { %7345 = vmatprep.mubr.bf16.mxu1 %v8162_v61  ;;  %7534 = vmatmul.mubr.bf16.gmra.mrb[24].mxu0 %v6667_v25  ;;  %v3078_v56 = vrot.slane %v3077_v46, 4  ;;  %v3088_v60 = vrot.slane %v3087_v50, 4  ;;  %v847_v61 = vrot.slane %v845_v52, 4  ;;  %v860_v3 = vrot.slane %v858_v58, 4  ;;  %v8171_v50 = vld [vmem:[%s9908_s1 + $0x80] sm:$0xff]  }
  0x58   : > { %v3069_v49 = vsel %vm8364_vm2, %v3064_v41, %v3068_v22  ;;  %v866_v9 = vrot.slane %v864_v63, 5  ;;  %v3578_v10 = vrot.slane %v6679_v59, 5  ;;  %v3581_v14 = vrot.slane %v6680_v0, 5  ;;  %v6682_v22 = vld [vmem:[%s8341_s30 + $0x24] sm:$0xf]  ;;  %7397 = vmatprep.subr.bf16.mxu1 %v8171_v50 }
  0x59   : > { %v6668_v55 = vcombine.low %v3059_v45, %v3069_v49  ;;  %v3083_v1 = vsel %vm8364_vm2, %v3078_v56, %v3082_v42  ;;  %v3093_v7 = vsel %vm8364_vm2, %v3088_v60, %v3092_v44  ;;  %v851_v8 = vor.u32 %v850_v62, %v847_v61  ;;  %v769_v44 = vld [vmem:[%s8341_s30 + $0x28] sm:$0x1]  ;;  %v6684_v49 = vld [vmem:[%s8341_s30 + $0x30] sm:$0xe]  ;;  %v6686_v60 = vld [vmem:[%s8341_s30 + $0x38] sm:$0x1] }
  0x5a   : > { %v6669_v12 = vcombine.low %v3083_v1, %v3093_v7  ;;  %v861_v13 = vor.u32 %v860_v3, %v856_v2  ;;  %v869_v16 = vshrl.u32 %v764_v6, 16  ;;  %v3579_v19 = vsel %vm8552_vm5, %v6726_v5, %v3578_v10  ;;  %v770_v1 = vld [vmem:[%s8341_s30 + $0x30] sm:$0xf]  ;;  %v771_v7 = vld [vmem:[%s8341_s30 + $0x34] sm:$0xf] }
  0x5b   : > { %7537 = vmatprep.mubr.bf16.mxu0 %v6668_v55  ;;  %v852_v18 = vrot.slane %v851_v8, 4  ;;  %v3580_v20 = vrot.slane %v3578_v10, 4  ;;  %v872_v21 = vshll.u32 %v764_v6, 16  ;;  %v878_v26 = vshll.u32 %v765_v11, 16  ;;  %v6685_v55 = vld [vmem:[%s8341_s30 + $0x34] sm:$0xf] }
  0x5c   : > { %v862_v24 = vrot.slane %v861_v13, 4  ;;  %v871_v25 = vrot.slane %v869_v16, 4  ;;  %v882_v27 = vshrl.u32 %v765_v11, 16  ;;  %v6727_v43 = vrot.slane %v6681_v17, 9  ;;  %v8168_v8 = vld [vmem:[%s9908_s1 + $0x188] sm:$0xff]  }
  0x5d   : > { %v857_v28 = vsel %vm8364_vm2, %v852_v18, %v856_v2  ;;  %v3582_v29 = vsel %vm8552_vm5, %v3580_v20, %v3581_v14  ;;  %v874_v30 = vrot.slane %v872_v21, 5  ;;  %v880_v35 = vrot.slane %v878_v26, 5  ;;  %v8173_v13 = vld [vmem:[%s9908_s1 + $0x88] sm:$0xff]   ;;  %v772_v17 = vld [vmem:[%s8341_s30 + $0x38] sm:$0x1] }
  0x5e   : > { %7346 = vmatmul.mubr.bf16.gmra.mrb[28].mxu1 %v8163_v15  ;;  %v766_v15 = vld [vmem:[%s8341_s30 + $0x18] sm:$0x1]  ;;  %v867_v33 = vsel %vm8364_vm2, %v862_v24, %v866_v9  ;;  %v6758_v34 = vcombine.low %v3579_v19, %v3582_v29  ;;  %v884_v36 = vrot.slane %v882_v27, 4  ;;  %v3585_v46 = vrot.slane %v6682_v22, 5  ;;  %v8169_v29 = vld [vmem:[%s9908_s1 + $0x190] sm:$0xff]  }
  0x5f   : > { %7538 = vmatmul.mubr.bf16.gmra.mrb[28].mxu0 %v6669_v12  ;;  %v888_v31 = vshll.u32 %v766_v15, 16  ;;  %v6438_v39 = vcombine.low %v857_v28, %v867_v33  ;;  %v875_v41 = vor.u32 %v874_v30, %v871_v25  ;;  %v3588_v47 = vrot.slane %v6683_v23, 5  ;;  %v6687_v23 = vld [vmem:[%s8341_s30 + $0x40] sm:$0xe]  ;;  %v6688_v28 = vld [vmem:[%s8341_s30 + $0x44] sm:$0xf] }
  0x60   : > { %7557 = vmatprep.mubr.bf16.mxu0 %v6758_v34  ;;  %v885_v45 = vor.u32 %v884_v36, %v880_v35  ;;  %v893_v48 = vshrl.u32 %v767_v32, 16  ;;  %v896_v52 = vshll.u32 %v767_v32, 16  ;;  %v902_v53 = vshll.u32 %v768_v38, 16  ;;  %v6689_v33 = vld [vmem:[%s8341_s30 + $0x48] sm:$0x1] }
  0x61   : > { %v890_v42 = vrot.slane %v888_v31, 5  ;;  %7365 = vmatprep.mubr.bf16.mxu1 %v6438_v39  ;;  %v876_v51 = vrot.slane %v875_v41, 4  ;;  %v906_v54 = vshrl.u32 %v768_v38, 16  ;;  %v3586_v57 = vsel %vm8552_vm5, %v6727_v43, %v3585_v46  ;;  %v773_v34 = vld [vmem:[%s8341_s30 + $0x40] sm:$0xf] }
  0x62   : > { %v886_v56 = vrot.slane %v885_v45, 4  ;;  %v3587_v58 = vrot.slane %v3585_v46, 4  ;;  %v895_v59 = vrot.slane %v893_v48, 4  ;;  %v898_v62 = vrot.slane %v896_v52, 5  ;;  %v774_v41 = vld [vmem:[%s8341_s30 + $0x44] sm:$0xf] }
  0x63   : > { %v881_v61 = vsel %vm8364_vm2, %v876_v51, %v880_v35  ;;  %v904_v63 = vrot.slane %v902_v53, 5  ;;  %v908_v0 = vrot.slane %v906_v54, 4  ;;  %v912_v5 = vshll.u32 %v769_v44, 16  ;;  %v775_v46 = vld [vmem:[%s8341_s30 + $0x48] sm:$0x1] }
  0x64   : > { %v891_v2 = vsel %vm8364_vm2, %v886_v56, %v890_v42  ;;  %v3589_v3 = vsel %vm8552_vm5, %v3587_v58, %v3588_v47  ;;  %v6728_v6 = vrot.slane %v6684_v49, 9  ;;  %v899_v11 = vor.u32 %v898_v62, %v895_v59  ;;  %v8174_v47 = vld [vmem:[%s9908_s1 + $0x90] sm:$0xff]   ;;  %v6692_v58 = vld [vmem:[%s8341_s30 + $0x58] sm:$0x1] }
  0x65   : > { %v6439_v9 = vcombine.low %v881_v61, %v891_v2  ;;  %v6759_v10 = vcombine.low %v3586_v57, %v3589_v3  ;;  %v909_v12 = vor.u32 %v908_v0, %v904_v63  ;;  %v914_v14 = vrot.slane %v912_v5, 5  ;;  %v6690_v52 = vld [vmem:[%s8341_s30 + $0x50] sm:$0xe]  ;;  %v6691_v57 = vld [vmem:[%s8341_s30 + $0x54] sm:$0xf] }
  0x66   : > { %v3592_v15 = vrot.slane %v6685_v55, 5  ;;  %v3595_v16 = vrot.slane %v6686_v60, 5  ;;  %v917_v18 = vshrl.u32 %v770_v1, 16  ;;  %v900_v19 = vrot.slane %v899_v11, 4  ;;  %v776_v59 = vld [vmem:[%s8341_s30 + $0x50] sm:$0xf] }
  0x67   : > { %7366 = vmatmul.mubr.bf16.vlgmr.msra.gmra.mrb[0].mxu1 %v6439_v9  ;;  %7558 = vmatmul.mubr.bf16.vlgmr.msra.gmra.mrb[0].mxu0 %v6759_v10  ;;  %v910_v20 = vrot.slane %v909_v12, 4  ;;  %v920_v21 = vshll.u32 %v770_v1, 16  ;;  %v926_v22 = vshll.u32 %v771_v7, 16  ;;  %v930_v27 = vshrl.u32 %v771_v7, 16  ;;  %v8170_v60 = vld [vmem:[%s9908_s1 + $0x198] sm:$0xff]  }
  0x68   : > { %7590 = vmatpush3.bf16.msra.mxu0 %v8535_v40  ;;  %v3593_v24 = vsel %vm8552_vm5, %v6728_v6, %v3592_v15  ;;  %v3594_v25 = vrot.slane %v3592_v15, 4  ;;  %v919_v26 = vrot.slane %v917_v18, 4  ;;  %7398 = vmatpush3.bf16.msra.mxu1 %v8171_v50  ;;  %v905_v30 = vsel %vm8364_vm2, %v900_v19, %v904_v63  ;;  %v8176_v1 = vld [vmem:[%s9908_s1 + $0x98] sm:$0xff]   ;;  %v777_v11 = vld [vmem:[%s8341_s30 + $0x54] sm:$0xf] }
  0x69   : > { %v915_v31 = vsel %vm8364_vm2, %v910_v20, %v914_v14  ;;  %v922_v40 = vrot.slane %v920_v21, 5  ;;  %v928_v32 = vrot.slane %v926_v22, 5  ;;  %7591 = vmatprep.subr.bf16.mxu0 %v8168_v8  ;;  %7399 = vmatprep.subr.bf16.mxu1 %v8173_v13  ;;  %v932_v38 = vrot.slane %v930_v27, 4  ;;  %v6693_v22 = vld [vmem:[%s8341_s30 + $0x60] sm:$0xe] }
  0x6a   : > { %v6440_v35 = vcombine.low %v905_v30, %v915_v31  ;;  %v3596_v36 = vsel %vm8552_vm5, %v3594_v25, %v3595_v16  ;;  %v936_v39 = vshll.u32 %v772_v17, 16  ;;  %v6729_v44 = vrot.slane %v6687_v23, 9  ;;  %v778_v16 = vld [vmem:[%s8341_s30 + $0x58] sm:$0x1]  ;;  %v8172_v17 = vld [vmem:[%s9908_s1 + $0x1a0] sm:$0xff]  }
  0x6b   : > { %v6760_v42 = vcombine.low %v3593_v24, %v3596_v36  ;;  %v923_v43 = vor.u32 %v922_v40, %v919_v26  ;;  %v3599_v45 = vrot.slane %v6688_v28, 5  ;;  %v933_v48 = vor.u32 %v932_v38, %v928_v32  ;;  %v6694_v27 = vld [vmem:[%s8341_s30 + $0x64] sm:$0xf]  ;;  %v779_v38 = vld [vmem:[%s8341_s30 + $0x60] sm:$0xf] }
  0x6c   : > { %7369 = vmatprep.mubr.bf16.mxu1 %v6440_v35  ;;  %v938_v49 = vrot.slane %v936_v39, 5  ;;  %v3602_v50 = vrot.slane %v6689_v33, 5  ;;  %7592 = vmatpush3.bf16.msra.mxu0 %v8168_v8  ;;  %v941_v51 = vshrl.u32 %v773_v34, 16  ;;  %v944_v56 = vshll.u32 %v773_v34, 16  ;;  %v8177_v28 = vld [vmem:[%s9908_s1 + $0xa0] sm:$0xff]  }
  0x6d   : > { %7561 = vmatprep.mubr.bf16.mxu0 %v6760_v42  ;;  %v924_v53 = vrot.slane %v923_v43, 4  ;;  %v3600_v54 = vsel %vm8552_vm5, %v6729_v44, %v3599_v45  ;;  %v3601_v55 = vrot.slane %v3599_v45, 4  ;;  %7593 = vmatprep.subr.bf16.mxu0 %v8169_v29  ;;  %v934_v61 = vrot.slane %v933_v48, 4  ;;  %v780_v44 = vld [vmem:[%s8341_s30 + $0x64] sm:$0xf]  ;;  %v8175_v45 = vld [vmem:[%s9908_s1 + $0x1a8] sm:$0xff]  }
  0x6e   : > { %v943_v62 = vrot.slane %v941_v51, 4  ;;  %v950_v63 = vshll.u32 %v774_v41, 16  ;;  %v954_v0 = vshrl.u32 %v774_v41, 16  ;;  %7400 = vmatpush3.bf16.msra.mxu1 %v8173_v13  ;;  %v946_v5 = vrot.slane %v944_v56, 5  ;;  %v8179_v51 = vld [vmem:[%s9908_s1 + $0xa8] sm:$0xff]  }
  0x6f   : > { %v929_v2 = vsel %vm8364_vm2, %v924_v53, %v928_v32  ;;  %v3603_v3 = vsel %vm8552_vm5, %v3601_v55, %v3602_v50  ;;  %v960_v6 = vshll.u32 %v775_v46, 16  ;;  %7401 = vmatprep.subr.bf16.mxu1 %v8174_v47  ;;  %v939_v7 = vsel %vm8364_vm2, %v934_v61, %v938_v49  ;;  %v6695_v32 = vld [vmem:[%s8341_s30 + $0x68] sm:$0x1]  ;;  %v6696_v56 = vld [vmem:[%s8341_s30 + $0x70] sm:$0xe] }
  0x70   : > { %v6761_v8 = vcombine.low %v3600_v54, %v3603_v3  ;;  %v952_v9 = vrot.slane %v950_v63, 5  ;;  %v956_v10 = vrot.slane %v954_v0, 4  ;;  %7594 = vmatpush3.bf16.msra.mxu0 %v8169_v29  ;;  %v6441_v12 = vcombine.low %v929_v2, %v939_v7  ;;  %v781_v50 = vld [vmem:[%s8341_s30 + $0x68] sm:$0x1]  ;;  %v8178_v61 = vld [vmem:[%s9908_s1 + $0x1b0] sm:$0xff]  }
  0x71   : > { %v947_v13 = vor.u32 %v946_v5, %v943_v62  ;;  %v962_v14 = vrot.slane %v960_v6, 5  ;;  %v6730_v15 = vrot.slane %v6690_v52, 9  ;;  %7595 = vmatprep.subr.bf16.mxu0 %v8170_v60  ;;  %v3606_v19 = vrot.slane %v6691_v57, 5  ;;  %v6697_v2 = vld [vmem:[%s8341_s30 + $0x74] sm:$0xf] }
  0x72   : > { %7562 = vmatmul.mubr.bf16.gmra.mrb[4].mxu0 %v6761_v8  ;;  %v957_v18 = vor.u32 %v956_v10, %v952_v9  ;;  %v3609_v20 = vrot.slane %v6692_v58, 5  ;;  %v965_v21 = vshrl.u32 %v776_v59, 16  ;;  %7402 = vmatpush3.bf16.msra.mxu1 %v8174_v47  ;;  %v968_v24 = vshll.u32 %v776_v59, 16  ;;  %v6698_v8 = vld [vmem:[%s8341_s30 + $0x78] sm:$0x1] }
  0x73   : > { %7370 = vmatmul.mubr.bf16.gmra.mrb[4].mxu1 %v6441_v12  ;;  %v948_v23 = vrot.slane %v947_v13, 4  ;;  %v974_v25 = vshll.u32 %v777_v11, 16  ;;  %v978_v26 = vshrl.u32 %v777_v11, 16  ;;  %7403 = vmatprep.subr.bf16.mxu1 %v8176_v1  ;;  %v3607_v30 = vsel %vm8552_vm5, %v6730_v15, %v3606_v19 }
  0x74   : > { %v958_v29 = vrot.slane %v957_v18, 4  ;;  %v3608_v31 = vrot.slane %v3606_v19, 4  ;;  %v967_v40 = vrot.slane %v965_v21, 4  ;;  %7596 = vmatpush3.bf16.msra.mxu0 %v8170_v60  ;;  %v970_v34 = vrot.slane %v968_v24, 5  ;;  %v783_v19 = vld [vmem:[%s8341_s30 + $0x74] sm:$0xf] }
  0x75   : > { %v953_v33 = vsel %vm8364_vm2, %v948_v23, %v952_v9  ;;  %v976_v35 = vrot.slane %v974_v25, 5  ;;  %v980_v36 = vrot.slane %v978_v26, 4  ;;  %7597 = vmatprep.subr.bf16.mxu0 %v8172_v17  ;;  %v984_v42 = vshll.u32 %v778_v16, 16  ;;  %v782_v9 = vld [vmem:[%s8341_s30 + $0x70] sm:$0xf]  ;;  %v8181_v26 = vld [vmem:[%s9908_s1 + $0x1b8] sm:$0xff]  }
  0x76   : > { %v963_v39 = vsel %vm8364_vm2, %v958_v29, %v962_v14  ;;  %v3610_v41 = vsel %vm8552_vm5, %v3608_v31, %v3609_v20  ;;  %v6731_v43 = vrot.slane %v6693_v22, 9  ;;  %7404 = vmatpush3.bf16.msra.mxu1 %v8176_v1  ;;  %v971_v48 = vor.u32 %v970_v34, %v967_v40  ;;  %v8180_v14 = vld [vmem:[%s9908_s1 + $0xb0] sm:$0xff]   ;;  %v784_v20 = vld [vmem:[%s8341_s30 + $0x78] sm:$0x1]  ;;  %v6699_v25 = vld [vmem:[%s8341_s30 + $0x80] sm:$0xe] }
  0x77   : > { %v6442_v46 = vcombine.low %v953_v33, %v963_v39  ;;  %v6762_v47 = vcombine.low %v3607_v30, %v3610_v41  ;;  %v981_v49 = vor.u32 %v980_v36, %v976_v35  ;;  %7405 = vmatprep.subr.bf16.mxu1 %v8177_v28  ;;  %v986_v52 = vrot.slane %v984_v42, 5  ;;  %v6700_v31 = vld [vmem:[%s8341_s30 + $0x84] sm:$0xf]  ;;  %v6701_v40 = vld [vmem:[%s8341_s30 + $0x88] sm:$0x1] }
  0x78   : > { %v3613_v53 = vrot.slane %v6694_v27, 5  ;;  %v3616_v54 = vrot.slane %v6695_v32, 5  ;;  %v989_v55 = vshrl.u32 %v779_v38, 16  ;;  %7598 = vmatpush3.bf16.msra.mxu0 %v8172_v17  ;;  %v972_v57 = vrot.slane %v971_v48, 4  ;;  %v785_v42 = vld [vmem:[%s8341_s30 + $0x80] sm:$0xf] }
  0x79   : > { %7373 = vmatprep.mubr.bf16.mxu1 %v6442_v46  ;;  %7565 = vmatprep.mubr.bf16.mxu0 %v6762_v47  ;;  %v982_v58 = vrot.slane %v981_v49, 4  ;;  %v992_v59 = vshll.u32 %v779_v38, 16  ;;  %v998_v60 = vshll.u32 %v780_v44, 16  ;;  %v1002_v1 = vshrl.u32 %v780_v44, 16  ;;  %v786_v48 = vld [vmem:[%s8341_s30 + $0x84] sm:$0xf] }
  0x7a   : > { %v3614_v62 = vsel %vm8552_vm5, %v6731_v43, %v3613_v53  ;;  %v3615_v63 = vrot.slane %v3613_v53, 4  ;;  %v991_v0 = vrot.slane %v989_v55, 4  ;;  %7599 = vmatprep.subr.bf16.mxu0 %v8175_v45  ;;  %7406 = vmatpush3.bf16.msra.mxu1 %v8177_v28  ;;  %v977_v3 = vsel %vm8364_vm2, %v972_v57, %v976_v35  ;;  %v8182_v43 = vld [vmem:[%s9908_s1 + $0xb8] sm:$0xff]   ;;  %v787_v53 = vld [vmem:[%s8341_s30 + $0x88] sm:$0x1] }
  0x7b   : > { %v987_v5 = vsel %vm8364_vm2, %v982_v58, %v986_v52  ;;  %v994_v6 = vrot.slane %v992_v59, 5  ;;  %v1000_v7 = vrot.slane %v998_v60, 5  ;;  %7407 = vmatprep.subr.bf16.mxu1 %v8179_v51  ;;  %v1004_v12 = vrot.slane %v1002_v1, 4 }
  0x7c   : > { %v6443_v10 = vcombine.low %v977_v3, %v987_v5  ;;  %v3617_v11 = vsel %vm8552_vm5, %v3615_v63, %v3616_v54  ;;  %v1008_v13 = vshll.u32 %v781_v50, 16  ;;  %7600 = vmatpush3.bf16.msra.mxu0 %v8175_v45  ;;  %v6732_v17 = vrot.slane %v6696_v56, 9  ;;  %v6702_v54 = vld [vmem:[%s8341_s30 + $0x90] sm:$0xe]  ;;  %v6703_v63 = vld [vmem:[%s8341_s30 + $0x94] sm:$0xf] }
  0x7d   : > { %v6763_v15 = vcombine.low %v3614_v62, %v3617_v11  ;;  %v995_v16 = vor.u32 %v994_v6, %v991_v0  ;;  %v3620_v18 = vrot.slane %v6697_v2, 5  ;;  %7601 = vmatprep.subr.bf16.mxu0 %v8178_v61  ;;  %v1005_v21 = vor.u32 %v1004_v12, %v1000_v7  ;;  %v6704_v5 = vld [vmem:[%s8341_s30 + $0x98] sm:$0x1]  ;;  %v8716_v11 = vld [vmem:[%s9908_s1 + $0x1c0] sm:$0xff]  }
  0x7e   : > { %7374 = vmatmul.mubr.bf16.gmra.mrb[8].mxu1 %v6443_v10  ;;  %v1010_v22 = vrot.slane %v1008_v13, 5  ;;  %v3623_v23 = vrot.slane %v6698_v8, 5  ;;  %v1013_v24 = vshrl.u32 %v782_v9, 16  ;;  %v1016_v30 = vshll.u32 %v782_v9, 16  ;;  %v788_v10 = vld [vmem:[%s8341_s30 + $0x90] sm:$0xf] }
  0x7f   : > { %7566 = vmatmul.mubr.bf16.gmra.mrb[8].mxu0 %v6763_v15  ;;  %v996_v27 = vrot.slane %v995_v16, 4  ;;  %v3621_v28 = vsel %vm8552_vm5, %v6732_v17, %v3620_v18  ;;  %v3622_v29 = vrot.slane %v3620_v18, 4  ;;  %7408 = vmatpush3.bf16.msra.mxu1 %v8179_v51  ;;  %v1006_v32 = vrot.slane %v1005_v21, 4  ;;  %v789_v16 = vld [vmem:[%s8341_s30 + $0x94] sm:$0xf] }
  0x80   : > { %v1015_v33 = vrot.slane %v1013_v24, 4  ;;  %v1022_v34 = vshll.u32 %v783_v19, 16  ;;  %v1026_v35 = vshrl.u32 %v783_v19, 16  ;;  %7602 = vmatpush3.bf16.msra.mxu0 %v8178_v61  ;;  %7409 = vmatprep.subr.bf16.mxu1 %v8180_v14  ;;  %v1018_v39 = vrot.slane %v1016_v30, 5  ;;  %v790_v21 = vld [vmem:[%s8341_s30 + $0x98] sm:$0x1] }
  0x81   : > { %v1001_v36 = vsel %vm8364_vm2, %v996_v27, %v1000_v7  ;;  %v3624_v38 = vsel %vm8552_vm5, %v3622_v29, %v3623_v23  ;;  %v1032_v41 = vshll.u32 %v784_v20, 16  ;;  %7603 = vmatprep.subr.bf16.mxu0 %v8181_v26  ;;  %v1011_v44 = vsel %vm8364_vm2, %v1006_v32, %v1010_v22  ;;  %v6706_v27 = vld [vmem:[%s8341_s30 + $0xa4] sm:$0xf] }
  0x82   : > { %v6764_v45 = vcombine.low %v3621_v28, %v3624_v38  ;;  %v1024_v46 = vrot.slane %v1022_v34, 5  ;;  %v1028_v47 = vrot.slane %v1026_v35, 4  ;;  %v6444_v49 = vcombine.low %v1001_v36, %v1011_v44 }
  0x83   : > { %v1019_v50 = vor.u32 %v1018_v39, %v1015_v33  ;;  %v1034_v51 = vrot.slane %v1032_v41, 5  ;;  %v6733_v52 = vrot.slane %v6699_v25, 9  ;;  %7410 = vmatpush3.bf16.msra.mxu1 %v8180_v14  ;;  %v3627_v56 = vrot.slane %v6700_v31, 5 }
  0x84   : > { %7569 = vmatprep.mubr.bf16.mxu0 %v6764_v45  ;;  %v1029_v55 = vor.u32 %v1028_v47, %v1024_v46  ;;  %v3630_v57 = vrot.slane %v6701_v40, 5  ;;  %v1037_v58 = vshrl.u32 %v785_v42, 16  ;;  %7604 = vmatpush3.bf16.msra.mxu0 %v8181_v26  ;;  %v1040_v60 = vshll.u32 %v785_v42, 16  ;;  %v6705_v26 = vld [vmem:[%s8341_s30 + $0xa0] sm:$0xe] }
  0x85   : > { %7377 = vmatprep.mubr.bf16.mxu1 %v6444_v49  ;;  %v1020_v59 = vrot.slane %v1019_v50, 4  ;;  %v1046_v61 = vshll.u32 %v786_v48, 16  ;;  %v1050_v62 = vshrl.u32 %v786_v48, 16  ;;  %7411 = vmatprep.subr.bf16.mxu1 %v8182_v43  ;;  %v3628_v1 = vsel %vm8552_vm5, %v6733_v52, %v3627_v56  ;;  %v6707_v40 = vld [vmem:[%s8341_s30 + $0xa8] sm:$0x1] }
  0x86   : > { %v1030_v0 = vrot.slane %v1029_v55, 4  ;;  %v3629_v2 = vrot.slane %v3627_v56, 4  ;;  %v1039_v3 = vrot.slane %v1037_v58, 4  ;;  %v1042_v7 = vrot.slane %v1040_v60, 5  ;;  %7637 = vmatprep.subr.bf16.mxu0 %v8716_v11  ;;  %v791_v42 = vld [vmem:[%s8341_s30 + $0xa0] sm:$0xf] }
  0x87   : > { %v1025_v6 = vsel %vm8364_vm2, %v1020_v59, %v1024_v46  ;;  %v1048_v8 = vrot.slane %v1046_v61, 5  ;;  %v1052_v9 = vrot.slane %v1050_v62, 4  ;;  %7412 = vmatpush3.bf16.msra.mxu1 %v8182_v43  ;;  %v1056_v14 = vshll.u32 %v787_v53, 16  ;;  %v792_v43 = vld [vmem:[%s8341_s30 + $0xa4] sm:$0xf] }
  0x88   : > { %v1035_v12 = vsel %vm8364_vm2, %v1030_v0, %v1034_v51  ;;  %v3631_v13 = vsel %vm8552_vm5, %v3629_v2, %v3630_v57  ;;  %v6734_v15 = vrot.slane %v6702_v54, 9  ;;  %v1043_v19 = vor.u32 %v1042_v7, %v1039_v3  ;;  %v793_v48 = vld [vmem:[%s8341_s30 + $0xa8] sm:$0x1]  ;;  %v6708_v61 = vld [vmem:[%s8341_s30 + $0xb0] sm:$0xe] }
  0x89   : > { %v6445_v17 = vcombine.low %v1025_v6, %v1035_v12  ;;  %v6765_v18 = vcombine.low %v3628_v1, %v3631_v13  ;;  %v1053_v20 = vor.u32 %v1052_v9, %v1048_v8  ;;  %v1058_v22 = vrot.slane %v1056_v14, 5  ;;  %v6709_v2 = vld [vmem:[%s8341_s30 + $0xb4] sm:$0xf]  ;;  %v794_v9 = vld [vmem:[%s8341_s30 + $0xb0] sm:$0xf] }
  0x8a   : > { %v3634_v23 = vrot.slane %v6703_v63, 5  ;;  %v3637_v24 = vrot.slane %v6704_v5, 5  ;;  %v1061_v25 = vshrl.u32 %v788_v10, 16  ;;  %v1044_v28 = vrot.slane %v1043_v19, 4 }
  0x8b   : > { %7378 = vmatmul.mubr.bf16.gmra.mrb[12].mxu1 %v6445_v17  ;;  %7570 = vmatmul.mubr.bf16.gmra.mrb[12].mxu0 %v6765_v18  ;;  %v1054_v29 = vrot.slane %v1053_v20, 4  ;;  %v1064_v30 = vshll.u32 %v788_v10, 16  ;;  %v1070_v31 = vshll.u32 %v789_v16, 16  ;;  %v1074_v35 = vshrl.u32 %v789_v16, 16  ;;  %v796_v20 = vld [vmem:[%s8341_s30 + $0xb8] sm:$0x1] }
  0x8c   : > { %v3635_v32 = vsel %vm8552_vm5, %v6734_v15, %v3634_v23  ;;  %v3636_v33 = vrot.slane %v3634_v23, 4  ;;  %v1063_v34 = vrot.slane %v1061_v25, 4  ;;  %v1049_v36 = vsel %vm8364_vm2, %v1044_v28, %v1048_v8  ;;  %v6710_v8 = vld [vmem:[%s8341_s30 + $0xb8] sm:$0x1]  ;;  %v795_v15 = vld [vmem:[%s8341_s30 + $0xb4] sm:$0xf] }
  0x8d   : > { %v1059_v38 = vsel %vm8364_vm2, %v1054_v29, %v1058_v22  ;;  %v1066_v39 = vrot.slane %v1064_v30, 5  ;;  %v1072_v41 = vrot.slane %v1070_v31, 5  ;;  %v1076_v46 = vrot.slane %v1074_v35, 4  ;;  %v6711_v25 = vld [vmem:[%s8341_s30 + $0xc0] sm:$0xe] }
  0x8e   : > { %v6446_v44 = vcombine.low %v1049_v36, %v1059_v38  ;;  %v3638_v45 = vsel %vm8552_vm5, %v3636_v33, %v3637_v24  ;;  %v1080_v47 = vshll.u32 %v790_v21, 16  ;;  %v6735_v51 = vrot.slane %v6705_v26, 9  ;;  %v6712_v30 = vld [vmem:[%s8341_s30 + $0xc4] sm:$0xf]  ;;  %v6713_v31 = vld [vmem:[%s8341_s30 + $0xc8] sm:$0x1] }
  0x8f   : > { %v6766_v49 = vcombine.low %v3635_v32, %v3638_v45  ;;  %v1067_v50 = vor.u32 %v1066_v39, %v1063_v34  ;;  %v3641_v52 = vrot.slane %v6706_v27, 5  ;;  %v1077_v53 = vor.u32 %v1076_v46, %v1072_v41  ;;  %v798_v46 = vld [vmem:[%s8341_s30 + $0xc4] sm:$0xf] }
  0x90   : > { %7381 = vmatprep.mubr.bf16.mxu1 %v6446_v44  ;;  %v1082_v54 = vrot.slane %v1080_v47, 5  ;;  %v3644_v55 = vrot.slane %v6707_v40, 5  ;;  %v1085_v56 = vshrl.u32 %v791_v42, 16  ;;  %v1088_v60 = vshll.u32 %v791_v42, 16 }
  0x91   : > { %7573 = vmatprep.mubr.bf16.mxu0 %v6766_v49  ;;  %v1068_v57 = vrot.slane %v1067_v50, 4  ;;  %v3642_v58 = vsel %vm8552_vm5, %v6735_v51, %v3641_v52  ;;  %v3643_v59 = vrot.slane %v3641_v52, 4  ;;  %v1078_v62 = vrot.slane %v1077_v53, 4  ;;  %v799_v51 = vld [vmem:[%s8341_s30 + $0xc8] sm:$0x1] }
  0x92   : > { %v1087_v63 = vrot.slane %v1085_v56, 4  ;;  %v1094_v0 = vshll.u32 %v792_v43, 16  ;;  %v1098_v1 = vshrl.u32 %v792_v43, 16  ;;  %v1090_v6 = vrot.slane %v1088_v60, 5  ;;  %v6714_v60 = vld [vmem:[%s8341_s30 + $0xd0] sm:$0xe] }
  0x93   : > { %v1073_v3 = vsel %vm8364_vm2, %v1068_v57, %v1072_v41  ;;  %v3645_v5 = vsel %vm8552_vm5, %v3643_v59, %v3644_v55  ;;  %v1104_v7 = vshll.u32 %v793_v48, 16  ;;  %v1083_v10 = vsel %vm8364_vm2, %v1078_v62, %v1082_v54  ;;  %v797_v41 = vld [vmem:[%s8341_s30 + $0xc0] sm:$0xf] }
  0x94   : > { %v6767_v12 = vcombine.low %v3642_v58, %v3645_v5  ;;  %v1096_v13 = vrot.slane %v1094_v0, 5  ;;  %v1100_v14 = vrot.slane %v1098_v1, 4  ;;  %v6447_v16 = vcombine.low %v1073_v3, %v1083_v10  ;;  %v6715_v1 = vld [vmem:[%s8341_s30 + $0xd4] sm:$0xf] }
  0x95   : > { %v1091_v17 = vor.u32 %v1090_v6, %v1087_v63  ;;  %v1106_v18 = vrot.slane %v1104_v7, 5  ;;  %v6736_v19 = vrot.slane %v6708_v61, 9  ;;  %v3648_v22 = vrot.slane %v6709_v2, 5  ;;  %v6716_v7 = vld [vmem:[%s8341_s30 + $0xd8] sm:$0x1] }
  0x96   : > { %7574 = vmatmul.mubr.bf16.gmra.mrb[16].mxu0 %v6767_v12  ;;  %v1101_v21 = vor.u32 %v1100_v14, %v1096_v13  ;;  %v3651_v23 = vrot.slane %v6710_v8, 5  ;;  %v1109_v24 = vshrl.u32 %v794_v9, 16  ;;  %7382 = vmatmul.mubr.bf16.gmra.mrb[16].mxu1 %v6447_v16  ;;  %v1112_v27 = vshll.u32 %v794_v9, 16  ;;  %v800_v8 = vld [vmem:[%s8341_s30 + $0xd0] sm:$0xf] }
  0x97   : > { %v1092_v26 = vrot.slane %v1091_v17, 4  ;;  %v1118_v28 = vshll.u32 %v795_v15, 16  ;;  %v1122_v29 = vshrl.u32 %v795_v15, 16  ;;  %v3649_v32 = vsel %vm8552_vm5, %v6736_v19, %v3648_v22  ;;  %v802_v19 = vld [vmem:[%s8341_s30 + $0xd8] sm:$0x1] }
  0x98   : > { %v1102_v40 = vrot.slane %v1101_v21, 4  ;;  %v3650_v33 = vrot.slane %v3648_v22, 4  ;;  %v1111_v34 = vrot.slane %v1109_v24, 4  ;;  %v1114_v36 = vrot.slane %v1112_v27, 5  ;;  %v6717_v24 = vld [vmem:[%s8341_s30 + $0xe0] sm:$0xe] }
  0x99   : > { %v1097_v35 = vsel %vm8364_vm2, %v1092_v26, %v1096_v13  ;;  %v1120_v38 = vrot.slane %v1118_v28, 5  ;;  %v1124_v39 = vrot.slane %v1122_v29, 4  ;;  %v1128_v44 = vshll.u32 %v796_v20, 16  ;;  %v6718_v29 = vld [vmem:[%s8341_s30 + $0xe4] sm:$0xf] }
  0x9a   : > { %v1107_v42 = vsel %vm8364_vm2, %v1102_v40, %v1106_v18  ;;  %v3652_v43 = vsel %vm8552_vm5, %v3650_v33, %v3651_v23  ;;  %v6737_v45 = vrot.slane %v6711_v25, 9  ;;  %v1115_v49 = vor.u32 %v1114_v36, %v1111_v34  ;;  %v801_v18 = vld [vmem:[%s8341_s30 + $0xd4] sm:$0xf] }
  0x9b   : > { %v6448_v47 = vcombine.low %v1097_v35, %v1107_v42  ;;  %v6768_v48 = vcombine.low %v3649_v32, %v3652_v43  ;;  %v1125_v50 = vor.u32 %v1124_v39, %v1120_v38  ;;  %v1130_v52 = vrot.slane %v1128_v44, 5  ;;  %v803_v39 = vld [vmem:[%s8341_s30 + $0xe0] sm:$0xf] }
  0x9c   : > { %v3655_v53 = vrot.slane %v6712_v30, 5  ;;  %v3658_v54 = vrot.slane %v6713_v31, 5  ;;  %v1133_v55 = vshrl.u32 %v797_v41, 16  ;;  %v1116_v56 = vrot.slane %v1115_v49, 4 }
  0x9d   : > { %7385 = vmatprep.mubr.bf16.mxu1 %v6448_v47  ;;  %7577 = vmatprep.mubr.bf16.mxu0 %v6768_v48  ;;  %v1126_v57 = vrot.slane %v1125_v50, 4  ;;  %v1136_v58 = vshll.u32 %v797_v41, 16  ;;  %v1142_v59 = vshll.u32 %v798_v46, 16  ;;  %v1146_v0 = vshrl.u32 %v798_v46, 16  ;;  %v805_v50 = vld [vmem:[%s8341_s30 + $0xe8] sm:$0x1] }
  0x9e   : > { %v3656_v61 = vsel %vm8552_vm5, %v6737_v45, %v3655_v53  ;;  %v3657_v62 = vrot.slane %v3655_v53, 4  ;;  %v1135_v63 = vrot.slane %v1133_v55, 4  ;;  %v1121_v2 = vsel %vm8364_vm2, %v1116_v56, %v1120_v38  ;;  %v6719_v38 = vld [vmem:[%s8341_s30 + $0xe8] sm:$0x1]  ;;  %v804_v45 = vld [vmem:[%s8341_s30 + $0xe4] sm:$0xf] }
  0x9f   : > { %v1131_v3 = vsel %vm8364_vm2, %v1126_v57, %v1130_v52  ;;  %v1138_v5 = vrot.slane %v1136_v58, 5  ;;  %v1144_v6 = vrot.slane %v1142_v59, 5  ;;  %v1148_v12 = vrot.slane %v1146_v0, 4 }
  0xa0   : > { %v6449_v9 = vcombine.low %v1121_v2, %v1131_v3  ;;  %v3659_v10 = vsel %vm8552_vm5, %v3657_v62, %v3658_v54  ;;  %v1152_v13 = vshll.u32 %v799_v51, 16  ;;  %v6738_v16 = vrot.slane %v6714_v60, 9  ;;  %v6720_v51 = vld [vmem:[%s8341_s30 + $0xf0] sm:$0xe]  ;;  %v6721_v60 = vld [vmem:[%s8341_s30 + $0xf4] sm:$0xf] }
  0xa1   : > { %v6769_v14 = vcombine.low %v3656_v61, %v3659_v10  ;;  %v1139_v15 = vor.u32 %v1138_v5, %v1135_v63  ;;  %v3662_v17 = vrot.slane %v6715_v1, 5  ;;  %v1149_v20 = vor.u32 %v1148_v12, %v1144_v6  ;;  %v6722_v61 = vld [vmem:[%s8341_s30 + $0xf8] sm:$0x1]  ;;  %v806_v2 = vld [vmem:[%s8341_s30 + $0xf0] sm:$0xf]  ;;  %v8804_v3 = vld [vmem:[%s9908_s1 + $0xc0] sm:$0xff]  }
  0xa2   : > { %7386 = vmatmul.mubr.bf16.gmra.mrb[20].mxu1 %v6449_v9  ;;  %v1154_v21 = vrot.slane %v1152_v13, 5  ;;  %v3665_v22 = vrot.slane %v6716_v7, 5  ;;  %v1157_v23 = vshrl.u32 %v800_v8, 16  ;;  %v1160_v28 = vshll.u32 %v800_v8, 16  ;;  %v807_v9 = vld [vmem:[%s8341_s30 + $0xf4] sm:$0xf]  ;;  %7445 = vmatprep.subr.bf16.mxu1 %v8804_v3 }
  0xa3   : > { %7578 = vmatmul.mubr.bf16.gmra.mrb[20].mxu0 %v6769_v14  ;;  %v1140_v25 = vrot.slane %v1139_v15, 4  ;;  %v3663_v26 = vsel %vm8552_vm5, %v6738_v16, %v3662_v17  ;;  %v3664_v27 = vrot.slane %v3662_v17, 4  ;;  %v1150_v30 = vrot.slane %v1149_v20, 4 }
  0xa4   : > { %v1159_v31 = vrot.slane %v1157_v23, 4  ;;  %v1166_v40 = vshll.u32 %v801_v18, 16  ;;  %v1170_v32 = vshrl.u32 %v801_v18, 16  ;;  %v1162_v35 = vrot.slane %v1160_v28, 5 }
  0xa5   : > { %v1145_v33 = vsel %vm8364_vm2, %v1140_v25, %v1144_v6  ;;  %v3666_v34 = vsel %vm8552_vm5, %v3664_v27, %v3665_v22  ;;  %v1176_v36 = vshll.u32 %v802_v19, 16  ;;  %v1155_v41 = vsel %vm8364_vm2, %v1150_v30, %v1154_v21  ;;  %v808_v19 = vld [vmem:[%s8341_s30 + $0xf8] sm:$0x1]  ;;  %v6724_v25 = vld [vmem:[%s8341_s30 + $0x104] sm:$0xf] }
  0xa6   : > { %v6770_v42 = vcombine.low %v3663_v26, %v3666_v34  ;;  %v1168_v43 = vrot.slane %v1166_v40, 5  ;;  %v1172_v44 = vrot.slane %v1170_v32, 4  ;;  %v6450_v46 = vcombine.low %v1145_v33, %v1155_v41  ;;  %v6725_v30 = vld [vmem:[%s8341_s30 + $0x108] sm:$0x1] }
  0xa7   : > { %v1163_v47 = vor.u32 %v1162_v35, %v1159_v31  ;;  %v1178_v48 = vrot.slane %v1176_v36, 5  ;;  %v6739_v49 = vrot.slane %v6717_v24, 9  ;;  %v3669_v53 = vrot.slane %v6718_v29, 5  ;;  %v6723_v24 = vld [vmem:[%s8341_s30 + $0x100] sm:$0xe] }
  0xa8   : > { %7581 = vmatprep.mubr.bf16.mxu0 %v6770_v42  ;;  %v1173_v52 = vor.u32 %v1172_v44, %v1168_v43  ;;  %v3672_v54 = vrot.slane %v6719_v38, 5  ;;  %v1181_v55 = vshrl.u32 %v803_v39, 16  ;;  %7389 = vmatprep.mubr.bf16.mxu1 %v6450_v46  ;;  %v1184_v57 = vshll.u32 %v803_v39, 16  ;;  %v1582_v31 = vld [vmem:[%s8341_s30] sm:$0xe] }
  0xa9   : > { %v1164_v56 = vrot.slane %v1163_v47, 4  ;;  %v1190_v58 = vshll.u32 %v804_v45, 16  ;;  %v1194_v59 = vshrl.u32 %v804_v45, 16  ;;  %v3670_v63 = vsel %vm8552_vm5, %v6739_v49, %v3669_v53  ;;  %v1583_v35 = vld [vmem:[%s8341_s30 + $0x4] sm:$0xf] }
  0xaa   : > { %v1174_v62 = vrot.slane %v1173_v52, 4  ;;  %v3671_v0 = vrot.slane %v3669_v53, 4  ;;  %v1183_v1 = vrot.slane %v1181_v55, 4  ;;  %v1186_v6 = vrot.slane %v1184_v57, 5  ;;  %v1584_v42 = vld [vmem:[%s8341_s30 + $0x8] sm:$0x1] }
  0xab   : > { %v1169_v5 = vsel %vm8364_vm2, %v1164_v56, %v1168_v43  ;;  %v1192_v7 = vrot.slane %v1190_v58, 5  ;;  %v1196_v8 = vrot.slane %v1194_v59, 4  ;;  %v1200_v13 = vshll.u32 %v805_v50, 16  ;;  %v1585_v47 = vld [vmem:[%s8341_s30 + $0x10] sm:$0xe] }
  0xac   : > { %v1179_v10 = vsel %vm8364_vm2, %v1174_v62, %v1178_v48  ;;  %v3673_v12 = vsel %vm8552_vm5, %v3671_v0, %v3672_v54  ;;  %v6740_v14 = vrot.slane %v6720_v51, 9  ;;  %v1187_v17 = vor.u32 %v1186_v6, %v1183_v1  ;;  %v1586_v48 = vld [vmem:[%s8341_s30 + $0x14] sm:$0xf]  ;;  %v1587_v57 = vld [vmem:[%s8341_s30 + $0x18] sm:$0x1] }
  0xad   : > { %v6451_v15 = vcombine.low %v1169_v5, %v1179_v10  ;;  %v6771_v16 = vcombine.low %v3670_v63, %v3673_v12  ;;  %v1197_v18 = vor.u32 %v1196_v8, %v1192_v7  ;;  %v1202_v20 = vrot.slane %v1200_v13, 5  ;;  %v1588_v58 = vld [vmem:[%s8341_s30 + $0x20] sm:$0xe]  ;;  %v1589_v63 = vld [vmem:[%s8341_s30 + $0x24] sm:$0xf] }
  0xae   : > { %v3676_v21 = vrot.slane %v6721_v60, 5  ;;  %v3679_v22 = vrot.slane %v6722_v61, 5  ;;  %v1205_v23 = vshrl.u32 %v806_v2, 16  ;;  %v1188_v26 = vrot.slane %v1187_v17, 4  ;;  %v1590_v6 = vld [vmem:[%s8341_s30 + $0x28] sm:$0x1] }
  0xaf   : > { %7390 = vmatmul.mubr.bf16.gmra.mrb[24].mxu1 %v6451_v15  ;;  %7582 = vmatmul.mubr.bf16.gmra.mrb[24].mxu0 %v6771_v16  ;;  %v1198_v27 = vrot.slane %v1197_v18, 4  ;;  %v1208_v28 = vshll.u32 %v806_v2, 16  ;;  %v1214_v29 = vshll.u32 %v807_v9, 16  ;;  %v1218_v34 = vshrl.u32 %v807_v9, 16  ;;  %v8183_v12 = vld [vmem:[%s8341_s30 + $0x20] sm:$0xff]  }
  0xb0   : > { %v3677_v40 = vsel %vm8552_vm5, %v6740_v14, %v3676_v21  ;;  %v3678_v32 = vrot.slane %v3676_v21, 4  ;;  %v1207_v33 = vrot.slane %v1205_v23, 4  ;;  %v1193_v36 = vsel %vm8364_vm2, %v1188_v26, %v1192_v7  ;;  %v1595_v21 = vld [vmem:[%s8341_s30 + $0x44] sm:$0xf] }
  0xb1   : > { %v1203_v38 = vsel %vm8364_vm2, %v1198_v27, %v1202_v20  ;;  %v1210_v39 = vrot.slane %v1208_v28, 5  ;;  %v1216_v41 = vrot.slane %v1214_v29, 5  ;;  %v1220_v45 = vrot.slane %v1218_v34, 4  ;;  %v1592_v20 = vld [vmem:[%s8341_s30 + $0x34] sm:$0xf] }
  0xb2   : > { %v6452_v43 = vcombine.low %v1193_v36, %v1203_v38  ;;  %v3680_v44 = vsel %vm8552_vm5, %v3678_v32, %v3679_v22  ;;  %v1224_v46 = vshll.u32 %v808_v19, 16  ;;  %v6741_v51 = vrot.slane %v6723_v24, 9  ;;  %v1593_v27 = vld [vmem:[%s8341_s30 + $0x38] sm:$0x1]  ;;  %v1594_v28 = vld [vmem:[%s8341_s30 + $0x40] sm:$0xe] }
  0xb3   : > { %v6772_v49 = vcombine.low %v3677_v40, %v3680_v44  ;;  %v1211_v50 = vor.u32 %v1210_v39, %v1207_v33  ;;  %v3683_v52 = vrot.slane %v6724_v25, 5  ;;  %v1221_v53 = vor.u32 %v1220_v45, %v1216_v41  ;;  %v1591_v25 = vld [vmem:[%s8341_s30 + $0x30] sm:$0xe]  ;;  %v8186_v44 = vld [vmem:[%s8341_s30 + $0x40] sm:$0xff]  }
  0xb4   : > { %7393 = vmatprep.mubr.bf16.mxu1 %v6452_v43  ;;  %v1226_v54 = vrot.slane %v1224_v46, 5  ;;  %v3686_v55 = vrot.slane %v6725_v30, 5  ;;  %v6462_v56 = vrot.slane %v1582_v31, 9  ;;  %v1715_v62 = vrot.slane %v1583_v35, 5  ;;  %v8184_v32 = vld [vmem:[%s8341_s30 + $0x30] sm:$0xff]   ;;  %v8188_v46 = vld [vmem:[%s9908_s1 + $0x1c8] sm:$0xff]  }
  0xb5   : > { %7585 = vmatprep.mubr.bf16.mxu0 %v6772_v49  ;;  %v1212_v59 = vrot.slane %v1211_v50, 4  ;;  %v3684_v60 = vsel %vm8552_vm5, %v6741_v51, %v3683_v52  ;;  %v3685_v61 = vrot.slane %v3683_v52, 4  ;;  %v1222_v0 = vrot.slane %v1221_v53, 4  ;;  %v1596_v35 = vld [vmem:[%s8341_s30 + $0x48] sm:$0x1] }
  0xb6   : > { %v1718_v1 = vrot.slane %v1584_v42, 5  ;;  %v6463_v2 = vrot.slane %v1585_v47, 9  ;;  %v1722_v5 = vrot.slane %v1586_v48, 5  ;;  %v1716_v9 = vsel %vm8552_vm5, %v6462_v56, %v1715_v62  ;;  %v8864_v42 = vld [vmem:[%s8341_s30 + $0x54] sm:$0xf]  ;;  %v8199_v53 = vld [vmem:[%s9908_s1 + $0xc8] sm:$0xff]  }
  0xb7   : > { %v1217_v7 = vsel %vm8364_vm2, %v1212_v59, %v1216_v41  ;;  %v3687_v8 = vsel %vm8552_vm5, %v3685_v61, %v3686_v55  ;;  %v1717_v10 = vrot.slane %v1715_v62, 4  ;;  %v1227_v13 = vsel %vm8364_vm2, %v1222_v0, %v1226_v54  ;;  %v1601_v49 = vld [vmem:[%s8341_s30 + $0x64] sm:$0xf]  ;;  %v1597_v50 = vld [vmem:[%s8341_s30 + $0x50] sm:$0xe] }
  0xb8   : > { %v6773_v14 = vcombine.low %v3684_v60, %v3687_v8  ;;  %v1724_v15 = vrot.slane %v1722_v5, 4  ;;  %v6453_v16 = vcombine.low %v1217_v7, %v1227_v13  ;;  %v1725_v18 = vrot.slane %v1587_v57, 5  ;;  %v1599_v51 = vld [vmem:[%s8341_s30 + $0x58] sm:$0x1]  ;;  %v1600_v55 = vld [vmem:[%s8341_s30 + $0x60] sm:$0xe] }
  0xb9   : > { %v1719_v17 = vsel %vm8552_vm5, %v1717_v10, %v1718_v1  ;;  %v6464_v19 = vrot.slane %v1588_v58, 9  ;;  %v1729_v23 = vrot.slane %v1589_v63, 5  ;;  %v1732_v24 = vrot.slane %v1590_v6, 5  ;;  %v1602_v56 = vld [vmem:[%s8341_s30 + $0x68] sm:$0x1]  ;;  %v8187_v58 = vld [vmem:[%s8341_s30 + $0x50] sm:$0xff]  }
  0xba   : > { %7586 = vmatmul.mubr.bf16.gmra.mrb[28].mxu0 %v6773_v14  ;;  %v6494_v22 = vcombine.low %v1716_v9, %v1719_v17  ;;  %7394 = vmatmul.mubr.bf16.gmra.mrb[28].mxu1 %v6453_v16  ;;  %v1723_v26 = vsel %vm8552_vm5, %v6463_v2, %v1722_v5  ;;  %v1726_v29 = vsel %vm8552_vm5, %v1724_v15, %v1725_v18  ;;  %v1736_v31 = vrot.slane %v1592_v20, 5  ;;  %v8893_v62 = vld [vmem:[%s8341_s30 + $0x70] sm:$0xe]  ;;  %v8896_v63 = vld [vmem:[%s8341_s30 + $0x74] sm:$0xf]  ;;  %v8189_v0 = vld [vmem:[%s8341_s30 + $0x60] sm:$0xff]  }
  0xbb   : > { %7605 = vmatprep.mubr.bf16.mxu0 %v8183_v12  ;;  %v1731_v30 = vrot.slane %v1729_v23, 4  ;;  %v1743_v40 = vrot.slane %v1595_v21, 5  ;;  %v1730_v33 = vsel %vm8552_vm5, %v6464_v19, %v1729_v23  ;;  %v6465_v34 = vrot.slane %v1591_v25, 9  ;;  %v8901_v2 = vld [vmem:[%s8341_s30 + $0x84] sm:$0xf]  ;;  %v8201_v5 = vld [vmem:[%s9908_s1 + $0xd0] sm:$0xff]  }
  0xbc   : > { %7413 = vmatprep.mubr.bf16.mxu1 %v6494_v22  ;;  %v1739_v38 = vrot.slane %v1593_v27, 5  ;;  %v6466_v39 = vrot.slane %v1594_v28, 9  ;;  %v6495_v41 = vcombine.low %v1723_v26, %v1726_v29  ;;  %v1738_v45 = vrot.slane %v1736_v31, 4  ;;  %v1605_v13 = vld [vmem:[%s8341_s30 + $0x78] sm:$0x1]  ;;  %v8198_v23 = vld [vmem:[%s9908_s1 + $0x1e0] sm:$0xff]  }
  0xbd   : > { %v1733_v36 = vsel %vm8552_vm5, %v1731_v30, %v1732_v24  ;;  %v1745_v47 = vrot.slane %v1743_v40, 4  ;;  %v1746_v48 = vrot.slane %v1596_v35, 5  ;;  %v1750_v52 = vrot.slane %v8864_v42, 5  ;;  %v8204_v16 = vld [vmem:[%s9908_s1 + $0xd8] sm:$0xff]   ;;  %v1606_v18 = vld [vmem:[%s8341_s30 + $0x80] sm:$0xe] }
  0xbe   : > { %v6496_v43 = vcombine.low %v1730_v33, %v1733_v36  ;;  %v1737_v54 = vsel %vm8552_vm5, %v6465_v34, %v1736_v31  ;;  %v1740_v57 = vsel %vm8552_vm5, %v1738_v45, %v1739_v38  ;;  %v1744_v59 = vsel %vm8552_vm5, %v6466_v39, %v1743_v40  ;;  %v1608_v19 = vld [vmem:[%s8341_s30 + $0x88] sm:$0x1]  ;;  %v8919_v21 = vld [vmem:[%s8341_s30 + $0x90] sm:$0xe]  ;;  %v8922_v22 = vld [vmem:[%s8341_s30 + $0x94] sm:$0xf] }
  0xbf   : > { %v1747_v60 = vsel %vm8552_vm5, %v1745_v47, %v1746_v48  ;;  %v1757_v61 = vrot.slane %v1601_v49, 5  ;;  %v6467_v1 = vrot.slane %v1597_v50, 9  ;;  %v6497_v6 = vcombine.low %v1737_v54, %v1740_v57  ;;  %v8190_v26 = vld [vmem:[%s8341_s30 + $0x70] sm:$0xff]   ;;  %v8192_v29 = vld [vmem:[%s8341_s30 + $0x80] sm:$0xff]   ;;  %v8938_v40 = vld [vmem:[%s8341_s30 + $0x98] sm:$0x1] }
  0xc0   : > { %v6498_v7 = vcombine.low %v1744_v59, %v1747_v60  ;;  %v1752_v8 = vrot.slane %v1750_v52, 4  ;;  %v1753_v9 = vrot.slane %v1599_v51, 5  ;;  %v6468_v10 = vrot.slane %v1600_v55, 9  ;;  %v8206_v36 = vld [vmem:[%s9908_s1 + $0xe0] sm:$0xff]   ;;  %v8949_v42 = vld [vmem:[%s8341_s30 + $0xb4] sm:$0xf] }
  0xc1   : > { %v1760_v12 = vrot.slane %v1602_v56, 5  ;;  %v6469_v14 = vrot.slane %v8893_v62, 9  ;;  %v1764_v15 = vrot.slane %v8896_v63, 5  ;;  %v1759_v17 = vrot.slane %v1757_v61, 4  ;;  %v8959_v47 = vld [vmem:[%s8341_s30 + $0xa8] sm:$0x1] }
  0xc2   : > { %7606 = vmatmul.mubr.bf16.vlgmr.msra.gmra.mrb[0].mxu0 %v8184_v32  ;;  %7414 = vmatmul.mubr.bf16.vlgmr.msra.gmra.mrb[0].mxu1 %v6495_v41  ;;  %v1771_v20 = vrot.slane %v8901_v2, 5  ;;  %v1751_v24 = vsel %vm8552_vm5, %v6467_v1, %v1750_v52  ;;  %v1754_v25 = vsel %vm8552_vm5, %v1752_v8, %v1753_v9  ;;  %v1758_v27 = vsel %vm8552_vm5, %v6468_v10, %v1757_v61  ;;  %v8941_v32 = vld [vmem:[%s8341_s30 + $0xa4] sm:$0xf]  ;;  %v8963_v49 = vld [vmem:[%s8341_s30 + $0xb0] sm:$0xe]  ;;  %v8209_v52 = vld [vmem:[%s9908_s1 + $0xe8] sm:$0xff]  }
  0xc3   : > { %7638 = vmatpush3.bf16.msra.mxu0 %v8716_v11  ;;  %7417 = vmatprep.mubr.bf16.mxu1 %v6496_v43  ;;  %v8191_v11 = vld [vmem:[%s9908_s1 + $0x1d0] sm:$0xff]   ;;  %v1761_v28 = vsel %vm8552_vm5, %v1759_v17, %v1760_v12  ;;  %v1766_v30 = vrot.slane %v1764_v15, 4  ;;  %v1767_v31 = vrot.slane %v1605_v13, 5  ;;  %v6470_v33 = vrot.slane %v1606_v18, 9  ;;  %v8203_v43 = vld [vmem:[%s9908_s1 + $0x1e8] sm:$0xff]   ;;  %v8213_v12 = vld [vmem:[%s9908_s1 + $0x1f8] sm:$0xff]  }
  0xc4   : > { %7609 = vmatprep.mubr.bf16.mxu0 %v8186_v44  ;;  %7639 = vmatprep.subr.bf16.mxu0 %v8188_v46  ;;  %v1773_v34 = vrot.slane %v1771_v20, 4  ;;  %v1774_v35 = vrot.slane %v1608_v19, 5  ;;  %v6499_v38 = vcombine.low %v1751_v24, %v1754_v25  ;;  %v6471_v39 = vrot.slane %v8919_v21, 9  ;;  %v8966_v50 = vld [vmem:[%s8341_s30 + $0xb8] sm:$0x1]  ;;  %v8208_v54 = vld [vmem:[%s9908_s1 + $0x1f0] sm:$0xff]  }
  0xc5   : > { %7446 = vmatpush3.bf16.msra.mxu1 %v8804_v3  ;;  %v8194_v3 = vld [vmem:[%s9908_s1 + $0x1d8] sm:$0xff]   ;;  %v1778_v41 = vrot.slane %v8922_v22, 5  ;;  %v6500_v44 = vcombine.low %v1758_v27, %v1761_v28  ;;  %v1781_v45 = vrot.slane %v8938_v40, 5  ;;  %v1785_v48 = vrot.slane %v8941_v32, 5  ;;  %v8193_v56 = vld [vmem:[%s8341_s30 + $0x90] sm:$0xff]  }
  0xc6   : > { %7447 = vmatprep.subr.bf16.mxu1 %v8199_v53  ;;  %v1792_v51 = vrot.slane %v8949_v42, 5  ;;  %v1768_v55 = vsel %vm8552_vm5, %v1766_v30, %v1767_v31  ;;  %v1772_v57 = vsel %vm8552_vm5, %v6470_v33, %v1771_v20  ;;  %v1618_v59 = vld [vmem:[%s8341_s30 + $0xc0] sm:$0xe]  ;;  %v1619_v60 = vld [vmem:[%s8341_s30 + $0xc4] sm:$0xf]  ;;  %v6473_v1 = vrot.slane %v8963_v49, 9 }
  0xc7   : > { %7640 = vmatpush3.bf16.msra.mxu0 %v8188_v46  ;;  %v8956_v46 = vld [vmem:[%s8341_s30 + $0xa0] sm:$0xe]  ;;  %v1780_v61 = vrot.slane %v1778_v41, 4  ;;  %v1787_v63 = vrot.slane %v1785_v48, 4  ;;  %v1620_v8 = vld [vmem:[%s8341_s30 + $0xc8] sm:$0x1]  ;;  %v1779_v20 = vsel %vm8552_vm5, %v6471_v39, %v1778_v41 }
  0xc8   : > { %7641 = vmatprep.subr.bf16.mxu0 %v8191_v11  ;;  %v6472_v62 = vrot.slane %v8956_v46, 9  ;;  %v1794_v2 = vrot.slane %v1792_v51, 4  ;;  %v6474_v9 = vrot.slane %v1618_v59, 9  ;;  %v1622_v10 = vld [vmem:[%s8341_s30 + $0xd4] sm:$0xf]  ;;  %v8214_v17 = vld [vmem:[%s9908_s1 + $0xf8] sm:$0xff]  }
  0xc9   : > { %7448 = vmatpush3.bf16.msra.mxu1 %v8199_v53  ;;  %v1765_v53 = vsel %vm8552_vm5, %v6469_v14, %v1764_v15  ;;  %v1621_v14 = vld [vmem:[%s8341_s30 + $0xd0] sm:$0xe]  ;;  %v1623_v15 = vld [vmem:[%s8341_s30 + $0xd8] sm:$0x1]  ;;  %v1624_v18 = vld [vmem:[%s8341_s30 + $0xe0] sm:$0xe] }
  0xca   : > { %7610 = vmatmul.mubr.bf16.gmra.mrb[4].mxu0 %v8187_v58  ;;  %7449 = vmatprep.subr.bf16.mxu1 %v8201_v5  ;;  %v1775_v58 = vsel %vm8552_vm5, %v1773_v34, %v1774_v35  ;;  %v1625_v19 = vld [vmem:[%s8341_s30 + $0xe4] sm:$0xf]  ;;  %v1802_v25 = vrot.slane %v1620_v8, 5  ;;  %v1786_v27 = vsel %vm8552_vm5, %v6472_v62, %v1785_v48  ;;  %v6475_v22 = vrot.slane %v1621_v14, 9  ;;  %v8197_v21 = vld [vmem:[%s8341_s30 + $0xb0] sm:$0xff]  }
  0xcb   : > { %7418 = vmatmul.mubr.bf16.gmra.mrb[4].mxu1 %v6497_v6  ;;  %7613 = vmatprep.mubr.bf16.mxu0 %v8189_v0  ;;  %v1788_v0 = vrot.slane %v8959_v47, 5  ;;  %v8211_v6 = vld [vmem:[%s9908_s1 + $0xf0] sm:$0xff]   ;;  %v6502_v13 = vcombine.low %v1772_v57, %v1775_v58  ;;  %v8200_v30 = vld [vmem:[%s8341_s30 + $0xc0] sm:$0xff]   ;;  %v1809_v40 = vrot.slane %v1623_v15, 5  ;;  %v6476_v32 = vrot.slane %v1624_v18, 9 }
  0xcc   : > { %7421 = vmatprep.mubr.bf16.mxu1 %v6498_v7  ;;  %7642 = vmatpush3.bf16.msra.mxu0 %v8191_v11  ;;  %v8195_v11 = vld [vmem:[%s8341_s30 + $0xa0] sm:$0xff]   ;;  %v6501_v7 = vcombine.low %v1765_v53, %v1768_v55  ;;  %v1793_v35 = vsel %vm8552_vm5, %v6473_v1, %v1792_v51  ;;  %v8202_v53 = vld [vmem:[%s8341_s30 + $0xd0] sm:$0xff]  }
  0xcd   : > { %7643 = vmatprep.subr.bf16.mxu0 %v8194_v3  ;;  %7450 = vmatpush3.bf16.msra.mxu1 %v8201_v5  ;;  %v1795_v5 = vrot.slane %v8966_v50, 5  ;;  %v1789_v28 = vsel %vm8552_vm5, %v1787_v63, %v1788_v0  ;;  %v6854_v50 = vld [vmem:[%s8341_s30 + $0x20] sm:$0xf]  ;;  %v6855_v51 = vld [vmem:[%s8341_s30 + $0x24] sm:$0xf] }
  0xce   : > { %7451 = vmatprep.subr.bf16.mxu1 %v8204_v16  ;;  %v6504_v39 = vcombine.low %v1786_v27, %v1789_v28  ;;  %v4574_v55 = vshrl.u32 %v6854_v50, 16  ;;  %v4583_v57 = vshll.u32 %v6855_v51, 16  ;;  %v8205_v58 = vld [vmem:[%s8341_s30 + $0xe0] sm:$0xff]   ;;  %v4587_v62 = vshrl.u32 %v6855_v51, 16  ;;  %v6857_v63 = vld [vmem:[%s8341_s30 + $0x30] sm:$0xf] }
  0xcf   : > { %v6864_v51 = vld [vmem:[%s8341_s30 + $0x54] sm:$0xf] }
  0xd0   : > { %7644 = vmatpush3.bf16.msra.mxu0 %v8194_v3  ;;  %v1799_v3 = vrot.slane %v1619_v60, 5  ;;  %v4576_v0 = vrot.slane %v4574_v55, 4 }
  0xd1   : > { %7645 = vmatprep.subr.bf16.mxu0 %v8198_v23  ;;  %7452 = vmatpush3.bf16.msra.mxu1 %v8204_v16  ;;  %v1806_v16 = vrot.slane %v1622_v10, 5 }
  0xd2   : > { %7614 = vmatmul.mubr.bf16.gmra.mrb[8].mxu0 %v8190_v26  ;;  %7453 = vmatprep.subr.bf16.mxu1 %v8206_v36  ;;  %v1801_v24 = vrot.slane %v1799_v3, 4  ;;  %v1626_v26 = vld [vmem:[%s8341_s30 + $0xe8] sm:$0x1]  ;;  %v1800_v41 = vsel %vm8552_vm5, %v6474_v9, %v1799_v3  ;;  %v6859_v9 = vld [vmem:[%s8341_s30 + $0x38] sm:$0x1]  ;;  %v4601_v3 = vshll.u32 %v6857_v63, 16 }
  0xd3   : > { %7422 = vmatmul.mubr.bf16.gmra.mrb[8].mxu1 %v6499_v38  ;;  %7617 = vmatprep.mubr.bf16.mxu0 %v8192_v29  ;;  %v1813_v29 = vrot.slane %v1625_v19, 5  ;;  %v1808_v31 = vrot.slane %v1806_v16, 4  ;;  %v1816_v33 = vrot.slane %v1626_v26, 5  ;;  %v9032_v38 = vld [vmem:[%s8341_s30 + $0xf0] sm:$0xe]  ;;  %v9048_v48 = vsel %vm8552_vm5, %v6475_v22, %v1806_v16 }
  0xd4   : > { %7425 = vmatprep.mubr.bf16.mxu1 %v6500_v44  ;;  %7646 = vmatpush3.bf16.msra.mxu0 %v8198_v23  ;;  %v1782_v23 = vsel %vm8552_vm5, %v1780_v61, %v1781_v45  ;;  %v9039_v44 = vld [vmem:[%s8341_s30 + $0xf4] sm:$0xf]  ;;  %v9044_v45 = vld [vmem:[%s9908_s1 + $0x200] sm:$0xff]   ;;  %v4617_v15 = vshll.u32 %v6859_v9, 16 }
  0xd5   : > { %7647 = vmatprep.subr.bf16.mxu0 %v8203_v43  ;;  %7454 = vmatpush3.bf16.msra.mxu1 %v8206_v36  ;;  %v6503_v34 = vcombine.low %v1779_v20, %v1782_v23  ;;  %v1796_v36 = vsel %vm8552_vm5, %v1794_v2, %v1795_v5  ;;  %v1815_v42 = vrot.slane %v1813_v29, 4  ;;  %v9052_v49 = vsel %vm8552_vm5, %v1808_v31, %v1809_v40  ;;  %v6858_v5 = vld [vmem:[%s8341_s30 + $0x34] sm:$0xf]  ;;  %v6860_v22 = vld [vmem:[%s8341_s30 + $0x40] sm:$0xf] }
  0xd6   : > { %7455 = vmatprep.subr.bf16.mxu1 %v8209_v52  ;;  %v6505_v46 = vcombine.low %v1793_v35, %v1796_v36  ;;  %v9063_v59 = vsel %vm8552_vm5, %v6476_v32, %v1813_v29  ;;  %v1820_v61 = vrot.slane %v9039_v44, 5  ;;  %v9072_v2 = vrot.slane %v4583_v57, 5  ;;  %v6861_v29 = vld [vmem:[%s8341_s30 + $0x44] sm:$0xf] }
  0xd7   : > { %v9067_v60 = vsel %vm8552_vm5, %v1815_v42, %v1816_v33  ;;  %v4607_v10 = vshll.u32 %v6858_v5, 16  ;;  %v4611_v14 = vshrl.u32 %v6858_v5, 16  ;;  %v4622_v40 = vshrl.u32 %v6860_v22, 16  ;;  %v8210_v33 = vld [vmem:[%s8341_s30 + $0x100] sm:$0xff]  }
  0xd8   : > { %7648 = vmatpush3.bf16.msra.mxu0 %v8203_v43  ;;  %v1803_v43 = vsel %vm8552_vm5, %v1801_v24, %v1802_v25  ;;  %v1822_v19 = vrot.slane %v1820_v61, 4  ;;  %v6507_v25 = vcombine.low %v9048_v48, %v9052_v49  ;;  %v6508_v26 = vcombine.low %v9063_v59, %v9067_v60 }
  0xd9   : > { %7649 = vmatprep.subr.bf16.mxu0 %v8208_v54  ;;  %7456 = vmatpush3.bf16.msra.mxu1 %v8209_v52  ;;  %v6506_v47 = vcombine.low %v1800_v41, %v1803_v43  ;;  %v6856_v52 = vld [vmem:[%s8341_s30 + $0x28] sm:$0x1]  ;;  %v9077_v18 = vrot.slane %v4607_v10, 5  ;;  %v4613_v24 = vrot.slane %v4611_v14, 4  ;;  %v4625_v32 = vshll.u32 %v6860_v22, 16 }
  0xda   : > { %7618 = vmatmul.mubr.bf16.gmra.mrb[12].mxu0 %v8193_v56  ;;  %7457 = vmatprep.subr.bf16.mxu1 %v8211_v6  ;;  %v4577_v56 = vshll.u32 %v6854_v50, 16  ;;  %v4593_v8 = vshll.u32 %v6856_v52, 16  ;;  %v9092_v35 = vrot.slane %v4617_v15, 5  ;;  %v4631_v36 = vshll.u32 %v6861_v29, 16  ;;  %v6862_v43 = vld [vmem:[%s8341_s30 + $0x48] sm:$0x1] }
  0xdb   : > { %7426 = vmatmul.mubr.bf16.gmra.mrb[12].mxu1 %v6501_v7  ;;  %7621 = vmatprep.mubr.bf16.mxu0 %v8195_v11  ;;  %v1629_v11 = vld [vmem:[%s8341_s30 + $0xf8] sm:$0x1]  ;;  %v4589_v7 = vrot.slane %v4587_v62, 4  ;;  %v4614_v31 = vor.u32 %v4613_v24, %v9077_v18  ;;  %v4624_v44 = vrot.slane %v4622_v40, 4  ;;  %v4627_v42 = vrot.slane %v4625_v32, 5 }
  0xdc   : > { %7429 = vmatprep.mubr.bf16.mxu1 %v6502_v13  ;;  %7650 = vmatpush3.bf16.msra.mxu0 %v8208_v54  ;;  %v6477_v54 = vrot.slane %v9032_v38, 9  ;;  %v4579_v1 = vrot.slane %v4577_v56, 5  ;;  %v1823_v20 = vrot.slane %v1629_v11, 5  ;;  %v4595_v27 = vrot.slane %v4593_v8, 5  ;;  %v6867_v10 = vld [vmem:[%s8341_s30 + $0x64] sm:$0xf] }
  0xdd   : > { %7651 = vmatprep.subr.bf16.mxu0 %v8213_v12  ;;  %7458 = vmatpush3.bf16.msra.mxu1 %v8211_v6  ;;  %v4598_v6 = vshrl.u32 %v6857_v63, 16  ;;  %v4590_v16 = vor.u32 %v4589_v7, %v9072_v2  ;;  %v4635_v38 = vshrl.u32 %v6861_v29, 16  ;;  %v9105_v48 = vrot.slane %v4614_v31, 4  ;;  %v8212_v7 = vld [vmem:[%s8341_s30 + $0x110] sm:$0xff]  }
  0xde   : > { %7459 = vmatprep.subr.bf16.mxu1 %v8214_v17  ;;  %v9107_v49 = vrot.slane %v4631_v36, 5  ;;  %v4641_v59 = vshll.u32 %v6862_v43, 16  ;;  %v4655_v60 = vshll.u32 %v6864_v51, 16  ;;  %v4659_v63 = vshrl.u32 %v6864_v51, 16  ;;  %v6869_v24 = vld [vmem:[%s8341_s30 + $0x70] sm:$0xf] }
  0xdf   : > { %v4600_v13 = vrot.slane %v4598_v6, 4  ;;  %v4637_v50 = vrot.slane %v4635_v38, 4  ;;  %v6866_v6 = vld [vmem:[%s8341_s30 + $0x60] sm:$0xf]  ;;  %v4620_v8 = vsel %vm8364_vm2, %v9105_v48, %v9092_v35  ;;  %v6870_v22 = vld [vmem:[%s8341_s30 + $0x74] sm:$0xf] }
  0xe0   : > { %7652 = vmatpush3.bf16.msra.mxu0 %v8213_v12  ;;  %v4580_v12 = vor.u32 %v4579_v1, %v4576_v0  ;;  %v4643_v15 = vrot.slane %v4641_v59, 5  ;;  %v8215_v29 = vld [vmem:[%s8341_s30 + $0x10] sm:$0xff]   ;;  %v4694_v31 = vshrl.u32 %v6869_v24, 16  ;;  %v4697_v40 = vshll.u32 %v6869_v24, 16  ;;  %v6871_v35 = vld [vmem:[%s8341_s30 + $0x78] sm:$0x1] }
  0xe1   : > { %7460 = vmatpush3.bf16.msra.mxu1 %v8214_v17  ;;  %7685 = vmatprep.subr.bf16.mxu0 %v9044_v45  ;;  %v4603_v17 = vrot.slane %v4601_v3, 5  ;;  %v4661_v3 = vrot.slane %v4659_v63, 4  ;;  %v4703_v36 = vshll.u32 %v6870_v22, 16  ;;  %v4707_v43 = vshrl.u32 %v6870_v22, 16  ;;  %v6872_v51 = vld [vmem:[%s8341_s30 + $0x80] sm:$0xf] }
  0xe2   : > { %7622 = vmatmul.mubr.bf16.gmra.mrb[16].mxu0 %v8197_v21  ;;  %v4581_v23 = vrot.slane %v4580_v12, 4  ;;  %v8207_v21 = vld [vmem:[%s8341_s30 + $0xf0] sm:$0xff]   ;;  %v6868_v12 = vld [vmem:[%s8341_s30 + $0x68] sm:$0x1] }
  0xe3   : > { %7430 = vmatmul.mubr.bf16.gmra.mrb[16].mxu1 %v6503_v34  ;;  %7625 = vmatprep.mubr.bf16.mxu0 %v8200_v30  ;;  %v4604_v28 = vor.u32 %v4603_v17, %v4600_v13  ;;  %v4591_v30 = vrot.slane %v4590_v16, 4  ;;  %v9090_v34 = vsel %vm8552_vm5, %v6477_v54, %v1820_v61  ;;  %v6865_v54 = vld [vmem:[%s8341_s30 + $0x58] sm:$0x1]  ;;  %v4670_v13 = vshrl.u32 %v6866_v6, 16 }
  0xe4   : > { %7433 = vmatprep.mubr.bf16.mxu1 %v6504_v39  ;;  %v9096_v39 = vsel %vm8552_vm5, %v1822_v19, %v1823_v20  ;;  %v4586_v41 = vsel %vm8364_vm2, %v4581_v23, %v9072_v2  ;;  %v9120_v2 = vrot.slane %v4655_v60, 5  ;;  %v4665_v5 = vshll.u32 %v6865_v54, 16 }
  0xe5   : > { %v4596_v52 = vsel %vm8364_vm2, %v4591_v30, %v4595_v27  ;;  %v6509_v57 = vcombine.low %v9090_v34, %v9096_v39  ;;  %v4673_v16 = vshll.u32 %v6866_v6, 16  ;;  %v4679_v17 = vshll.u32 %v6867_v10, 16 }
  0xe6   : > { %v6918_v0 = vcombine.low %v4586_v41, %v4596_v52  ;;  %v4662_v19 = vor.u32 %v4661_v3, %v9120_v2  ;;  %v9134_v20 = vrot.slane %v4665_v5, 5  ;;  %v4672_v23 = vrot.slane %v4670_v13, 4  ;;  %v6873_v52 = vld [vmem:[%s8341_s30 + $0x84] sm:$0xf]  ;;  %v6876_v3 = vld [vmem:[%s8341_s30 + $0x94] sm:$0xf] }
  0xe7   : > { %v4683_v27 = vshrl.u32 %v6867_v10, 16  ;;  %v4696_v39 = vrot.slane %v4694_v31, 4  ;;  %v4699_v41 = vrot.slane %v4697_v40, 5  ;;  %v4731_v5 = vshrl.u32 %v6873_v52, 16  ;;  %v8220_v10 = vld [vmem:[%s9908_s1 + $0x208] sm:$0xff]  }
  0xe8   : > { %v4663_v30 = vrot.slane %v4662_v19, 4 }
  0xe9   : > { %v4685_v34 = vrot.slane %v4683_v27, 4  ;;  %v4700_v48 = vor.u32 %v4699_v41, %v4696_v39  ;;  %v4733_v13 = vrot.slane %v4731_v5, 4 }
  0xea   : > { %7626 = vmatmul.mubr.bf16.gmra.mrb[20].mxu0 %v8202_v53  ;;  %v4628_v53 = vor.u32 %v4627_v42, %v4624_v44  ;;  %v4668_v60 = vsel %vm8364_vm2, %v4663_v30, %v9134_v20  ;;  %v4751_v20 = vshll.u32 %v6876_v3, 16  ;;  %v8219_v30 = vld [vmem:[%s8341_s30 + $0x40] sm:$0xff]  }
  0xeb   : > { %7434 = vmatmul.mubr.bf16.gmra.mrb[20].mxu1 %v6505_v46  ;;  %7629 = vmatprep.mubr.bf16.mxu0 %v8205_v58  ;;  %v6863_v46 = vld [vmem:[%s8341_s30 + $0x50] sm:$0xf]  ;;  %v4638_v58 = vor.u32 %v4637_v50, %v9107_v49  ;;  %v4713_v50 = vshll.u32 %v6871_v35, 16  ;;  %v9161_v63 = vrot.slane %v4700_v48, 4 }
  0xec   : > { %7437 = vmatprep.mubr.bf16.mxu1 %v6506_v47  ;;  %v9103_v47 = vrot.slane %v4604_v28, 4  ;;  %v4646_v55 = vshrl.u32 %v6863_v46, 16  ;;  %v4649_v56 = vshll.u32 %v6863_v46, 16  ;;  %v4629_v11 = vrot.slane %v4628_v53, 4  ;;  %v8216_v53 = vld [vmem:[%s8341_s30 + $0x20] sm:$0xff]  }
  0xed   : > { %v4639_v14 = vrot.slane %v4638_v58, 4  ;;  %v4689_v28 = vshll.u32 %v6868_v12, 16  ;;  %v9147_v46 = vrot.slane %v4703_v36, 5  ;;  %v8218_v58 = vld [vmem:[%s8341_s30 + $0x30] sm:$0xff]  }
  0xee   : > { %v4648_v61 = vrot.slane %v4646_v55, 4  ;;  %v4651_v62 = vrot.slane %v4649_v56, 5  ;;  %v4610_v1 = vsel %vm8364_vm2, %v9103_v47, %v9077_v18  ;;  %v4634_v18 = vsel %vm8364_vm2, %v4629_v11, %v9107_v49 }
  0xef   : > { %v4644_v32 = vsel %vm8364_vm2, %v4639_v14, %v4643_v15  ;;  %v9144_v38 = vrot.slane %v4689_v28, 5  ;;  %v6919_v47 = vcombine.low %v4610_v1, %v4620_v8  ;;  %v4709_v49 = vrot.slane %v4707_v43, 4  ;;  %v6877_v15 = vld [vmem:[%s8341_s30 + $0x98] sm:$0x1]  ;;  %v8221_v43 = vld [vmem:[%s8341_s30 + $0x50] sm:$0xff]  }
  0xf0   : > { %v4652_v9 = vor.u32 %v4651_v62, %v4648_v61  ;;  %v6920_v54 = vcombine.low %v4634_v18, %v4644_v32  ;;  %v4718_v56 = vshrl.u32 %v6872_v51, 16  ;;  %v6874_v61 = vld [vmem:[%s8341_s30 + $0x88] sm:$0x1]  ;;  %v4727_v62 = vshll.u32 %v6873_v52, 16  ;;  %v8223_v18 = vld [vmem:[%s9908_s1 + $0x210] sm:$0xff]  }
  0xf1   : > { %v4710_v11 = vor.u32 %v4709_v49, %v9147_v46  ;;  %v4737_v14 = vshll.u32 %v6874_v61, 16  ;;  %v4706_v31 = vsel %vm8364_vm2, %v9161_v63, %v9147_v46  ;;  %v4761_v32 = vshll.u32 %v6877_v15, 16 }
  0xf2   : > { %7630 = vmatmul.mubr.bf16.gmra.mrb[24].mxu0 %v8207_v21  ;;  %v4653_v21 = vrot.slane %v4652_v9, 4  ;;  %v9171_v8 = vrot.slane %v4727_v62, 5  ;;  %v6875_v9 = vld [vmem:[%s8341_s30 + $0x90] sm:$0xf] }
  0xf3   : > { %7438 = vmatmul.mubr.bf16.gmra.mrb[24].mxu1 %v6507_v25  ;;  %7633 = vmatprep.mubr.bf16.mxu0 %v8210_v33  ;;  %v4675_v25 = vrot.slane %v4673_v16, 5  ;;  %v4742_v16 = vshrl.u32 %v6875_v9, 16  ;;  %v4745_v19 = vshll.u32 %v6875_v9, 16  ;;  %v9188_v27 = vrot.slane %v4737_v14, 5 }
  0xf4   : > { %7441 = vmatprep.mubr.bf16.mxu1 %v6508_v26  ;;  %v9137_v26 = vrot.slane %v4679_v17, 5  ;;  %v4658_v59 = vsel %vm8364_vm2, %v4653_v21, %v9120_v2  ;;  %v9179_v17 = vrot.slane %v4710_v11, 4  ;;  %v6883_v11 = vld [vmem:[%s8341_s30 + $0xb8] sm:$0x1] }
  0xf5   : > { %v4676_v33 = vor.u32 %v4675_v25, %v4672_v23  ;;  %v4755_v23 = vshrl.u32 %v6876_v3, 16  ;;  %v6921_v24 = vcombine.low %v4658_v59, %v4668_v60  ;;  %v4744_v28 = vrot.slane %v4742_v16, 4 }
  0xf6   : > { %v4686_v42 = vor.u32 %v4685_v34, %v9137_v26  ;;  %v4747_v22 = vrot.slane %v4745_v19, 5  ;;  %v6879_v34 = vld [vmem:[%s8341_s30 + $0xa4] sm:$0xf]  ;;  %v6886_v19 = vld [vmem:[%s8341_s30 + $0xc8] sm:$0x1] }
  0xf7   : > { %v4677_v44 = vrot.slane %v4676_v33, 4  ;;  %v4757_v21 = vrot.slane %v4755_v23, 4  ;;  %v6878_v33 = vld [vmem:[%s8341_s30 + $0xa0] sm:$0xf]  ;;  %v4775_v46 = vshll.u32 %v6879_v34, 16 }
  0xf8   : > { %v4687_v55 = vrot.slane %v4686_v42, 4  ;;  %v4748_v35 = vor.u32 %v4747_v22, %v4744_v28  ;;  %v4766_v39 = vshrl.u32 %v6878_v33, 16  ;;  %v4769_v41 = vshll.u32 %v6878_v33, 16 }
  0xf9   : > { %v4682_v6 = vsel %vm8364_vm2, %v4677_v44, %v9137_v26  ;;  %v4734_v26 = vor.u32 %v4733_v13, %v9171_v8  ;;  %v4763_v42 = vrot.slane %v4761_v32, 5  ;;  %v6884_v13 = vld [vmem:[%s8341_s30 + $0xc0] sm:$0xf]  ;;  %v4833_v33 = vshll.u32 %v6886_v19, 16 }
  0xfa   : > { %7634 = vmatmul.mubr.bf16.gmra.mrb[28].mxu0 %v8212_v7  ;;  %v4692_v2 = vsel %vm8364_vm2, %v4687_v55, %v9144_v38  ;;  %v9169_v7 = vrot.slane %v4713_v50, 5  ;;  %v6880_v38 = vld [vmem:[%s8341_s30 + $0xa8] sm:$0x1]  ;;  %v4749_v49 = vrot.slane %v4748_v35, 4  ;;  %v4768_v52 = vrot.slane %v4766_v39, 4 }
  0xfb   : > { %7442 = vmatmul.mubr.bf16.gmra.mrb[28].mxu1 %v6509_v57  ;;  %7653 = vmatprep.mubr.bf16.mxu0 %v6918_v0  ;;  %v4721_v57 = vshll.u32 %v6872_v51, 16  ;;  %v4720_v0 = vrot.slane %v4718_v56, 4  ;;  %v4735_v40 = vrot.slane %v4734_v26, 4  ;;  %v8226_v51 = vld [vmem:[%s9908_s1 + $0x218] sm:$0xff]   ;;  %v9214_v55 = vrot.slane %v4775_v46, 5 }
  0xfc   : > { %7461 = vmatprep.mubr.bf16.mxu1 %v8215_v29  ;;  %v9190_v29 = vrot.slane %v4751_v20, 5  ;;  %v4716_v44 = vsel %vm8364_vm2, %v9179_v17, %v9169_v7  ;;  %v8222_v20 = vld [vmem:[%s8341_s30 + $0x60] sm:$0xff]   ;;  %v4814_v26 = vshrl.u32 %v6884_v13, 16  ;;  %v6889_v39 = vld [vmem:[%s8341_s30 + $0xd8] sm:$0x1] }
  0xfd   : > { %v4723_v1 = vrot.slane %v4721_v57, 5  ;;  %v4785_v57 = vshll.u32 %v6880_v38, 16  ;;  %v4740_v59 = vsel %vm8364_vm2, %v4735_v40, %v9188_v27  ;;  %v6923_v14 = vcombine.low %v4706_v31, %v4716_v44  ;;  %v8224_v27 = vld [vmem:[%s8341_s30 + $0x70] sm:$0xff]  }
  0xfe   : > { %v4758_v36 = vor.u32 %v4757_v21, %v9190_v29  ;;  %v4754_v60 = vsel %vm8364_vm2, %v4749_v49, %v9190_v29  ;;  %v4817_v21 = vshll.u32 %v6884_v13, 16  ;;  %v4816_v31 = vrot.slane %v4814_v26, 4  ;;  %v8238_v13 = vld [vmem:[%s9908_s1 + $0x238] sm:$0xff]  }
  0xff   : > { %v4724_v12 = vor.u32 %v4723_v1, %v4720_v0  ;;  %v4787_v5 = vrot.slane %v4785_v57, 5  ;;  %v6891_v57 = vld [vmem:[%s8341_s30 + $0xe4] sm:$0xf] }
 0x100   : > { %v4759_v50 = vrot.slane %v4758_v36, 4  ;;  %v4819_v38 = vrot.slane %v4817_v21, 5 }
 0x101   : > { %v9185_v25 = vrot.slane %v4724_v12, 4  ;;  %v8229_v12 = vld [vmem:[%s9908_s1 + $0x220] sm:$0xff]  }
 0x102   : > { %7654 = vmatmul.mubr.bf16.vlgmr.msra.gmra.mrb[0].mxu0 %v6919_v47  ;;  %v4779_v47 = vshrl.u32 %v6879_v34, 16  ;;  %v4764_v63 = vsel %vm8364_vm2, %v4759_v50, %v4763_v42  ;;  %v6888_v34 = vld [vmem:[%s8341_s30 + $0xd4] sm:$0xf]  ;;  %v4835_v42 = vrot.slane %v4833_v33, 5  ;;  %v4820_v49 = vor.u32 %v4819_v38, %v4816_v31  ;;  %v6896_v33 = vld [vmem:[%s8341_s30 + $0x100] sm:$0xf] }
 0x103   : > { %7462 = vmatmul.mubr.bf16.vlgmr.msra.gmra.mrb[0].mxu1 %v8216_v53  ;;  %7686 = vmatpush3.bf16.msra.mxu0 %v9044_v45  ;;  %v6922_v45 = vcombine.low %v4682_v6, %v4692_v2  ;;  %v4730_v48 = vsel %vm8364_vm2, %v9185_v25, %v9171_v8  ;;  %v6881_v53 = vld [vmem:[%s8341_s30 + $0xb0] sm:$0xf] }
 0x104   : > { %7465 = vmatprep.mubr.bf16.mxu1 %v8218_v58  ;;  %7657 = vmatprep.mubr.bf16.mxu0 %v6920_v54  ;;  %v4771_v54 = vrot.slane %v4769_v41, 5  ;;  %v4781_v56 = vrot.slane %v4779_v47, 4  ;;  %v6882_v58 = vld [vmem:[%s8341_s30 + $0xb4] sm:$0xf]  ;;  %v4790_v61 = vshrl.u32 %v6881_v53, 16  ;;  %v4793_v62 = vshll.u32 %v6881_v53, 16 }
 0x105   : > { %7687 = vmatprep.subr.bf16.mxu0 %v8220_v10  ;;  %v4799_v7 = vshll.u32 %v6882_v58, 16  ;;  %v4803_v8 = vshrl.u32 %v6882_v58, 16  ;;  %v6924_v23 = vcombine.low %v4730_v48, %v4740_v59  ;;  %v8235_v47 = vld [vmem:[%s9908_s1 + $0x230] sm:$0xff]   ;;  %v8225_v58 = vld [vmem:[%s8341_s30 + $0x80] sm:$0xff]  }
 0x106   : > { %v4772_v0 = vor.u32 %v4771_v54, %v4768_v52  ;;  %v4782_v1 = vor.u32 %v4781_v56, %v9214_v55  ;;  %v4792_v6 = vrot.slane %v4790_v61, 4  ;;  %v4795_v2 = vrot.slane %v4793_v62, 5  ;;  %v6890_v56 = vld [vmem:[%s8341_s30 + $0xe0] sm:$0xf]  ;;  %v8227_v59 = vld [vmem:[%s8341_s30 + $0x90] sm:$0xff]  }
 0x107   : > { %7688 = vmatpush3.bf16.msra.mxu0 %v8220_v10  ;;  %v4809_v10 = vshll.u32 %v6883_v11, 16  ;;  %v9231_v16 = vrot.slane %v4799_v7, 5  ;;  %v4805_v17 = vrot.slane %v4803_v8, 4  ;;  %v4821_v11 = vrot.slane %v4820_v49, 4 }
 0x108   : > { %7689 = vmatprep.subr.bf16.mxu0 %v8223_v18  ;;  %v4773_v9 = vrot.slane %v4772_v0, 4  ;;  %v4783_v3 = vrot.slane %v4782_v1, 4  ;;  %v4796_v15 = vor.u32 %v4795_v2, %v4792_v6  ;;  %v4862_v62 = vshrl.u32 %v6890_v56, 16  ;;  %v6892_v6 = vld [vmem:[%s8341_s30 + $0xe8] sm:$0x1] }
 0x109   : > { %v4806_v29 = vor.u32 %v4805_v17, %v9231_v16  ;;  %v4811_v36 = vrot.slane %v4809_v10, 5  ;;  %v4857_v1 = vshll.u32 %v6889_v39, 16  ;;  %v4871_v7 = vshll.u32 %v6891_v57, 16  ;;  %v6893_v10 = vld [vmem:[%s8341_s30 + $0xf0] sm:$0xf] }
 0x10a   : > { %7658 = vmatmul.mubr.bf16.gmra.mrb[4].mxu0 %v6921_v24  ;;  %v9236_v24 = vcombine.low %v4754_v60, %v4764_v63  ;;  %v4778_v25 = vsel %vm8364_vm2, %v4773_v9, %v9214_v55  ;;  %v4788_v28 = vsel %vm8364_vm2, %v4783_v3, %v4787_v5  ;;  %v4797_v22 = vrot.slane %v4796_v15, 4 }
 0x10b   : > { %7466 = vmatmul.mubr.bf16.gmra.mrb[4].mxu1 %v8219_v30  ;;  %7661 = vmatprep.mubr.bf16.mxu0 %v6922_v45  ;;  %v6887_v30 = vld [vmem:[%s8341_s30 + $0xd0] sm:$0xf]  ;;  %v8232_v45 = vld [vmem:[%s9908_s1 + $0x228] sm:$0xff]   ;;  %v4807_v35 = vrot.slane %v4806_v29, 4  ;;  %v6926_v48 = vcombine.low %v4778_v25, %v4788_v28  ;;  %v4851_v55 = vshrl.u32 %v6888_v34, 16  ;;  %v4865_v5 = vshll.u32 %v6890_v56, 16 }
 0x10c   : > { %7469 = vmatprep.mubr.bf16.mxu1 %v8221_v43  ;;  %7690 = vmatpush3.bf16.msra.mxu0 %v8223_v18  ;;  %v6885_v18 = vld [vmem:[%s8341_s30 + $0xc4] sm:$0xf]  ;;  %v4838_v41 = vshrl.u32 %v6887_v30, 16  ;;  %v4841_v46 = vshll.u32 %v6887_v30, 16  ;;  %v4802_v52 = vsel %vm8364_vm2, %v4797_v22, %v9231_v16  ;;  %v4864_v2 = vrot.slane %v4862_v62, 4 }
 0x10d   : > { %7691 = vmatprep.subr.bf16.mxu0 %v8226_v51  ;;  %v4823_v40 = vshll.u32 %v6885_v18, 16  ;;  %v4827_v32 = vshrl.u32 %v6885_v18, 16  ;;  %v4812_v60 = vsel %vm8364_vm2, %v4807_v35, %v4811_v36  ;;  %v4853_v0 = vrot.slane %v4851_v55, 4  ;;  %v8228_v35 = vld [vmem:[%s8341_s30 + $0xa0] sm:$0xff]   ;;  %v8230_v36 = vld [vmem:[%s8341_s30 + $0xb0] sm:$0xff]  }
 0x10e   : > { %v4840_v50 = vrot.slane %v4838_v41, 4  ;;  %v4843_v54 = vrot.slane %v4841_v46, 5  ;;  %v4867_v3 = vrot.slane %v4865_v5, 5  ;;  %v9279_v16 = vrot.slane %v4871_v7, 5 }
 0x10f   : > { %v9251_v43 = vrot.slane %v4823_v40, 5  ;;  %v4829_v44 = vrot.slane %v4827_v32, 4  ;;  %v4875_v17 = vshrl.u32 %v6891_v57, 16  ;;  %v4886_v25 = vshrl.u32 %v6893_v10, 16  ;;  %v6899_v57 = vld [vmem:[%s8341_s30 + $0x110] sm:$0xf] }
 0x110   : > { %7692 = vmatpush3.bf16.msra.mxu0 %v8226_v51  ;;  %v4847_v51 = vshll.u32 %v6888_v34, 16  ;;  %v4844_v8 = vor.u32 %v4843_v54, %v4840_v50  ;;  %v4868_v19 = vor.u32 %v4867_v3, %v4864_v2  ;;  %v6897_v34 = vld [vmem:[%s8341_s30 + $0x104] sm:$0xf]  ;;  %v4913_v46 = vshll.u32 %v6896_v33, 16  ;;  %v6898_v50 = vld [vmem:[%s8341_s30 + $0x108] sm:$0x1] }
 0x111   : > { %7693 = vmatprep.subr.bf16.mxu0 %v8229_v12  ;;  %v4830_v53 = vor.u32 %v4829_v44, %v9251_v43  ;;  %v4826_v15 = vsel %vm8364_vm2, %v4821_v11, %v9251_v43  ;;  %v4877_v26 = vrot.slane %v4875_v17, 4  ;;  %v4888_v21 = vrot.slane %v4886_v25, 4  ;;  %v6900_v11 = vld [vmem:[%s8341_s30 + $0x114] sm:$0xf]  ;;  %v8231_v3 = vld [vmem:[%s8341_s30 + $0xc0] sm:$0xff]  }
 0x112   : > { %7662 = vmatmul.mubr.bf16.gmra.mrb[8].mxu0 %v6923_v14  ;;  %v9266_v61 = vrot.slane %v4847_v51, 5  ;;  %v6927_v14 = vcombine.low %v4802_v52, %v4812_v60  ;;  %v4845_v22 = vrot.slane %v4844_v8, 4  ;;  %v4869_v38 = vrot.slane %v4868_v19, 4  ;;  %v6901_v19 = vld [vmem:[%s8341_s30 + $0x118] sm:$0x1] }
 0x113   : > { %7470 = vmatmul.mubr.bf16.gmra.mrb[8].mxu1 %v8222_v20  ;;  %7665 = vmatprep.mubr.bf16.mxu0 %v6924_v23  ;;  %v4831_v63 = vrot.slane %v4830_v53, 4  ;;  %v4881_v20 = vshll.u32 %v6892_v6, 16  ;;  %v6895_v23 = vld [vmem:[%s8341_s30 + $0xf8] sm:$0x1]  ;;  %v4878_v31 = vor.u32 %v4877_v26, %v9279_v16  ;;  %v4910_v43 = vshrl.u32 %v6896_v33, 16 }
 0x114   : > { %7473 = vmatprep.mubr.bf16.mxu1 %v8224_v27  ;;  %7694 = vmatpush3.bf16.msra.mxu0 %v8229_v12  ;;  %v4854_v9 = vor.u32 %v4853_v0, %v9266_v61  ;;  %v6894_v12 = vld [vmem:[%s8341_s30 + $0xf4] sm:$0xf]  ;;  %v4889_v27 = vshll.u32 %v6893_v10, 16  ;;  %v4923_v52 = vshrl.u32 %v6897_v34, 16  ;;  %v4915_v55 = vrot.slane %v4913_v46, 5 }
 0x115   : > { %7695 = vmatprep.subr.bf16.mxu0 %v8232_v45  ;;  %v4836_v18 = vsel %vm8364_vm2, %v4831_v63, %v4835_v42  ;;  %v4895_v28 = vshll.u32 %v6894_v12, 16  ;;  %v4899_v30 = vshrl.u32 %v6894_v12, 16  ;;  %v4883_v39 = vrot.slane %v4881_v20, 5 }
 0x116   : > { %v4855_v29 = vrot.slane %v4854_v9, 4  ;;  %v4891_v40 = vrot.slane %v4889_v27, 5  ;;  %v4879_v44 = vrot.slane %v4878_v31, 4  ;;  %v4905_v42 = vshll.u32 %v6895_v23, 16  ;;  %v6943_v23 = vld [vmem:[%s8341_s30 + $0x24] sm:$0xf] }
 0x117   : > { %v9285_v32 = vrot.slane %v4895_v28, 5  ;;  %v4901_v41 = vrot.slane %v4899_v30, 4  ;;  %v4912_v51 = vrot.slane %v4910_v43, 4  ;;  %v4925_v60 = vrot.slane %v4923_v52, 4  ;;  %v6942_v30 = vld [vmem:[%s8341_s30 + $0x20] sm:$0xe] }
 0x118   : > { %7696 = vmatpush3.bf16.msra.mxu0 %v8232_v45  ;;  %v6928_v45 = vcombine.low %v4826_v15, %v4836_v18  ;;  %v4892_v53 = vor.u32 %v4891_v40, %v4888_v21  ;;  %v4929_v62 = vshll.u32 %v6898_v50, 16  ;;  %v4934_v63 = vshrl.u32 %v6899_v57, 16  ;;  %v8233_v15 = vld [vmem:[%s8341_s30 + $0xd0] sm:$0xff]   ;;  %v8234_v40 = vld [vmem:[%s8341_s30 + $0xe0] sm:$0xff]  }
 0x119   : > { %7697 = vmatprep.subr.bf16.mxu0 %v8235_v47  ;;  %v4902_v54 = vor.u32 %v4901_v41, %v9285_v32  ;;  %v4937_v0 = vshll.u32 %v6899_v57, 16  ;;  %v4943_v6 = vshll.u32 %v6900_v11, 16  ;;  %v4907_v9 = vrot.slane %v4905_v42, 5  ;;  %v6946_v43 = vld [vmem:[%s8341_s30 + $0x34] sm:$0xf] }
 0x11a   : > { %7666 = vmatmul.mubr.bf16.gmra.mrb[12].mxu0 %v9236_v24  ;;  %v4859_v24 = vrot.slane %v4857_v1, 5  ;;  %v4893_v7 = vrot.slane %v4892_v53, 4  ;;  %v4936_v10 = vrot.slane %v4934_v63, 4  ;;  %v4931_v18 = vrot.slane %v4929_v62, 5  ;;  %v6945_v50 = vld [vmem:[%s8341_s30 + $0x30] sm:$0xe] }
 0x11b   : > { %7474 = vmatmul.mubr.bf16.gmra.mrb[12].mxu1 %v8225_v58  ;;  %7669 = vmatprep.mubr.bf16.mxu0 %v6926_v48  ;;  %v4850_v48 = vsel %vm8364_vm2, %v4845_v22, %v9266_v61  ;;  %v4874_v58 = vsel %vm8364_vm2, %v4869_v38, %v9279_v16  ;;  %v4916_v61 = vor.u32 %v4915_v55, %v4912_v51  ;;  %v4903_v8 = vrot.slane %v4902_v54, 4  ;;  %v6947_v51 = vld [vmem:[%s8341_s30 + $0x38] sm:$0x1]  ;;  %v6948_v53 = vld [vmem:[%s8341_s30 + $0x40] sm:$0xe] }
 0x11c   : > { %7477 = vmatprep.mubr.bf16.mxu1 %v8227_v59  ;;  %7698 = vmatpush3.bf16.msra.mxu0 %v8235_v47  ;;  %v4919_v47 = vshll.u32 %v6897_v34, 16  ;;  %v4860_v49 = vsel %vm8364_vm2, %v4855_v29, %v4859_v24  ;;  %v4884_v59 = vsel %vm8364_vm2, %v4879_v44, %v4883_v39  ;;  %v4939_v12 = vrot.slane %v4937_v0, 5  ;;  %v6949_v44 = vld [vmem:[%s8341_s30 + $0x44] sm:$0xf]  ;;  %v6950_v54 = vld [vmem:[%s8341_s30 + $0x48] sm:$0x1] }
 0x11d   : > { %7699 = vmatprep.subr.bf16.mxu0 %v8238_v13  ;;  %v6929_v1 = vcombine.low %v4850_v48, %v4860_v49  ;;  %v6930_v2 = vcombine.low %v4874_v58, %v4884_v59  ;;  %v4917_v16 = vrot.slane %v4916_v61, 4  ;;  %v4898_v25 = vsel %vm8364_vm2, %v4893_v7, %v9285_v32  ;;  %v6952_v62 = vld [vmem:[%s8341_s30 + $0x54] sm:$0xf]  ;;  %v6955_v63 = vld [vmem:[%s8341_s30 + $0x64] sm:$0xf] }
 0x11e   : > { %v4921_v56 = vrot.slane %v4919_v47, 5  ;;  %v4908_v24 = vsel %vm8364_vm2, %v4903_v8, %v4907_v9  ;;  %v4940_v26 = vor.u32 %v4939_v12, %v4936_v10  ;;  %v4953_v28 = vshll.u32 %v6901_v19, 16  ;;  %v6951_v7 = vld [vmem:[%s8341_s30 + $0x50] sm:$0xe]  ;;  %v6953_v8 = vld [vmem:[%s8341_s30 + $0x58] sm:$0x1] }
 0x11f   : > { %v5441_v21 = vrot.slane %v6943_v23, 5  ;;  %v6931_v31 = vcombine.low %v4898_v25, %v4908_v24  ;;  %v6990_v38 = vrot.slane %v6942_v30, 9  ;;  %v5448_v47 = vrot.slane %v6946_v43, 5  ;;  %v6956_v10 = vld [vmem:[%s8341_s30 + $0x68] sm:$0x1] }
 0x120   : > { %7700 = vmatpush3.bf16.msra.mxu0 %v8238_v13  ;;  %v4926_v5 = vor.u32 %v4925_v60, %v4921_v56  ;;  %v4945_v13 = vrot.slane %v4943_v6, 5  ;;  %v4922_v22 = vsel %vm8364_vm2, %v4917_v16, %v4921_v56  ;;  %v4941_v33 = vrot.slane %v4940_v26, 4  ;;  %v8237_v56 = vld [vmem:[%s8341_s30 + $0x100] sm:$0xff]  }
 0x121   : > { %v5443_v39 = vrot.slane %v5441_v21, 4  ;;  %v5442_v48 = vsel %vm8552_vm5, %v6990_v38, %v5441_v21  ;;  %v5455_v52 = vrot.slane %v6949_v44, 5  ;;  %v6991_v37 = vrot.slane %v6945_v50, 9  ;;  %v6961_v23 = vld [vmem:[%s8341_s30 + $0x84] sm:$0xf] }
 0x122   : > { %7670 = vmatmul.mubr.bf16.gmra.mrb[16].mxu0 %v6927_v14  ;;  %v4947_v14 = vshrl.u32 %v6900_v11, 16  ;;  %v4927_v17 = vrot.slane %v4926_v5, 4  ;;  %v4946_v42 = vsel %vm8364_vm2, %v4941_v33, %v4945_v13  ;;  %v5450_v58 = vrot.slane %v5448_v47, 4  ;;  %v6960_v30 = vld [vmem:[%s8341_s30 + $0x80] sm:$0xe] }
 0x123   : > { %7478 = vmatmul.mubr.bf16.gmra.mrb[16].mxu1 %v8228_v35  ;;  %7673 = vmatprep.mubr.bf16.mxu0 %v6928_v45  ;;  %v6944_v45 = vld [vmem:[%s8341_s30 + $0x28] sm:$0x1]  ;;  %v4955_v35 = vrot.slane %v4953_v28, 5  ;;  %v5451_v59 = vrot.slane %v6947_v51, 5  ;;  %v6992_v60 = vrot.slane %v6948_v53, 9  ;;  %v5457_v11 = vrot.slane %v5455_v52, 4 }
 0x124   : > { %7481 = vmatprep.mubr.bf16.mxu1 %v8230_v36  ;;  %v4949_v20 = vrot.slane %v4947_v14, 4  ;;  %v4932_v29 = vsel %vm8364_vm2, %v4927_v17, %v4931_v18  ;;  %v8236_v36 = vld [vmem:[%s8341_s30 + $0xf0] sm:$0xff]   ;;  %v5444_v41 = vrot.slane %v6944_v45, 5  ;;  %v5458_v61 = vrot.slane %v6950_v54, 5  ;;  %v6962_v45 = vld [vmem:[%s8341_s30 + $0x88] sm:$0x1] }
 0x125   : > { %v6932_v32 = vcombine.low %v4922_v22, %v4932_v29  ;;  %v5449_v0 = vsel %vm8552_vm5, %v6991_v37, %v5448_v47  ;;  %v5462_v5 = vrot.slane %v6952_v62, 5  ;;  %v5456_v6 = vsel %vm8552_vm5, %v6992_v60, %v5455_v52  ;;  %v6957_v22 = vld [vmem:[%s8341_s30 + $0x70] sm:$0xe]  ;;  %v6959_v29 = vld [vmem:[%s8341_s30 + $0x78] sm:$0x1] }
 0x126   : > { %v4950_v27 = vor.u32 %v4949_v20, %v4945_v13  ;;  %v5445_v49 = vsel %vm8552_vm5, %v5443_v39, %v5444_v41  ;;  %v5469_v9 = vrot.slane %v6955_v63, 5  ;;  %v6993_v14 = vrot.slane %v6951_v7, 9  ;;  %v6958_v20 = vld [vmem:[%s8341_s30 + $0x74] sm:$0xf]  ;;  %v6967_v41 = vld [vmem:[%s8341_s30 + $0xa4] sm:$0xf] }
 0x127   : > { %v7022_v57 = vcombine.low %v5442_v48, %v5445_v49  ;;  %v5465_v16 = vrot.slane %v6953_v8, 5  ;;  %v5472_v19 = vrot.slane %v6956_v10, 5  ;;  %v5476_v26 = vrot.slane %v6958_v20, 5  ;;  %v6964_v39 = vld [vmem:[%s8341_s30 + $0x94] sm:$0xf] }
 0x128   : > { %v4951_v34 = vrot.slane %v4950_v27, 4  ;;  %v5471_v18 = vrot.slane %v5469_v9, 4  ;;  %v5463_v25 = vsel %vm8552_vm5, %v6993_v14, %v5462_v5  ;;  %v5483_v21 = vrot.slane %v6961_v23, 5  ;;  %v6963_v48 = vld [vmem:[%s8341_s30 + $0x90] sm:$0xe] }
 0x129   : > { %v5478_v33 = vrot.slane %v5476_v26, 4  ;;  %v5486_v38 = vrot.slane %v6962_v45, 5  ;;  %v6965_v49 = vld [vmem:[%s8341_s30 + $0x98] sm:$0x1]  ;;  %v5497_v50 = vrot.slane %v6967_v41, 5 }
 0x12a   : > { %7674 = vmatmul.mubr.bf16.gmra.mrb[20].mxu0 %v6929_v1  ;;  %v4956_v46 = vsel %vm8364_vm2, %v4951_v34, %v4955_v35  ;;  %v5452_v1 = vsel %vm8552_vm5, %v5450_v58, %v5451_v59  ;;  %v5473_v28 = vsel %vm8552_vm5, %v5471_v18, %v5472_v19  ;;  %v5479_v34 = vrot.slane %v6959_v29, 5  ;;  %v6966_v51 = vld [vmem:[%s8341_s30 + $0xa0] sm:$0xe]  ;;  %v6968_v52 = vld [vmem:[%s8341_s30 + $0xa8] sm:$0x1] }
 0x12b   : > { %7482 = vmatmul.mubr.bf16.gmra.mrb[20].mxu1 %v8231_v3  ;;  %7677 = vmatprep.mubr.bf16.mxu0 %v6930_v2  ;;  %v6933_v55 = vcombine.low %v4946_v42, %v4956_v46  ;;  %v5459_v2 = vsel %vm8552_vm5, %v5457_v11, %v5458_v61  ;;  %v6954_v3 = vld [vmem:[%s8341_s30 + $0x60] sm:$0xe]  ;;  %v7023_v12 = vcombine.low %v5449_v0, %v5452_v1  ;;  %v6996_v35 = vrot.slane %v6960_v30, 9  ;;  %v6970_v60 = vld [vmem:[%s8341_s30 + $0xb4] sm:$0xf] }
 0x12c   : > { %7485 = vmatprep.mubr.bf16.mxu1 %v8233_v15  ;;  %v7024_v13 = vcombine.low %v5456_v6, %v5459_v2  ;;  %v5464_v15 = vrot.slane %v5462_v5, 4  ;;  %v6994_v17 = vrot.slane %v6954_v3, 9  ;;  %v5480_v44 = vsel %vm8552_vm5, %v5478_v33, %v5479_v34  ;;  %v6973_v11 = vld [vmem:[%s8341_s30 + $0xc4] sm:$0xf]  ;;  %v6969_v5 = vld [vmem:[%s8341_s30 + $0xb0] sm:$0xe] }
 0x12d   : > { %v5490_v42 = vrot.slane %v6964_v39, 5  ;;  %v5484_v46 = vsel %vm8552_vm5, %v6996_v35, %v5483_v21  ;;  %v6998_v37 = vrot.slane %v6966_v51, 9  ;;  %v5499_v58 = vrot.slane %v5497_v50, 4  ;;  %v6971_v6 = vld [vmem:[%s8341_s30 + $0xb8] sm:$0x1] }
 0x12e   : > { %v5466_v24 = vsel %vm8552_vm5, %v5464_v15, %v5465_v16  ;;  %v5470_v27 = vsel %vm8552_vm5, %v6994_v17, %v5469_v9  ;;  %v5500_v59 = vrot.slane %v6968_v52, 5  ;;  %v5504_v63 = vrot.slane %v6970_v60, 5  ;;  %v6972_v7 = vld [vmem:[%s8341_s30 + $0xc0] sm:$0xe]  ;;  %v6974_v8 = vld [vmem:[%s8341_s30 + $0xc8] sm:$0x1] }
 0x12f   : > { %v5498_v0 = vsel %vm8552_vm5, %v6998_v37, %v5497_v50  ;;  %v5511_v2 = vrot.slane %v6973_v11, 5  ;;  %v6999_v10 = vrot.slane %v6969_v5, 9  ;;  %v7000_v14 = vrot.slane %v6972_v7, 9  ;;  %v6976_v17 = vld [vmem:[%s8341_s30 + $0xd4] sm:$0xf] }
 0x130   : > { %v5501_v1 = vsel %vm8552_vm5, %v5499_v58, %v5500_v59  ;;  %v5514_v16 = vrot.slane %v6974_v8, 5  ;;  %v6979_v18 = vld [vmem:[%s8341_s30 + $0xe4] sm:$0xf]  ;;  %v5518_v23 = vrot.slane %v6976_v17, 5  ;;  %v6980_v29 = vld [vmem:[%s8341_s30 + $0xe8] sm:$0x1] }
 0x131   : > { %v7030_v3 = vcombine.low %v5498_v0, %v5501_v1  ;;  %v5513_v15 = vrot.slane %v5511_v2, 4  ;;  %v5505_v19 = vsel %vm8552_vm5, %v6999_v10, %v5504_v63  ;;  %v5528_v34 = vrot.slane %v6980_v29, 5  ;;  %v6982_v35 = vld [vmem:[%s8341_s30 + $0xf4] sm:$0xf]  ;;  %v6047_v10 = vld [vmem:[%s9910_s3 + $0x8] sm:$0xff] }
 0x132   : > { %7678 = vmatmul.mubr.bf16.gmra.mrb[24].mxu0 %v6931_v31  ;;  %v7025_v31 = vcombine.low %v5463_v25, %v5466_v24  ;;  %v5512_v25 = vsel %vm8552_vm5, %v7000_v14, %v5511_v2  ;;  %v5532_v41 = vrot.slane %v6982_v35, 5  ;;  %v6988_v37 = vld [vmem:[%s8341_s30 + $0x114] sm:$0xf]  ;;  %v6049_v14 = vld [vmem:[%s9910_s3 + $0x18] sm:$0xff]  ;;  %v6051_v17 = vld [vmem:[%s9910_s3 + $0x28] sm:$0xff] }
 0x133   : > { %7486 = vmatmul.mubr.bf16.gmra.mrb[24].mxu1 %v8234_v40  ;;  %7681 = vmatprep.mubr.bf16.mxu0 %v6932_v32  ;;  %v7026_v40 = vcombine.low %v5470_v27, %v5473_v28  ;;  %v6995_v32 = vrot.slane %v6957_v22, 9  ;;  %v5515_v24 = vsel %vm8552_vm5, %v5513_v15, %v5514_v16  ;;  %v6977_v27 = vld [vmem:[%s8341_s30 + $0xd8] sm:$0x1]  ;;  %v5525_v28 = vrot.slane %v6979_v18, 5  ;;  %v6978_v22 = vld [vmem:[%s8341_s30 + $0xe0] sm:$0xe] }
 0x134   : > { %7489 = vmatprep.mubr.bf16.mxu1 %v8236_v36  ;;  %v5485_v36 = vrot.slane %v5483_v21, 4  ;;  %v7032_v30 = vcombine.low %v5512_v25, %v5515_v24  ;;  %v5546_v60 = vrot.slane %v6988_v37, 5  ;;  %v7807_v15 = vpack.c.bf16 %v6049_v14, %v6048_v4  ;;  %v6050_v16 = vld [vmem:[%s9910_s3 + $0x20] sm:$0xff]  ;;  %v6055_v24 = vld [vmem:[%s9910_s3 + $0x48] sm:$0xff] }
 0x135   : > { %v5477_v43 = vsel %vm8552_vm5, %v6995_v32, %v5476_v26  ;;  %v6975_v26 = vld [vmem:[%s8341_s30 + $0xd0] sm:$0xe]  ;;  %v7002_v32 = vrot.slane %v6978_v22, 9  ;;  %v5527_v33 = vrot.slane %v5525_v28, 4  ;;  %v7810_v18 = vpack.c.bf16 %v6051_v17, %v6050_v16  ;;  %v6054_v25 = vld [vmem:[%s9910_s3 + $0x40] sm:$0xff]  ;;  %v6059_v35 = vld [vmem:[%s9910_s3 + $0x68] sm:$0xff] }
 0x136   : > { %v5487_v47 = vsel %vm8552_vm5, %v5485_v36, %v5486_v38  ;;  %v7027_v53 = vcombine.low %v5477_v43, %v5480_v44  ;;  %v7001_v45 = vrot.slane %v6975_v26, 9  ;;  %v6985_v36 = vld [vmem:[%s8341_s30 + $0x104] sm:$0xf]  ;;  %v7816_v26 = vpack.c.bf16 %v6055_v24, %v6054_v25 }
 0x137   : > { %v7028_v54 = vcombine.low %v5484_v46, %v5487_v47  ;;  %v5526_v43 = vsel %vm8552_vm5, %v7002_v32, %v5525_v28  ;;  %v5529_v44 = vsel %vm8552_vm5, %v5527_v33, %v5528_v34  ;;  %v6983_v46 = vld [vmem:[%s8341_s30 + $0xf8] sm:$0x1]  ;;  %v5539_v47 = vrot.slane %v6985_v36, 5  ;;  %v6058_v34 = vld [vmem:[%s9910_s3 + $0x60] sm:$0xff] }
 0x138   : > { %v5519_v38 = vsel %vm8552_vm5, %v7001_v45, %v5518_v23  ;;  %v7034_v51 = vcombine.low %v5526_v43, %v5529_v44  ;;  %v6057_v45 = vld [vmem:[%s9910_s3 + $0x58] sm:$0xff]  ;;  %v7822_v36 = vpack.c.bf16 %v6059_v35, %v6058_v34 }
 0x13a   : > { %7682 = vmatmul.mubr.bf16.gmra.mrb[28].mxu0 %v6933_v55  ;;  %v6997_v55 = vrot.slane %v6963_v48, 9  ;;  %v6984_v48 = vld [vmem:[%s8341_s30 + $0x100] sm:$0xe] }
 0x13b   : > { %7490 = vmatmul.mubr.bf16.gmra.mrb[28].mxu1 %v8237_v56  ;;  %7701 = vmatprep.mubr.bf16.mxu0 %v7022_v57  ;;  %v5492_v56 = vrot.slane %v5490_v42, 4  ;;  %v5493_v57 = vrot.slane %v6965_v49, 5  ;;  %v6986_v49 = vld [vmem:[%s8341_s30 + $0x108] sm:$0x1] }
 0x13c   : > { %v5491_v61 = vsel %vm8552_vm5, %v6997_v55, %v5490_v42  ;;  %v6981_v42 = vld [vmem:[%s8341_s30 + $0xf0] sm:$0xe]  ;;  %v7004_v55 = vrot.slane %v6984_v48, 9 }
 0x13d   : > { %v5494_v62 = vsel %vm8552_vm5, %v5492_v56, %v5493_v57  ;;  %v7003_v52 = vrot.slane %v6981_v42, 9  ;;  %v5541_v56 = vrot.slane %v5539_v47, 4  ;;  %v5542_v57 = vrot.slane %v6986_v49, 5 }
 0x13e   : > { %v7029_v9 = vcombine.low %v5491_v61, %v5494_v62  ;;  %v5540_v11 = vsel %vm8552_vm5, %v7004_v55, %v5539_v47  ;;  %v6987_v62 = vld [vmem:[%s8341_s30 + $0x110] sm:$0xe] }
 0x13f   : > { %v5533_v58 = vsel %vm8552_vm5, %v7003_v52, %v5532_v41  ;;  %v5543_v61 = vsel %vm8552_vm5, %v5541_v56, %v5542_v57  ;;  %v7005_v5 = vrot.slane %v6987_v62, 9 }
 0x140   : > { %v7036_v1 = vcombine.low %v5540_v11, %v5543_v61 }
 0x141   : > { %v5547_v7 = vsel %vm8552_vm5, %v7005_v5, %v5546_v60 }
 0x142   : > { %7702 = vmatmul.mubr.bf16.vlgmr.msra.gmra.mrb[0].mxu0 %v7023_v12  ;;  %v5506_v12 = vrot.slane %v5504_v63, 4  ;;  %v6989_v63 = vld [vmem:[%s8341_s30 + $0x118] sm:$0x1] }
 0x143   : > { %7705 = vmatprep.mubr.bf16.mxu0 %v7024_v13  ;;  %v5507_v13 = vrot.slane %v6971_v6, 5  ;;  %v5548_v6 = vrot.slane %v5546_v60, 4  ;;  %v5549_v2 = vrot.slane %v6989_v63, 5 }
 0x145   : > { %v5508_v20 = vsel %vm8552_vm5, %v5506_v12, %v5507_v13  ;;  %v5550_v8 = vsel %vm8552_vm5, %v5548_v6, %v5549_v2  ;;  %v8251_v12 = vmov 0.0|0.0   ;;  %v9552_v2 = vld [vmem:[%s9909_s2] ss:$0 sm:$0xff] }
 0x146   : > { %v7031_v21 = vcombine.low %v5505_v19, %v5508_v20  ;;  %7803 = vmatprep.subr.bf16.mxu1 %v8251_v12  ;;  %v6052_v19 = vld [vmem:[%s9910_s3 + $0x30] sm:$0xff]  ;;  %v6053_v20 = vld [vmem:[%s9910_s3 + $0x38] sm:$0xff] }
 0x14a   : > { %7706 = vmatmul.mubr.bf16.gmra.mrb[4].mxu0 %v7025_v31  ;;  %v5520_v31 = vrot.slane %v5518_v23, 4  ;;  %v7813_v23 = vpack.c.bf16 %v6053_v20, %v6052_v19 }
 0x14b   : > { %7709 = vmatprep.mubr.bf16.mxu0 %v7026_v40  ;;  %v5521_v40 = vrot.slane %v6977_v27, 5 }
 0x14d   : > { %v5522_v39 = vsel %vm8552_vm5, %v5520_v31, %v5521_v40 }
 0x14e   : > { %v7033_v50 = vcombine.low %v5519_v38, %v5522_v39  ;;  %v6060_v38 = vld [vmem:[%s9910_s3 + $0x70] sm:$0xff]  ;;  %v6061_v39 = vld [vmem:[%s9910_s3 + $0x78] sm:$0xff] }
 0x14f   : > { %v7825_v43 = vpack.c.bf16 %v6061_v39, %v6060_v38 }
 0x152   : > { %7710 = vmatmul.mubr.bf16.gmra.mrb[8].mxu0 %v7027_v53  ;;  %v5534_v53 = vrot.slane %v5532_v41, 4  ;;  %v8253_v41 = vmov 0.0  }
 0x153   : > { %7713 = vmatprep.mubr.bf16.mxu0 %v7028_v54  ;;  %v5535_v54 = vrot.slane %v6983_v46, 5  ;;  %7765 = vmatprep.mubr.msk.f32.mxu1 %vm8252_vm6, %v8253_v41 }
 0x155   : > { %v5536_v59 = vsel %vm8552_vm5, %v5534_v53, %v5535_v54 }
 0x156   : > { %v7035_v0 = vcombine.low %v5533_v58, %v5536_v59 }
 0x15a   : > { %7714 = vmatmul.mubr.bf16.gmra.mrb[12].mxu0 %v7029_v9  ;;  %v7037_v9 = vcombine.low %v5547_v7, %v5550_v8 }
 0x15b   : > { %7717 = vmatprep.mubr.bf16.mxu0 %v7030_v3  ;;  %v6046_v3 = vld [vmem:[%s9910_s3] sm:$0xff] }
 0x15c   : > { %v7804_v13 = vpack.c.bf16 %v6047_v10, %v6046_v3 }
 0x15e   : > { %7805 = vmatpush3.bf16.msra.mxu1 %v7804_v13 }
 0x15f   : > { %7806 = vmatprep.subr.bf16.mxu1 %v8251_v12 }
 0x162   : > { %7718 = vmatmul.mubr.bf16.gmra.mrb[16].mxu0 %v7031_v21  ;;  %7808 = vmatpush3.bf16.msra.mxu1 %v7807_v15 }
 0x163   : > { %7721 = vmatprep.mubr.bf16.mxu0 %v7032_v30  ;;  %7809 = vmatprep.subr.bf16.mxu1 %v8251_v12  ;;  %v6056_v30 = vld [vmem:[%s9910_s3 + $0x50] sm:$0xff] }
 0x164   : > { %v7819_v40 = vpack.c.bf16 %v6057_v45, %v6056_v30 }
 0x166   : > { %7811 = vmatpush3.bf16.msra.mxu1 %v7810_v18 }
 0x167   : > { %7812 = vmatprep.subr.bf16.mxu1 %v8251_v12 }
 0x16a   : > { %7722 = vmatmul.mubr.bf16.gmra.mrb[20].mxu0 %v7033_v50  ;;  %7814 = vmatpush3.bf16.msra.mxu1 %v7813_v23 }
 0x16b   : > { %7725 = vmatprep.mubr.bf16.mxu0 %v7034_v51  ;;  %7815 = vmatprep.subr.bf16.mxu1 %v8251_v12 }
 0x16e   : > { %7817 = vmatpush3.bf16.msra.mxu1 %v7816_v26 }
 0x16f   : > { %7818 = vmatprep.subr.bf16.mxu1 %v8251_v12 }
 0x172   : > { %7726 = vmatmul.mubr.bf16.gmra.mrb[24].mxu0 %v7035_v0  ;;  %7820 = vmatpush3.bf16.msra.mxu1 %v7819_v40 }
 0x173   : > { %7729 = vmatprep.mubr.bf16.mxu0 %v7036_v1  ;;  %7821 = vmatprep.subr.bf16.mxu1 %v8251_v12 }
 0x176   : > { %7823 = vmatpush3.bf16.msra.mxu1 %v7822_v36 }
 0x177   : > { %7824 = vmatprep.subr.bf16.mxu1 %v8251_v12 }
 0x17a   : > { %7730 = vmatmul.mubr.bf16.gmra.mrb[28].mxu0 %v7037_v9  ;;  %7826 = vmatpush3.bf16.msra.mxu1 %v7825_v43 }
 0x17b   : > { %7827 = vmatprep.subr.bf16.mxu1 %v8251_v12 }
 0x1d6   : > { %v7463_v27 = vpop.f32.mrb[0].mxu1 }
 0x1d7   : > { %v2439_v28 = vpop.f32.mrb[1].mxu1 }
 0x1d8   : > { %v7464_v22 = vpop.f32.mrb[2].mxu1 }
 0x1d9   : > { %v2442_v29 = vpop.f32.mrb[3].mxu1 }
 0x1de   : > { %v7467_v21 = vpop.f32.mrb[4].mxu1 }
 0x1df   : > { %v9478_v31 = vpop.f32.mrb[5].mxu1 }
 0x1e0   : > { %v9480_v32 = vpop.f32.mrb[6].mxu1 }
 0x1e1   : > { %v9482_v33 = vpop.f32.mrb[7].mxu1 }
 0x1e6   : > { %v9499_v44 = vpop.f32.mrb[8].mxu1 }
 0x1e7   : > { %v9502_v42 = vpop.f32.mrb[9].mxu1 }
 0x1e8   : > { %v9504_v46 = vpop.f32.mrb[10].mxu1 }
 0x1e9   : > { %v9506_v47 = vpop.f32.mrb[11].mxu1 }
 0x1ee   : > { %v9509_v48 = vpop.f32.mrb[12].mxu1 }
 0x1ef   : > { %v9511_v49 = vpop.f32.mrb[13].mxu1 }
 0x1f0   : > { %v9513_v50 = vpop.f32.mrb[14].mxu1 }
 0x1f1   : > { %v9515_v51 = vpop.f32.mrb[15].mxu1 }
 0x1f6   : > { %v9517_v52 = vpop.f32.mrb[16].mxu1 }
 0x1f7   : > { %v9519_v53 = vpop.f32.mrb[17].mxu1 }
 0x1f8   : > { %v9521_v54 = vpop.f32.mrb[18].mxu1 }
 0x1f9   : > { %v9523_v55 = vpop.f32.mrb[19].mxu1 }
 0x1fe   : > { %v9525_v56 = vpop.f32.mrb[20].mxu1 }
 0x1ff   : > { %v9527_v57 = vpop.f32.mrb[21].mxu1 }
 0x200   : > { %v9529_v37 = vpop.f32.mrb[22].mxu1 }
 0x201   : > { %v9531_v58 = vpop.f32.mrb[23].mxu1 }
 0x206   : > { %v9533_v59 = vpop.f32.mrb[24].mxu1 }
 0x207   : > { %v9535_v60 = vpop.f32.mrb[25].mxu1 }
 0x208   : > { %v9537_v11 = vpop.f32.mrb[26].mxu1 }
 0x209   : > { %v9539_v61 = vpop.f32.mrb[27].mxu1 }
 0x20e   : > { %v9541_v62 = vpop.f32.mrb[28].mxu1 }
 0x20f   : > { %v9543_v63 = vpop.f32.mrb[29].mxu1 }
 0x210   : > { %v9545_v0 = vpop.f32.mrb[30].mxu1 }
 0x211   : > { %v9547_v1 = vpop.f32.mrb[31].mxu1 }
 0x215   : > { %v7703_v5 = vpop.f32.mrb[0].mxu0 }
 0x216   : > { %v7851_v6 = vadd.f32 %v7703_v5, %v7463_v27  ;;  %v5714_v7 = vpop.f32.mrb[1].mxu0 }
 0x217   : > { %v7852_v8 = vadd.f32 %v5714_v7, %v2439_v28  ;;  %v7704_v9 = vpop.f32.mrb[2].mxu0 }
 0x218   : > { %v7853_v3 = vadd.f32 %v7704_v9, %v7464_v22  ;;  %v5717_v10 = vpop.f32.mrb[3].mxu0  ;;  %v9558_v14 = vadd.f32 %v7851_v6, %v9552_v2 }
 0x219   : > { %v9555_v13 = vadd.f32 %v7852_v8, %v9552_v2  ;;  %v7854_v4 = vadd.f32 %v5717_v10, %v2442_v29 }
 0x21a   : > { %v9565_v17 = vadd.f32 %v7853_v3, %v9552_v2  ;;  %v5978_v25 = vmax.f32 %v9558_v14, 0.0 }
 0x21b   : > { %v9561_v15 = vadd.f32 %v7854_v4, %v9552_v2  ;;  %v5976_v16 = vmax.f32 %v9555_v13, 0.0 }
 0x21c   : > { %v5979_v29 = vmax.f32 %v9565_v17, 0.0 }
 0x21d   : > { %v5977_v18 = vmax.f32 %v9561_v15, 0.0  ;;  %v7707_v19 = vpop.f32.mrb[4].mxu0 }
 0x21e   : > { %v7855_v20 = vadd.f32 %v7707_v19, %v7467_v21  ;;  %v5730_v23 = vpop.f32.mrb[5].mxu0 }
 0x21f   : > { %v6008_v24 = vadd.f32 %v5977_v18, %v5976_v16  ;;  %v7856_v26 = vadd.f32 %v5730_v23, %v9478_v31  ;;  %v7708_v27 = vpop.f32.mrb[6].mxu0 }
 0x220   : > { %v7857_v28 = vadd.f32 %v7708_v27, %v9480_v32  ;;  %v5733_v22 = vpop.f32.mrb[7].mxu0  ;;  %v9583_v40 = vadd.f32 %v7855_v20, %v9552_v2 }
 0x221   : > { %v6009_v30 = vadd.f32 %v6008_v24, %v5978_v25  ;;  %v9579_v21 = vadd.f32 %v7856_v26, %v9552_v2  ;;  %v7858_v45 = vadd.f32 %v5733_v22, %v9482_v33 }
 0x222   : > { %v9594_v36 = vadd.f32 %v7857_v28, %v9552_v2  ;;  %v5982_v5 = vmax.f32 %v9583_v40, 0.0 }
 0x223   : > { %v5980_v34 = vmax.f32 %v9579_v21, 0.0  ;;  %v6010_v31 = vadd.f32 %v6009_v30, %v5979_v29  ;;  %v9589_v32 = vadd.f32 %v7858_v45, %v9552_v2 }
 0x224   : > { %v9924_v10 = vmax.f32 %v9594_v36, 0.0 }
 0x225   : > { %v6011_v35 = vadd.f32 %v6010_v31, %v5980_v34  ;;  %v5981_v38 = vmax.f32 %v9589_v32, 0.0  ;;  %v7711_v33 = vpop.f32.mrb[8].mxu0 }
 0x226   : > { %v7859_v39 = vadd.f32 %v7711_v33, %v9499_v44  ;;  %v5746_v43 = vpop.f32.mrb[9].mxu0 }
 0x227   : > { %v6012_v6 = vadd.f32 %v6011_v35, %v5981_v38  ;;  %v7860_v7 = vadd.f32 %v5746_v43, %v9502_v42  ;;  %v7712_v8 = vpop.f32.mrb[10].mxu0 }
 0x228   : > { %v7861_v9 = vadd.f32 %v7712_v8, %v9504_v46  ;;  %v5749_v3 = vpop.f32.mrb[11].mxu0  ;;  %v9611_v20 = vadd.f32 %v7859_v39, %v9552_v2 }
 0x229   : > { %v6013_v4 = vadd.f32 %v6012_v6, %v5982_v5  ;;  %v9607_v19 = vadd.f32 %v7860_v7, %v9552_v2  ;;  %v7862_v44 = vadd.f32 %v5749_v3, %v9506_v47 }
 0x22a   : > { %v9622_v26 = vadd.f32 %v7861_v9, %v9552_v2  ;;  %v9920_v30 = vmax.f32 %v9611_v20, 0.0 }
 0x22b   : > { %v9922_v23 = vmax.f32 %v9607_v19, 0.0  ;;  %v6014_v42 = vadd.f32 %v6013_v4, %v9924_v10  ;;  %v9617_v46 = vadd.f32 %v7862_v44, %v9552_v2 }
 0x22c   : > { %v9919_v43 = vmax.f32 %v9622_v26, 0.0 }
 0x22d   : > { %v6015_v24 = vadd.f32 %v6014_v42, %v9922_v23  ;;  %v9921_v27 = vmax.f32 %v9617_v46, 0.0  ;;  %v7715_v47 = vpop.f32.mrb[12].mxu0 }
 0x22e   : > { %v7863_v28 = vadd.f32 %v7715_v47, %v9509_v48  ;;  %v5762_v22 = vpop.f32.mrb[13].mxu0 }
 0x22f   : > { %v6016_v45 = vadd.f32 %v6015_v24, %v9921_v27  ;;  %v7864_v31 = vadd.f32 %v5762_v22, %v9511_v49  ;;  %v7716_v35 = vpop.f32.mrb[14].mxu0 }
 0x230   : > { %v7865_v33 = vadd.f32 %v7716_v35, %v9513_v50  ;;  %v5765_v39 = vpop.f32.mrb[15].mxu0  ;;  %v9639_v8 = vadd.f32 %v7863_v28, %v9552_v2 }
 0x231   : > { %v6017_v6 = vadd.f32 %v6016_v45, %v9920_v30  ;;  %v9635_v7 = vadd.f32 %v7864_v31, %v9552_v2  ;;  %v7866_v48 = vadd.f32 %v5765_v39, %v9515_v51 }
 0x232   : > { %v9650_v4 = vadd.f32 %v7865_v33, %v9552_v2  ;;  %v9916_v47 = vmax.f32 %v9639_v8, 0.0 }
 0x233   : > { %v9918_v9 = vmax.f32 %v9635_v7, 0.0  ;;  %v6018_v49 = vadd.f32 %v6017_v6, %v9919_v43  ;;  %v9645_v50 = vadd.f32 %v7866_v48, %v9552_v2 }
 0x234   : > { %v9915_v33 = vmax.f32 %v9650_v4, 0.0 }
 0x235   : > { %v6019_v3 = vadd.f32 %v6018_v49, %v9918_v9  ;;  %v9917_v44 = vmax.f32 %v9645_v50, 0.0  ;;  %v7719_v51 = vpop.f32.mrb[16].mxu0 }
 0x236   : > { %v7867_v42 = vadd.f32 %v7719_v51, %v9517_v52  ;;  %v5778_v24 = vpop.f32.mrb[17].mxu0 }
 0x237   : > { %v6020_v28 = vadd.f32 %v6019_v3, %v9917_v44  ;;  %v7868_v22 = vadd.f32 %v5778_v24, %v9519_v53  ;;  %v7720_v45 = vpop.f32.mrb[18].mxu0 }
 0x238   : > { %v7869_v31 = vadd.f32 %v7720_v45, %v9521_v54  ;;  %v5781_v35 = vpop.f32.mrb[19].mxu0  ;;  %v9667_v48 = vadd.f32 %v7867_v42, %v9552_v2 }
 0x239   : > { %v6021_v39 = vadd.f32 %v6020_v28, %v9916_v47  ;;  %v9663_v6 = vadd.f32 %v7868_v22, %v9552_v2  ;;  %v7870_v52 = vadd.f32 %v5781_v35, %v9523_v55 }
 0x23a   : > { %v9678_v51 = vadd.f32 %v7869_v31, %v9552_v2  ;;  %v5994_v22 = vmax.f32 %v9667_v48, 0.0  ;;  %v9937_v48 = vmax.f32 %v9607_v19, 0.0 }
 0x23b   : > { %v5992_v49 = vmax.f32 %v9663_v6, 0.0  ;;  %v6022_v53 = vadd.f32 %v6021_v39, %v9915_v33  ;;  %v9673_v54 = vadd.f32 %v7870_v52, %v9552_v2 }
 0x23c   : > { %v5995_v31 = vmax.f32 %v9678_v51, 0.0 }
 0x23d   : > { %v6023_v3 = vadd.f32 %v6022_v53, %v5992_v49  ;;  %v5993_v24 = vmax.f32 %v9673_v54, 0.0  ;;  %v7723_v55 = vpop.f32.mrb[20].mxu0  ;;  %v9939_v54 = vmax.f32 %v9617_v46, 0.0 }
 0x23e   : > { %v7871_v42 = vadd.f32 %v7723_v55, %v9525_v56  ;;  %v5794_v28 = vpop.f32.mrb[21].mxu0 }
 0x23f   : > { %v6024_v45 = vadd.f32 %v6023_v3, %v5993_v24  ;;  %v7872_v35 = vadd.f32 %v5794_v28, %v9527_v57  ;;  %v7724_v39 = vpop.f32.mrb[22].mxu0 }
 0x240   : > { %v7873_v52 = vadd.f32 %v7724_v39, %v9529_v37  ;;  %v5797_v53 = vpop.f32.mrb[23].mxu0  ;;  %v9695_v55 = vadd.f32 %v7871_v42, %v9552_v2 }
 0x241   : > { %v6025_v33 = vadd.f32 %v6024_v45, %v5994_v22  ;;  %v9691_v47 = vadd.f32 %v7872_v35, %v9552_v2  ;;  %v7874_v56 = vadd.f32 %v5797_v53, %v9531_v58 }
 0x242   : > { %v9706_v45 = vadd.f32 %v7873_v52, %v9552_v2  ;;  %v5998_v53 = vmax.f32 %v9695_v55, 0.0  ;;  %v9943_v55 = vmax.f32 %v9622_v26, 0.0 }
 0x243   : > { %v5996_v3 = vmax.f32 %v9691_v47, 0.0  ;;  %v6026_v57 = vadd.f32 %v6025_v33, %v5995_v31  ;;  %v9701_v37 = vadd.f32 %v7874_v56, %v9552_v2 }
 0x244   : > { %v5999_v52 = vmax.f32 %v9706_v45, 0.0  ;;  %v9945_v45 = vmax.f32 %v9635_v7, 0.0 }
 0x245   : > { %v6027_v28 = vadd.f32 %v6026_v57, %v5996_v3  ;;  %v5997_v35 = vmax.f32 %v9701_v37, 0.0  ;;  %v7727_v58 = vpop.f32.mrb[24].mxu0 }
 0x246   : > { %v7875_v42 = vadd.f32 %v7727_v58, %v9533_v59  ;;  %v5810_v39 = vpop.f32.mrb[25].mxu0 }
 0x247   : > { %v6028_v33 = vadd.f32 %v6027_v28, %v5997_v35  ;;  %v7876_v56 = vadd.f32 %v5810_v39, %v9535_v60  ;;  %v7728_v44 = vpop.f32.mrb[26].mxu0 }
 0x248   : > { %v7877_v9 = vadd.f32 %v7728_v44, %v9537_v11  ;;  %v5813_v57 = vpop.f32.mrb[27].mxu0  ;;  %v9723_v58 = vadd.f32 %v7875_v42, %v9552_v2 }
 0x249   : > { %v6029_v43 = vadd.f32 %v6028_v33, %v5998_v53  ;;  %v9719_v30 = vadd.f32 %v7876_v56, %v9552_v2  ;;  %v7878_v59 = vadd.f32 %v5813_v57, %v9539_v61 }
 0x24a   : > { %v9734_v39 = vadd.f32 %v7877_v9, %v9552_v2  ;;  %v9928_v57 = vmax.f32 %v9723_v58, 0.0 }
 0x24b   : > { %v9923_v28 = vmax.f32 %v9719_v30, 0.0  ;;  %v6030_v60 = vadd.f32 %v6029_v43, %v5999_v52  ;;  %v9729_v11 = vadd.f32 %v7878_v59, %v9552_v2  ;;  %v9936_v32 = vmax.f32 %v9719_v30, 0.0 }
 0x24c   : > { %v9926_v9 = vmax.f32 %v9734_v39, 0.0  ;;  %v9942_v19 = vmax.f32 %v9734_v39, 0.0 }
 0x24d   : > { %v6031_v44 = vadd.f32 %v6030_v60, %v9923_v28  ;;  %v9929_v33 = vmax.f32 %v9729_v11, 0.0  ;;  %v7731_v61 = vpop.f32.mrb[28].mxu0  ;;  %v9938_v40 = vmax.f32 %v9729_v11, 0.0 }
 0x24e   : > { %v7879_v42 = vadd.f32 %v7731_v61, %v9541_v62  ;;  %v5826_v56 = vpop.f32.mrb[29].mxu0 }
 0x24f   : > { %v6032_v43 = vadd.f32 %v6031_v44, %v9929_v33  ;;  %v7880_v59 = vadd.f32 %v5826_v56, %v9543_v63  ;;  %v7732_v27 = vpop.f32.mrb[30].mxu0 }
 0x250   : > { %v7881_v23 = vadd.f32 %v7732_v27, %v9545_v0  ;;  %v5829_v60 = vpop.f32.mrb[31].mxu0  ;;  %v9751_v61 = vadd.f32 %v7879_v42, %v9552_v2 }
 0x251   : > { %v6033_v28 = vadd.f32 %v6032_v43, %v9928_v57  ;;  %v9747_v10 = vadd.f32 %v7880_v59, %v9552_v2  ;;  %v7882_v62 = vadd.f32 %v5829_v60, %v9547_v1 }
 0x252   : > { %v9762_v56 = vadd.f32 %v7881_v23, %v9552_v2  ;;  %v6006_v1 = vmax.f32 %v9751_v61, 0.0 }
 0x253   : > { %v9925_v44 = vmax.f32 %v9747_v10, 0.0  ;;  %v6034_v63 = vadd.f32 %v6033_v28, %v9926_v9  ;;  %v9757_v0 = vadd.f32 %v7882_v62, %v9552_v2  ;;  %v6134_v9 = vld [vmem:[%s9912_s5] sm:$0xff]  ;;  %v9944_v46 = vmax.f32 %v9747_v10, 0.0 }
 0x254   : > { %v9930_v59 = vmax.f32 %v9762_v56, 0.0  ;;  %v9948_v10 = vmax.f32 %v9639_v8, 0.0  ;;  %v9949_v7 = vmax.f32 %v9762_v56, 0.0 }
 0x255   : > { %v6035_v27 = vadd.f32 %v6034_v63, %v9925_v44  ;;  %v9927_v43 = vmax.f32 %v9757_v0, 0.0 }
 0x257   : > { %v6036_v42 = vadd.f32 %v6035_v27, %v9927_v43  ;;  %v6135_v27 = vld [vmem:[%s9912_s5 + $0x8] sm:$0xff] }
 0x258   : > { %v7828_v57 = vpack.c.bf16 %v6135_v27, %v6134_v9  ;;  %v6138_v9 = vld [vmem:[%s9912_s5 + $0x20] sm:$0xff]  ;;  %v6145_v27 = vld [vmem:[%s9912_s5 + $0x58] sm:$0xff] }
 0x259   : > { %v6037_v28 = vadd.f32 %v6036_v42, %v6006_v1  ;;  %v6136_v42 = vld [vmem:[%s9912_s5 + $0x10] sm:$0xff] }
 0x25b   : > { %v6038_v60 = vadd.f32 %v6037_v28, %v9930_v59 }
 0x25d   : > { %v6039_v62 = vrot.slane %v6038_v60, 4 }
 0x25f   : > { %v6040_v63 = vadd.f32 %v6039_v62, %v6038_v60  ;;  %v6142_v62 = vld [vmem:[%s9912_s5 + $0x40] sm:$0xff] }
 0x261   : > { %v6041_v44 = vrot.slane %v6040_v63, 2 }
 0x263   : > { %v6042_v2 = vadd.f32 %v6041_v44, %v6040_v63  ;;  %v6137_v44 = vld [vmem:[%s9912_s5 + $0x18] sm:$0xff]  ;;  %v6143_v63 = vld [vmem:[%s9912_s5 + $0x48] sm:$0xff] }
 0x264   : > { %v7831_v28 = vpack.c.bf16 %v6137_v44, %v6136_v42  ;;  %v6146_v44 = vld [vmem:[%s9912_s5 + $0x60] sm:$0xff] }
 0x265   : > { %v6043_v23 = vrot.slane %v6042_v2, 1 }
 0x267   : > { %v6044_v43 = vadd.f32 %v6043_v23, %v6042_v2  ;;  %v7840_v2 = vpack.c.bf16 %v6143_v63, %v6142_v62  ;;  %v6144_v23 = vld [vmem:[%s9912_s5 + $0x50] sm:$0xff] }
 0x268   : > { %v7843_v42 = vpack.c.bf16 %v6145_v27, %v6144_v23 }
 0x269   : > { %v6045_v33 = vmul.f32 0.00390625, %v6044_v43  ;;  %v6139_v43 = vld [vmem:[%s9912_s5 + $0x28] sm:$0xff] }
 0x26a   : > { %v7834_v60 = vpack.c.bf16 %v6139_v43, %v6138_v9  ;;  %v6148_v43 = vld [vmem:[%s9912_s5 + $0x70] sm:$0xff] }
 0x26b   : > { %7766 = vmatmul.mubr.f32.vlgmr.msra.gmra.mrb[32].mxu1 %v6045_v33  ;;  %v6140_v33 = vld [vmem:[%s9912_s5 + $0x30] sm:$0xff] }
 0x26c   : > { %7829 = vmatpush3.bf16.msra.mxu1 %v7828_v57  ;;  %7800 = vmatprep.mubr.msk.f32.mxu1 %vm8252_vm6, %v8253_v41  ;;  %v6141_v41 = vld [vmem:[%s9912_s5 + $0x38] sm:$0xff] }
 0x26d   : > { %7830 = vmatprep.subr.bf16.mxu1 %v8251_v12  ;;  %v7837_v57 = vpack.c.bf16 %v6141_v41, %v6140_v33  ;;  %v6062_v41 = vld [vmem:[%s9911_s4] sm:$0x1] }
 0x270   : > { %7832 = vmatpush3.bf16.msra.mxu1 %v7831_v28  ;;  %v6147_v28 = vld [vmem:[%s9912_s5 + $0x68] sm:$0xff] }
 0x271   : > { %7833 = vmatprep.subr.bf16.mxu1 %v8251_v12  ;;  %v7846_v9 = vpack.c.bf16 %v6147_v28, %v6146_v44 }
 0x274   : > { %7835 = vmatpush3.bf16.msra.mxu1 %v7834_v60  ;;  %v6149_v60 = vld [vmem:[%s9912_s5 + $0x78] sm:$0xff] }
 0x275   : > { %7836 = vmatprep.subr.bf16.mxu1 %v8251_v12  ;;  %v7849_v33 = vpack.c.bf16 %v6149_v60, %v6148_v43  ;;  %v6227_v43 = vlaneseq }
 0x277   : > { %v6228_v60 = vshrl.u32 %v6227_v43, 7 }
 0x278   : > { %7838 = vmatpush3.bf16.msra.mxu1 %v7837_v57 }
 0x279   : > { %7839 = vmatprep.subr.bf16.mxu1 %v8251_v12 }
 0x27c   : > { %7841 = vmatpush3.bf16.msra.mxu1 %v7840_v2 }
 0x27d   : > { %7842 = vmatprep.subr.bf16.mxu1 %v8251_v12 }
 0x280   : > { %7844 = vmatpush3.bf16.msra.mxu1 %v7843_v42 }
 0x281   : > { %7845 = vmatprep.subr.bf16.mxu1 %v8251_v12 }
 0x284   : > { %7847 = vmatpush3.bf16.msra.mxu1 %v7846_v9 }
 0x285   : > { %7848 = vmatprep.subr.bf16.mxu1 %v8251_v12  ;;  %v6150_v12 = vld [vmem:[%s9913_s6] sm:$0x1] }
 0x288   : > { %7850 = vmatpush3.bf16.msra.mxu1 %v7849_v33  ;;  %v6229_v33 = vsub.s32 0, %v6228_v60 }
 0x33e   : > { %v6129_v57 = vpop.f32.mrb[32].mxu1 }
 0x33f   : > { %v6130_v62 = vadd.f32 %v6129_v57, %v6062_v41  ;;  %v7767_v63 = vpop.f32.mrb[33].mxu1 }
 0x341   : > { %v6133_v2 = vmax.f32 %v6130_v62, 0.0 }
 0x343   : > { %7801 = vmatmul.mubr.f32.vlgmr.msra.gmra.mrb[34].mxu1 %v6133_v2 }
 0x416   : > { %v6217_v23 = vpop.f32.mrb[34].mxu1 }
 0x417   : > { %v6218_v27 = vadd.f32 %v6217_v23, %v6150_v12  ;;  %v7802_v42 = vpop.f32.mrb[35].mxu1 }
 0x419   : > { %v7047_v44 = vmul.f32 -1.442695, %v6218_v27 }
 0x41b   : > { %8239 = vpow2.f32 %v7047_v44 }
 0x425   : > { %v8240_v28 = vpop.eup %8239 }
 0x426   : > { %v6224_v9 = vadd.f32 1.0, %v8240_v28 }
 0x428   : > { %8241 = vrcp.f32 %v6224_v9 }
 0x432   : > { %v8242_v59 = vpop.eup %8241 }
 0x433   : > { %v6230_v41 = vrot.slane %v8242_v59, %v6229_v33  ;;  %v9950_v59 = vmax.f32 %v9650_v4, 0.0 }
 0x435   : > { %v6247_v57 = vmul.f32 %v6230_v41, %v5992_v49  ;;  %v6231_v62 = vmul.f32 %v6230_v41, %v5976_v16  ;;  %v6248_v63 = vmul.f32 %v6230_v41, %v5993_v24  ;;  %v6232_v2 = vmul.f32 %v6230_v41, %v5977_v18 }
 0x436   : > { %v6249_v12 = vmul.f32 %v6230_v41, %v5994_v22  ;;  %v6233_v6 = vmul.f32 %v6230_v41, %v5978_v25  ;;  %v6250_v13 = vmul.f32 %v6230_v41, %v5995_v31  ;;  %v6234_v16 = vmul.f32 %v6230_v41, %v5979_v29 }
 0x437   : > { %6295 = vxpose.xlu1.b32.start [1/16] (narrow) %v6247_v57, 32  ;;  %6263 = vxpose.xlu0.b32.start [1/16] (narrow) %v6231_v62, 32  ;;  %v6251_v15 = vmul.f32 %v6230_v41, %v5996_v3  ;;  %v6235_v18 = vmul.f32 %v6230_v41, %v5980_v34  ;;  %v6252_v14 = vmul.f32 %v6230_v41, %v5997_v35  ;;  %v9935_v34 = vmax.f32 %v9594_v36, 0.0 }
 0x438   : > { %v6236_v25 = vmul.f32 %v6230_v41, %v5981_v38  ;;  %v6253_v17 = vmul.f32 %v6230_v41, %v5998_v53  ;;  %v6237_v29 = vmul.f32 %v6230_v41, %v5982_v5  ;;  %v6254_v21 = vmul.f32 %v6230_v41, %v5999_v52 }
 0x439   : > { %v6238_v47 = vmul.f32 %v6230_v41, %v9935_v34  ;;  %v6255_v38 = vmul.f32 %v6230_v41, %v9936_v32  ;;  %v6239_v49 = vmul.f32 %v6230_v41, %v9937_v48  ;;  %v6256_v5 = vmul.f32 %v6230_v41, %v9938_v40 }
 0x43a   : > { %v6240_v51 = vmul.f32 %v6230_v41, %v9939_v54  ;;  %v9940_v36 = vmax.f32 %v9723_v58, 0.0  ;;  %v9941_v22 = vmax.f32 %v9611_v20, 0.0  ;;  %v6258_v31 = vmul.f32 %v6230_v41, %v9942_v19 }
 0x43b   : > { %6296 = vxpose.xlu1.b32.cont [2/16] (narrow) %v6248_v63, 32  ;;  %6264 = vxpose.xlu0.b32.cont [2/16] (narrow) %v6232_v2, 32  ;;  %v6242_v3 = vmul.f32 %v6230_v41, %v9943_v55  ;;  %v6259_v37 = vmul.f32 %v6230_v41, %v9944_v46  ;;  %v6243_v35 = vmul.f32 %v6230_v41, %v9945_v45  ;;  %v9946_v20 = vmax.f32 %v9757_v0, 0.0 }
 0x43c   : > { %v6257_v24 = vmul.f32 %v6230_v41, %v9940_v36  ;;  %v6241_v30 = vmul.f32 %v6230_v41, %v9941_v22  ;;  %v9947_v52 = vmax.f32 %v9645_v50, 0.0  ;;  %v6261_v26 = vmul.f32 %v6230_v41, %v6006_v1 }
 0x43d   : > { %v6260_v53 = vmul.f32 %v6230_v41, %v9946_v20  ;;  %v6245_v11 = vmul.f32 %v6230_v41, %v9948_v10  ;;  %v6262_v39 = vmul.f32 %v6230_v41, %v9949_v7  ;;  %v6246_v0 = vmul.f32 %v6230_v41, %v9950_v59 }
 0x43e   : > { %v6244_v58 = vmul.f32 %v6230_v41, %v9947_v52 }
 0x43f   : > { %6297 = vxpose.xlu1.b32.cont [3/16] (narrow) %v6249_v12, 32  ;;  %6265 = vxpose.xlu0.b32.cont [3/16] (narrow) %v6233_v6, 32 }
 0x443   : > { %6298 = vxpose.xlu1.b32.cont [4/16] (narrow) %v6250_v13, 32  ;;  %6266 = vxpose.xlu0.b32.cont [4/16] (narrow) %v6234_v16, 32 }
 0x447   : > { %6299 = vxpose.xlu1.b32.cont [5/16] (narrow) %v6251_v15, 32  ;;  %6267 = vxpose.xlu0.b32.cont [5/16] (narrow) %v6235_v18, 32 }
 0x44b   : > { %6300 = vxpose.xlu1.b32.cont [6/16] (narrow) %v6252_v14, 32  ;;  %6268 = vxpose.xlu0.b32.cont [6/16] (narrow) %v6236_v25, 32 }
 0x44f   : > { %6301 = vxpose.xlu1.b32.cont [7/16] (narrow) %v6253_v17, 32  ;;  %6269 = vxpose.xlu0.b32.cont [7/16] (narrow) %v6237_v29, 32 }
 0x453   : > { %6302 = vxpose.xlu1.b32.cont [8/16] (narrow) %v6254_v21, 32  ;;  %6270 = vxpose.xlu0.b32.cont [8/16] (narrow) %v6238_v47, 32 }
 0x457   : > { %6303 = vxpose.xlu1.b32.cont [9/16] (narrow) %v6255_v38, 32  ;;  %6271 = vxpose.xlu0.b32.cont [9/16] (narrow) %v6239_v49, 32 }
 0x45b   : > { %6304 = vxpose.xlu1.b32.cont [10/16] (narrow) %v6256_v5, 32  ;;  %6272 = vxpose.xlu0.b32.cont [10/16] (narrow) %v6240_v51, 32 }
 0x45f   : > { %6305 = vxpose.xlu1.b32.cont [11/16] (narrow) %v6257_v24, 32  ;;  %6273 = vxpose.xlu0.b32.cont [11/16] (narrow) %v6241_v30, 32 }
 0x463   : > { %6306 = vxpose.xlu1.b32.cont [12/16] (narrow) %v6258_v31, 32  ;;  %6274 = vxpose.xlu0.b32.cont [12/16] (narrow) %v6242_v3, 32 }
 0x467   : > { %6307 = vxpose.xlu1.b32.cont [13/16] (narrow) %v6259_v37, 32  ;;  %6275 = vxpose.xlu0.b32.cont [13/16] (narrow) %v6243_v35, 32 }
 0x46b   : > { %6308 = vxpose.xlu1.b32.cont [14/16] (narrow) %v6260_v53, 32  ;;  %6276 = vxpose.xlu0.b32.cont [14/16] (narrow) %v6244_v58, 32 }
 0x46f   : > { %6309 = vxpose.xlu1.b32.cont [15/16] (narrow) %v6261_v26, 32  ;;  %6277 = vxpose.xlu0.b32.cont [15/16] (narrow) %v6245_v11, 32 }
 0x473   : > { %6310 = vxpose.xlu1.b32.end [16/16] (narrow) %v6262_v39, 32  ;;  %6278 = vxpose.xlu0.b32.end [16/16] (narrow) %v6246_v0, 32 }
 0x4b7   : > { %v6311_v50 = vpop.trf.xlu1  ;;  %v6279_v61 = vpop.trf.xlu0 }
 0x4b8   : > { %6328 = vst [vmem:[%s278_s19 + $0x8] sm:$0xff] %v6311_v50  ;;  %6327 = vst [vmem:[%s278_s19] sm:$0xff] %v6279_v61 }
 0x4bb   : > { %v6312_v8 = vpop.trf.xlu1  ;;  %v6280_v1 = vpop.trf.xlu0 }
 0x4bc   : > { %6330 = vst [vmem:[%s278_s19 + $0x18] sm:$0xff] %v6312_v8  ;;  %6329 = vst [vmem:[%s278_s19 + $0x10] sm:$0xff] %v6280_v1 }
 0x4bf   : > { %v6313_v56 = vpop.trf.xlu1  ;;  %v6281_v23 = vpop.trf.xlu0 }
 0x4c0   : > { %6332 = vst [vmem:[%s278_s19 + $0x28] sm:$0xff] %v6313_v56  ;;  %6331 = vst [vmem:[%s278_s19 + $0x20] sm:$0xff] %v6281_v23 }
 0x4c3   : > { %v6314_v4 = vpop.trf.xlu1  ;;  %v6282_v27 = vpop.trf.xlu0 }
 0x4c4   : > { %6334 = vst [vmem:[%s278_s19 + $0x38] sm:$0xff] %v6314_v4  ;;  %6333 = vst [vmem:[%s278_s19 + $0x30] sm:$0xff] %v6282_v27 }
 0x4c5 PF: > { %s17_s24 = sadd.s32 1, %s8249_s24  }
 0x4c6   : > { %p14_p4 = scmp.ge.s32.totalorder %s17_s24, 4  }
 0x4c8   :  { %16 = sbr.rel (!%p14_p4) target bundleno = 1 (0x1), region = 88 }

// kernel: sspin_forward.2
= control target key start
LH: loop header
LB: loop body
LE: loop exit
PB: predicated region body
PF: predicated region fallthrough
CT: control target
= control target key end

     0   :  { %s14833_s12 = smov 0   ;;  %s18470_s0 = inlined_call_operand.vmem [shape: bf16[2,20,34,8], index: 0, kind: input, shape index: {}]   ;;  %s18471_s1 = inlined_call_operand.vmem [shape: bf16[9,8,128], index: 1, kind: input, shape index: {}]   ;;  %s18472_s2 = inlined_call_operand.vmem [shape: f32[1,128], index: 2, kind: input, shape index: {}]   ;;  %s18473_s3 = inlined_call_operand.vmem [shape: bf16[2,18,32,128], index: 3, kind: output, shape index: {}]  }
   0x1 LB: > { %s12134_s13 = sadd.s32 4294967295, %s14809_s12   ;;  %p12138_p0 = scmp.ge.s32.totalorder %s14809_s12, 1  ;;  %s14809_s12 = sphi %s14833_s12, %s13_s12  }
   0x2   : > { %p137_p1 = scmp.lt.s32.totalorder %s14809_s12, 3 }
   0x4   : > { %p138_p2 = pnand %p12138_p0, %p137_p1 }
   0x6   : > { %141 = sbr.rel (%p138_p2) target bundleno = 961 (0x3c1), region = 32 }
   0xd   : > { %v388_v0 = vld [vmem:[%s18471_s1] sm:$0xf]  ;;  %vm678_vm0 = vcmask 1043456   ;;  %p161_p3 = scmp.lt.s32.totalorder %s12134_s13, 1  ;;  %v12213_v2 = vld [vmem:[%s18471_s1 + $0x4] sm:$0xf] }
   0xe   : > { %14672 = vmatprep.subr.msk.bf16.mxu1 %vm678_vm0, %v388_v0  ;;  %14671 = vmatprep.subr.msk.bf16.mxu0 %vm678_vm0, %v388_v0  ;;  %v680_v1 = vsel %vm678_vm0, %v388_v0, 0  ;;  %v12304_v3 = vld [vmem:[%s18471_s1 + $0x8] sm:$0xf]  ;;  %vm569_vm1 = vcmask 64512   ;;  %v12449_v8 = vld [vmem:[%s18471_s1 + $0xc] sm:$0xf] }
   0xf   : > { %14670 = vmatpush3.bf16.msra.mxu1 %v680_v1  ;;  %14004 = vmatpush3.bf16.msra.mxu0 %v680_v1  ;;  %s18820_s13 = smov (!%p161_p3, %s12134_s13), 1  ;;  %v3498_v7 = vsel %vm678_vm0, %v12304_v3, 0  ;;  %v2323_v10 = vsel %vm678_vm0, %v12213_v2, 0  ;;  %v12612_v11 = vld [vmem:[%s18471_s1 + $0x10] sm:$0xf]  ;;  %vm3042_vm4 = vcmask 1042432  }
  0x10   : > { %14673 = vmatprep.subr.msk.bf16.mxu1 %vm678_vm0, %v12213_v2  ;;  %14674 = vmatprep.subr.msk.bf16.mxu0 %vm678_vm0, %v12304_v3  ;;  %s14681_s20 = smul.u32 400, %s18820_s13  ;;  %vm1309_vm2 = vsmask.f32 3328  ;;  %vm1310_vm3 = vsmask.f32 7440  ;;  %vm3043_vm5 = vcmask 1046532  }
  0x11   : > { %v14914_v30 = vsel %vm678_vm0, %v12449_v8, 0  ;;  %v14917_v31 = vsel %vm678_vm0, %v12612_v11, 0  ;;  %vm14931_vm6 = vmor %vm3042_vm4, %vm3043_vm5  ;;  %v18483_v48 = vmov 0  ;;  %s14682_s17 = smul.u32 288, %s18820_s13 }
  0x12   : > { %s14861_s23 = scalar_lea.vmem %s18470_s0, %s14681_s20  ;;  %v18484_v48 = vsel %vm14931_vm6, 4294967295, %v18483_v48  ;;  %vm14943_vm7 = vmor %vm1309_vm2, %vm1310_vm3 }
  0x13   : > { %v14693_v4 = vld [vmem:[%s14861_s23] sm:$0xff]   ;;  %v14694_v5 = vld [vmem:[%s14861_s23 + $0xb4] sm:$0xff]   ;;  %v14695_v6 = vld [vmem:[%s14861_s23 + $0x8] sm:$0xff]   ;;  %18485 = vst [vmem:[#allocation3_spill] sm:$0xff] %v18484_v48  ;;  %s18258_s19 = scalar_lea.vmem %s18473_s3, %s14682_s17 }
  0x14   : > { %14005 = vmatprep.mubr.msk.bf16.mxu0 %vm569_vm1, %v14693_v4  ;;  %14041 = vmatprep.mubr.msk.bf16.mxu1 %vm569_vm1, %v14694_v5  ;;  %v14696_v9 = vld [vmem:[%s14861_s23 + $0xbc] sm:$0xff]   ;;  %v14697_v12 = vld [vmem:[%s14861_s23 + $0x14] sm:$0xff]   ;;  %v14698_v13 = vld [vmem:[%s14861_s23 + $0xc8] sm:$0xff]  }
  0x15   : > { %14006 = vmatmul.mubr.msk.bf16.vlgmr.msra.gmra.mrb[0].mxu0 %vm569_vm1, %v14695_v6  ;;  %14042 = vmatmul.mubr.msk.bf16.vlgmr.msra.gmra.mrb[0].mxu1 %vm569_vm1, %v14696_v9  ;;  %v14699_v14 = vld [vmem:[%s14861_s23 + $0x1c] sm:$0xff]   ;;  %v14700_v15 = vld [vmem:[%s14861_s23 + $0xd0] sm:$0xff]   ;;  %v14701_v16 = vld [vmem:[%s14861_s23 + $0x28] sm:$0xff]  }
  0x16   : > { %14152 = vmatpush3.bf16.msra.mxu0 %v3498_v7  ;;  %14078 = vmatpush3.bf16.msra.mxu1 %v2323_v10  ;;  %v14702_v17 = vld [vmem:[%s14861_s23 + $0xdc] sm:$0xff]   ;;  %v14703_v18 = vld [vmem:[%s14861_s23 + $0x30] sm:$0xff]   ;;  %v14704_v19 = vld [vmem:[%s14861_s23 + $0xe4] sm:$0xff]  }
  0x17   : > { %14009 = vmatprep.mubr.msk.bf16.mxu0 %vm569_vm1, %v14697_v12  ;;  %14045 = vmatprep.mubr.msk.bf16.mxu1 %vm569_vm1, %v14698_v13  ;;  %v14705_v20 = vld [vmem:[%s14861_s23 + $0x3c] sm:$0xff]   ;;  %v14706_v21 = vld [vmem:[%s14861_s23 + $0xf0] sm:$0xff]   ;;  %v14707_v22 = vld [vmem:[%s14861_s23 + $0x44] sm:$0xff]  }
  0x18   : > { %14675 = vmatprep.subr.msk.bf16.mxu1 %vm678_vm0, %v12449_v8  ;;  %14676 = vmatprep.subr.msk.bf16.mxu0 %vm678_vm0, %v12612_v11  ;;  %v14708_v23 = vld [vmem:[%s14861_s23 + $0xf8] sm:$0xff]   ;;  %v14709_v24 = vld [vmem:[%s14861_s23 + $0x50] sm:$0xff]   ;;  %v14710_v25 = vld [vmem:[%s14861_s23 + $0x104] sm:$0xff]  }
  0x19   : > { %v14711_v26 = vld [vmem:[%s14861_s23 + $0x58] sm:$0xff]   ;;  %v14712_v27 = vld [vmem:[%s14861_s23 + $0x10c] sm:$0xff]   ;;  %v14713_v28 = vld [vmem:[%s14861_s23 + $0x64] sm:$0xff]  }
  0x1a   : > { %v14714_v29 = vld [vmem:[%s14861_s23 + $0x118] sm:$0xff]   ;;  %v1147_v32 = vld [vmem:[%s14861_s23] sm:$0xf]  ;;  %v1148_v33 = vld [vmem:[%s14861_s23 + $0x4] sm:$0xf] }
  0x1b   : > { %v1149_v34 = vld [vmem:[%s14861_s23 + $0x8] sm:$0xf]  ;;  %v1313_v35 = vshrl.u32 %v1147_v32, 16  ;;  %v1316_v36 = vshll.u32 %v1147_v32, 16  ;;  %v1322_v37 = vshll.u32 %v1148_v33, 16  ;;  %v1326_v38 = vshrl.u32 %v1148_v33, 16 }
  0x1c   : > { %v2790_v39 = vld [vmem:[%s14861_s23] sm:$0xe]  ;;  %v1332_v40 = vshll.u32 %v1149_v34, 16  ;;  %v1336_v41 = vshrl.u32 %v1149_v34, 16  ;;  %v2791_v42 = vld [vmem:[%s14861_s23 + $0x4] sm:$0xf] }
  0x1d   : > { %14010 = vmatmul.mubr.msk.bf16.gmra.mrb[4].mxu0 %vm569_vm1, %v14699_v14  ;;  %14046 = vmatmul.mubr.msk.bf16.gmra.mrb[4].mxu1 %vm569_vm1, %v14700_v15  ;;  %v2792_v43 = vld [vmem:[%s14861_s23 + $0x8] sm:$0xf]  ;;  %v1315_v44 = vrot.slane %v1313_v35, 4  ;;  %v1318_v45 = vrot.slane %v1316_v36, 5  ;;  %v1324_v46 = vrot.slane %v1322_v37, 5  ;;  %v1328_v47 = vrot.slane %v1326_v38, 4 }
  0x1e   : > { %14013 = vmatprep.mubr.msk.bf16.mxu0 %vm569_vm1, %v14701_v16  ;;  %14049 = vmatprep.mubr.msk.bf16.mxu1 %vm569_vm1, %v14702_v17  ;;  %v1150_v49 = vld [vmem:[%s14861_s23 + $0xc] sm:$0xf]  ;;  %v1334_v51 = vrot.slane %v1332_v40, 5  ;;  %v1338_v52 = vrot.slane %v1336_v41, 4  ;;  %v12286_v53 = vrot.slane %v2790_v39, 9  ;;  %v3047_v54 = vrot.slane %v2791_v42, 5 }
  0x1f   : > { %v14715_v50 = vld [vmem:[%s14861_s23 + $0x6c] sm:$0xff]   ;;  %v14716_v55 = vld [vmem:[%s14861_s23 + $0x120] sm:$0xff]   ;;  %v14717_v56 = vld [vmem:[%s14861_s23 + $0x78] sm:$0xff]   ;;  %v1319_v57 = vor.u32 %v1318_v45, %v1315_v44  ;;  %v1329_v58 = vor.u32 %v1328_v47, %v1324_v46  ;;  %v3050_v59 = vrot.slane %v2792_v43, 5  ;;  %v1342_v61 = vshll.u32 %v1150_v49, 16 }
  0x20   : > { %v1151_v60 = vld [vmem:[%s14861_s23 + $0x10] sm:$0x1]  ;;  %v1339_v0 = vor.u32 %v1338_v52, %v1334_v51  ;;  %v14949_v1 = vsel %vm14931_vm6, %v12286_v53, %v3047_v54  ;;  %v3049_v2 = vrot.slane %v3047_v54, 4  ;;  %v1346_v3 = vshrl.u32 %v1150_v49, 16  ;;  %v2793_v4 = vld [vmem:[%s14861_s23 + $0xc] sm:$0xf] }
  0x21   : > { %v14718_v62 = vld [vmem:[%s14861_s23 + $0x12c] sm:$0xff]   ;;  %v1320_v5 = vrot.slane %v1319_v57, 4  ;;  %v1330_v6 = vrot.slane %v1329_v58, 4  ;;  %v3052_v7 = vrot.slane %v3050_v59, 4  ;;  %v1344_v8 = vrot.slane %v1342_v61, 5  ;;  %v14722_v40 = vld [vmem:[%s14861_s23 + $0x140] sm:$0xff]  }
  0x22   : > { %v2794_v9 = vld [vmem:[%s14861_s23 + $0x10] sm:$0x1]  ;;  %v1340_v10 = vrot.slane %v1339_v0, 4  ;;  %v14956_v11 = vsel %vm14931_vm6, %v3049_v2, %v3050_v59  ;;  %v1348_v12 = vrot.slane %v1346_v3, 4  ;;  %v1352_v13 = vshll.u32 %v1151_v60, 16 }
  0x23   : > { %v1152_v14 = vld [vmem:[%s14861_s23 + $0x14] sm:$0xf]  ;;  %v1325_v15 = vsel %vm14943_vm7, %v1320_v5, %v1324_v46  ;;  %v1335_v16 = vsel %vm14943_vm7, %v1330_v6, %v1334_v51  ;;  %v12305_v17 = vcombine.low %v14949_v1, %v14956_v11  ;;  %v3056_v32 = vrot.slane %v2794_v9, 5  ;;  %v2796_v39 = vld [vmem:[%s14861_s23 + $0x18] sm:$0xf] }
  0x24   : > { %v1357_v33 = vshrl.u32 %v1152_v14, 16  ;;  %v2795_v34 = vld [vmem:[%s14861_s23 + $0x14] sm:$0xe]  ;;  %v1360_v36 = vshll.u32 %v1152_v14, 16  ;;  %v2797_v45 = vld [vmem:[%s14861_s23 + $0x1c] sm:$0xf] }
  0x25   : > { %14014 = vmatmul.mubr.msk.bf16.gmra.mrb[8].mxu0 %vm569_vm1, %v14703_v18  ;;  %14050 = vmatmul.mubr.msk.bf16.gmra.mrb[8].mxu1 %vm569_vm1, %v14704_v19  ;;  %v3053_v18 = vrot.slane %v2793_v4, 5  ;;  %v1153_v19 = vld [vmem:[%s14861_s23 + $0x18] sm:$0xf]  ;;  %v1155_v51 = vld [vmem:[%s14861_s23 + $0x20] sm:$0xf]  ;;  %v3060_v58 = vrot.slane %v2796_v39, 5 }
  0x26   : > { %14017 = vmatprep.mubr.msk.bf16.mxu0 %vm569_vm1, %v14705_v20  ;;  %14053 = vmatprep.mubr.msk.bf16.mxu1 %vm569_vm1, %v14706_v21  ;;  %v14719_v20 = vld [vmem:[%s14861_s23 + $0x80] sm:$0xff]   ;;  %v14970_v21 = vcombine.low %v1325_v15, %v1335_v16  ;;  %v1366_v37 = vshll.u32 %v1153_v19, 16  ;;  %v1370_v38 = vshrl.u32 %v1153_v19, 16  ;;  %v1359_v42 = vrot.slane %v1357_v33, 4  ;;  %v1157_v14 = vld [vmem:[%s14861_s23 + $0x28] sm:$0xf] }
  0x27   : > { %v1362_v49 = vrot.slane %v1360_v36, 5  ;;  %v1156_v52 = vld [vmem:[%s14861_s23 + $0x24] sm:$0x1]  ;;  %v3063_v59 = vrot.slane %v2797_v45, 5  ;;  %v1390_v0 = vshrl.u32 %v1155_v51, 16  ;;  %v3062_v5 = vrot.slane %v3060_v58, 4 }
  0x28   : > { %v1372_v54 = vrot.slane %v1370_v38, 4  ;;  %v1396_v2 = vshll.u32 %v1156_v52, 16  ;;  %v14723_v15 = vld [vmem:[%s14861_s23 + $0x94] sm:$0xff]   ;;  %v14724_v16 = vld [vmem:[%s14861_s23 + $0x148] sm:$0xff]   ;;  %v2805_v1 = vld [vmem:[%s14861_s23 + $0x3c] sm:$0xe] }
  0x29   : > { %v1363_v57 = vor.u32 %v1362_v49, %v1359_v42  ;;  %v15014_v19 = vsel %vm14931_vm6, %v3062_v5, %v3063_v59  ;;  %v14726_v33 = vld [vmem:[%s14861_s23 + $0x154] sm:$0xff]   ;;  %v1404_v42 = vshll.u32 %v1157_v14, 16 }
  0x2a   : > { %v1161_v5 = vld [vmem:[%s14861_s23 + $0x38] sm:$0x1] }
  0x2b   : > { %v1364_v3 = vrot.slane %v1363_v57, 4  ;;  %v1160_v57 = vld [vmem:[%s14861_s23 + $0x34] sm:$0xf] }
  0x2d   : > { %14018 = vmatmul.mubr.msk.bf16.gmra.mrb[12].mxu0 %vm569_vm1, %v14707_v22  ;;  %14054 = vmatmul.mubr.msk.bf16.gmra.mrb[12].mxu1 %vm569_vm1, %v14708_v23  ;;  %v1345_v22 = vsel %vm14943_vm7, %v1340_v10, %v1344_v8  ;;  %v1349_v23 = vor.u32 %v1348_v12, %v1344_v8  ;;  %v2799_v8 = vld [vmem:[%s14861_s23 + $0x24] sm:$0x1]  ;;  %v1392_v12 = vrot.slane %v1390_v0, 4 }
  0x2e   : > { %14021 = vmatprep.mubr.msk.bf16.mxu0 %vm569_vm1, %v14709_v24  ;;  %14057 = vmatprep.mubr.msk.bf16.mxu1 %vm569_vm1, %v14710_v25  ;;  %v1354_v24 = vrot.slane %v1352_v13, 5  ;;  %v1154_v25 = vld [vmem:[%s14861_s23 + $0x1c] sm:$0xf]  ;;  %v1398_v13 = vrot.slane %v1396_v2, 5  ;;  %v3069_v36 = vrot.slane %v2799_v8, 5 }
  0x2f   : > { %v1350_v35 = vrot.slane %v1349_v23, 4  ;;  %v1376_v43 = vshll.u32 %v1154_v25, 16  ;;  %v1380_v44 = vshrl.u32 %v1154_v25, 16  ;;  %v14725_v23 = vld [vmem:[%s14861_s23 + $0xa0] sm:$0xff]  }
  0x31   : > { %v1355_v46 = vsel %vm14943_vm7, %v1350_v35, %v1354_v24  ;;  %v1382_v60 = vrot.slane %v1380_v44, 4 }
  0x32   : > { %v14995_v53 = vcombine.low %v1345_v22, %v1355_v46  ;;  %v3065_v22 = vrot.slane %v3063_v59, 4 }
  0x35   : > { %14022 = vmatmul.mubr.msk.bf16.gmra.mrb[16].mxu0 %vm569_vm1, %v14711_v26  ;;  %14058 = vmatmul.mubr.msk.bf16.gmra.mrb[16].mxu1 %vm569_vm1, %v14712_v27  ;;  %v14720_v26 = vld [vmem:[%s14861_s23 + $0x134] sm:$0xff]   ;;  %v14721_v27 = vld [vmem:[%s14861_s23 + $0x8c] sm:$0xff]  }
  0x36   : > { %14025 = vmatprep.mubr.msk.bf16.mxu0 %vm569_vm1, %v14713_v28  ;;  %14061 = vmatprep.mubr.msk.bf16.mxu1 %vm569_vm1, %v14714_v29  ;;  %v14979_v28 = vsel %vm14931_vm6, %v3052_v7, %v3053_v18  ;;  %v3055_v29 = vrot.slane %v3053_v18, 4  ;;  %v2798_v7 = vld [vmem:[%s14861_s23 + $0x20] sm:$0xf] }
  0x38   : > { %v14986_v41 = vsel %vm14931_vm6, %v3055_v29, %v3056_v32  ;;  %v1158_v29 = vld [vmem:[%s14861_s23 + $0x2c] sm:$0xf]  ;;  %v1159_v32 = vld [vmem:[%s14861_s23 + $0x30] sm:$0xf] }
  0x39   : > { %v12306_v47 = vcombine.low %v14979_v28, %v14986_v41  ;;  %v1410_v45 = vshll.u32 %v1158_v29, 16  ;;  %v1414_v46 = vshrl.u32 %v1158_v29, 16  ;;  %v1420_v49 = vshll.u32 %v1159_v32, 16  ;;  %v2808_v41 = vld [vmem:[%s14861_s23 + $0x48] sm:$0xf] }
  0x3b   : > { %v1422_v0 = vrot.slane %v1420_v49, 5  ;;  %v1164_v49 = vld [vmem:[%s14861_s23 + $0x44] sm:$0xf] }
  0x3d   : > { %14026 = vmatmul.mubr.msk.bf16.gmra.mrb[20].mxu0 %vm569_vm1, %v14715_v50  ;;  %14062 = vmatmul.mubr.msk.bf16.gmra.mrb[20].mxu1 %vm569_vm1, %v14716_v55  ;;  %v1368_v50 = vrot.slane %v1366_v37, 5  ;;  %v1378_v55 = vrot.slane %v1376_v43, 5  ;;  %v1401_v37 = vshrl.u32 %v1157_v14, 16  ;;  %v2800_v43 = vld [vmem:[%s14861_s23 + $0x28] sm:$0xe] }
  0x3e   : > { %14029 = vmatprep.mubr.msk.bf16.mxu0 %vm569_vm1, %v14717_v56  ;;  %14065 = vmatprep.mubr.msk.bf16.mxu1 %vm569_vm1, %v14718_v62  ;;  %v12287_v56 = vrot.slane %v2795_v34, 9  ;;  %v1386_v62 = vshll.u32 %v1155_v51, 16  ;;  %v12288_v2 = vrot.slane %v2800_v43, 9 }
  0x3f   : > { %v1373_v61 = vor.u32 %v1372_v54, %v1368_v50  ;;  %v1383_v6 = vor.u32 %v1382_v60, %v1378_v55  ;;  %v1369_v18 = vsel %vm14943_vm7, %v1364_v3, %v1368_v50  ;;  %v1403_v44 = vrot.slane %v1401_v37, 4  ;;  %v2801_v50 = vld [vmem:[%s14861_s23 + $0x2c] sm:$0xf] }
  0x40   : > { %v15003_v4 = vsel %vm14931_vm6, %v12287_v56, %v3060_v58  ;;  %v1388_v10 = vrot.slane %v1386_v62, 5  ;;  %v1406_v54 = vrot.slane %v1404_v42, 5  ;;  %v2802_v56 = vld [vmem:[%s14861_s23 + $0x30] sm:$0xf]  ;;  %v1412_v60 = vrot.slane %v1410_v45, 5 }
  0x41   : > { %v1374_v9 = vrot.slane %v1373_v61, 4  ;;  %v12307_v25 = vcombine.low %v15003_v4, %v15014_v19  ;;  %v1416_v61 = vrot.slane %v1414_v46, 4  ;;  %v3073_v3 = vrot.slane %v2801_v50, 5 }
  0x42   : > { %v1407_v62 = vor.u32 %v1406_v54, %v1403_v44  ;;  %v3076_v8 = vrot.slane %v2802_v56, 5  ;;  %v3092_v19 = vrot.slane %v2808_v41, 5 }
  0x43   : > { %v1379_v24 = vsel %vm14943_vm7, %v1374_v9, %v1378_v55  ;;  %v1424_v55 = vshrl.u32 %v1159_v32, 16  ;;  %v15055_v14 = vsel %vm14931_vm6, %v12288_v2, %v3073_v3  ;;  %v2807_v2 = vld [vmem:[%s14861_s23 + $0x44] sm:$0xf] }
  0x44   : > { %v15024_v34 = vcombine.low %v1369_v18, %v1379_v24  ;;  %v2803_v18 = vld [vmem:[%s14861_s23 + $0x34] sm:$0xf]  ;;  %v1440_v24 = vshll.u32 %v1161_v5, 16 }
  0x45   : > { %14030 = vmatmul.mubr.msk.bf16.gmra.mrb[24].mxu0 %vm569_vm1, %v14719_v20  ;;  %14066 = vmatmul.mubr.msk.bf16.gmra.mrb[24].mxu1 %vm569_vm1, %v14720_v26  ;;  %v1384_v20 = vrot.slane %v1383_v6, 4  ;;  %v1393_v26 = vor.u32 %v1392_v12, %v1388_v10  ;;  %v14727_v6 = vld [vmem:[%s14861_s23 + $0xa8] sm:$0xff]   ;;  %v1426_v9 = vrot.slane %v1424_v55, 4  ;;  %v14728_v12 = vld [vmem:[%s14861_s23 + $0x15c] sm:$0xff]   ;;  %v3079_v45 = vrot.slane %v2803_v18, 5 }
  0x46   : > { %14033 = vmatprep.mubr.msk.bf16.mxu0 %vm569_vm1, %v14721_v27  ;;  %14069 = vmatprep.mubr.msk.bf16.mxu1 %vm569_vm1, %v14722_v40  ;;  %v3066_v27 = vrot.slane %v2798_v7, 5  ;;  %v1417_v7 = vor.u32 %v1416_v61, %v1412_v60  ;;  %v1442_v42 = vrot.slane %v1440_v24, 5  ;;  %v12289_v18 = vrot.slane %v2805_v1, 9 }
  0x47   : > { %v1389_v35 = vsel %vm14943_vm7, %v1384_v20, %v1388_v10  ;;  %v1394_v38 = vrot.slane %v1393_v26, 4  ;;  %v1430_v10 = vshll.u32 %v1160_v57, 16  ;;  %v2804_v26 = vld [vmem:[%s14861_s23 + $0x38] sm:$0x1]  ;;  %v3081_v56 = vrot.slane %v3079_v45, 4 }
  0x48   : > { %v15030_v39 = vsel %vm14931_vm6, %v3065_v22, %v3066_v27  ;;  %v3068_v40 = vrot.slane %v3066_v27, 4  ;;  %v1418_v20 = vrot.slane %v1417_v7, 4  ;;  %v1427_v22 = vor.u32 %v1426_v9, %v1422_v0 }
  0x49   : > { %v1399_v51 = vsel %vm14943_vm7, %v1394_v38, %v1398_v13  ;;  %v1408_v13 = vrot.slane %v1407_v62, 4  ;;  %v3082_v46 = vrot.slane %v2804_v26, 5  ;;  %v1468_v7 = vshrl.u32 %v1164_v49, 16 }
  0x4a   : > { %v15041_v52 = vsel %vm14931_vm6, %v3068_v40, %v3069_v36  ;;  %v15046_v58 = vcombine.low %v1389_v35, %v1399_v51  ;;  %v1162_v35 = vld [vmem:[%s14861_s23 + $0x3c] sm:$0xf]  ;;  %v1163_v36 = vld [vmem:[%s14861_s23 + $0x40] sm:$0xf]  ;;  %v1423_v37 = vsel %vm14943_vm7, %v1418_v20, %v1422_v0  ;;  %v1428_v40 = vrot.slane %v1427_v22, 4 }
  0x4b   : > { %v12308_v59 = vcombine.low %v15030_v39, %v15041_v52  ;;  %v1413_v27 = vsel %vm14943_vm7, %v1408_v13, %v1412_v60  ;;  %v1445_v51 = vshrl.u32 %v1162_v35, 16  ;;  %v1448_v54 = vshll.u32 %v1162_v35, 16  ;;  %v2806_v60 = vld [vmem:[%s14861_s23 + $0x40] sm:$0xf] }
  0x4c   : > { %v15077_v43 = vcombine.low %v1413_v27, %v1423_v37  ;;  %v1454_v55 = vshll.u32 %v1163_v36, 16  ;;  %v1464_v0 = vshll.u32 %v1164_v49, 16  ;;  %v15095_v5 = vsel %vm14931_vm6, %v3081_v56, %v3082_v46  ;;  %v2809_v37 = vld [vmem:[%s14861_s23 + $0x4c] sm:$0x1] }
  0x4d   : > { %14034 = vmatmul.mubr.msk.bf16.gmra.mrb[28].mxu0 %vm569_vm1, %v14723_v15  ;;  %14070 = vmatmul.mubr.msk.bf16.gmra.mrb[28].mxu1 %vm569_vm1, %v14724_v16  ;;  %v3075_v15 = vrot.slane %v3073_v3, 4  ;;  %v1434_v16 = vshrl.u32 %v1160_v57, 16  ;;  %v1458_v57 = vshrl.u32 %v1163_v36, 16  ;;  %v1447_v61 = vrot.slane %v1445_v51, 4  ;;  %v1169_v51 = vld [vmem:[%s14861_s23 + $0x58] sm:$0xf] }
  0x4e   : > { %14037 = vmatprep.mubr.msk.bf16.mxu0 %vm569_vm1, %v14725_v23  ;;  %14073 = vmatprep.mubr.msk.bf16.mxu1 %vm569_vm1, %v14726_v33  ;;  %v1432_v23 = vrot.slane %v1430_v10, 5  ;;  %v3078_v33 = vrot.slane %v3076_v8, 4  ;;  %v1450_v62 = vrot.slane %v1448_v54, 5  ;;  %v1466_v13 = vrot.slane %v1464_v0, 5 }
  0x4f   : > { %v15063_v29 = vsel %vm14931_vm6, %v3075_v15, %v3076_v8  ;;  %v1436_v32 = vrot.slane %v1434_v16, 4  ;;  %v1165_v8 = vld [vmem:[%s14861_s23 + $0x48] sm:$0xf]  ;;  %v1166_v15 = vld [vmem:[%s14861_s23 + $0x4c] sm:$0x1]  ;;  %v3086_v20 = vrot.slane %v2806_v60, 5 }
  0x50   : > { %v12309_v38 = vcombine.low %v15055_v14, %v15063_v29  ;;  %v1433_v50 = vsel %vm14943_vm7, %v1428_v40, %v1432_v23  ;;  %v3089_v22 = vrot.slane %v2807_v2, 5  ;;  %v1470_v24 = vrot.slane %v1468_v7, 4  ;;  %v1167_v40 = vld [vmem:[%s14861_s23 + $0x50] sm:$0xf]  ;;  %v2811_v2 = vld [vmem:[%s14861_s23 + $0x54] sm:$0xf] }
  0x51   : > { %v1437_v44 = vor.u32 %v1436_v32, %v1432_v23  ;;  %v1474_v26 = vshll.u32 %v1165_v8, 16  ;;  %v1478_v27 = vshrl.u32 %v1165_v8, 16  ;;  %v3088_v35 = vrot.slane %v3086_v20, 4  ;;  %v2810_v60 = vld [vmem:[%s14861_s23 + $0x50] sm:$0xe] }
  0x52   : > { %v1484_v28 = vshll.u32 %v1166_v15, 16  ;;  %v1489_v54 = vshrl.u32 %v1167_v40, 16  ;;  %v1508_v8 = vshll.u32 %v1169_v51, 16  ;;  %v1170_v15 = vld [vmem:[%s14861_s23 + $0x5c] sm:$0xf] }
  0x53   : > { %v1438_v11 = vrot.slane %v1437_v44, 4  ;;  %v1476_v36 = vrot.slane %v1474_v26, 5  ;;  %v3091_v44 = vrot.slane %v3089_v22, 4  ;;  %v1518_v26 = vshll.u32 %v1170_v15, 16 }
  0x54   : > { %v1510_v29 = vrot.slane %v1508_v8, 5 }
  0x55   : > { %14038 = vmatmul.mubr.msk.bf16.gmra.mrb[32].mxu0 %vm569_vm1, %v14727_v6  ;;  %14074 = vmatmul.mubr.msk.bf16.gmra.mrb[32].mxu1 %vm569_vm1, %v14728_v12  ;;  %v1443_v3 = vsel %vm14943_vm7, %v1438_v11, %v1442_v42  ;;  %v1460_v6 = vrot.slane %v1458_v57, 4  ;;  %v1451_v12 = vor.u32 %v1450_v62, %v1447_v61  ;;  %v1486_v42 = vrot.slane %v1484_v28, 5 }
  0x56   : > { %14153 = vmatprep.mubr.msk.bf16.mxu0 %vm569_vm1, %v12305_v17  ;;  %14079 = vmatprep.mubr.msk.bf16.mxu1 %vm569_vm1, %v14970_v21  ;;  %v15087_v17 = vsel %vm14931_vm6, %v3078_v33, %v3079_v45  ;;  %v1456_v21 = vrot.slane %v1454_v55, 5  ;;  %v15098_v9 = vcombine.low %v1433_v50, %v1443_v3  ;;  %v15112_v33 = vsel %vm14931_vm6, %v12289_v18, %v3086_v20  ;;  %v1168_v45 = vld [vmem:[%s14861_s23 + $0x54] sm:$0xf] }
  0x57   : > { %v12310_v10 = vcombine.low %v15087_v17, %v15095_v5  ;;  %v1452_v23 = vrot.slane %v1451_v12, 4  ;;  %v1492_v55 = vshll.u32 %v1167_v40, 16  ;;  %v1498_v56 = vshll.u32 %v1168_v45, 16  ;;  %v2812_v12 = vld [vmem:[%s14861_s23 + $0x58] sm:$0xf] }
  0x58   : > { %v1461_v16 = vor.u32 %v1460_v6, %v1456_v21  ;;  %v1502_v57 = vshrl.u32 %v1168_v45, 16  ;;  %v15143_v61 = vsel %vm14931_vm6, %v3091_v44, %v3092_v19  ;;  %v3094_v62 = vrot.slane %v3092_v19, 4 }
  0x59   : > { %v1494_v0 = vrot.slane %v1492_v55, 5  ;;  %v1500_v6 = vrot.slane %v1498_v56, 5  ;;  %v3099_v20 = vrot.slane %v2811_v2, 5  ;;  %v1174_v55 = vld [vmem:[%s14861_s23 + $0x6c] sm:$0xf] }
  0x5a   : > { %v1462_v32 = vrot.slane %v1461_v16, 4  ;;  %v1504_v7 = vrot.slane %v1502_v57, 4  ;;  %v1171_v16 = vld [vmem:[%s14861_s23 + $0x60] sm:$0x1] }
  0x5b   : > { %v3101_v41 = vrot.slane %v3099_v20, 4 }
  0x5c   : > { %v1505_v14 = vor.u32 %v1504_v7, %v1500_v6  ;;  %v1175_v7 = vld [vmem:[%s14861_s23 + $0x70] sm:$0xf] }
  0x5d   : > { %14154 = vmatmul.mubr.msk.bf16.vlgmr.msra.gmra.mrb[36].mxu0 %vm569_vm1, %v12306_v47  ;;  %14080 = vmatmul.mubr.msk.bf16.vlgmr.msra.gmra.mrb[36].mxu1 %vm569_vm1, %v14995_v53  ;;  %v1457_v47 = vsel %vm14943_vm7, %v1452_v23, %v1456_v21  ;;  %v1471_v53 = vor.u32 %v1470_v24, %v1466_v13  ;;  %v1491_v21 = vrot.slane %v1489_v54, 4 }
  0x5e   : > { %14300 = vmatpush3.bf16.msra.mxu0 %v14917_v31  ;;  %14226 = vmatpush3.bf16.msra.mxu1 %v14914_v30  ;;  %v1480_v31 = vrot.slane %v1478_v27, 4  ;;  %v1467_v30 = vsel %vm14943_vm7, %v1462_v32, %v1466_v13  ;;  %v1506_v24 = vrot.slane %v1505_v14, 4  ;;  %v1522_v27 = vshrl.u32 %v1170_v15, 16  ;;  %v1176_v15 = vld [vmem:[%s14861_s23 + $0x74] sm:$0x1] }
  0x5f   : > { %14083 = vmatprep.mubr.msk.bf16.mxu1 %vm569_vm1, %v15024_v34  ;;  %14157 = vmatprep.mubr.msk.bf16.mxu0 %vm569_vm1, %v12307_v25  ;;  %v15130_v34 = vsel %vm14931_vm6, %v3088_v35, %v3089_v22  ;;  %v15133_v46 = vcombine.low %v1457_v47, %v1467_v30  ;;  %v1472_v50 = vrot.slane %v1471_v53, 4  ;;  %v3095_v25 = vrot.slane %v2809_v37, 5  ;;  %v2813_v35 = vld [vmem:[%s14861_s23 + $0x5c] sm:$0xf]  ;;  %v2814_v53 = vld [vmem:[%s14861_s23 + $0x60] sm:$0x1] }
  0x60   : > { %v12311_v49 = vcombine.low %v15112_v33, %v15130_v34  ;;  %v1481_v4 = vor.u32 %v1480_v31, %v1476_v36  ;;  %v1495_v52 = vor.u32 %v1494_v0, %v1491_v21  ;;  %v3102_v22 = vrot.slane %v2812_v12, 5  ;;  %v2817_v0 = vld [vmem:[%s14861_s23 + $0x6c] sm:$0xf] }
  0x61   : > { %v1477_v1 = vsel %vm14943_vm7, %v1472_v50, %v1476_v36  ;;  %v15163_v39 = vsel %vm14931_vm6, %v3094_v62, %v3095_v25  ;;  %v1528_v32 = vshll.u32 %v1171_v16, 16  ;;  %v1172_v36 = vld [vmem:[%s14861_s23 + $0x64] sm:$0xf]  ;;  %v1511_v31 = vsel %vm14943_vm7, %v1506_v24, %v1510_v29 }
  0x62   : > { %v1482_v11 = vrot.slane %v1481_v4, 4  ;;  %v1496_v18 = vrot.slane %v1495_v52, 4  ;;  %v1520_v37 = vrot.slane %v1518_v26, 5  ;;  %v1524_v40 = vrot.slane %v1522_v27, 4 }
  0x63   : > { %v1530_v30 = vrot.slane %v1528_v32, 5  ;;  %v3103_v45 = vsel %vm14931_vm6, %v3101_v41, %v3102_v22  ;;  %v3104_v4 = vrot.slane %v3102_v22, 4  ;;  %v3108_v54 = vrot.slane %v2814_v53, 5  ;;  %v1177_v41 = vld [vmem:[%s14861_s23 + $0x78] sm:$0xf] }
  0x64   : > { %v1487_v3 = vsel %vm14943_vm7, %v1482_v11, %v1486_v42  ;;  %v1173_v42 = vld [vmem:[%s14861_s23 + $0x68] sm:$0xf]  ;;  %v1525_v25 = vor.u32 %v1524_v40, %v1520_v37  ;;  %v1533_v5 = vshrl.u32 %v1172_v36, 16  ;;  %v2815_v11 = vld [vmem:[%s14861_s23 + $0x64] sm:$0xe]  ;;  %v1552_v21 = vshll.u32 %v1174_v55, 16 }
  0x65   : > { %14158 = vmatmul.mubr.msk.bf16.gmra.mrb[40].mxu0 %vm569_vm1, %v12308_v59  ;;  %14084 = vmatmul.mubr.msk.bf16.gmra.mrb[40].mxu1 %vm569_vm1, %v15046_v58  ;;  %v15159_v13 = vcombine.low %v1477_v1, %v1487_v3  ;;  %v1512_v59 = vshrl.u32 %v1169_v51, 16  ;;  %v12312_v58 = vcombine.low %v15143_v61, %v15163_v39  ;;  %v3105_v51 = vrot.slane %v2813_v35, 5  ;;  %v2818_v35 = vld [vmem:[%s14861_s23 + $0x70] sm:$0xf] }
  0x66   : > { %14161 = vmatprep.mubr.msk.bf16.mxu0 %vm569_vm1, %v12309_v38  ;;  %14087 = vmatprep.mubr.msk.bf16.mxu1 %vm569_vm1, %v15077_v43  ;;  %v12290_v38 = vrot.slane %v2810_v60, 9  ;;  %v1501_v43 = vsel %vm14943_vm7, %v1496_v18, %v1500_v6  ;;  %v1542_v1 = vshll.u32 %v1173_v42, 16  ;;  %v1526_v56 = vrot.slane %v1525_v25, 4 }
  0x67   : > { %v1514_v23 = vrot.slane %v1512_v59, 4  ;;  %v12222_v44 = vcombine.low %v1501_v43, %v1511_v31  ;;  %v3107_v33 = vrot.slane %v3105_v51, 4  ;;  %v1546_v34 = vshrl.u32 %v1173_v42, 16  ;;  %v1178_v31 = vld [vmem:[%s14861_s23 + $0x7c] sm:$0xf] }
  0x68   : > { %v15176_v28 = vsel %vm14931_vm6, %v12290_v38, %v3099_v20  ;;  %v1535_v57 = vrot.slane %v1533_v5, 4  ;;  %v1544_v62 = vrot.slane %v1542_v1, 5  ;;  %v1531_v2 = vsel %vm14943_vm7, %v1526_v56, %v1530_v30  ;;  %v2821_v56 = vld [vmem:[%s14861_s23 + $0x7c] sm:$0xf] }
  0x69   : > { %v1515_v47 = vor.u32 %v1514_v23, %v1510_v29  ;;  %v12313_v19 = vcombine.low %v15176_v28, %v3103_v45  ;;  %v1548_v3 = vrot.slane %v1546_v34, 4  ;;  %v1556_v6 = vshrl.u32 %v1174_v55, 16 }
  0x6a   : > { %v1554_v59 = vrot.slane %v1552_v21, 5  ;;  %v12291_v14 = vrot.slane %v2815_v11, 9  ;;  %v3115_v38 = vrot.slane %v2817_v0, 5  ;;  %v1562_v22 = vshll.u32 %v1175_v7, 16 }
  0x6b   : > { %v1516_v50 = vrot.slane %v1515_v47, 4  ;;  %v1549_v16 = vor.u32 %v1548_v3, %v1544_v62  ;;  %v1558_v20 = vrot.slane %v1556_v6, 4  ;;  %v1566_v23 = vshrl.u32 %v1175_v7, 16 }
  0x6c   : > { %v1572_v32 = vshll.u32 %v1176_v15, 16  ;;  %v1564_v61 = vrot.slane %v1562_v22, 5  ;;  %v3118_v45 = vrot.slane %v2818_v35, 5  ;;  %v1590_v55 = vshrl.u32 %v1178_v31, 16 }
  0x6d   : > { %14162 = vmatmul.mubr.msk.bf16.gmra.mrb[44].mxu0 %vm569_vm1, %v12310_v10  ;;  %14088 = vmatmul.mubr.msk.bf16.gmra.mrb[44].mxu1 %vm569_vm1, %v15098_v9  ;;  %v1521_v17 = vsel %vm14943_vm7, %v1516_v50, %v1520_v37  ;;  %v1536_v10 = vshll.u32 %v1172_v36, 16  ;;  %v15204_v9 = vsel %vm14931_vm6, %v3104_v4, %v3105_v51  ;;  %v1550_v24 = vrot.slane %v1549_v16, 4  ;;  %v1179_v4 = vld [vmem:[%s14861_s23 + $0x80] sm:$0xf] }
  0x6e   : > { %14165 = vmatprep.mubr.msk.bf16.mxu0 %vm569_vm1, %v12311_v49  ;;  %14091 = vmatprep.mubr.msk.bf16.mxu1 %vm569_vm1, %v15133_v46  ;;  %v2816_v49 = vld [vmem:[%s14861_s23 + $0x68] sm:$0xf]  ;;  %v3109_v46 = vsel %vm14931_vm6, %v3107_v33, %v3108_v54  ;;  %v15213_v8 = vcombine.low %v1521_v17, %v1531_v2  ;;  %v1559_v28 = vor.u32 %v1558_v20, %v1554_v59  ;;  %v1568_v39 = vrot.slane %v1566_v23, 4  ;;  %v2820_v17 = vld [vmem:[%s14861_s23 + $0x78] sm:$0xe] }
  0x6f   : > { %v1538_v60 = vrot.slane %v1536_v10, 5  ;;  %v12314_v12 = vcombine.low %v15204_v9, %v3109_v46  ;;  %v3112_v29 = vrot.slane %v2816_v49, 5  ;;  %v1555_v47 = vsel %vm14943_vm7, %v1550_v24, %v1554_v59  ;;  %v1180_v2 = vld [vmem:[%s14861_s23 + $0x84] sm:$0xf]  ;;  %v1181_v46 = vld [vmem:[%s14861_s23 + $0x88] sm:$0x1] }
  0x70   : > { %v3117_v36 = vrot.slane %v3115_v38, 4  ;;  %v1560_v30 = vrot.slane %v1559_v28, 4  ;;  %v1569_v42 = vor.u32 %v1568_v39, %v1564_v61  ;;  %v1586_v54 = vshll.u32 %v1178_v31, 16 }
  0x71   : > { %v1539_v52 = vor.u32 %v1538_v60, %v1535_v57  ;;  %v3113_v26 = vsel %vm14931_vm6, %v12291_v14, %v3112_v29  ;;  %v3114_v27 = vrot.slane %v3112_v29, 4  ;;  %v3120_v10 = vrot.slane %v3118_v45, 4  ;;  %v2822_v57 = vld [vmem:[%s14861_s23 + $0x80] sm:$0xf] }
  0x72   : > { %v1565_v25 = vsel %vm14943_vm7, %v1560_v30, %v1564_v61  ;;  %v1570_v51 = vrot.slane %v1569_v42, 4  ;;  %v3119_v5 = vsel %vm14931_vm6, %v3117_v36, %v3118_v45  ;;  %v1588_v33 = vrot.slane %v1586_v54, 5  ;;  %v1183_v61 = vld [vmem:[%s14861_s23 + $0x90] sm:$0xf] }
  0x73   : > { %v1540_v18 = vrot.slane %v1539_v52, 4  ;;  %v3116_v53 = vsel %vm14931_vm6, %v3114_v27, %v3115_v38  ;;  %v1592_v34 = vrot.slane %v1590_v55, 4  ;;  %v1596_v49 = vshll.u32 %v1179_v4, 16  ;;  %v1182_v27 = vld [vmem:[%s14861_s23 + $0x8c] sm:$0xf] }
  0x74   : > { %v12315_v40 = vcombine.low %v3113_v26, %v3116_v53  ;;  %v1600_v0 = vshrl.u32 %v1179_v4, 16  ;;  %v12292_v52 = vrot.slane %v2820_v17, 9  ;;  %v3125_v59 = vrot.slane %v2821_v56, 5  ;;  %v2824_v26 = vld [vmem:[%s14861_s23 + $0x88] sm:$0x1] }
  0x75   : > { %14166 = vmatmul.mubr.msk.bf16.gmra.mrb[48].mxu0 %vm569_vm1, %v12312_v58  ;;  %14092 = vmatmul.mubr.msk.bf16.gmra.mrb[48].mxu1 %vm569_vm1, %v15159_v13  ;;  %v1545_v43 = vsel %vm14943_vm7, %v1540_v18, %v1544_v62  ;;  %v2819_v58 = vld [vmem:[%s14861_s23 + $0x74] sm:$0x1]  ;;  %v1574_v13 = vrot.slane %v1572_v32, 5  ;;  %v1593_v6 = vor.u32 %v1592_v34, %v1588_v33  ;;  %v1598_v7 = vrot.slane %v1596_v49, 5 }
  0x76   : > { %14169 = vmatprep.mubr.msk.bf16.mxu0 %vm569_vm1, %v12313_v19  ;;  %14095 = vmatprep.mubr.msk.bf16.mxu1 %vm569_vm1, %v12222_v44  ;;  %v12224_v37 = vcombine.low %v1545_v43, %v1555_v47  ;;  %v3121_v50 = vrot.slane %v2819_v58, 5  ;;  %v1577_v19 = vshrl.u32 %v1177_v41, 16  ;;  %v1580_v44 = vshll.u32 %v1177_v41, 16 }
  0x77   : > { %v1575_v9 = vsel %vm14943_vm7, %v1570_v51, %v1574_v13  ;;  %v3128_v15 = vrot.slane %v2822_v57, 5  ;;  %v1602_v16 = vrot.slane %v1600_v0, 4  ;;  %v1594_v14 = vrot.slane %v1593_v6, 4  ;;  %v2826_v51 = vld [vmem:[%s14861_s23 + $0x90] sm:$0xf] }
  0x78   : > { %v1579_v1 = vrot.slane %v1577_v19, 4  ;;  %v1582_v11 = vrot.slane %v1580_v44, 5  ;;  %v12225_v60 = vcombine.low %v1565_v25, %v1575_v9  ;;  %v3122_v62 = vsel %vm14931_vm6, %v3120_v10, %v3121_v50  ;;  %v2825_v50 = vld [vmem:[%s14861_s23 + $0x8c] sm:$0xe]  ;;  %v2827_v10 = vld [vmem:[%s14861_s23 + $0x94] sm:$0xf] }
  0x79   : > { %v12316_v3 = vcombine.low %v3119_v5, %v3122_v62  ;;  %v1606_v29 = vshll.u32 %v1180_v2, 16  ;;  %v1610_v38 = vshrl.u32 %v1180_v2, 16  ;;  %v1616_v18 = vshll.u32 %v1181_v46, 16  ;;  %v1186_v62 = vld [vmem:[%s14861_s23 + $0x9c] sm:$0x1] }
  0x7a   : > { %v1583_v21 = vor.u32 %v1582_v11, %v1579_v1  ;;  %v3126_v22 = vsel %vm14931_vm6, %v12292_v52, %v3125_v59  ;;  %v3127_v23 = vrot.slane %v3125_v59, 4  ;;  %v1603_v24 = vor.u32 %v1602_v16, %v1598_v7 }
  0x7b   : > { %v1599_v32 = vsel %vm14943_vm7, %v1594_v14, %v1598_v7  ;;  %v1608_v35 = vrot.slane %v1606_v29, 5  ;;  %v1612_v43 = vrot.slane %v1610_v38, 4  ;;  %v1618_v28 = vrot.slane %v1616_v18, 5  ;;  %v2828_v14 = vld [vmem:[%s14861_s23 + $0x98] sm:$0xf] }
  0x7c   : > { %v3129_v58 = vsel %vm14931_vm6, %v3127_v23, %v3128_v15  ;;  %v1604_v41 = vrot.slane %v1603_v24, 4  ;;  %v3130_v47 = vrot.slane %v3128_v15, 4  ;;  %v3134_v31 = vrot.slane %v2824_v26, 5 }
  0x7d   : > { %14170 = vmatmul.mubr.msk.bf16.gmra.mrb[52].mxu0 %vm569_vm1, %v12314_v12  ;;  %14096 = vmatmul.mubr.msk.bf16.gmra.mrb[52].mxu1 %vm569_vm1, %v15213_v8  ;;  %v1584_v12 = vrot.slane %v1583_v21, 4  ;;  %v2823_v8 = vld [vmem:[%s14861_s23 + $0x84] sm:$0xf]  ;;  %v12317_v53 = vcombine.low %v3126_v22, %v3129_v58  ;;  %v1613_v13 = vor.u32 %v1612_v43, %v1608_v35  ;;  %v1621_v30 = vshrl.u32 %v1182_v27, 16  ;;  %v1187_v22 = vld [vmem:[%s14861_s23 + $0xa0] sm:$0xf] }
  0x7e   : > { %14173 = vmatprep.mubr.msk.bf16.mxu0 %vm569_vm1, %v12315_v40  ;;  %14099 = vmatprep.mubr.msk.bf16.mxu1 %vm569_vm1, %v12224_v37  ;;  %v3131_v36 = vrot.slane %v2823_v8, 5  ;;  %v1184_v37 = vld [vmem:[%s14861_s23 + $0x94] sm:$0xf]  ;;  %v1609_v40 = vsel %vm14943_vm7, %v1604_v41, %v1608_v35  ;;  %v1624_v42 = vshll.u32 %v1182_v27, 16  ;;  %v1630_v45 = vshll.u32 %v1183_v61, 16 }
  0x7f   : > { %v1589_v20 = vsel %vm14943_vm7, %v1584_v12, %v1588_v33  ;;  %v1614_v4 = vrot.slane %v1613_v13, 4  ;;  %v1634_v25 = vshrl.u32 %v1183_v61, 16  ;;  %v1623_v54 = vrot.slane %v1621_v30, 4  ;;  %v1185_v33 = vld [vmem:[%s14861_s23 + $0x98] sm:$0xf] }
  0x80   : > { %v12226_v39 = vcombine.low %v1589_v20, %v1599_v32  ;;  %v3132_v19 = vsel %vm14931_vm6, %v3130_v47, %v3131_v36  ;;  %v3133_v44 = vrot.slane %v3131_v36, 4  ;;  %v1626_v55 = vrot.slane %v1624_v42, 5  ;;  %v2829_v20 = vld [vmem:[%s14861_s23 + $0x9c] sm:$0x1]  ;;  %v1188_v32 = vld [vmem:[%s14861_s23 + $0xa4] sm:$0xf] }
  0x81   : > { %v1632_v17 = vrot.slane %v1630_v45, 5  ;;  %v1640_v5 = vshll.u32 %v1184_v37, 16  ;;  %v1619_v1 = vsel %vm14943_vm7, %v1614_v4, %v1618_v28  ;;  %v1636_v56 = vrot.slane %v1634_v25, 4  ;;  %v1189_v41 = vld [vmem:[%s14861_s23 + $0xa8] sm:$0xf] }
  0x82   : > { %v3135_v11 = vsel %vm14931_vm6, %v3133_v44, %v3134_v31  ;;  %v1644_v9 = vshrl.u32 %v1184_v37, 16  ;;  %v12227_v34 = vcombine.low %v1609_v40, %v1619_v1  ;;  %v1627_v57 = vor.u32 %v1626_v55, %v1623_v54  ;;  %v2830_v40 = vld [vmem:[%s14861_s23 + $0xa0] sm:$0xe]  ;;  %v2831_v4 = vld [vmem:[%s14861_s23 + $0xa4] sm:$0xf] }
  0x83   : > { %v12318_v49 = vcombine.low %v3132_v19, %v3135_v11  ;;  %v1637_v21 = vor.u32 %v1636_v56, %v1632_v17  ;;  %v12293_v0 = vrot.slane %v2825_v50, 9  ;;  %v3138_v2 = vrot.slane %v2826_v51, 5  ;;  %v2832_v54 = vld [vmem:[%s14861_s23 + $0xa8] sm:$0xf]  ;;  %v1190_v1 = vld [vmem:[%s14861_s23 + $0xac] sm:$0xf] }
  0x84   : > { %v3141_v46 = vrot.slane %v2827_v10, 5  ;;  %v1646_v6 = vrot.slane %v1644_v9, 4  ;;  %v1650_v7 = vshll.u32 %v1185_v33, 16  ;;  %v1654_v52 = vshrl.u32 %v1185_v33, 16  ;;  %v1191_v11 = vld [vmem:[%s14861_s23 + $0xb0] sm:$0x1] }
  0x85   : > { %14174 = vmatmul.mubr.msk.bf16.gmra.mrb[56].mxu0 %vm569_vm1, %v12316_v3  ;;  %14100 = vmatmul.mubr.msk.bf16.gmra.mrb[56].mxu1 %vm569_vm1, %v12225_v60  ;;  %v1642_v60 = vrot.slane %v1640_v5, 5  ;;  %v1628_v3 = vrot.slane %v1627_v57, 4  ;;  %v1638_v12 = vrot.slane %v1637_v21, 4  ;;  %v3139_v59 = vsel %vm14931_vm6, %v12293_v0, %v3138_v2 }
  0x86   : > { %14177 = vmatprep.mubr.msk.bf16.mxu0 %vm569_vm1, %v12317_v53  ;;  %14103 = vmatprep.mubr.msk.bf16.mxu1 %vm569_vm1, %v12226_v39  ;;  %v3140_v15 = vrot.slane %v3138_v2, 4  ;;  %v1660_v16 = vshll.u32 %v1186_v62, 16  ;;  %v1652_v18 = vrot.slane %v1650_v7, 5  ;;  %v1656_v8 = vrot.slane %v1654_v52, 4 }
  0x87   : > { %v1633_v29 = vsel %vm14943_vm7, %v1628_v3, %v1632_v17  ;;  %v1647_v38 = vor.u32 %v1646_v6, %v1642_v60  ;;  %v1643_v23 = vsel %vm14943_vm7, %v1638_v12, %v1642_v60  ;;  %v3143_v27 = vrot.slane %v3141_v46, 4  ;;  %v2833_v3 = vld [vmem:[%s14861_s23 + $0xac] sm:$0xf] }
  0x88   : > { %v3142_v24 = vsel %vm14931_vm6, %v3140_v15, %v3141_v46  ;;  %v1662_v26 = vrot.slane %v1660_v16, 5  ;;  %v12228_v35 = vcombine.low %v1633_v29, %v1643_v23  ;;  %v1657_v61 = vor.u32 %v1656_v8, %v1652_v18  ;;  %v1192_v15 = vld [vmem:[%s14861_s23 + $0xb4] sm:$0xf] }
  0x89   : > { %v12319_v43 = vcombine.low %v3139_v59, %v3142_v24  ;;  %v1648_v28 = vrot.slane %v1647_v38, 4  ;;  %v3144_v39 = vrot.slane %v2828_v14, 5  ;;  %v3147_v58 = vrot.slane %v2829_v20, 5  ;;  %v2834_v59 = vld [vmem:[%s14861_s23 + $0xb0] sm:$0x1] }
  0x8a   : > { %v1665_v47 = vshrl.u32 %v1187_v22, 16  ;;  %v1668_v53 = vshll.u32 %v1187_v22, 16  ;;  %v1658_v36 = vrot.slane %v1657_v61, 4  ;;  %v1674_v31 = vshll.u32 %v1188_v32, 16 }
  0x8b   : > { %v1653_v13 = vsel %vm14943_vm7, %v1648_v28, %v1652_v18  ;;  %v1678_v37 = vshrl.u32 %v1188_v32, 16  ;;  %v3145_v30 = vsel %vm14931_vm6, %v3143_v27, %v3144_v39  ;;  %v3146_v42 = vrot.slane %v3144_v39, 4  ;;  %v1193_v18 = vld [vmem:[%s14861_s23 + $0xb8] sm:$0xf] }
  0x8c   : > { %v1667_v45 = vrot.slane %v1665_v47, 4  ;;  %v1670_v50 = vrot.slane %v1668_v53, 5  ;;  %v1663_v19 = vsel %vm14943_vm7, %v1658_v36, %v1662_v26  ;;  %v1676_v44 = vrot.slane %v1674_v31, 5  ;;  %v2836_v36 = vld [vmem:[%s14861_s23 + $0xb8] sm:$0xf] }
  0x8d   : > { %14178 = vmatmul.mubr.msk.bf16.gmra.mrb[60].mxu0 %vm569_vm1, %v12318_v49  ;;  %14104 = vmatmul.mubr.msk.bf16.gmra.mrb[60].mxu1 %vm569_vm1, %v12227_v34  ;;  %v1680_v25 = vrot.slane %v1678_v37, 4  ;;  %v1684_v51 = vshll.u32 %v1189_v41, 16  ;;  %v12229_v55 = vcombine.low %v1653_v13, %v1663_v19  ;;  %v3148_v17 = vsel %vm14931_vm6, %v3146_v42, %v3147_v58  ;;  %v2835_v58 = vld [vmem:[%s14861_s23 + $0xb4] sm:$0xe]  ;;  %v2837_v42 = vld [vmem:[%s14861_s23 + $0xbc] sm:$0xf] }
  0x8e   : > { %14107 = vmatprep.mubr.msk.bf16.mxu1 %vm569_vm1, %v12228_v35  ;;  %14181 = vmatprep.mubr.msk.bf16.mxu0 %vm569_vm1, %v12319_v43  ;;  %v1671_v5 = vor.u32 %v1670_v50, %v1667_v45  ;;  %v1688_v10 = vshrl.u32 %v1189_v41, 16  ;;  %v12320_v56 = vcombine.low %v3145_v30, %v3148_v17  ;;  %v12294_v34 = vrot.slane %v2830_v40, 9  ;;  %v1194_v35 = vld [vmem:[%s14861_s23 + $0xbc] sm:$0xf]  ;;  %v1196_v17 = vld [vmem:[%s14861_s23 + $0xc4] sm:$0x1] }
  0x8f   : > { %v1681_v9 = vor.u32 %v1680_v25, %v1676_v44  ;;  %v1686_v33 = vrot.slane %v1684_v51, 5  ;;  %v3151_v57 = vrot.slane %v2831_v4, 5  ;;  %v3154_v60 = vrot.slane %v2832_v54, 5 }
  0x90   : > { %v1672_v49 = vrot.slane %v1671_v5, 4  ;;  %v1690_v62 = vrot.slane %v1688_v10, 4  ;;  %v1694_v0 = vshll.u32 %v1190_v1, 16  ;;  %v1698_v2 = vshrl.u32 %v1190_v1, 16 }
  0x91   : > { %v1682_v21 = vrot.slane %v1681_v9, 4  ;;  %v1704_v46 = vshll.u32 %v1191_v11, 16  ;;  %v3152_v7 = vsel %vm14931_vm6, %v12294_v34, %v3151_v57  ;;  %v3153_v52 = vrot.slane %v3151_v57, 4 }
  0x92   : > { %v1677_v6 = vsel %vm14943_vm7, %v1672_v49, %v1676_v44  ;;  %v1691_v12 = vor.u32 %v1690_v62, %v1686_v33  ;;  %v1696_v14 = vrot.slane %v1694_v0, 5  ;;  %v1700_v29 = vrot.slane %v1698_v2, 4  ;;  %v1195_v44 = vld [vmem:[%s14861_s23 + $0xc0] sm:$0xf] }
  0x93   : > { %v1687_v16 = vsel %vm14943_vm7, %v1682_v21, %v1686_v33  ;;  %v1706_v38 = vrot.slane %v1704_v46, 5  ;;  %v3155_v20 = vsel %vm14931_vm6, %v3153_v52, %v3154_v60  ;;  %v3156_v23 = vrot.slane %v3154_v60, 4  ;;  %v2838_v21 = vld [vmem:[%s14861_s23 + $0xc0] sm:$0xf] }
  0x94   : > { %v12230_v8 = vcombine.low %v1677_v6, %v1687_v16  ;;  %v1692_v22 = vrot.slane %v1691_v12, 4  ;;  %v12321_v24 = vcombine.low %v3152_v7, %v3155_v20  ;;  %v1701_v26 = vor.u32 %v1700_v29, %v1696_v14  ;;  %v2839_v6 = vld [vmem:[%s14861_s23 + $0xc4] sm:$0x1]  ;;  %v1197_v7 = vld [vmem:[%s14861_s23 + $0xc8] sm:$0xf] }
  0x95   : > { %14108 = vmatmul.mubr.msk.bf16.gmra.mrb[64].mxu1 %vm569_vm1, %v12229_v55  ;;  %14182 = vmatmul.mubr.msk.bf16.gmra.mrb[64].mxu0 %vm569_vm1, %v12320_v56  ;;  %v3157_v27 = vrot.slane %v2833_v3, 5  ;;  %v3160_v32 = vrot.slane %v2834_v59, 5  ;;  %v1709_v28 = vshrl.u32 %v1192_v15, 16  ;;  %v1712_v61 = vshll.u32 %v1192_v15, 16  ;;  %v1198_v16 = vld [vmem:[%s14861_s23 + $0xcc] sm:$0xf] }
  0x96   : > { %14111 = vmatprep.mubr.msk.bf16.mxu1 %vm569_vm1, %v12230_v8  ;;  %v1697_v43 = vsel %vm14943_vm7, %v1692_v22, %v1696_v14  ;;  %v1718_v39 = vshll.u32 %v1193_v18, 16  ;;  %14185 = vmatprep.mubr.msk.bf16.mxu0 %vm569_vm1, %v12321_v24  ;;  %v1702_v41 = vrot.slane %v1701_v26, 4  ;;  %v1722_v13 = vshrl.u32 %v1193_v18, 16  ;;  %v1199_v22 = vld [vmem:[%s14861_s23 + $0xd0] sm:$0xf] }
  0x97   : > { %v3158_v47 = vsel %vm14931_vm6, %v3156_v23, %v3157_v27  ;;  %v3159_v53 = vrot.slane %v3157_v27, 4  ;;  %v1711_v31 = vrot.slane %v1709_v28, 4  ;;  %v1714_v37 = vrot.slane %v1712_v61, 5 }
  0x98   : > { %v1720_v40 = vrot.slane %v1718_v39, 5  ;;  %v1728_v30 = vshll.u32 %v1194_v35, 16  ;;  %v1707_v45 = vsel %vm14943_vm7, %v1702_v41, %v1706_v38  ;;  %v1724_v4 = vrot.slane %v1722_v13, 4  ;;  %v2841_v41 = vld [vmem:[%s14861_s23 + $0xcc] sm:$0xf] }
  0x99   : > { %v3161_v50 = vsel %vm14931_vm6, %v3159_v53, %v3160_v32  ;;  %v1732_v19 = vshrl.u32 %v1194_v35, 16  ;;  %v12231_v25 = vcombine.low %v1697_v43, %v1707_v45  ;;  %v1715_v54 = vor.u32 %v1714_v37, %v1711_v31  ;;  %v2840_v43 = vld [vmem:[%s14861_s23 + $0xc8] sm:$0xe]  ;;  %v2842_v31 = vld [vmem:[%s14861_s23 + $0xd0] sm:$0xf] }
  0x9a   : > { %v12322_v51 = vcombine.low %v3158_v47, %v3161_v50  ;;  %v1730_v55 = vrot.slane %v1728_v30, 5  ;;  %v1725_v5 = vor.u32 %v1724_v4, %v1720_v40  ;;  %v12295_v10 = vrot.slane %v2835_v58, 9  ;;  %v1200_v45 = vld [vmem:[%s14861_s23 + $0xd4] sm:$0xf]  ;;  %v1201_v50 = vld [vmem:[%s14861_s23 + $0xd8] sm:$0x1] }
  0x9b   : > { %v3164_v1 = vrot.slane %v2836_v36, 5  ;;  %v3167_v11 = vrot.slane %v2837_v42, 5  ;;  %v1716_v56 = vrot.slane %v1715_v54, 4  ;;  %v1734_v9 = vrot.slane %v1732_v19, 4 }
  0x9c   : > { %v1738_v33 = vshll.u32 %v1195_v44, 16  ;;  %v1742_v34 = vshrl.u32 %v1195_v44, 16  ;;  %v1726_v49 = vrot.slane %v1725_v5, 4  ;;  %v1748_v62 = vshll.u32 %v1196_v17, 16 }
  0x9d   : > { %14112 = vmatmul.mubr.msk.bf16.gmra.mrb[68].mxu1 %vm569_vm1, %v12231_v25  ;;  %14186 = vmatmul.mubr.msk.bf16.gmra.mrb[68].mxu0 %vm569_vm1, %v12322_v51  ;;  %v3165_v57 = vsel %vm14931_vm6, %v12295_v10, %v3164_v1  ;;  %v3166_v60 = vrot.slane %v3164_v1, 4  ;;  %v1721_v0 = vsel %vm14943_vm7, %v1716_v56, %v1720_v40  ;;  %v1735_v2 = vor.u32 %v1734_v9, %v1730_v55  ;;  %v2843_v56 = vld [vmem:[%s14861_s23 + $0xd4] sm:$0xf] }
  0x9e   : > { %v1740_v46 = vrot.slane %v1738_v33, 5  ;;  %v1744_v3 = vrot.slane %v1742_v34, 4  ;;  %v1731_v52 = vsel %vm14943_vm7, %v1726_v49, %v1730_v55  ;;  %v1750_v59 = vrot.slane %v1748_v62, 5 }
  0x9f   : > { %v3168_v12 = vsel %vm14931_vm6, %v3166_v60, %v3167_v11  ;;  %v3169_v15 = vrot.slane %v3167_v11, 4  ;;  %v12232_v14 = vcombine.low %v1721_v0, %v1731_v52  ;;  %v1736_v38 = vrot.slane %v1735_v2, 4  ;;  %v1202_v60 = vld [vmem:[%s14861_s23 + $0xdc] sm:$0xf] }
  0xa0   : > { %v12323_v29 = vcombine.low %v3165_v57, %v3168_v12  ;;  %v1745_v18 = vor.u32 %v1744_v3, %v1740_v46  ;;  %v3170_v8 = vrot.slane %v2838_v21, 5  ;;  %v3173_v20 = vrot.slane %v2839_v6, 5  ;;  %v2844_v57 = vld [vmem:[%s14861_s23 + $0xd8] sm:$0x1] }
  0xa1   : > { %v1753_v23 = vshrl.u32 %v1197_v7, 16  ;;  %v1756_v24 = vshll.u32 %v1197_v7, 16  ;;  %14115 = vmatprep.mubr.msk.bf16.mxu1 %vm569_vm1, %v12232_v14  ;;  %v1741_v26 = vsel %vm14943_vm7, %v1736_v38, %v1740_v46  ;;  %v1762_v32 = vshll.u32 %v1198_v16, 16  ;;  %v1203_v46 = vld [vmem:[%s14861_s23 + $0xe0] sm:$0xf] }
  0xa2   : > { %14189 = vmatprep.mubr.msk.bf16.mxu0 %vm569_vm1, %v12323_v29  ;;  %v1746_v27 = vrot.slane %v1745_v18, 4  ;;  %v1766_v35 = vshrl.u32 %v1198_v16, 16  ;;  %v3171_v28 = vsel %vm14931_vm6, %v3169_v15, %v3170_v8  ;;  %v3172_v61 = vrot.slane %v3170_v8, 4  ;;  %v1204_v14 = vld [vmem:[%s14861_s23 + $0xe4] sm:$0xf] }
  0xa3   : > { %v1755_v39 = vrot.slane %v1753_v23, 4  ;;  %v1758_v58 = vrot.slane %v1756_v24, 5  ;;  %v1764_v53 = vrot.slane %v1762_v32, 5  ;;  %v1772_v36 = vshll.u32 %v1199_v22, 16  ;;  %v2847_v23 = vld [vmem:[%s14861_s23 + $0xe4] sm:$0xf] }
  0xa4   : > { %v1751_v47 = vsel %vm14943_vm7, %v1746_v27, %v1750_v59  ;;  %v1768_v13 = vrot.slane %v1766_v35, 4  ;;  %v3174_v40 = vsel %vm14931_vm6, %v3172_v61, %v3173_v20  ;;  %v1776_v42 = vshrl.u32 %v1199_v22, 16  ;;  %v2845_v20 = vld [vmem:[%s14861_s23 + $0xdc] sm:$0xe]  ;;  %v2846_v22 = vld [vmem:[%s14861_s23 + $0xe0] sm:$0xf] }
  0xa5   : > { %v12233_v37 = vcombine.low %v1741_v26, %v1751_v47  ;;  %v1759_v30 = vor.u32 %v1758_v58, %v1755_v39  ;;  %v12324_v4 = vcombine.low %v3171_v28, %v3174_v40  ;;  %v1774_v44 = vrot.slane %v1772_v36, 5  ;;  %v1205_v35 = vld [vmem:[%s14861_s23 + $0xe8] sm:$0xf]  ;;  %v12793_v58 = vld [vmem:[%s18471_s1 + $0x14] sm:$0xf] }
  0xa6   : > { %v1769_v19 = vor.u32 %v1768_v13, %v1764_v53  ;;  %v12296_v25 = vrot.slane %v2840_v43, 9  ;;  %v3177_v54 = vrot.slane %v2841_v41, 5  ;;  %v3180_v55 = vrot.slane %v2842_v31, 5  ;;  %14677 = vmatprep.subr.msk.bf16.mxu1 %vm678_vm0, %v12793_v58 }
  0xa7   : > { %14116 = vmatmul.mubr.msk.bf16.gmra.mrb[72].mxu1 %vm569_vm1, %v12233_v37  ;;  %v1760_v51 = vrot.slane %v1759_v30, 4  ;;  %v1778_v17 = vrot.slane %v1776_v42, 4  ;;  %14190 = vmatmul.mubr.msk.bf16.gmra.mrb[72].mxu0 %vm569_vm1, %v12324_v4  ;;  %v1782_v10 = vshll.u32 %v1200_v45, 16  ;;  %v1786_v1 = vshrl.u32 %v1200_v45, 16  ;;  %v1206_v30 = vld [vmem:[%s14861_s23 + $0xec] sm:$0x1] }
  0xa8   : > { %v1770_v5 = vrot.slane %v1769_v19, 4  ;;  %v1792_v11 = vshll.u32 %v1201_v50, 16  ;;  %v3178_v33 = vsel %vm14931_vm6, %v12296_v25, %v3177_v54  ;;  %v3179_v34 = vrot.slane %v3177_v54, 4  ;;  %v15413_v19 = vld [vmem:[%s18471_s1 + $0x18] sm:$0xf] }
  0xa9   : > { %v1765_v9 = vsel %vm14943_vm7, %v1760_v51, %v1764_v53  ;;  %v1779_v49 = vor.u32 %v1778_v17, %v1774_v44  ;;  %v1784_v21 = vrot.slane %v1782_v10, 5  ;;  %v1788_v0 = vrot.slane %v1786_v1, 4  ;;  %14678 = vmatprep.subr.msk.bf16.mxu0 %vm678_vm0, %v15413_v19 }
  0xaa   : > { %v1775_v62 = vsel %vm14943_vm7, %v1770_v5, %v1774_v44  ;;  %v1794_v2 = vrot.slane %v1792_v11, 5  ;;  %v3181_v6 = vsel %vm14931_vm6, %v3179_v34, %v3180_v55  ;;  %v3182_v52 = vrot.slane %v3180_v55, 4  ;;  %v2848_v55 = vld [vmem:[%s14861_s23 + $0xe8] sm:$0xf]  ;;  %v2849_v34 = vld [vmem:[%s14861_s23 + $0xec] sm:$0x1] }
  0xab   : > { %v12234_v3 = vcombine.low %v1765_v9, %v1775_v62  ;;  %v1780_v7 = vrot.slane %v1779_v49, 4  ;;  %v12325_v12 = vcombine.low %v3178_v33, %v3181_v6  ;;  %v1789_v59 = vor.u32 %v1788_v0, %v1784_v21  ;;  %v1207_v49 = vld [vmem:[%s14861_s23 + $0xf0] sm:$0xf]  ;;  %v1208_v0 = vld [vmem:[%s14861_s23 + $0xf4] sm:$0xf] }
  0xac   : > { %v3183_v15 = vrot.slane %v2843_v56, 5  ;;  %v3186_v16 = vrot.slane %v2844_v57, 5  ;;  %v1797_v38 = vshrl.u32 %v1202_v60, 16  ;;  %v1800_v18 = vshll.u32 %v1202_v60, 16 }
  0xad   : > { %14119 = vmatprep.mubr.msk.bf16.mxu1 %vm569_vm1, %v12234_v3  ;;  %v1785_v29 = vsel %vm14943_vm7, %v1780_v7, %v1784_v21  ;;  %v1806_v8 = vshll.u32 %v1203_v46, 16  ;;  %14193 = vmatprep.mubr.msk.bf16.mxu0 %vm569_vm1, %v12325_v12  ;;  %v1790_v24 = vrot.slane %v1789_v59, 4  ;;  %v1810_v32 = vshrl.u32 %v1203_v46, 16  ;;  %v1209_v7 = vld [vmem:[%s14861_s23 + $0xf8] sm:$0xf] }
  0xae   : > { %v3184_v26 = vsel %vm14931_vm6, %v3182_v52, %v3183_v15  ;;  %v3185_v27 = vrot.slane %v3183_v15, 4  ;;  %v1799_v43 = vrot.slane %v1797_v38, 4  ;;  %v1802_v28 = vrot.slane %v1800_v18, 5 }
  0xaf   : > { %v1808_v61 = vrot.slane %v1806_v8, 5  ;;  %v1816_v39 = vshll.u32 %v1204_v14, 16  ;;  %v1795_v41 = vsel %vm14943_vm7, %v1790_v24, %v1794_v2  ;;  %v1812_v53 = vrot.slane %v1810_v32, 4  ;;  %v2851_v8 = vld [vmem:[%s14861_s23 + $0xf4] sm:$0xf] }
  0xb0   : > { %v3187_v47 = vsel %vm14931_vm6, %v3185_v27, %v3186_v16  ;;  %v1820_v13 = vshrl.u32 %v1204_v14, 16  ;;  %v12235_v36 = vcombine.low %v1785_v29, %v1795_v41  ;;  %v1803_v37 = vor.u32 %v1802_v28, %v1799_v43  ;;  %v2850_v16 = vld [vmem:[%s14861_s23 + $0xf0] sm:$0xe]  ;;  %v2852_v43 = vld [vmem:[%s14861_s23 + $0xf8] sm:$0xf] }
  0xb1   : > { %v12326_v31 = vcombine.low %v3184_v26, %v3187_v47  ;;  %v1818_v40 = vrot.slane %v1816_v39, 5  ;;  %v1813_v42 = vor.u32 %v1812_v53, %v1808_v61  ;;  %v12297_v45 = vrot.slane %v2845_v20, 9  ;;  %v1210_v41 = vld [vmem:[%s14861_s23 + $0xfc] sm:$0xf]  ;;  %v1211_v47 = vld [vmem:[%s14861_s23 + $0x100] sm:$0x1] }
  0xb2   : > { %v3190_v50 = vrot.slane %v2846_v22, 5  ;;  %v3193_v4 = vrot.slane %v2847_v23, 5  ;;  %14120 = vmatmul.mubr.msk.bf16.gmra.mrb[76].mxu1 %vm569_vm1, %v12235_v36  ;;  %v1804_v44 = vrot.slane %v1803_v37, 4  ;;  %v1822_v25 = vrot.slane %v1820_v13, 4 }
  0xb3   : > { %14194 = vmatmul.mubr.msk.bf16.gmra.mrb[76].mxu0 %vm569_vm1, %v12326_v31  ;;  %v1826_v51 = vshll.u32 %v1205_v35, 16  ;;  %v1830_v54 = vshrl.u32 %v1205_v35, 16  ;;  %v1814_v17 = vrot.slane %v1813_v42, 4  ;;  %v1836_v1 = vshll.u32 %v1206_v30, 16 }
  0xb4   : > { %v3191_v5 = vsel %vm14931_vm6, %v12297_v45, %v3190_v50  ;;  %v3192_v10 = vrot.slane %v3190_v50, 4  ;;  %v1809_v11 = vsel %vm14943_vm7, %v1804_v44, %v1808_v61  ;;  %v1823_v56 = vor.u32 %v1822_v25, %v1818_v40  ;;  %v2853_v45 = vld [vmem:[%s14861_s23 + $0xfc] sm:$0xf]  ;;  %v2854_v50 = vld [vmem:[%s14861_s23 + $0x100] sm:$0x1] }
  0xb5   : > { %v1828_v9 = vrot.slane %v1826_v51, 5  ;;  %v1832_v33 = vrot.slane %v1830_v54, 4  ;;  %v1819_v57 = vsel %vm14943_vm7, %v1814_v17, %v1818_v40  ;;  %v1838_v62 = vrot.slane %v1836_v1, 5  ;;  %v1212_v54 = vld [vmem:[%s14861_s23 + $0x104] sm:$0xf] }
  0xb6   : > { %v3194_v60 = vsel %vm14931_vm6, %v3192_v10, %v3193_v4  ;;  %v3195_v21 = vrot.slane %v3193_v4, 4  ;;  %v12236_v2 = vcombine.low %v1809_v11, %v1819_v57  ;;  %v1824_v3 = vrot.slane %v1823_v56, 4 }
  0xb7   : > { %v12327_v46 = vcombine.low %v3191_v5, %v3194_v60  ;;  %v1833_v6 = vor.u32 %v1832_v33, %v1828_v9  ;;  %v3196_v52 = vrot.slane %v2848_v55, 5  ;;  %v3199_v12 = vrot.slane %v2849_v34, 5  ;;  %v1213_v33 = vld [vmem:[%s14861_s23 + $0x108] sm:$0xf] }
  0xb8   : > { %v1841_v59 = vshrl.u32 %v1207_v49, 16  ;;  %v1844_v15 = vshll.u32 %v1207_v49, 16  ;;  %14123 = vmatprep.mubr.msk.bf16.mxu1 %vm569_vm1, %v12236_v2  ;;  %v1829_v14 = vsel %vm14943_vm7, %v1824_v3, %v1828_v9  ;;  %v1850_v38 = vshll.u32 %v1208_v0, 16 }
  0xb9   : > { %14197 = vmatprep.mubr.msk.bf16.mxu0 %vm569_vm1, %v12327_v46  ;;  %v1834_v29 = vrot.slane %v1833_v6, 4  ;;  %v1854_v18 = vshrl.u32 %v1208_v0, 16  ;;  %v3197_v20 = vsel %vm14931_vm6, %v3195_v21, %v3196_v52  ;;  %v3198_v22 = vrot.slane %v3196_v52, 4 }
  0xba   : > { %v1843_v23 = vrot.slane %v1841_v59, 4  ;;  %v1846_v24 = vrot.slane %v1844_v15, 5  ;;  %v1852_v27 = vrot.slane %v1850_v38, 5  ;;  %v1860_v35 = vshll.u32 %v1209_v7, 16  ;;  %v2856_v59 = vld [vmem:[%s14861_s23 + $0x108] sm:$0xf] }
  0xbb   : > { %v1839_v26 = vsel %vm14943_vm7, %v1834_v29, %v1838_v62  ;;  %v1856_v32 = vrot.slane %v1854_v18, 4  ;;  %v3200_v61 = vsel %vm14931_vm6, %v3198_v22, %v3199_v12  ;;  %v1864_v58 = vshrl.u32 %v1209_v7, 16  ;;  %v1214_v62 = vld [vmem:[%s14861_s23 + $0x10c] sm:$0xf]  ;;  %v2855_v12 = vld [vmem:[%s14861_s23 + $0x104] sm:$0xe] }
  0xbc   : > { %v12237_v28 = vcombine.low %v1829_v14, %v1839_v26  ;;  %v1847_v39 = vor.u32 %v1846_v24, %v1843_v23  ;;  %v12328_v53 = vcombine.low %v3197_v20, %v3200_v61  ;;  %v1862_v36 = vrot.slane %v1860_v35, 5  ;;  %v2857_v38 = vld [vmem:[%s14861_s23 + $0x10c] sm:$0xf] }
  0xbd   : > { %v1857_v13 = vor.u32 %v1856_v32, %v1852_v27  ;;  %v12298_v31 = vrot.slane %v2850_v16, 9  ;;  %v3203_v40 = vrot.slane %v2851_v8, 5  ;;  %v3206_v30 = vrot.slane %v2852_v43, 5  ;;  %v1215_v32 = vld [vmem:[%s14861_s23 + $0x110] sm:$0xf] }
  0xbe   : > { %14124 = vmatmul.mubr.msk.bf16.gmra.mrb[80].mxu1 %vm569_vm1, %v12237_v28  ;;  %v1848_v37 = vrot.slane %v1847_v39, 4  ;;  %v1866_v42 = vrot.slane %v1864_v58, 4  ;;  %14198 = vmatmul.mubr.msk.bf16.gmra.mrb[80].mxu0 %vm569_vm1, %v12328_v53  ;;  %v1870_v44 = vshll.u32 %v1210_v41, 16  ;;  %v1874_v25 = vshrl.u32 %v1210_v41, 16  ;;  %v1216_v39 = vld [vmem:[%s14861_s23 + $0x114] sm:$0x1] }
  0xbf   : > { %v1858_v4 = vrot.slane %v1857_v13, 4  ;;  %v1880_v51 = vshll.u32 %v1211_v47, 16  ;;  %v3204_v17 = vsel %vm14931_vm6, %v12298_v31, %v3203_v40  ;;  %v3205_v5 = vrot.slane %v3203_v40, 4  ;;  %v2858_v40 = vld [vmem:[%s14861_s23 + $0x110] sm:$0xf] }
  0xc0   : > { %v1853_v55 = vsel %vm14943_vm7, %v1848_v37, %v1852_v27  ;;  %v1867_v10 = vor.u32 %v1866_v42, %v1862_v36  ;;  %v1872_v11 = vrot.slane %v1870_v44, 5  ;;  %v1876_v56 = vrot.slane %v1874_v25, 4 }
  0xc1   : > { %v1863_v1 = vsel %vm14943_vm7, %v1858_v4, %v1862_v36  ;;  %v1882_v9 = vrot.slane %v1880_v51, 5  ;;  %v3207_v49 = vsel %vm14931_vm6, %v3205_v5, %v3206_v30  ;;  %v3208_v60 = vrot.slane %v3206_v30, 4  ;;  %v2859_v4 = vld [vmem:[%s14861_s23 + $0x114] sm:$0x1] }
  0xc2   : > { %v12238_v34 = vcombine.low %v1853_v55, %v1863_v1  ;;  %v1868_v57 = vrot.slane %v1867_v10, 4  ;;  %v12329_v21 = vcombine.low %v3204_v17, %v3207_v49  ;;  %v1877_v0 = vor.u32 %v1876_v56, %v1872_v11  ;;  %v1217_v55 = vld [vmem:[%s14861_s23 + $0x118] sm:$0xf]  ;;  %v1219_v49 = vld [vmem:[%s14861_s23 + $0x120] sm:$0xf] }
  0xc3   : > { %v3209_v2 = vrot.slane %v2853_v45, 5  ;;  %v3212_v46 = vrot.slane %v2854_v50, 5  ;;  %v1885_v6 = vshrl.u32 %v1212_v54, 16  ;;  %v1888_v7 = vshll.u32 %v1212_v54, 16 }
  0xc4   : > { %14127 = vmatprep.mubr.msk.bf16.mxu1 %vm569_vm1, %v12238_v34  ;;  %v1873_v3 = vsel %vm14943_vm7, %v1868_v57, %v1872_v11  ;;  %v1894_v52 = vshll.u32 %v1213_v33, 16  ;;  %14201 = vmatprep.mubr.msk.bf16.mxu0 %vm569_vm1, %v12329_v21  ;;  %v1878_v15 = vrot.slane %v1877_v0, 4  ;;  %v1898_v29 = vshrl.u32 %v1213_v33, 16  ;;  %v1218_v11 = vld [vmem:[%s14861_s23 + $0x11c] sm:$0xf] }
  0xc5   : > { %v3210_v16 = vsel %vm14931_vm6, %v3208_v60, %v3209_v2  ;;  %v3211_v14 = vrot.slane %v3209_v2, 4  ;;  %v1887_v18 = vrot.slane %v1885_v6, 4  ;;  %v1890_v8 = vrot.slane %v1888_v7, 5  ;;  %v2860_v0 = vld [vmem:[%s14861_s23 + $0x118] sm:$0xe] }
  0xc6   : > { %v1896_v20 = vrot.slane %v1894_v52, 5  ;;  %v1904_v22 = vshll.u32 %v1214_v62, 16  ;;  %v1883_v23 = vsel %vm14943_vm7, %v1878_v15, %v1882_v9  ;;  %v1900_v26 = vrot.slane %v1898_v29, 4  ;;  %v2861_v7 = vld [vmem:[%s14861_s23 + $0x11c] sm:$0xf] }
  0xc7   : > { %v3213_v24 = vsel %vm14931_vm6, %v3211_v14, %v3212_v46  ;;  %v1908_v27 = vshrl.u32 %v1214_v62, 16  ;;  %v12239_v35 = vcombine.low %v1873_v3, %v1883_v23  ;;  %v1891_v28 = vor.u32 %v1890_v8, %v1887_v18  ;;  %v2862_v52 = vld [vmem:[%s14861_s23 + $0x120] sm:$0xf]  ;;  %v1220_v14 = vld [vmem:[%s14861_s23 + $0x124] sm:$0xf] }
  0xc8   : > { %v12330_v43 = vcombine.low %v3210_v16, %v3213_v24  ;;  %v1906_v61 = vrot.slane %v1904_v22, 5  ;;  %v1901_v58 = vor.u32 %v1900_v26, %v1896_v20  ;;  %v12299_v41 = vrot.slane %v2855_v12, 9 }
  0xc9   : > { %v3216_v47 = vrot.slane %v2856_v59, 5  ;;  %v3219_v53 = vrot.slane %v2857_v38, 5  ;;  %14128 = vmatmul.mubr.msk.bf16.gmra.mrb[84].mxu1 %vm569_vm1, %v12239_v35  ;;  %v1892_v13 = vrot.slane %v1891_v28, 4  ;;  %v1910_v36 = vrot.slane %v1908_v27, 4 }
  0xca   : > { %14202 = vmatmul.mubr.msk.bf16.gmra.mrb[84].mxu0 %vm569_vm1, %v12330_v43  ;;  %v1914_v31 = vshll.u32 %v1215_v32, 16  ;;  %v1918_v37 = vshrl.u32 %v1215_v32, 16  ;;  %v1902_v30 = vrot.slane %v1901_v58, 4  ;;  %v1924_v50 = vshll.u32 %v1216_v39, 16 }
  0xcb   : > { %v3217_v42 = vsel %vm14931_vm6, %v12299_v41, %v3216_v47  ;;  %v3218_v45 = vrot.slane %v3216_v47, 4  ;;  %v1897_v44 = vsel %vm14943_vm7, %v1892_v13, %v1896_v20  ;;  %v1911_v25 = vor.u32 %v1910_v36, %v1906_v61  ;;  %v1221_v20 = vld [vmem:[%s14861_s23 + $0x128] sm:$0x1]  ;;  %v2863_v41 = vld [vmem:[%s14861_s23 + $0x124] sm:$0xf] }
  0xcc   : > { %v1916_v51 = vrot.slane %v1914_v31, 5  ;;  %v1920_v54 = vrot.slane %v1918_v37, 4  ;;  %v1907_v17 = vsel %vm14943_vm7, %v1902_v30, %v1906_v61  ;;  %v1926_v10 = vrot.slane %v1924_v50, 5  ;;  %v2864_v47 = vld [vmem:[%s14861_s23 + $0x128] sm:$0x1] }
  0xcd   : > { %v3220_v5 = vsel %vm14931_vm6, %v3218_v45, %v3219_v53  ;;  %v3221_v1 = vrot.slane %v3219_v53, 4  ;;  %v12240_v56 = vcombine.low %v1897_v44, %v1907_v17  ;;  %v1912_v33 = vrot.slane %v1911_v25, 4  ;;  %v1222_v45 = vld [vmem:[%s14861_s23 + $0x12c] sm:$0xf] }
  0xce   : > { %v12331_v9 = vcombine.low %v3217_v42, %v3220_v5  ;;  %v1921_v34 = vor.u32 %v1920_v54, %v1916_v51  ;;  %v3222_v57 = vrot.slane %v2858_v40, 5  ;;  %v3225_v60 = vrot.slane %v2859_v4, 5 }
  0xcf   : > { %v1929_v62 = vshrl.u32 %v1217_v55, 16  ;;  %v1932_v21 = vshll.u32 %v1217_v55, 16  ;;  %14131 = vmatprep.mubr.msk.bf16.mxu1 %vm569_vm1, %v12240_v56  ;;  %v1917_v2 = vsel %vm14943_vm7, %v1912_v33, %v1916_v51  ;;  %v1938_v3 = vshll.u32 %v1218_v11, 16  ;;  %v1223_v51 = vld [vmem:[%s14861_s23 + $0x130] sm:$0xf] }
  0xd0   : > { %14205 = vmatprep.mubr.msk.bf16.mxu0 %vm569_vm1, %v12331_v9  ;;  %v1922_v46 = vrot.slane %v1921_v34, 4  ;;  %v1942_v6 = vshrl.u32 %v1218_v11, 16  ;;  %v3223_v12 = vsel %vm14931_vm6, %v3221_v1, %v3222_v57  ;;  %v3224_v59 = vrot.slane %v3222_v57, 4  ;;  %v1224_v9 = vld [vmem:[%s14861_s23 + $0x134] sm:$0xf] }
  0xd1   : > { %v1931_v15 = vrot.slane %v1929_v62, 4  ;;  %v1934_v16 = vrot.slane %v1932_v21, 5  ;;  %v1940_v38 = vrot.slane %v1938_v3, 5  ;;  %v1948_v8 = vshll.u32 %v1219_v49, 16  ;;  %v2866_v62 = vld [vmem:[%s14861_s23 + $0x130] sm:$0xf] }
  0xd2   : > { %v1927_v29 = vsel %vm14943_vm7, %v1922_v46, %v1926_v10  ;;  %v1944_v18 = vrot.slane %v1942_v6, 4  ;;  %v3226_v23 = vsel %vm14931_vm6, %v3224_v59, %v3225_v60  ;;  %v1952_v26 = vshrl.u32 %v1219_v49, 16  ;;  %v2865_v60 = vld [vmem:[%s14861_s23 + $0x12c] sm:$0xe]  ;;  %v2867_v21 = vld [vmem:[%s14861_s23 + $0x134] sm:$0xf] }
  0xd3   : > { %v12241_v22 = vcombine.low %v1917_v2, %v1927_v29  ;;  %v1935_v24 = vor.u32 %v1934_v16, %v1931_v15  ;;  %v12332_v27 = vcombine.low %v3223_v12, %v3226_v23  ;;  %v1950_v35 = vrot.slane %v1948_v8, 5  ;;  %v1225_v29 = vld [vmem:[%s14861_s23 + $0x138] sm:$0xf] }
  0xd4   : > { %v1945_v32 = vor.u32 %v1944_v18, %v1940_v38  ;;  %v12300_v43 = vrot.slane %v2860_v0, 9  ;;  %v3229_v61 = vrot.slane %v2861_v7, 5  ;;  %v3232_v39 = vrot.slane %v2862_v52, 5 }
  0xd5   : > { %14132 = vmatmul.mubr.msk.bf16.gmra.mrb[88].mxu1 %vm569_vm1, %v12241_v22  ;;  %v1936_v28 = vrot.slane %v1935_v24, 4  ;;  %v1954_v58 = vrot.slane %v1952_v26, 4  ;;  %14206 = vmatmul.mubr.msk.bf16.gmra.mrb[88].mxu0 %vm569_vm1, %v12332_v27  ;;  %v1958_v13 = vshll.u32 %v1220_v14, 16  ;;  %v1962_v36 = vshrl.u32 %v1220_v14, 16 }
  0xd6   : > { %v1946_v53 = vrot.slane %v1945_v32, 4  ;;  %v1968_v31 = vshll.u32 %v1221_v20, 16  ;;  %v3230_v40 = vsel %vm14931_vm6, %v12300_v43, %v3229_v61  ;;  %v3231_v30 = vrot.slane %v3229_v61, 4  ;;  %v2868_v61 = vld [vmem:[%s14861_s23 + $0x138] sm:$0xf] }
  0xd7   : > { %v1941_v37 = vsel %vm14943_vm7, %v1936_v28, %v1940_v38  ;;  %v1955_v42 = vor.u32 %v1954_v58, %v1950_v35  ;;  %v1960_v4 = vrot.slane %v1958_v13, 5  ;;  %v1964_v44 = vrot.slane %v1962_v36, 4  ;;  %v1226_v38 = vld [vmem:[%s14861_s23 + $0x13c] sm:$0x1]  ;;  %v1227_v58 = vld [vmem:[%s14861_s23 + $0x140] sm:$0xf] }
  0xd8   : > { %v1951_v50 = vsel %vm14943_vm7, %v1946_v53, %v1950_v35  ;;  %v1970_v25 = vrot.slane %v1968_v31, 5  ;;  %v3233_v55 = vsel %vm14931_vm6, %v3231_v30, %v3232_v39  ;;  %v3234_v5 = vrot.slane %v3232_v39, 4  ;;  %v2869_v39 = vld [vmem:[%s14861_s23 + $0x13c] sm:$0x1]  ;;  %v1228_v36 = vld [vmem:[%s14861_s23 + $0x144] sm:$0xf] }
  0xd9   : > { %v12242_v54 = vcombine.low %v1941_v37, %v1951_v50  ;;  %v1956_v17 = vrot.slane %v1955_v42, 4  ;;  %v12333_v10 = vcombine.low %v3230_v40, %v3233_v55  ;;  %v1965_v1 = vor.u32 %v1964_v44, %v1960_v4 }
  0xda   : > { %v3235_v11 = vrot.slane %v2863_v41, 5  ;;  %v3238_v56 = vrot.slane %v2864_v47, 5  ;;  %v1973_v34 = vshrl.u32 %v1222_v45, 16  ;;  %v1976_v49 = vshll.u32 %v1222_v45, 16 }
  0xdb   : > { %14135 = vmatprep.mubr.msk.bf16.mxu1 %vm569_vm1, %v12242_v54  ;;  %v1961_v33 = vsel %vm14943_vm7, %v1956_v17, %v1960_v4  ;;  %v1982_v57 = vshll.u32 %v1223_v51, 16  ;;  %14209 = vmatprep.mubr.msk.bf16.mxu0 %vm569_vm1, %v12333_v10  ;;  %v1966_v0 = vrot.slane %v1965_v1, 4  ;;  %v1986_v3 = vshrl.u32 %v1223_v51, 16 }
  0xdc   : > { %v3236_v2 = vsel %vm14931_vm6, %v3234_v5, %v3235_v11  ;;  %v3237_v46 = vrot.slane %v3235_v11, 4  ;;  %v1975_v6 = vrot.slane %v1973_v34, 4  ;;  %v1978_v7 = vrot.slane %v1976_v49, 5  ;;  %v1229_v11 = vld [vmem:[%s14861_s23 + $0x148] sm:$0xf] }
  0xdd   : > { %v1984_v52 = vrot.slane %v1982_v57, 5  ;;  %v1992_v12 = vshll.u32 %v1224_v9, 16  ;;  %v1971_v59 = vsel %vm14943_vm7, %v1966_v0, %v1970_v25  ;;  %v1988_v16 = vrot.slane %v1986_v3, 4  ;;  %v2871_v3 = vld [vmem:[%s14861_s23 + $0x144] sm:$0xf] }
  0xde   : > { %v3239_v15 = vsel %vm14931_vm6, %v3237_v46, %v3238_v56  ;;  %v1996_v14 = vshrl.u32 %v1224_v9, 16  ;;  %v12243_v18 = vcombine.low %v1961_v33, %v1971_v59  ;;  %v1979_v20 = vor.u32 %v1978_v7, %v1975_v6  ;;  %v2872_v6 = vld [vmem:[%s14861_s23 + $0x148] sm:$0xf] }
  0xdf   : > { %v12334_v8 = vcombine.low %v3236_v2, %v3239_v15  ;;  %v1994_v22 = vrot.slane %v1992_v12, 5  ;;  %v1989_v23 = vor.u32 %v1988_v16, %v1984_v52  ;;  %v12301_v24 = vrot.slane %v2865_v60, 9  ;;  %v2870_v60 = vld [vmem:[%s14861_s23 + $0x140] sm:$0xe] }
  0xe0   : > { %v3242_v26 = vrot.slane %v2866_v62, 5  ;;  %v3245_v27 = vrot.slane %v2867_v21, 5  ;;  %14136 = vmatmul.mubr.msk.bf16.gmra.mrb[92].mxu1 %vm569_vm1, %v12243_v18  ;;  %v1980_v32 = vrot.slane %v1979_v20, 4  ;;  %v1998_v35 = vrot.slane %v1996_v14, 4 }
  0xe1   : > { %14210 = vmatmul.mubr.msk.bf16.gmra.mrb[92].mxu0 %vm569_vm1, %v12334_v8  ;;  %v2002_v43 = vshll.u32 %v1225_v29, 16  ;;  %v2006_v28 = vshrl.u32 %v1225_v29, 16  ;;  %v1990_v41 = vrot.slane %v1989_v23, 4  ;;  %v2012_v13 = vshll.u32 %v1226_v38, 16  ;;  %v1231_v23 = vld [vmem:[%s14861_s23 + $0x150] sm:$0x1] }
  0xe2   : > { %v3243_v47 = vsel %vm14931_vm6, %v12301_v24, %v3242_v26  ;;  %v3244_v53 = vrot.slane %v3242_v26, 4  ;;  %v1985_v37 = vsel %vm14943_vm7, %v1980_v32, %v1984_v52  ;;  %v1999_v40 = vor.u32 %v1998_v35, %v1994_v22 }
  0xe3   : > { %v2004_v30 = vrot.slane %v2002_v43, 5  ;;  %v2008_v42 = vrot.slane %v2006_v28, 4  ;;  %v1995_v4 = vsel %vm14943_vm7, %v1990_v41, %v1994_v22  ;;  %v2014_v25 = vrot.slane %v2012_v13, 5  ;;  %v1230_v22 = vld [vmem:[%s14861_s23 + $0x14c] sm:$0xf] }
  0xe4   : > { %v3246_v44 = vsel %vm14931_vm6, %v3244_v53, %v3245_v27  ;;  %v3247_v51 = vrot.slane %v3245_v27, 4  ;;  %v12244_v17 = vcombine.low %v1985_v37, %v1995_v4  ;;  %v2000_v10 = vrot.slane %v1999_v40, 4  ;;  %v2874_v53 = vld [vmem:[%s14861_s23 + $0x150] sm:$0x1] }
  0xe5   : > { %v12335_v5 = vcombine.low %v3243_v47, %v3246_v44  ;;  %v2009_v1 = vor.u32 %v2008_v42, %v2004_v30  ;;  %v3248_v33 = vrot.slane %v2868_v61, 5  ;;  %v3251_v34 = vrot.slane %v2869_v39, 5  ;;  %v2873_v47 = vld [vmem:[%s14861_s23 + $0x14c] sm:$0xf]  ;;  %v1232_v42 = vld [vmem:[%s14861_s23 + $0x154] sm:$0xf] }
  0xe6   : > { %v2017_v49 = vshrl.u32 %v1227_v58, 16  ;;  %v2020_v57 = vshll.u32 %v1227_v58, 16  ;;  %14139 = vmatprep.mubr.msk.bf16.mxu1 %vm569_vm1, %v12244_v17  ;;  %v2005_v21 = vsel %vm14943_vm7, %v2000_v10, %v2004_v30  ;;  %v2026_v2 = vshll.u32 %v1228_v36, 16 }
  0xe7   : > { %14213 = vmatprep.mubr.msk.bf16.mxu0 %vm569_vm1, %v12335_v5  ;;  %v2010_v0 = vrot.slane %v2009_v1, 4  ;;  %v2030_v46 = vshrl.u32 %v1228_v36, 16  ;;  %v3249_v7 = vsel %vm14931_vm6, %v3247_v51, %v3248_v33  ;;  %v3250_v52 = vrot.slane %v3248_v33, 4 }
  0xe8   : > { %v14007_v31 = vpop.f32.mrb[0].mxu0  ;;  %v15547_v45 = vpop.f32.mrb[0].mxu1  ;;  %v2019_v12 = vrot.slane %v2017_v49, 4  ;;  %v2022_v59 = vrot.slane %v2020_v57, 5  ;;  %v2028_v16 = vrot.slane %v2026_v2, 5  ;;  %v2036_v29 = vshll.u32 %v1229_v11, 16 }
  0xe9   : > { %v716_v50 = vpop.f32.mrb[1].mxu0  ;;  %v15553_v54 = vpop.f32.mrb[1].mxu1  ;;  %v2015_v15 = vsel %vm14943_vm7, %v2010_v0, %v2014_v25  ;;  %v2032_v14 = vrot.slane %v2030_v46, 4  ;;  %v3252_v18 = vsel %vm14931_vm6, %v3250_v52, %v3251_v34  ;;  %v2040_v20 = vshrl.u32 %v1229_v11, 16  ;;  %v1234_v2 = vld [vmem:[%s14861_s23 + $0x15c] sm:$0xf] }
  0xea   : > { %v14008_v55 = vpop.f32.mrb[2].mxu0  ;;  %v14044_v56 = vpop.f32.mrb[2].mxu1  ;;  %v12245_v38 = vcombine.low %v2005_v21, %v2015_v15  ;;  %v2023_v8 = vor.u32 %v2022_v59, %v2019_v12  ;;  %v12336_v26 = vcombine.low %v3249_v7, %v3252_v18  ;;  %v2038_v32 = vrot.slane %v2036_v29, 5  ;;  %v2875_v52 = vld [vmem:[%s14861_s23 + $0x154] sm:$0xe] }
  0xeb   : > { %v719_v9 = vpop.f32.mrb[3].mxu0  ;;  %v15557_v62 = vpop.f32.mrb[3].mxu1  ;;  %v2033_v27 = vor.u32 %v2032_v14, %v2028_v16  ;;  %v12302_v35 = vrot.slane %v2870_v60, 9  ;;  %v3255_v39 = vrot.slane %v2871_v3, 5  ;;  %v3258_v58 = vrot.slane %v2872_v6, 5 }
  0xec   : > { %14140 = vmatmul.mubr.msk.bf16.gmra.mrb[96].mxu1 %vm569_vm1, %v12245_v38  ;;  %v2024_v61 = vrot.slane %v2023_v8, 4  ;;  %v2042_v41 = vrot.slane %v2040_v20, 4  ;;  %14214 = vmatmul.mubr.msk.bf16.gmra.mrb[96].mxu0 %vm569_vm1, %v12336_v26  ;;  %v2046_v37 = vshll.u32 %v1230_v22, 16  ;;  %v2050_v40 = vshrl.u32 %v1230_v22, 16  ;;  %v1233_v56 = vld [vmem:[%s14861_s23 + $0x158] sm:$0xf] }
  0xed   : > { %v2034_v31 = vrot.slane %v2033_v27, 4  ;;  %v2056_v30 = vshll.u32 %v1231_v23, 16  ;;  %v3256_v25 = vsel %vm14931_vm6, %v12302_v35, %v3255_v39  ;;  %v3257_v51 = vrot.slane %v3255_v39, 4  ;;  %v2876_v12 = vld [vmem:[%s14861_s23 + $0x158] sm:$0xf] }
  0xee   : > { %v2029_v44 = vsel %vm14943_vm7, %v2024_v61, %v2028_v16  ;;  %v2043_v55 = vor.u32 %v2042_v41, %v2038_v32  ;;  %v2048_v10 = vrot.slane %v2046_v37, 5  ;;  %v2052_v1 = vrot.slane %v2050_v40, 4  ;;  %v2877_v59 = vld [vmem:[%s14861_s23 + $0x15c] sm:$0xf]  ;;  %v1235_v18 = vld [vmem:[%s14861_s23 + $0x160] sm:$0xf] }
  0xef   : > { %v2039_v5 = vsel %vm14943_vm7, %v2034_v31, %v2038_v32  ;;  %v2058_v11 = vrot.slane %v2056_v30, 5  ;;  %v3259_v33 = vsel %vm14931_vm6, %v3257_v51, %v3258_v58  ;;  %v3260_v49 = vrot.slane %v3258_v58, 4 }
  0xf0   : > { %v15573_v24 = vpop.f32.mrb[4].mxu0  ;;  %v15575_v43 = vpop.f32.mrb[4].mxu1  ;;  %v12246_v9 = vcombine.low %v2029_v44, %v2039_v5  ;;  %v2044_v34 = vrot.slane %v2043_v55, 4  ;;  %v12337_v57 = vcombine.low %v3256_v25, %v3259_v33  ;;  %v2053_v60 = vor.u32 %v2052_v1, %v2048_v10 }
  0xf1   : > { %18488 = vst [vmem:[#allocation4_spill] sm:$0xff] %v15575_v43  ;;  %v15577_v28 = vpop.f32.mrb[5].mxu0  ;;  %v15582_v13 = vpop.f32.mrb[5].mxu1  ;;  %v3261_v21 = vrot.slane %v2873_v47, 5  ;;  %v3264_v0 = vrot.slane %v2874_v53, 5  ;;  %v2061_v3 = vshrl.u32 %v1232_v42, 16 }
  0xf2   : > { %18489 = vst [vmem:[#allocation5_spill] sm:$0xff] %v15582_v13  ;;  %v14012_v36 = vpop.f32.mrb[6].mxu0  ;;  %v14048_v50 = vpop.f32.mrb[6].mxu1  ;;  %14143 = vmatprep.mubr.msk.bf16.mxu1 %vm569_vm1, %v12246_v9  ;;  %v2049_v46 = vsel %vm14943_vm7, %v2044_v34, %v2048_v10  ;;  %v2064_v6 = vshll.u32 %v1232_v42, 16  ;;  %v2070_v7 = vshll.u32 %v1233_v56, 16  ;;  %14217 = vmatprep.mubr.msk.bf16.mxu0 %vm569_vm1, %v12337_v57  ;;  %v2054_v16 = vrot.slane %v2053_v60, 4 }
  0xf3   : > { %v15586_v4 = vpop.f32.mrb[7].mxu0  ;;  %v15592_v17 = vpop.f32.mrb[7].mxu1  ;;  %v3262_v14 = vsel %vm14931_vm6, %v3260_v49, %v3261_v21  ;;  %v3263_v29 = vrot.slane %v3261_v21, 4  ;;  %v2074_v38 = vshrl.u32 %v1233_v56, 16  ;;  %v2063_v22 = vrot.slane %v2061_v3, 4 }
  0xf4   : > { %18490 = vst [vmem:[#allocation6_spill] sm:$0xff] %v15592_v17  ;;  %v2066_v23 = vrot.slane %v2064_v6, 5  ;;  %v2072_v26 = vrot.slane %v2070_v7, 5  ;;  %v2080_v27 = vshll.u32 %v1234_v2, 16  ;;  %v2059_v61 = vsel %vm14943_vm7, %v2054_v16, %v2058_v11  ;;  %v1236_v47 = vld [vmem:[%s14861_s23 + $0x164] sm:$0x1] }
  0xf5   : > { %v3265_v39 = vsel %vm14931_vm6, %v3263_v29, %v3264_v0  ;;  %v2076_v58 = vrot.slane %v2074_v38, 4  ;;  %v2084_v41 = vshrl.u32 %v1234_v2, 16  ;;  %v12247_v31 = vcombine.low %v2049_v46, %v2059_v61  ;;  %v2878_v11 = vld [vmem:[%s14861_s23 + $0x160] sm:$0xf]  ;;  %v2879_v56 = vld [vmem:[%s14861_s23 + $0x164] sm:$0x1] }
  0xf6   : > { %v12338_v37 = vcombine.low %v3262_v14, %v3265_v39  ;;  %v2067_v40 = vor.u32 %v2066_v23, %v2063_v22  ;;  %v2082_v30 = vrot.slane %v2080_v27, 5  ;;  %v12303_v44 = vrot.slane %v2875_v52, 9  ;;  %v12522_v9 = vld [vmem:[%s14861_s23 + $0x14] sm:$0xf]  ;;  %v12524_v22 = vld [vmem:[%s14861_s23 + $0x1c] sm:$0xf] }
  0xf7   : > { %v2077_v50 = vor.u32 %v2076_v58, %v2072_v26  ;;  %v3268_v25 = vrot.slane %v2876_v12, 5  ;;  %v3271_v51 = vrot.slane %v2877_v59, 5  ;;  %14144 = vmatmul.mubr.msk.bf16.gmra.mrb[100].mxu1 %vm569_vm1, %v12247_v31  ;;  %v2086_v5 = vrot.slane %v2084_v41, 4  ;;  %v12523_v12 = vld [vmem:[%s14861_s23 + $0x18] sm:$0xf] }
  0xf8   : > { %v15606_v15 = vpop.f32.mrb[8].mxu0  ;;  %v15612_v8 = vpop.f32.mrb[8].mxu1  ;;  %14218 = vmatmul.mubr.msk.bf16.gmra.mrb[100].mxu0 %vm569_vm1, %v12338_v37  ;;  %v2068_v55 = vrot.slane %v2067_v40, 4  ;;  %v2090_v10 = vshll.u32 %v1235_v18, 16  ;;  %v2094_v1 = vshrl.u32 %v1235_v18, 16  ;;  %v2100_v57 = vshll.u32 %v1236_v47, 16 }
  0xf9   : > { %18491 = vst [vmem:[#allocation7_spill] sm:$0xff] %v15612_v8  ;;  %v15614_v20 = vpop.f32.mrb[9].mxu0  ;;  %v15616_v32 = vpop.f32.mrb[9].mxu1  ;;  %v2078_v33 = vrot.slane %v2077_v50, 4  ;;  %v3269_v34 = vsel %vm14931_vm6, %v12303_v44, %v3268_v25  ;;  %v3270_v49 = vrot.slane %v3268_v25, 4  ;;  %v2087_v21 = vor.u32 %v2086_v5, %v2082_v30 }
  0xfa   : > { %18492 = vst [vmem:[#allocation8_spill] sm:$0xff] %v15616_v32  ;;  %v14016_v35 = vpop.f32.mrb[10].mxu0  ;;  %v14052_v53 = vpop.f32.mrb[10].mxu1  ;;  %v2073_v60 = vsel %vm14943_vm7, %v2068_v55, %v2072_v26  ;;  %v2092_v0 = vrot.slane %v2090_v10, 5  ;;  %v2096_v2 = vrot.slane %v2094_v1, 4  ;;  %v2102_v7 = vrot.slane %v2100_v57, 5 }
  0xfb   : > { %v15623_v36 = vpop.f32.mrb[11].mxu0  ;;  %v15625_v42 = vpop.f32.mrb[11].mxu1  ;;  %v2083_v3 = vsel %vm14943_vm7, %v2078_v33, %v2082_v30  ;;  %v3272_v6 = vsel %vm14931_vm6, %v3270_v49, %v3271_v51  ;;  %v3273_v52 = vrot.slane %v3271_v51, 4  ;;  %v2088_v38 = vrot.slane %v2087_v21, 4  ;;  %v12525_v58 = vld [vmem:[%s14861_s23 + $0x20] sm:$0xf] }
  0xfc   : > { %18493 = vst [vmem:[#allocation9_spill] sm:$0xff] %v15625_v42  ;;  %v12248_v14 = vcombine.low %v2073_v60, %v2083_v3  ;;  %v12339_v29 = vcombine.low %v3269_v34, %v3272_v6  ;;  %v2097_v18 = vor.u32 %v2096_v2, %v2092_v0  ;;  %v3274_v27 = vrot.slane %v2878_v11, 5  ;;  %v12526_v30 = vld [vmem:[%s14861_s23 + $0x24] sm:$0x1]  ;;  %v14729_v10 = vld [vmem:[%s14861_s23 + $0x14] sm:$0xff]  }
  0xfd   : > { %v3277_v35 = vrot.slane %v2879_v56, 5  ;;  %v5031_v61 = vshrl.u32 %v12522_v9, 16  ;;  %v5034_v39 = vshll.u32 %v12522_v9, 16  ;;  %v2093_v53 = vsel %vm14943_vm7, %v2088_v38, %v2092_v0  ;;  %v12527_v57 = vld [vmem:[%s14861_s23 + $0x28] sm:$0xf] }
  0xfe   : > { %14147 = vmatprep.mubr.msk.bf16.mxu1 %vm569_vm1, %v12248_v14  ;;  %14221 = vmatprep.mubr.msk.bf16.mxu0 %vm569_vm1, %v12339_v29  ;;  %v2098_v31 = vrot.slane %v2097_v18, 4  ;;  %v5040_v37 = vshll.u32 %v12523_v12, 16  ;;  %v5044_v40 = vshrl.u32 %v12523_v12, 16  ;;  %v3275_v44 = vsel %vm14931_vm6, %v3273_v52, %v3274_v27  ;;  %v12528_v60 = vld [vmem:[%s14861_s23 + $0x2c] sm:$0xf] }
  0xff   : > { %v3276_v25 = vrot.slane %v3274_v27, 4  ;;  %v5033_v51 = vrot.slane %v5031_v61, 4  ;;  %v5036_v55 = vrot.slane %v5034_v39, 5  ;;  %v5050_v56 = vshll.u32 %v12524_v22, 16  ;;  %v12529_v29 = vld [vmem:[%s14861_s23 + $0x30] sm:$0xf] }
 0x100   : > { %v15636_v46 = vpop.f32.mrb[12].mxu0  ;;  %v15643_v59 = vpop.f32.mrb[12].mxu1  ;;  %v2103_v5 = vsel %vm14943_vm7, %v2098_v31, %v2102_v7  ;;  %v5042_v1 = vrot.slane %v5040_v37, 5  ;;  %v5046_v11 = vrot.slane %v5044_v40, 4  ;;  %v5054_v49 = vshrl.u32 %v12524_v22, 16 }
 0x101   : > { %18494 = vst [vmem:[#allocation10_spill] sm:$0xff] %v15643_v59  ;;  %v15645_v16 = vpop.f32.mrb[13].mxu0  ;;  %v15648_v23 = vpop.f32.mrb[13].mxu1  ;;  %v12249_v9 = vcombine.low %v2093_v53, %v2103_v5  ;;  %v3278_v33 = vsel %vm14931_vm6, %v3276_v25, %v3277_v35  ;;  %v5037_v34 = vor.u32 %v5036_v55, %v5033_v51  ;;  %v5052_v2 = vrot.slane %v5050_v56, 5  ;;  %v14801_v27 = vld [vmem:[%s18471_s1 + $0x14] sm:$0xf] }
 0x102   : > { %18495 = vst [vmem:[#allocation11_spill] sm:$0xff] %v15648_v23  ;;  %v14020_v26 = vpop.f32.mrb[14].mxu0  ;;  %v14056_v41 = vpop.f32.mrb[14].mxu1  ;;  %v12340_v21 = vcombine.low %v3275_v44, %v3278_v33  ;;  %v5047_v0 = vor.u32 %v5046_v11, %v5042_v1  ;;  %v5060_v3 = vshll.u32 %v12525_v58, 16  ;;  %v5056_v52 = vrot.slane %v5054_v49, 4  ;;  %v14730_v25 = vld [vmem:[%s14861_s23 + $0x1c] sm:$0xff]  }
 0x103   : > { %v15651_v47 = vpop.f32.mrb[15].mxu0  ;;  %v15658_v50 = vpop.f32.mrb[15].mxu1  ;;  %14148 = vmatmul.mubr.msk.bf16.gmra.mrb[104].mxu1 %vm569_vm1, %v12249_v9  ;;  %v5038_v7 = vrot.slane %v5037_v34, 4  ;;  %v5064_v12 = vshrl.u32 %v12525_v58, 16  ;;  %v5070_v14 = vshll.u32 %v12526_v30, 16  ;;  %v7213_v35 = vsel %vm678_vm0, %v14801_v27, 0 }
 0x104   : > { %18496 = vst [vmem:[#allocation12_spill] sm:$0xff] %v15658_v50  ;;  %14222 = vmatmul.mubr.msk.bf16.gmra.mrb[104].mxu0 %vm569_vm1, %v12340_v21  ;;  %14227 = vmatprep.mubr.msk.bf16.mxu1 %vm569_vm1, %v14729_v10  ;;  %v5048_v22 = vrot.slane %v5047_v0, 4  ;;  %v5062_v26 = vrot.slane %v5060_v3, 5  ;;  %v15685_v61 = vsel %vm678_vm0, %v15413_v19, 0  ;;  %v5057_v53 = vor.u32 %v5056_v52, %v5052_v2  ;;  %v14731_v19 = vld [vmem:[%s14861_s23 + $0x28] sm:$0xff]  }
 0x105   : > { %v5043_v41 = vsel %vm14943_vm7, %v5038_v7, %v5042_v1  ;;  %v5066_v31 = vrot.slane %v5064_v12, 4  ;;  %v5072_v37 = vrot.slane %v5070_v14, 5  ;;  %v5075_v51 = vshrl.u32 %v12527_v57, 16  ;;  %v12530_v33 = vld [vmem:[%s14861_s23 + $0x34] sm:$0xf] }
 0x106   : > { %v5053_v44 = vsel %vm14943_vm7, %v5048_v22, %v5052_v2  ;;  %v5078_v55 = vshll.u32 %v12527_v57, 16  ;;  %v5084_v5 = vshll.u32 %v12528_v60, 16  ;;  %v5058_v11 = vrot.slane %v5057_v53, 4  ;;  %v12531_v34 = vld [vmem:[%s14861_s23 + $0x38] sm:$0x1] }
 0x107   : > { %v12613_v1 = vcombine.low %v5043_v41, %v5053_v44  ;;  %v5067_v56 = vor.u32 %v5066_v31, %v5062_v26  ;;  %v5088_v9 = vshrl.u32 %v12528_v60, 16  ;;  %v5077_v49 = vrot.slane %v5075_v51, 4  ;;  %v12532_v27 = vld [vmem:[%s14861_s23 + $0x3c] sm:$0xf]  ;;  %v12558_v42 = vld [vmem:[%s14861_s23 + $0xa4] sm:$0xf] }
 0x108   : > { %v15669_v6 = vpop.f32.mrb[16].mxu0  ;;  %v15673_v38 = vpop.f32.mrb[16].mxu1  ;;  %v5080_v21 = vrot.slane %v5078_v55, 5  ;;  %v5086_v0 = vrot.slane %v5084_v5, 5  ;;  %v5094_v3 = vshll.u32 %v12529_v29, 16  ;;  %v5063_v57 = vsel %vm14943_vm7, %v5058_v11, %v5062_v26 }
 0x109   : > { %18497 = vst [vmem:[#allocation13_spill] sm:$0xff] %v15673_v38  ;;  %v15675_v18 = vpop.f32.mrb[17].mxu0  ;;  %v15687_v39 = vpop.f32.mrb[17].mxu1  ;;  %14301 = vmatprep.mubr.msk.bf16.mxu0 %vm569_vm1, %v12613_v1  ;;  %v5068_v2 = vrot.slane %v5067_v56, 4  ;;  %v5090_v7 = vrot.slane %v5088_v9, 4  ;;  %v5098_v52 = vshrl.u32 %v12529_v29, 16 }
 0x10a   : > { %18498 = vst [vmem:[#allocation14_spill] sm:$0xff] %v15687_v39  ;;  %v14024_v58 = vpop.f32.mrb[18].mxu0  ;;  %v14060_v40 = vpop.f32.mrb[18].mxu1  ;;  %v5081_v12 = vor.u32 %v5080_v21, %v5077_v49  ;;  %v5096_v14 = vrot.slane %v5094_v3, 5  ;;  %v5104_v22 = vshll.u32 %v12530_v33, 16  ;;  %v5108_v60 = vshrl.u32 %v12530_v33, 16 }
 0x10b   : > { %v15691_v30 = vpop.f32.mrb[19].mxu0  ;;  %v15697_v10 = vpop.f32.mrb[19].mxu1  ;;  %14228 = vmatmul.mubr.msk.bf16.vlgmr.msra.gmra.mrb[108].mxu1 %vm569_vm1, %v14730_v25  ;;  %v5073_v41 = vsel %vm14943_vm7, %v5068_v2, %v5072_v37  ;;  %v5091_v53 = vor.u32 %v5090_v7, %v5086_v0  ;;  %v5100_v31 = vrot.slane %v5098_v52, 4  ;;  %v5114_v40 = vshll.u32 %v12531_v34, 16  ;;  %v12533_v26 = vld [vmem:[%s14861_s23 + $0x40] sm:$0xf] }
 0x10c   : > { %18499 = vst [vmem:[#allocation15_spill] sm:$0xff] %v15697_v10  ;;  %v12614_v51 = vcombine.low %v5063_v57, %v5073_v41  ;;  %14374 = vmatpush3.bf16.msra.mxu1 %v7213_v35  ;;  %14231 = vmatprep.mubr.msk.bf16.mxu1 %vm569_vm1, %v14731_v19  ;;  %v5082_v55 = vrot.slane %v5081_v12, 4  ;;  %v5106_v5 = vrot.slane %v5104_v22, 5  ;;  %v5110_v11 = vrot.slane %v5108_v60, 4  ;;  %v12534_v25 = vld [vmem:[%s14861_s23 + $0x44] sm:$0xf] }
 0x10d   : > { %v5092_v56 = vrot.slane %v5091_v53, 4  ;;  %v5101_v9 = vor.u32 %v5100_v31, %v5096_v14  ;;  %v5116_v33 = vrot.slane %v5114_v40, 5  ;;  %v5119_v34 = vshrl.u32 %v12532_v27, 16  ;;  %v12535_v49 = vld [vmem:[%s14861_s23 + $0x48] sm:$0xf]  ;;  %v14732_v12 = vld [vmem:[%s14861_s23 + $0x30] sm:$0xff]  }
 0x10e   : > { %14302 = vmatmul.mubr.msk.bf16.vlgmr.msra.gmra.mrb[108].mxu0 %vm569_vm1, %v12614_v51  ;;  %v5087_v35 = vsel %vm14943_vm7, %v5082_v55, %v5086_v0  ;;  %v5111_v19 = vor.u32 %v5110_v11, %v5106_v5  ;;  %v5122_v57 = vshll.u32 %v12532_v27, 16  ;;  %v5128_v2 = vshll.u32 %v12533_v26, 16  ;;  %v14733_v0 = vld [vmem:[%s14861_s23 + $0x3c] sm:$0xff]   ;;  %v12536_v27 = vld [vmem:[%s14861_s23 + $0x4c] sm:$0x1]  ;;  %v14737_v10 = vld [vmem:[%s14861_s23 + $0x64] sm:$0xff]  }
 0x10f   : > { %14448 = vmatpush3.bf16.msra.mxu0 %v15685_v61  ;;  %v5097_v52 = vsel %vm14943_vm7, %v5092_v56, %v5096_v14  ;;  %v5102_v22 = vrot.slane %v5101_v9, 4  ;;  %v5121_v60 = vrot.slane %v5119_v34, 4  ;;  %v5132_v41 = vshrl.u32 %v12533_v26, 16  ;;  %v12538_v34 = vld [vmem:[%s14861_s23 + $0x54] sm:$0xf] }
 0x110   : > { %v15705_v58 = vpop.f32.mrb[20].mxu0  ;;  %v15711_v44 = vpop.f32.mrb[20].mxu1  ;;  %v12615_v53 = vcombine.low %v5087_v35, %v5097_v52  ;;  %v5112_v31 = vrot.slane %v5111_v19, 4  ;;  %v5124_v40 = vrot.slane %v5122_v57, 5  ;;  %v5130_v51 = vrot.slane %v5128_v2, 5 }
 0x111   : > { %18500 = vst [vmem:[#allocation16_spill] sm:$0xff] %v15711_v44  ;;  %v15713_v29 = vpop.f32.mrb[21].mxu0  ;;  %v15717_v1 = vpop.f32.mrb[21].mxu1  ;;  %v5107_v55 = vsel %vm14943_vm7, %v5102_v22, %v5106_v5  ;;  %v5134_v11 = vrot.slane %v5132_v41, 4  ;;  %v5138_v61 = vshll.u32 %v12534_v25, 16  ;;  %v5148_v56 = vshll.u32 %v12535_v49, 16 }
 0x112   : > { %18501 = vst [vmem:[#allocation17_spill] sm:$0xff] %v15717_v1  ;;  %v14028_v37 = vpop.f32.mrb[22].mxu0  ;;  %v14064_v21 = vpop.f32.mrb[22].mxu1  ;;  %14305 = vmatprep.mubr.msk.bf16.mxu0 %vm569_vm1, %v12615_v53  ;;  %v5117_v14 = vsel %vm14943_vm7, %v5112_v31, %v5116_v33  ;;  %v5125_v26 = vor.u32 %v5124_v40, %v5121_v60  ;;  %v5152_v9 = vshrl.u32 %v12535_v49, 16  ;;  %v5158_v49 = vshll.u32 %v12536_v27, 16 }
 0x113   : > { %v15720_v3 = vpop.f32.mrb[23].mxu0  ;;  %v15725_v7 = vpop.f32.mrb[23].mxu1  ;;  %v5142_v37 = vshrl.u32 %v12534_v25, 16  ;;  %v12537_v21 = vld [vmem:[%s14861_s23 + $0x50] sm:$0xf]  ;;  %14232 = vmatmul.mubr.msk.bf16.gmra.mrb[112].mxu1 %vm569_vm1, %v14732_v12  ;;  %v12616_v19 = vcombine.low %v5107_v55, %v5117_v14  ;;  %v5135_v5 = vor.u32 %v5134_v11, %v5130_v51  ;;  %v5140_v57 = vrot.slane %v5138_v61, 5 }
 0x114   : > { %18502 = vst [vmem:[#allocation18_spill] sm:$0xff] %v15725_v7  ;;  %14235 = vmatprep.mubr.msk.bf16.mxu1 %vm569_vm1, %v14733_v0  ;;  %v5126_v33 = vrot.slane %v5125_v26, 4  ;;  %v5150_v22 = vrot.slane %v5148_v56, 5  ;;  %v5154_v60 = vrot.slane %v5152_v9, 4  ;;  %v12539_v41 = vld [vmem:[%s14861_s23 + $0x58] sm:$0xf] }
 0x115   : > { %v5144_v25 = vrot.slane %v5142_v37, 4  ;;  %v5136_v31 = vrot.slane %v5135_v5, 4  ;;  %v5163_v55 = vshrl.u32 %v12537_v21, 16  ;;  %v5166_v11 = vshll.u32 %v12537_v21, 16  ;;  %v12540_v61 = vld [vmem:[%s14861_s23 + $0x5c] sm:$0xf] }
 0x116   : > { %14306 = vmatmul.mubr.msk.bf16.gmra.mrb[112].mxu0 %vm569_vm1, %v12616_v19  ;;  %v5131_v0 = vsel %vm14943_vm7, %v5126_v33, %v5130_v51  ;;  %v5155_v27 = vor.u32 %v5154_v60, %v5150_v22  ;;  %v5160_v26 = vrot.slane %v5158_v49, 5  ;;  %v5172_v56 = vshll.u32 %v12538_v34, 16  ;;  %v14734_v21 = vld [vmem:[%s14861_s23 + $0x44] sm:$0xff]   ;;  %v14735_v7 = vld [vmem:[%s14861_s23 + $0x50] sm:$0xff]   ;;  %v12547_v38 = vld [vmem:[%s14861_s23 + $0x78] sm:$0xf] }
 0x117   : > { %v5145_v40 = vor.u32 %v5144_v25, %v5140_v57  ;;  %v5141_v5 = vsel %vm14943_vm7, %v5136_v31, %v5140_v57  ;;  %v5176_v51 = vshrl.u32 %v12538_v34, 16  ;;  %v12542_v33 = vld [vmem:[%s14861_s23 + $0x64] sm:$0xf]  ;;  %v5186_v44 = vshrl.u32 %v12539_v41, 16  ;;  %v12562_v8 = vld [vmem:[%s14861_s23 + $0xb4] sm:$0xf] }
 0x118   : > { %v15740_v35 = vpop.f32.mrb[24].mxu0  ;;  %v15743_v2 = vpop.f32.mrb[24].mxu1  ;;  %v5156_v19 = vrot.slane %v5155_v27, 4  ;;  %v5174_v1 = vrot.slane %v5172_v56, 5  ;;  %v12566_v13 = vld [vmem:[%s14861_s23 + $0xc4] sm:$0x1] }
 0x119   : > { %18503 = vst [vmem:[#allocation19_spill] sm:$0xff] %v15743_v2  ;;  %v15745_v52 = vpop.f32.mrb[25].mxu0  ;;  %v15749_v53 = vpop.f32.mrb[25].mxu1  ;;  %v5146_v25 = vrot.slane %v5145_v40, 4  ;;  %v12617_v2 = vcombine.low %v5131_v0, %v5141_v5  ;;  %v5178_v31 = vrot.slane %v5176_v51, 4  ;;  %v5192_v40 = vshll.u32 %v12540_v61, 16 }
 0x11a   : > { %18504 = vst [vmem:[#allocation20_spill] sm:$0xff] %v15749_v53  ;;  %v14032_v12 = vpop.f32.mrb[26].mxu0  ;;  %v14068_v37 = vpop.f32.mrb[26].mxu1  ;;  %v12541_v53 = vld [vmem:[%s14861_s23 + $0x60] sm:$0x1]  ;;  %v5161_v57 = vsel %vm14943_vm7, %v5156_v19, %v5160_v26  ;;  %v5188_v56 = vrot.slane %v5186_v44, 4 }
 0x11b   : > { %v15752_v14 = vpop.f32.mrb[27].mxu0  ;;  %v15757_v9 = vpop.f32.mrb[27].mxu1  ;;  %v5165_v12 = vrot.slane %v5163_v55, 4  ;;  %v5168_v37 = vrot.slane %v5166_v11, 5  ;;  %v5151_v60 = vsel %vm14943_vm7, %v5146_v25, %v5150_v22  ;;  %14309 = vmatprep.mubr.msk.bf16.mxu0 %vm569_vm1, %v12617_v2  ;;  %v5196_v55 = vshrl.u32 %v12540_v61, 16  ;;  %14236 = vmatmul.mubr.msk.bf16.gmra.mrb[116].mxu1 %vm569_vm1, %v14734_v21  ;;  %v14736_v19 = vld [vmem:[%s14861_s23 + $0x58] sm:$0xff]  }
 0x11c   : > { %18505 = vst [vmem:[#allocation21_spill] sm:$0xff] %v15757_v9  ;;  %v5182_v9 = vshll.u32 %v12539_v41, 16  ;;  %v12543_v11 = vld [vmem:[%s14861_s23 + $0x68] sm:$0xf]  ;;  %v12618_v34 = vcombine.low %v5151_v60, %v5161_v57  ;;  %14239 = vmatprep.mubr.msk.bf16.mxu1 %vm569_vm1, %v14735_v7  ;;  %v5179_v26 = vor.u32 %v5178_v31, %v5174_v1  ;;  %v5194_v5 = vrot.slane %v5192_v40, 5 }
 0x11d   : > { %v5169_v49 = vor.u32 %v5168_v37, %v5165_v12  ;;  %v5198_v61 = vrot.slane %v5196_v55, 4  ;;  %v5202_v25 = vshll.u32 %v12541_v53, 16  ;;  %v12544_v44 = vld [vmem:[%s14861_s23 + $0x6c] sm:$0xf]  ;;  %v5207_v51 = vshrl.u32 %v12542_v33, 16 }
 0x11e   : > { %v5184_v27 = vrot.slane %v5182_v9, 5  ;;  %v5210_v60 = vshll.u32 %v12542_v33, 16  ;;  %14310 = vmatmul.mubr.msk.bf16.gmra.mrb[116].mxu0 %vm569_vm1, %v12618_v34  ;;  %v5180_v53 = vrot.slane %v5179_v26, 4  ;;  %v5216_v40 = vshll.u32 %v12543_v11, 16  ;;  %v12545_v55 = vld [vmem:[%s14861_s23 + $0x70] sm:$0xf] }
 0x11f   : > { %v5170_v22 = vrot.slane %v5169_v49, 4  ;;  %v5199_v57 = vor.u32 %v5198_v61, %v5194_v5  ;;  %v5204_v31 = vrot.slane %v5202_v25, 5  ;;  %v12546_v33 = vld [vmem:[%s14861_s23 + $0x74] sm:$0x1]  ;;  %v5226_v26 = vshll.u32 %v12544_v44, 16 }
 0x120   : > { %v15771_v0 = vpop.f32.mrb[28].mxu0  ;;  %v15774_v41 = vpop.f32.mrb[28].mxu1  ;;  %v5189_v9 = vor.u32 %v5188_v56, %v5184_v27  ;;  %v5212_v56 = vrot.slane %v5210_v60, 5  ;;  %v5218_v34 = vrot.slane %v5216_v40, 5  ;;  %v5230_v60 = vshrl.u32 %v12544_v44, 16 }
 0x121   : > { %18506 = vst [vmem:[#allocation22_spill] sm:$0xff] %v15774_v41  ;;  %v15776_v2 = vpop.f32.mrb[29].mxu0  ;;  %v15779_v12 = vpop.f32.mrb[29].mxu1  ;;  %v5175_v21 = vsel %vm14943_vm7, %v5170_v22, %v5174_v1  ;;  %v5209_v22 = vrot.slane %v5207_v51, 4  ;;  %v5200_v41 = vrot.slane %v5199_v57, 4  ;;  %v5228_v51 = vrot.slane %v5226_v26, 5 }
 0x122   : > { %18507 = vst [vmem:[#allocation23_spill] sm:$0xff] %v15779_v12  ;;  %v14036_v37 = vpop.f32.mrb[30].mxu0  ;;  %v14072_v49 = vpop.f32.mrb[30].mxu1  ;;  %v5190_v1 = vrot.slane %v5189_v9, 4  ;;  %v5220_v12 = vshrl.u32 %v12543_v11, 16  ;;  %v5236_v50 = vshll.u32 %v12545_v55, 16 }
 0x123   : > { %v15785_v7 = vpop.f32.mrb[31].mxu0  ;;  %v15789_v37 = vpop.f32.mrb[31].mxu1  ;;  %v5185_v49 = vsel %vm14943_vm7, %v5180_v53, %v5184_v27  ;;  %v5213_v39 = vor.u32 %v5212_v56, %v5209_v22  ;;  %v12548_v9 = vld [vmem:[%s14861_s23 + $0x7c] sm:$0xf]  ;;  %v5205_v11 = vsel %vm14943_vm7, %v5200_v41, %v5204_v31  ;;  %14240 = vmatmul.mubr.msk.bf16.gmra.mrb[120].mxu1 %vm569_vm1, %v14736_v19  ;;  %v5240_v57 = vshrl.u32 %v12545_v55, 16 }
 0x124   : > { %18508 = vst [vmem:[#allocation24_spill] sm:$0xff] %v15789_v37  ;;  %v12619_v61 = vcombine.low %v5175_v21, %v5185_v49  ;;  %v5195_v25 = vsel %vm14943_vm7, %v5190_v1, %v5194_v5  ;;  %v5222_v37 = vrot.slane %v5220_v12, 4  ;;  %v12549_v40 = vld [vmem:[%s14861_s23 + $0x80] sm:$0xf]  ;;  %14243 = vmatprep.mubr.msk.bf16.mxu1 %vm569_vm1, %v14737_v10  ;;  %v5232_v41 = vrot.slane %v5230_v60, 4  ;;  %v14738_v10 = vld [vmem:[%s14861_s23 + $0x6c] sm:$0xff]  }
 0x125   : > { %v12620_v21 = vcombine.low %v5195_v25, %v5205_v11  ;;  %v5214_v53 = vrot.slane %v5213_v39, 4  ;;  %v5238_v44 = vrot.slane %v5236_v50, 5  ;;  %v5246_v31 = vshll.u32 %v12546_v33, 16 }
 0x126   : > { %14313 = vmatprep.mubr.msk.bf16.mxu0 %vm569_vm1, %v12619_v61  ;;  %v5223_v5 = vor.u32 %v5222_v37, %v5218_v34  ;;  %v5251_v22 = vshrl.u32 %v12547_v38, 16  ;;  %v5242_v39 = vrot.slane %v5240_v57, 4  ;;  %v5254_v55 = vshll.u32 %v12547_v38, 16  ;;  %v12551_v38 = vld [vmem:[%s14861_s23 + $0x88] sm:$0x1] }
 0x127   : > { %v5219_v19 = vsel %vm14943_vm7, %v5214_v53, %v5218_v34  ;;  %14314 = vmatmul.mubr.msk.bf16.gmra.mrb[120].mxu0 %vm569_vm1, %v12620_v21  ;;  %v5233_v50 = vor.u32 %v5232_v41, %v5228_v51  ;;  %v5248_v33 = vrot.slane %v5246_v31, 5  ;;  %v5260_v11 = vshll.u32 %v12548_v9, 16 }
 0x128   : > { %v15801_v27 = vpop.f32.mrb[32].mxu0  ;;  %v14075_v12 = vpop.f32.mrb[32].mxu1  ;;  %v5224_v26 = vrot.slane %v5223_v5, 4  ;;  %v5253_v25 = vrot.slane %v5251_v22, 4  ;;  %v5243_v53 = vor.u32 %v5242_v39, %v5238_v44  ;;  %v5256_v5 = vrot.slane %v5254_v55, 5 }
 0x129   : > { %v15806_v1 = vpop.f32.mrb[33].mxu0  ;;  %v988_v56 = vpop.f32.mrb[33].mxu1  ;;  %v5264_v57 = vshrl.u32 %v12548_v9, 16  ;;  %v12550_v12 = vld [vmem:[%s14861_s23 + $0x84] sm:$0xf]  ;;  %v5262_v23 = vrot.slane %v5260_v11, 5 }
 0x12a   : > { %v14040_v49 = vpop.f32.mrb[34].mxu0  ;;  %v14076_v37 = vpop.f32.mrb[34].mxu1  ;;  %v5229_v34 = vsel %vm14943_vm7, %v5224_v26, %v5228_v51  ;;  %v5270_v21 = vshll.u32 %v12549_v40, 16  ;;  %v5244_v59 = vrot.slane %v5243_v53, 4  ;;  %v5257_v41 = vor.u32 %v5256_v5, %v5253_v25  ;;  %v12552_v55 = vld [vmem:[%s14861_s23 + $0x8c] sm:$0xf] }
 0x12b   : > { %v15811_v61 = vpop.f32.mrb[35].mxu0  ;;  %v991_v60 = vpop.f32.mrb[35].mxu1  ;;  %v12621_v56 = vcombine.low %v5219_v19, %v5229_v34  ;;  %v5234_v49 = vrot.slane %v5233_v50, 4  ;;  %v14739_v37 = vld [vmem:[%s14861_s23 + $0x78] sm:$0xff]   ;;  %v5266_v31 = vrot.slane %v5264_v57, 4  ;;  %v5274_v22 = vshrl.u32 %v12549_v40, 16  ;;  %14244 = vmatmul.mubr.msk.bf16.gmra.mrb[124].mxu1 %vm569_vm1, %v14738_v10 }
 0x12c   : > { %v5272_v26 = vrot.slane %v5270_v21, 5  ;;  %v5280_v9 = vshll.u32 %v12550_v12, 16  ;;  %v5284_v39 = vshrl.u32 %v12550_v12, 16  ;;  %v5249_v50 = vsel %vm14943_vm7, %v5244_v59, %v5248_v33  ;;  %v12553_v40 = vld [vmem:[%s14861_s23 + $0x90] sm:$0xf]  ;;  %14247 = vmatprep.mubr.msk.bf16.mxu1 %vm569_vm1, %v14739_v37 }
 0x12d   : > { %14317 = vmatprep.mubr.msk.bf16.mxu0 %vm569_vm1, %v12621_v56  ;;  %v5239_v51 = vsel %vm14943_vm7, %v5234_v49, %v5238_v44  ;;  %v5258_v11 = vrot.slane %v5257_v41, 4  ;;  %v5267_v25 = vor.u32 %v5266_v31, %v5262_v23  ;;  %v5276_v60 = vrot.slane %v5274_v22, 4  ;;  %v12554_v56 = vld [vmem:[%s14861_s23 + $0x94] sm:$0xf]  ;;  %v12555_v31 = vld [vmem:[%s14861_s23 + $0x98] sm:$0xf] }
 0x12e   : > { %v12622_v5 = vcombine.low %v5239_v51, %v5249_v50  ;;  %v5282_v44 = vrot.slane %v5280_v9, 5  ;;  %v5286_v57 = vrot.slane %v5284_v39, 4  ;;  %v5290_v12 = vshll.u32 %v12551_v38, 16 }
 0x12f   : > { %v5263_v59 = vsel %vm14943_vm7, %v5258_v11, %v5262_v23  ;;  %v5268_v33 = vrot.slane %v5267_v25, 4  ;;  %v5277_v21 = vor.u32 %v5276_v60, %v5272_v26  ;;  %v5295_v41 = vshrl.u32 %v12552_v55, 16  ;;  %v14740_v23 = vld [vmem:[%s14861_s23 + $0x80] sm:$0xff]  }
 0x130   : > { %v14155_v19 = vpop.f32.mrb[36].mxu0  ;;  %v14081_v34 = vpop.f32.mrb[36].mxu1  ;;  %14318 = vmatmul.mubr.msk.bf16.gmra.mrb[124].mxu0 %vm569_vm1, %v12622_v5  ;;  %v5287_v37 = vor.u32 %v5286_v57, %v5282_v44  ;;  %v5292_v38 = vrot.slane %v5290_v12, 5  ;;  %v5298_v9 = vshll.u32 %v12552_v55, 16  ;;  %v5304_v39 = vshll.u32 %v12553_v40, 16 }
 0x131   : > { %v3534_v53 = vpop.f32.mrb[37].mxu0  ;;  %v2359_v49 = vpop.f32.mrb[37].mxu1  ;;  %v5273_v50 = vsel %vm14943_vm7, %v5268_v33, %v5272_v26  ;;  %v5278_v11 = vrot.slane %v5277_v21, 4  ;;  %v5297_v25 = vrot.slane %v5295_v41, 4  ;;  %v5308_v60 = vshrl.u32 %v12553_v40, 16 }
 0x132   : > { %v14156_v10 = vpop.f32.mrb[38].mxu0  ;;  %v14082_v22 = vpop.f32.mrb[38].mxu1  ;;  %v12556_v34 = vld [vmem:[%s14861_s23 + $0x9c] sm:$0x1]  ;;  %v12623_v53 = vcombine.low %v5263_v59, %v5273_v50  ;;  %v5288_v49 = vrot.slane %v5287_v37, 4  ;;  %v5306_v5 = vrot.slane %v5304_v39, 5 }
 0x133   : > { %v3537_v51 = vpop.f32.mrb[39].mxu0  ;;  %v2362_v19 = vpop.f32.mrb[39].mxu1  ;;  %v14741_v10 = vld [vmem:[%s14861_s23 + $0x8c] sm:$0xff]   ;;  %v5300_v22 = vrot.slane %v5298_v9, 5  ;;  %v12557_v57 = vld [vmem:[%s14861_s23 + $0xa0] sm:$0xf]  ;;  %v5283_v55 = vsel %vm14943_vm7, %v5278_v11, %v5282_v44  ;;  %14248 = vmatmul.mubr.msk.bf16.gmra.mrb[128].mxu1 %vm569_vm1, %v14740_v23 }
 0x134   : > { %v5310_v12 = vrot.slane %v5308_v60, 4  ;;  %v5314_v51 = vshll.u32 %v12554_v56, 16  ;;  %v5318_v19 = vshrl.u32 %v12554_v56, 16  ;;  %14321 = vmatprep.mubr.msk.bf16.mxu0 %vm569_vm1, %v12623_v53  ;;  %v5293_v26 = vsel %vm14943_vm7, %v5288_v49, %v5292_v38  ;;  %14251 = vmatprep.mubr.msk.bf16.mxu1 %vm569_vm1, %v14741_v10 }
 0x135   : > { %v5301_v40 = vor.u32 %v5300_v22, %v5297_v25  ;;  %v5324_v59 = vshll.u32 %v12555_v31, 16  ;;  %v5328_v33 = vshrl.u32 %v12555_v31, 16  ;;  %v12624_v41 = vcombine.low %v5283_v55, %v5293_v26  ;;  %v12559_v31 = vld [vmem:[%s14861_s23 + $0xa8] sm:$0xf] }
 0x136   : > { %v5311_v37 = vor.u32 %v5310_v12, %v5306_v5  ;;  %v5316_v44 = vrot.slane %v5314_v51, 5  ;;  %v5320_v9 = vrot.slane %v5318_v19, 4  ;;  %v5334_v25 = vshll.u32 %v12556_v34, 16 }
 0x137   : > { %v5302_v50 = vrot.slane %v5301_v40, 4  ;;  %v5326_v38 = vrot.slane %v5324_v59, 5  ;;  %v5330_v11 = vrot.slane %v5328_v33, 4  ;;  %v5339_v22 = vshrl.u32 %v12557_v57, 16  ;;  %v12560_v40 = vld [vmem:[%s14861_s23 + $0xac] sm:$0xf] }
 0x138   : > { %v15846_v21 = vpop.f32.mrb[40].mxu0  ;;  %v15849_v39 = vpop.f32.mrb[40].mxu1  ;;  %v5312_v53 = vrot.slane %v5311_v37, 4  ;;  %v5321_v49 = vor.u32 %v5320_v9, %v5316_v44  ;;  %v5342_v55 = vshll.u32 %v12557_v57, 16  ;;  %14322 = vmatmul.mubr.msk.bf16.gmra.mrb[128].mxu0 %vm569_vm1, %v12624_v41  ;;  %v5336_v19 = vrot.slane %v5334_v25, 5  ;;  %v14742_v57 = vld [vmem:[%s14861_s23 + $0x94] sm:$0xff]  }
 0x139   : > { %18509 = vst [vmem:[#allocation25_spill] sm:$0xff] %v15846_v21  ;;  %v15851_v56 = vpop.f32.mrb[41].mxu0  ;;  %v15855_v60 = vpop.f32.mrb[41].mxu1  ;;  %v5307_v10 = vsel %vm14943_vm7, %v5302_v50, %v5306_v5  ;;  %v5331_v34 = vor.u32 %v5330_v11, %v5326_v38  ;;  %v5348_v26 = vshll.u32 %v12558_v42, 16  ;;  %v5341_v9 = vrot.slane %v5339_v22, 4 }
 0x13a   : > { %18510 = vst [vmem:[#allocation26_spill] sm:$0xff] %v15851_v56  ;;  %v14160_v23 = vpop.f32.mrb[42].mxu0  ;;  %v14086_v12 = vpop.f32.mrb[42].mxu1  ;;  %v5317_v33 = vsel %vm14943_vm7, %v5312_v53, %v5316_v44  ;;  %v5322_v37 = vrot.slane %v5321_v49, 4  ;;  %v14743_v56 = vld [vmem:[%s14861_s23 + $0xa0] sm:$0xff]   ;;  %v5352_v50 = vshrl.u32 %v12558_v42, 16 }
 0x13b   : > { %v15857_v51 = vpop.f32.mrb[43].mxu0  ;;  %v15863_v59 = vpop.f32.mrb[43].mxu1  ;;  %v5344_v23 = vrot.slane %v5342_v55, 5  ;;  %v12561_v12 = vld [vmem:[%s14861_s23 + $0xb0] sm:$0x1]  ;;  %v12625_v41 = vcombine.low %v5307_v10, %v5317_v33  ;;  %v5350_v5 = vrot.slane %v5348_v26, 5  ;;  %14252 = vmatmul.mubr.msk.bf16.gmra.mrb[132].mxu1 %vm569_vm1, %v14742_v57 }
 0x13c   : > { %18511 = vst [vmem:[#allocation27_spill] sm:$0xff] %v15857_v51  ;;  %v5332_v51 = vrot.slane %v5331_v34, 4  ;;  %v5327_v11 = vsel %vm14943_vm7, %v5322_v37, %v5326_v38  ;;  %v5358_v21 = vshll.u32 %v12559_v31, 16  ;;  %v5362_v32 = vshrl.u32 %v12559_v31, 16  ;;  %v12563_v55 = vld [vmem:[%s14861_s23 + $0xb8] sm:$0xf]  ;;  %14255 = vmatprep.mubr.msk.bf16.mxu1 %vm569_vm1, %v14743_v56 }
 0x13d   : > { %v5345_v25 = vor.u32 %v5344_v23, %v5341_v9  ;;  %14325 = vmatprep.mubr.msk.bf16.mxu0 %vm569_vm1, %v12625_v41  ;;  %v5354_v53 = vrot.slane %v5352_v50, 4  ;;  %v5368_v49 = vshll.u32 %v12560_v40, 16  ;;  %v5372_v22 = vshrl.u32 %v12560_v40, 16  ;;  %v12564_v31 = vld [vmem:[%s14861_s23 + $0xbc] sm:$0xf] }
 0x13e   : > { %v5337_v44 = vsel %vm14943_vm7, %v5332_v51, %v5336_v19  ;;  %v5360_v34 = vrot.slane %v5358_v21, 5  ;;  %v5364_v26 = vrot.slane %v5362_v32, 4  ;;  %v5378_v9 = vshll.u32 %v12561_v12, 16  ;;  %v14744_v21 = vld [vmem:[%s14861_s23 + $0xa8] sm:$0xff]  }
 0x13f   : > { %v12626_v42 = vcombine.low %v5327_v11, %v5337_v44  ;;  %v5346_v38 = vrot.slane %v5345_v25, 4  ;;  %v5355_v51 = vor.u32 %v5354_v53, %v5350_v5  ;;  %v5370_v19 = vrot.slane %v5368_v49, 5  ;;  %v12565_v25 = vld [vmem:[%s14861_s23 + $0xc0] sm:$0xf] }
 0x140   : > { %v15877_v10 = vpop.f32.mrb[44].mxu0  ;;  %v15881_v33 = vpop.f32.mrb[44].mxu1  ;;  %v5374_v40 = vrot.slane %v5372_v22, 4  ;;  %v5365_v32 = vor.u32 %v5364_v26, %v5360_v34  ;;  %v5383_v50 = vshrl.u32 %v12562_v8, 16  ;;  %v5386_v11 = vshll.u32 %v12562_v8, 16 }
 0x141   : > { %18512 = vst [vmem:[#allocation28_spill] sm:$0xff] %v15877_v10  ;;  %v15883_v37 = vpop.f32.mrb[45].mxu0  ;;  %v15886_v23 = vpop.f32.mrb[45].mxu1  ;;  %v5351_v41 = vsel %vm14943_vm7, %v5346_v38, %v5350_v5  ;;  %14326 = vmatmul.mubr.msk.bf16.gmra.mrb[132].mxu0 %vm569_vm1, %v12626_v42  ;;  %v5356_v56 = vrot.slane %v5355_v51, 4  ;;  %v5380_v12 = vrot.slane %v5378_v9, 5  ;;  %v5392_v49 = vshll.u32 %v12563_v55, 16 }
 0x142   : > { %18513 = vst [vmem:[#allocation29_spill] sm:$0xff] %v15883_v37  ;;  %v14164_v57 = vpop.f32.mrb[46].mxu0  ;;  %v14090_v44 = vpop.f32.mrb[46].mxu1  ;;  %v5375_v53 = vor.u32 %v5374_v40, %v5370_v19  ;;  %v5366_v5 = vrot.slane %v5365_v32, 4  ;;  %v5385_v38 = vrot.slane %v5383_v50, 4  ;;  %v5388_v26 = vrot.slane %v5386_v11, 5 }
 0x143   : > { %v15892_v37 = vpop.f32.mrb[47].mxu0  ;;  %v15895_v22 = vpop.f32.mrb[47].mxu1  ;;  %v5396_v57 = vshrl.u32 %v12563_v55, 16  ;;  %v5361_v8 = vsel %vm14943_vm7, %v5356_v56, %v5360_v34  ;;  %v5394_v10 = vrot.slane %v5392_v49, 5  ;;  %v5402_v42 = vshll.u32 %v12564_v31, 16  ;;  %14256 = vmatmul.mubr.msk.bf16.gmra.mrb[136].mxu1 %vm569_vm1, %v14744_v21 }
 0x144   : > { %18514 = vst [vmem:[#allocation30_spill] sm:$0xff] %v15892_v37  ;;  %v5376_v44 = vrot.slane %v5375_v53, 4  ;;  %v14745_v37 = vld [vmem:[%s14861_s23 + $0xb4] sm:$0xff]   ;;  %v12627_v51 = vcombine.low %v5351_v41, %v5361_v8  ;;  %v5371_v40 = vsel %vm14943_vm7, %v5366_v5, %v5370_v19  ;;  %v5389_v9 = vor.u32 %v5388_v26, %v5385_v38  ;;  %v12567_v32 = vld [vmem:[%s14861_s23 + $0xc8] sm:$0xf] }
 0x145   : > { %v5398_v17 = vrot.slane %v5396_v57, 4  ;;  %v5404_v50 = vrot.slane %v5402_v42, 5  ;;  %v5406_v11 = vshrl.u32 %v12564_v31, 16  ;;  %v5412_v43 = vshll.u32 %v12565_v25, 16  ;;  %v12568_v34 = vld [vmem:[%s14861_s23 + $0xcc] sm:$0xf]  ;;  %14259 = vmatprep.mubr.msk.bf16.mxu1 %vm569_vm1, %v14745_v37 }
 0x146   : > { %v5381_v55 = vsel %vm14943_vm7, %v5376_v44, %v5380_v12  ;;  %14329 = vmatprep.mubr.msk.bf16.mxu0 %vm569_vm1, %v12627_v51  ;;  %v5390_v19 = vrot.slane %v5389_v9, 4  ;;  %v5416_v49 = vshrl.u32 %v12565_v25, 16  ;;  %v12569_v5 = vld [vmem:[%s14861_s23 + $0xd0] sm:$0xf]  ;;  %v5422_v57 = vshll.u32 %v12566_v13, 16  ;;  %v14746_v25 = vld [vmem:[%s14861_s23 + $0xbc] sm:$0xff]  }
 0x147   : > { %v12628_v41 = vcombine.low %v5371_v40, %v5381_v55  ;;  %v5399_v53 = vor.u32 %v5398_v17, %v5394_v10  ;;  %v5408_v31 = vrot.slane %v5406_v11, 4  ;;  %v5414_v26 = vrot.slane %v5412_v43, 5  ;;  %v12570_v9 = vld [vmem:[%s14861_s23 + $0xd4] sm:$0xf] }
 0x148   : > { %v15907_v56 = vpop.f32.mrb[48].mxu0  ;;  %v15912_v38 = vpop.f32.mrb[48].mxu1  ;;  %v5427_v8 = vshrl.u32 %v12567_v32, 16  ;;  %v5395_v42 = vsel %vm14943_vm7, %v5390_v19, %v5394_v10  ;;  %v5418_v51 = vrot.slane %v5416_v49, 4  ;;  %v5430_v40 = vshll.u32 %v12567_v32, 16 }
 0x149   : > { %18515 = vst [vmem:[#allocation31_spill] sm:$0xff] %v15907_v56  ;;  %v15914_v12 = vpop.f32.mrb[49].mxu0  ;;  %v15917_v44 = vpop.f32.mrb[49].mxu1  ;;  %v5400_v17 = vrot.slane %v5399_v53, 4  ;;  %14330 = vmatmul.mubr.msk.bf16.gmra.mrb[136].mxu0 %vm569_vm1, %v12628_v41  ;;  %v5409_v43 = vor.u32 %v5408_v31, %v5404_v50  ;;  %v5424_v13 = vrot.slane %v5422_v57, 5  ;;  %v5436_v11 = vshll.u32 %v12568_v34, 16 }
 0x14a   : > { %18516 = vst [vmem:[#allocation32_spill] sm:$0xff] %v15914_v12  ;;  %v14168_v21 = vpop.f32.mrb[50].mxu0  ;;  %v14094_v55 = vpop.f32.mrb[50].mxu1  ;;  %v5429_v37 = vrot.slane %v5427_v8, 4  ;;  %v5419_v19 = vor.u32 %v5418_v51, %v5414_v26  ;;  %v5432_v53 = vrot.slane %v5430_v40, 5  ;;  %v5440_v32 = vshrl.u32 %v12568_v34, 16 }
 0x14b   : > { %v15923_v12 = vpop.f32.mrb[51].mxu0  ;;  %v15926_v56 = vpop.f32.mrb[51].mxu1  ;;  %v5405_v10 = vsel %vm14943_vm7, %v5400_v17, %v5404_v50  ;;  %v13101_v49 = vld [vmem:[%s18471_s1 + $0x1c] sm:$0xf]  ;;  %v5410_v41 = vrot.slane %v5409_v43, 4  ;;  %v14747_v31 = vld [vmem:[%s14861_s23 + $0xc8] sm:$0xff]   ;;  %14260 = vmatmul.mubr.msk.bf16.gmra.mrb[140].mxu1 %vm569_vm1, %v14746_v25 }
 0x14c   : > { %18517 = vst [vmem:[#allocation33_spill] sm:$0xff] %v15923_v12  ;;  %v12629_v21 = vcombine.low %v5395_v42, %v5405_v10  ;;  %v5438_v57 = vrot.slane %v5436_v11, 5  ;;  %v5446_v8 = vshll.u32 %v12569_v5, 16  ;;  %14679 = vmatprep.subr.msk.bf16.mxu1 %vm678_vm0, %v13101_v49  ;;  %v5420_v55 = vrot.slane %v5419_v19, 4  ;;  %v12571_v17 = vld [vmem:[%s14861_s23 + $0xd8] sm:$0x1]  ;;  %14263 = vmatprep.mubr.msk.bf16.mxu1 %vm569_vm1, %v14747_v31 }
 0x14d   : > { %v5433_v12 = vor.u32 %v5432_v53, %v5429_v37  ;;  %v5442_v48 = vrot.slane %v5440_v32, 4  ;;  %v5450_v50 = vshrl.u32 %v12569_v5, 16  ;;  %v5415_v34 = vsel %vm14943_vm7, %v5410_v41, %v5414_v26  ;;  %v12572_v43 = vld [vmem:[%s14861_s23 + $0xdc] sm:$0xf]  ;;  %v12573_v53 = vld [vmem:[%s14861_s23 + $0xe0] sm:$0xf] }
 0x14e   : > { %14333 = vmatprep.mubr.msk.bf16.mxu0 %vm569_vm1, %v12629_v21  ;;  %v5448_v51 = vrot.slane %v5446_v8, 5  ;;  %v5456_v42 = vshll.u32 %v12570_v9, 16  ;;  %v5460_v40 = vshrl.u32 %v12570_v9, 16  ;;  %v5425_v37 = vsel %vm14943_vm7, %v5420_v55, %v5424_v13 }
 0x14f   : > { %v5434_v11 = vrot.slane %v5433_v12, 4  ;;  %v5443_v19 = vor.u32 %v5442_v48, %v5438_v57  ;;  %v5452_v5 = vrot.slane %v5450_v50, 4  ;;  %v12630_v26 = vcombine.low %v5415_v34, %v5425_v37 }
 0x150   : > { %v15940_v10 = vpop.f32.mrb[52].mxu0  ;;  %v15946_v32 = vpop.f32.mrb[52].mxu1  ;;  %v5458_v9 = vrot.slane %v5456_v42, 5  ;;  %v5462_v21 = vrot.slane %v5460_v40, 4  ;;  %v5466_v41 = vshll.u32 %v12571_v17, 16  ;;  %v15957_v55 = vadd.f32 %v15849_v39, %v15573_v24 }
 0x151   : > { %18518 = vst [vmem:[#allocation34_spill] sm:$0xff] %v15940_v10  ;;  %v15948_v49 = vpop.f32.mrb[53].mxu0  ;;  %v15951_v25 = vpop.f32.mrb[53].mxu1  ;;  %v5439_v48 = vsel %vm14943_vm7, %v5434_v11, %v5438_v57  ;;  %v5444_v12 = vrot.slane %v5443_v19, 4  ;;  %v5453_v13 = vor.u32 %v5452_v5, %v5448_v51  ;;  %v15964_v17 = vld [vmem:[%s18471_s1 + $0x20] sm:$0xf]  ;;  %14334 = vmatmul.mubr.msk.bf16.gmra.mrb[140].mxu0 %vm569_vm1, %v12630_v26  ;;  %v15969_v42 = vadd.f32 %v15855_v60, %v15577_v28 }
 0x152   : > { %18519 = vst [vmem:[#allocation35_spill] sm:$0xff] %v15948_v49  ;;  %v14172_v8 = vpop.f32.mrb[54].mxu0  ;;  %v14098_v50 = vpop.f32.mrb[54].mxu1  ;;  %v5463_v34 = vor.u32 %v5462_v21, %v5458_v9  ;;  %v5468_v57 = vrot.slane %v5466_v41, 5  ;;  %v15973_v24 = vadd.f32 %v15863_v59, %v15586_v4  ;;  %v12574_v39 = vld [vmem:[%s14861_s23 + $0xe4] sm:$0xf]  ;;  %14680 = vmatprep.subr.msk.bf16.mxu0 %vm678_vm0, %v15964_v17 }
 0x153   : > { %v15959_v31 = vpop.f32.mrb[55].mxu0  ;;  %v12575_v40 = vld [vmem:[%s14861_s23 + $0xe8] sm:$0xf]  ;;  %v15977_v37 = vpop.f32.mrb[55].mxu1  ;;  %v5449_v11 = vsel %vm14943_vm7, %v5444_v12, %v5448_v51  ;;  %v14748_v19 = vld [vmem:[%s14861_s23 + $0xd0] sm:$0xff]   ;;  %v5454_v5 = vrot.slane %v5453_v13, 4 }
 0x154   : > { %18520 = vst [vmem:[#allocation36_spill] sm:$0xff] %v15959_v31  ;;  %v5471_v26 = vshrl.u32 %v12572_v43, 16  ;;  %v5474_v21 = vshll.u32 %v12572_v43, 16  ;;  %v12576_v28 = vld [vmem:[%s14861_s23 + $0xec] sm:$0x1]  ;;  %v12631_v60 = vcombine.low %v5439_v48, %v5449_v11  ;;  %v5464_v41 = vrot.slane %v5463_v34, 4  ;;  %14264 = vmatmul.mubr.msk.bf16.gmra.mrb[144].mxu1 %vm569_vm1, %v14748_v19 }
 0x155   : > { %v14749_v4 = vld [vmem:[%s14861_s23 + $0xdc] sm:$0xff]   ;;  %v5480_v59 = vshll.u32 %v12573_v53, 16  ;;  %v5484_v8 = vshrl.u32 %v12573_v53, 16  ;;  %v5459_v50 = vsel %vm14943_vm7, %v5454_v5, %v5458_v9  ;;  %v5490_v10 = vshll.u32 %v12574_v39, 16  ;;  %v12577_v48 = vld [vmem:[%s14861_s23 + $0xf0] sm:$0xf] }
 0x156   : > { %v5473_v31 = vrot.slane %v5471_v26, 4  ;;  %v5476_v49 = vrot.slane %v5474_v21, 5  ;;  %14337 = vmatprep.mubr.msk.bf16.mxu0 %vm569_vm1, %v12631_v60  ;;  %v5469_v51 = vsel %vm14943_vm7, %v5464_v41, %v5468_v57  ;;  %v5494_v13 = vshrl.u32 %v12574_v39, 16  ;;  %v12578_v26 = vld [vmem:[%s14861_s23 + $0xf4] sm:$0xf]  ;;  %14267 = vmatprep.mubr.msk.bf16.mxu1 %vm569_vm1, %v14749_v4 }
 0x157   : > { %v5482_v43 = vrot.slane %v5480_v59, 5  ;;  %v5486_v12 = vrot.slane %v5484_v8, 4  ;;  %v12632_v53 = vcombine.low %v5459_v50, %v5469_v51  ;;  %v5492_v11 = vrot.slane %v5490_v10, 5 }
 0x158   : > { %v15992_v34 = vpop.f32.mrb[56].mxu0  ;;  %v5477_v9 = vor.u32 %v5476_v49, %v5473_v31  ;;  %v5500_v5 = vshll.u32 %v12575_v40, 16  ;;  %v15996_v21 = vpop.f32.mrb[56].mxu1  ;;  %v5496_v41 = vrot.slane %v5494_v13, 4  ;;  %v5504_v39 = vshrl.u32 %v12575_v40, 16  ;;  %v14750_v49 = vld [vmem:[%s14861_s23 + $0xe4] sm:$0xff]  }
 0x159   : > { %18521 = vst [vmem:[#allocation37_spill] sm:$0xff] %v15992_v34  ;;  %v15998_v60 = vpop.f32.mrb[57].mxu0  ;;  %v5487_v57 = vor.u32 %v5486_v12, %v5482_v43  ;;  %v5510_v59 = vshll.u32 %v12576_v28, 16  ;;  %v16001_v8 = vpop.f32.mrb[57].mxu1  ;;  %v16006_v31 = vadd.f32 %v15881_v33, %v15606_v15  ;;  %v16010_v4 = vadd.f32 %v15886_v23, %v15614_v20  ;;  %14338 = vmatmul.mubr.msk.bf16.gmra.mrb[144].mxu0 %vm569_vm1, %v12632_v53  ;;  %v12579_v33 = vld [vmem:[%s14861_s23 + $0xf8] sm:$0xf] }
 0x15a   : > { %18522 = vst [vmem:[#allocation38_spill] sm:$0xff] %v15998_v60  ;;  %v14176_v19 = vpop.f32.mrb[58].mxu0  ;;  %v5478_v34 = vrot.slane %v5477_v9, 4  ;;  %v5502_v10 = vrot.slane %v5500_v5, 5  ;;  %v14102_v50 = vpop.f32.mrb[58].mxu1  ;;  %v5497_v51 = vor.u32 %v5496_v41, %v5492_v11  ;;  %v5506_v12 = vrot.slane %v5504_v39, 4 }
 0x15b   : > { %18523 = vst [vmem:[#allocation39_spill] sm:$0xff] %v16010_v4  ;;  %v16012_v40 = vpop.f32.mrb[59].mxu0  ;;  %v5488_v28 = vrot.slane %v5487_v57, 4  ;;  %v5512_v13 = vrot.slane %v5510_v59, 5  ;;  %v14751_v9 = vld [vmem:[%s14861_s23 + $0xf0] sm:$0xff]   ;;  %v16016_v5 = vpop.f32.mrb[59].mxu1  ;;  %v16022_v20 = vadd.f32 %v15895_v22, %v15623_v36 }
 0x15c   : > { %18524 = vst [vmem:[#allocation40_spill] sm:$0xff] %v16012_v40  ;;  %v5483_v15 = vsel %vm14943_vm7, %v5478_v34, %v5482_v43  ;;  %v5515_v23 = vshrl.u32 %v12577_v48, 16  ;;  %v5518_v19 = vshll.u32 %v12577_v48, 16  ;;  %v12580_v50 = vld [vmem:[%s14861_s23 + $0xfc] sm:$0xf]  ;;  %v5498_v57 = vrot.slane %v5497_v51, 4  ;;  %14268 = vmatmul.mubr.msk.bf16.gmra.mrb[148].mxu1 %vm569_vm1, %v14750_v49 }
 0x15d   : > { %18525 = vst [vmem:[#allocation41_spill] sm:$0xff] %v16022_v20  ;;  %v5493_v53 = vsel %vm14943_vm7, %v5488_v28, %v5492_v11  ;;  %v5507_v41 = vor.u32 %v5506_v12, %v5502_v10  ;;  %v5524_v39 = vshll.u32 %v12578_v26, 16  ;;  %v12581_v59 = vld [vmem:[%s14861_s23 + $0x100] sm:$0x1]  ;;  %v5528_v43 = vshrl.u32 %v12578_v26, 16  ;;  %14271 = vmatprep.mubr.msk.bf16.mxu1 %vm569_vm1, %v14751_v9 }
 0x15e   : > { %v12633_v40 = vcombine.low %v5483_v15, %v5493_v53  ;;  %v5517_v60 = vrot.slane %v5515_v23, 4  ;;  %v5520_v4 = vrot.slane %v5518_v19, 5  ;;  %v5503_v36 = vsel %vm14943_vm7, %v5498_v57, %v5502_v10  ;;  %v12582_v15 = vld [vmem:[%s14861_s23 + $0x104] sm:$0xf] }
 0x15f   : > { %v5508_v22 = vrot.slane %v5507_v41, 4  ;;  %v5526_v34 = vrot.slane %v5524_v39, 5  ;;  %v5534_v20 = vshll.u32 %v12579_v33, 16  ;;  %v5530_v28 = vrot.slane %v5528_v43, 4  ;;  %v12583_v39 = vld [vmem:[%s14861_s23 + $0x108] sm:$0xf] }
 0x160   : > { %v16031_v48 = vpop.f32.mrb[60].mxu0  ;;  %14341 = vmatprep.mubr.msk.bf16.mxu0 %vm569_vm1, %v12633_v40  ;;  %v5521_v11 = vor.u32 %v5520_v4, %v5517_v60  ;;  %v5538_v51 = vshrl.u32 %v12579_v33, 16  ;;  %v5544_v12 = vshll.u32 %v12580_v50, 16  ;;  %v16036_v23 = vpop.f32.mrb[60].mxu1  ;;  %v5548_v53 = vshrl.u32 %v12580_v50, 16 }
 0x161   : > { %18526 = vst [vmem:[#allocation42_spill] sm:$0xff] %v16031_v48  ;;  %v16038_v26 = vpop.f32.mrb[61].mxu0  ;;  %v5513_v10 = vsel %vm14943_vm7, %v5508_v22, %v5512_v13  ;;  %v5536_v19 = vrot.slane %v5534_v20, 5  ;;  %v5554_v40 = vshll.u32 %v12581_v59, 16  ;;  %v16043_v57 = vpop.f32.mrb[61].mxu1  ;;  %v5531_v33 = vor.u32 %v5530_v28, %v5526_v34 }
 0x162   : > { %18527 = vst [vmem:[#allocation43_spill] sm:$0xff] %v16038_v26  ;;  %v14180_v60 = vpop.f32.mrb[62].mxu0  ;;  %v12634_v49 = vcombine.low %v5503_v36, %v5513_v10  ;;  %v5522_v4 = vrot.slane %v5521_v11, 4  ;;  %v5540_v41 = vrot.slane %v5538_v51, 4  ;;  %v14106_v43 = vpop.f32.mrb[62].mxu1  ;;  %v5546_v13 = vrot.slane %v5544_v12, 5 }
 0x163   : > { %v16046_v26 = vpop.f32.mrb[63].mxu0  ;;  %v5550_v22 = vrot.slane %v5548_v53, 4  ;;  %v5556_v9 = vrot.slane %v5554_v40, 5  ;;  %v16050_v20 = vadd.f32 %v15912_v38, %v15636_v46  ;;  %v16052_v50 = vpop.f32.mrb[63].mxu1  ;;  %v5532_v36 = vrot.slane %v5531_v33, 4  ;;  %v14752_v11 = vld [vmem:[%s14861_s23 + $0xf8] sm:$0xff]  }
 0x164   : > { %18528 = vst [vmem:[#allocation44_spill] sm:$0xff] %v16046_v26  ;;  %14342 = vmatmul.mubr.msk.bf16.gmra.mrb[148].mxu0 %vm569_vm1, %v12634_v49  ;;  %v5527_v59 = vsel %vm14943_vm7, %v5522_v4, %v5526_v34  ;;  %v5541_v28 = vor.u32 %v5540_v41, %v5536_v19  ;;  %v16060_v51 = vadd.f32 %v15917_v44, %v15645_v16  ;;  %v14753_v12 = vld [vmem:[%s14861_s23 + $0x104] sm:$0xff]   ;;  %v12584_v38 = vld [vmem:[%s14861_s23 + $0x10c] sm:$0xf]  ;;  %v5559_v53 = vshrl.u32 %v12582_v15, 16 }
 0x165   : > { %v5551_v10 = vor.u32 %v5550_v22, %v5546_v13  ;;  %v16065_v46 = vadd.f32 %v15926_v56, %v15651_v47  ;;  %v5562_v40 = vshll.u32 %v12582_v15, 16  ;;  %v12585_v60 = vld [vmem:[%s14861_s23 + $0x110] sm:$0xf]  ;;  %v5537_v34 = vsel %vm14943_vm7, %v5532_v36, %v5536_v19  ;;  %14272 = vmatmul.mubr.msk.bf16.gmra.mrb[152].mxu1 %vm569_vm1, %v14752_v11  ;;  %v12586_v26 = vld [vmem:[%s14861_s23 + $0x114] sm:$0x1] }
 0x166   : > { %v5542_v49 = vrot.slane %v5541_v28, 4  ;;  %v5568_v4 = vshll.u32 %v12583_v39, 16  ;;  %v5572_v33 = vshrl.u32 %v12583_v39, 16  ;;  %v12635_v41 = vcombine.low %v5527_v59, %v5537_v34  ;;  %14275 = vmatprep.mubr.msk.bf16.mxu1 %vm569_vm1, %v14753_v12  ;;  %v12587_v11 = vld [vmem:[%s14861_s23 + $0x118] sm:$0xf] }
 0x167   : > { %v5552_v16 = vrot.slane %v5551_v10, 4  ;;  %v5561_v44 = vrot.slane %v5559_v53, 4  ;;  %v5564_v43 = vrot.slane %v5562_v40, 5  ;;  %v5578_v15 = vshll.u32 %v12584_v38, 16 }
 0x168   : > { %v5547_v47 = vsel %vm14943_vm7, %v5542_v49, %v5546_v13  ;;  %v5570_v56 = vrot.slane %v5568_v4, 5  ;;  %v5574_v22 = vrot.slane %v5572_v33, 4  ;;  %v16075_v48 = vpop.f32.mrb[64].mxu1  ;;  %14345 = vmatprep.mubr.msk.bf16.mxu0 %vm569_vm1, %v12635_v41  ;;  %v5582_v59 = vshrl.u32 %v12584_v38, 16  ;;  %v16082_v28 = vpop.f32.mrb[64].mxu0 }
 0x169   : > { %v5557_v19 = vsel %vm14943_vm7, %v5552_v16, %v5556_v9  ;;  %v5565_v39 = vor.u32 %v5564_v43, %v5561_v44  ;;  %v5588_v36 = vshll.u32 %v12585_v60, 16  ;;  %18529 = vst [vmem:[#allocation45_spill] sm:$0xff] %v16082_v28  ;;  %v16084_v13 = vpop.f32.mrb[65].mxu1  ;;  %v5580_v40 = vrot.slane %v5578_v15, 5  ;;  %v12588_v49 = vld [vmem:[%s14861_s23 + $0x11c] sm:$0xf] }
 0x16a   : > { %v12636_v10 = vcombine.low %v5547_v47, %v5557_v19  ;;  %v5575_v53 = vor.u32 %v5574_v22, %v5570_v56  ;;  %v5592_v34 = vshrl.u32 %v12585_v60, 16  ;;  %v16087_v4 = vpop.f32.mrb[65].mxu0  ;;  %v14110_v33 = vpop.f32.mrb[66].mxu1  ;;  %v5584_v41 = vrot.slane %v5582_v59, 4  ;;  %v14754_v47 = vld [vmem:[%s14861_s23 + $0x10c] sm:$0xff]  }
 0x16b   : > { %18530 = vst [vmem:[#allocation46_spill] sm:$0xff] %v16087_v4  ;;  %v5566_v9 = vrot.slane %v5565_v39, 4  ;;  %v5590_v12 = vrot.slane %v5588_v36, 5  ;;  %v5598_v38 = vshll.u32 %v12586_v26, 16  ;;  %v14184_v16 = vpop.f32.mrb[66].mxu0  ;;  %v16089_v44 = vpop.f32.mrb[67].mxu1  ;;  %v16095_v60 = vadd.f32 %v15946_v32, %v15669_v6 }
 0x16c   : > { %14346 = vmatmul.mubr.msk.bf16.gmra.mrb[152].mxu0 %vm569_vm1, %v12636_v10  ;;  %v5576_v43 = vrot.slane %v5575_v53, 4  ;;  %v5594_v22 = vrot.slane %v5592_v34, 4  ;;  %v16099_v15 = vadd.f32 %v15951_v25, %v15675_v18  ;;  %v16101_v19 = vpop.f32.mrb[67].mxu0  ;;  %v5585_v39 = vor.u32 %v5584_v41, %v5580_v40  ;;  %v14755_v10 = vld [vmem:[%s14861_s23 + $0x118] sm:$0xff]   ;;  %v12589_v53 = vld [vmem:[%s14861_s23 + $0x120] sm:$0xf] }
 0x16d   : > { %18531 = vst [vmem:[#allocation47_spill] sm:$0xff] %v16101_v19  ;;  %v5571_v26 = vsel %vm14943_vm7, %v5566_v9, %v5570_v56  ;;  %v5600_v59 = vrot.slane %v5598_v38, 5  ;;  %v16107_v36 = vadd.f32 %v15977_v37, %v15691_v30  ;;  %v5603_v34 = vshrl.u32 %v12587_v11, 16  ;;  %v12590_v25 = vld [vmem:[%s14861_s23 + $0x124] sm:$0xf]  ;;  %14276 = vmatmul.mubr.msk.bf16.gmra.mrb[156].mxu1 %vm569_vm1, %v14754_v47 }
 0x16e   : > { %v5581_v6 = vsel %vm14943_vm7, %v5576_v43, %v5580_v40  ;;  %v5595_v32 = vor.u32 %v5594_v22, %v5590_v12  ;;  %v5606_v18 = vshll.u32 %v12587_v11, 16  ;;  %v5586_v16 = vrot.slane %v5585_v39, 4  ;;  %14279 = vmatprep.mubr.msk.bf16.mxu1 %vm569_vm1, %v14755_v10  ;;  %v14756_v39 = vld [vmem:[%s14861_s23 + $0x120] sm:$0xff]   ;;  %v12593_v10 = vld [vmem:[%s14861_s23 + $0x130] sm:$0xf] }
 0x16f   : > { %v12637_v33 = vcombine.low %v5571_v26, %v5581_v6  ;;  %v5612_v19 = vshll.u32 %v12588_v49, 16  ;;  %v5616_v56 = vshrl.u32 %v12588_v49, 16  ;;  %v5605_v30 = vrot.slane %v5603_v34, 4  ;;  %v12591_v49 = vld [vmem:[%s14861_s23 + $0x128] sm:$0x1] }
 0x170   : > { %v5596_v9 = vrot.slane %v5595_v32, 4  ;;  %v5608_v37 = vrot.slane %v5606_v18, 5  ;;  %v5622_v41 = vshll.u32 %v12589_v53, 16  ;;  %v5591_v40 = vsel %vm14943_vm7, %v5586_v16, %v5590_v12 }
 0x171   : > { %14349 = vmatprep.mubr.msk.bf16.mxu0 %vm569_vm1, %v12637_v33  ;;  %v5614_v11 = vrot.slane %v5612_v19, 5  ;;  %v5618_v38 = vrot.slane %v5616_v56, 4  ;;  %v5626_v43 = vshrl.u32 %v12589_v53, 16  ;;  %v5632_v6 = vshll.u32 %v12590_v25, 16  ;;  %v12592_v33 = vld [vmem:[%s14861_s23 + $0x12c] sm:$0xf] }
 0x172   : > { %v5601_v47 = vsel %vm14943_vm7, %v5596_v9, %v5600_v59  ;;  %v5609_v22 = vor.u32 %v5608_v37, %v5605_v30  ;;  %v5624_v26 = vrot.slane %v5622_v41, 5  ;;  %v5636_v12 = vshrl.u32 %v12590_v25, 16  ;;  %v14757_v59 = vld [vmem:[%s14861_s23 + $0x12c] sm:$0xff]   ;;  %v12594_v9 = vld [vmem:[%s14861_s23 + $0x134] sm:$0xf]  ;;  %v16131_v30 = vpop.f32.mrb[68].mxu1 }
 0x173   : > { %v12638_v32 = vcombine.low %v5591_v40, %v5601_v47  ;;  %v5619_v34 = vor.u32 %v5618_v38, %v5614_v11  ;;  %v5628_v18 = vrot.slane %v5626_v43, 4  ;;  %v5634_v16 = vrot.slane %v5632_v6, 5  ;;  %v16133_v37 = vpop.f32.mrb[68].mxu0  ;;  %v12595_v43 = vld [vmem:[%s14861_s23 + $0x138] sm:$0xf] }
 0x174   : > { %v5610_v19 = vrot.slane %v5609_v22, 4  ;;  %v5642_v53 = vshll.u32 %v12591_v49, 16  ;;  %v16127_v56 = vadd.f32 %v15996_v21, %v15705_v58  ;;  %v5638_v40 = vrot.slane %v5636_v12, 4  ;;  %v16141_v49 = vpop.f32.mrb[69].mxu1  ;;  %v16143_v58 = vpop.f32.mrb[69].mxu0 }
 0x175   : > { %14350 = vmatmul.mubr.msk.bf16.gmra.mrb[156].mxu0 %vm569_vm1, %v12638_v32  ;;  %v5620_v41 = vrot.slane %v5619_v34, 4  ;;  %v5629_v25 = vor.u32 %v5628_v18, %v5624_v26  ;;  %v16138_v38 = vadd.f32 %v16001_v8, %v15713_v29  ;;  %v16149_v22 = vadd.f32 %v16016_v5, %v15720_v3  ;;  %v14114_v32 = vpop.f32.mrb[70].mxu1  ;;  %v14188_v34 = vpop.f32.mrb[70].mxu0  ;;  %14280 = vmatmul.mubr.msk.bf16.gmra.mrb[160].mxu1 %vm569_vm1, %v14756_v39 }
 0x176   : > { %v5615_v21 = vsel %vm14943_vm7, %v5610_v19, %v5614_v11  ;;  %v5644_v47 = vrot.slane %v5642_v53, 5  ;;  %v5647_v6 = vshrl.u32 %v12592_v33, 16  ;;  %v5639_v18 = vor.u32 %v5638_v40, %v5634_v16  ;;  %v16153_v4 = vpop.f32.mrb[71].mxu1  ;;  %v16155_v28 = vpop.f32.mrb[71].mxu0  ;;  %14283 = vmatprep.mubr.msk.bf16.mxu1 %vm569_vm1, %v14757_v59  ;;  %v14758_v34 = vld [vmem:[%s14861_s23 + $0x134] sm:$0xff]  }
 0x177   : > { %18532 = vst [vmem:[#allocation48_spill] sm:$0xff] %v16138_v38  ;;  %18533 = vst [vmem:[#allocation49_spill] sm:$0xff] %v16149_v22  ;;  %v5625_v29 = vsel %vm14943_vm7, %v5620_v41, %v5624_v26  ;;  %v5630_v8 = vrot.slane %v5629_v25, 4  ;;  %v5650_v12 = vshll.u32 %v12592_v33, 16  ;;  %v5656_v3 = vshll.u32 %v12593_v10, 16 }
 0x178   : > { %v12639_v11 = vcombine.low %v5615_v21, %v5625_v29  ;;  %v5649_v19 = vrot.slane %v5647_v6, 4  ;;  %v5660_v5 = vshrl.u32 %v12593_v10, 16  ;;  %v5640_v32 = vrot.slane %v5639_v18, 4  ;;  %v12596_v33 = vld [vmem:[%s14861_s23 + $0x13c] sm:$0x1] }
 0x179   : > { %v5635_v53 = vsel %vm14943_vm7, %v5630_v8, %v5634_v16  ;;  %v5652_v26 = vrot.slane %v5650_v12, 5  ;;  %v5666_v41 = vshll.u32 %v12594_v9, 16  ;;  %v5658_v25 = vrot.slane %v5656_v3, 5  ;;  %v12597_v22 = vld [vmem:[%s14861_s23 + $0x140] sm:$0xf] }
 0x17a   : > { %14353 = vmatprep.mubr.msk.bf16.mxu0 %vm569_vm1, %v12639_v11  ;;  %v5662_v40 = vrot.slane %v5660_v5, 4  ;;  %v5670_v39 = vshrl.u32 %v12594_v9, 16  ;;  %v5676_v21 = vshll.u32 %v12595_v43, 16  ;;  %v5645_v10 = vsel %vm14943_vm7, %v5640_v32, %v5644_v47  ;;  %v12598_v38 = vld [vmem:[%s14861_s23 + $0x144] sm:$0xf] }
 0x17b   : > { %v5653_v6 = vor.u32 %v5652_v26, %v5649_v19  ;;  %v5668_v16 = vrot.slane %v5666_v41, 5  ;;  %v5680_v29 = vshrl.u32 %v12595_v43, 16  ;;  %v12640_v59 = vcombine.low %v5635_v53, %v5645_v10  ;;  %v14759_v47 = vld [vmem:[%s14861_s23 + $0x140] sm:$0xff]   ;;  %v12599_v26 = vld [vmem:[%s14861_s23 + $0x148] sm:$0xf] }
 0x17c   : > { %v5663_v8 = vor.u32 %v5662_v40, %v5658_v25  ;;  %v5672_v18 = vrot.slane %v5670_v39, 4  ;;  %v5678_v12 = vrot.slane %v5676_v21, 5  ;;  %v5686_v9 = vshll.u32 %v12596_v33, 16  ;;  %v12600_v40 = vld [vmem:[%s14861_s23 + $0x14c] sm:$0xf]  ;;  %v16186_v39 = vpop.f32.mrb[72].mxu1 }
 0x17d   : > { %v5654_v11 = vrot.slane %v5653_v6, 4  ;;  %v5682_v3 = vrot.slane %v5680_v29, 4  ;;  %v16170_v5 = vadd.f32 %v16036_v23, %v15740_v35  ;;  %14354 = vmatmul.mubr.msk.bf16.gmra.mrb[160].mxu0 %vm569_vm1, %v12640_v59  ;;  %v16176_v53 = vadd.f32 %v16043_v57, %v15745_v52  ;;  %14284 = vmatmul.mubr.msk.bf16.gmra.mrb[164].mxu1 %vm569_vm1, %v14758_v34  ;;  %v16194_v6 = vpop.f32.mrb[73].mxu1 }
 0x17e   : > { %v5664_v19 = vrot.slane %v5663_v8, 4  ;;  %v5673_v43 = vor.u32 %v5672_v18, %v5668_v16  ;;  %v16180_v32 = vadd.f32 %v16052_v50, %v15752_v14  ;;  %v5688_v23 = vrot.slane %v5686_v9, 5  ;;  %v12601_v14 = vld [vmem:[%s14861_s23 + $0x150] sm:$0x1]  ;;  %v16192_v50 = vpop.f32.mrb[72].mxu0  ;;  %14287 = vmatprep.mubr.msk.bf16.mxu1 %vm569_vm1, %v14759_v47 }
 0x17f   : > { %18534 = vst [vmem:[#allocation50_spill] sm:$0xff] %v16176_v53  ;;  %v5659_v41 = vsel %vm14943_vm7, %v5654_v11, %v5658_v25  ;;  %v5683_v35 = vor.u32 %v5682_v3, %v5678_v12  ;;  %v5691_v33 = vshrl.u32 %v12597_v22, 16  ;;  %v5694_v57 = vshll.u32 %v12597_v22, 16  ;;  %v16197_v18 = vpop.f32.mrb[73].mxu0  ;;  %v14118_v11 = vpop.f32.mrb[74].mxu1 }
 0x180   : > { %18535 = vst [vmem:[#allocation51_spill] sm:$0xff] %v16180_v32  ;;  %v5669_v21 = vsel %vm14943_vm7, %v5664_v19, %v5668_v16  ;;  %v5674_v52 = vrot.slane %v5673_v43, 4  ;;  %v5700_v10 = vshll.u32 %v12598_v38, 16  ;;  %v5704_v8 = vshrl.u32 %v12598_v38, 16  ;;  %v14192_v9 = vpop.f32.mrb[74].mxu0  ;;  %v16201_v19 = vpop.f32.mrb[75].mxu1 }
 0x181   : > { %v12641_v25 = vcombine.low %v5659_v41, %v5669_v21  ;;  %v5684_v29 = vrot.slane %v5683_v35, 4  ;;  %v5693_v59 = vrot.slane %v5691_v33, 4  ;;  %v5696_v22 = vrot.slane %v5694_v57, 5  ;;  %v16206_v35 = vpop.f32.mrb[75].mxu0  ;;  %v14761_v32 = vld [vmem:[%s14861_s23 + $0x154] sm:$0xff]  }
 0x182   : > { %v5679_v16 = vsel %vm14943_vm7, %v5674_v52, %v5678_v12  ;;  %v5702_v34 = vrot.slane %v5700_v10, 5  ;;  %v5710_v3 = vshll.u32 %v12599_v26, 16  ;;  %v5706_v47 = vrot.slane %v5704_v8, 4  ;;  %v14760_v52 = vld [vmem:[%s14861_s23 + $0x148] sm:$0xff]   ;;  %v12602_v53 = vld [vmem:[%s14861_s23 + $0x154] sm:$0xf] }
 0x183   : > { %14357 = vmatprep.mubr.msk.bf16.mxu0 %vm569_vm1, %v12641_v25  ;;  %v5689_v38 = vsel %vm14943_vm7, %v5684_v29, %v5688_v23  ;;  %v5714_v43 = vshrl.u32 %v12599_v26, 16  ;;  %v5720_v41 = vshll.u32 %v12600_v40, 16  ;;  %v5697_v12 = vor.u32 %v5696_v22, %v5693_v59 }
 0x184   : > { %v12642_v33 = vcombine.low %v5679_v16, %v5689_v38  ;;  %v5712_v21 = vrot.slane %v5710_v3, 5  ;;  %v5724_v57 = vshrl.u32 %v12600_v40, 16  ;;  %v5707_v10 = vor.u32 %v5706_v47, %v5702_v34  ;;  %v12603_v40 = vld [vmem:[%s14861_s23 + $0x158] sm:$0xf]  ;;  %v12604_v3 = vld [vmem:[%s14861_s23 + $0x15c] sm:$0xf] }
 0x185   : > { %v5716_v11 = vrot.slane %v5714_v43, 4  ;;  %v5722_v9 = vrot.slane %v5720_v41, 5  ;;  %v5730_v25 = vshll.u32 %v12601_v14, 16  ;;  %v5698_v26 = vrot.slane %v5697_v12, 4  ;;  %14288 = vmatmul.mubr.msk.bf16.gmra.mrb[168].mxu1 %vm569_vm1, %v14760_v52 }
 0x186   : > { %14358 = vmatmul.mubr.msk.bf16.gmra.mrb[164].mxu0 %vm569_vm1, %v12642_v33  ;;  %v5726_v23 = vrot.slane %v5724_v57, 4  ;;  %v16214_v29 = vadd.f32 %v16075_v48, %v15771_v0  ;;  %v16218_v59 = vadd.f32 %v16084_v13, %v15776_v2  ;;  %v5708_v8 = vrot.slane %v5707_v10, 4  ;;  %v12605_v2 = vld [vmem:[%s14861_s23 + $0x160] sm:$0xf]  ;;  %14291 = vmatprep.mubr.msk.bf16.mxu1 %vm569_vm1, %v14761_v32  ;;  %v12606_v57 = vld [vmem:[%s14861_s23 + $0x164] sm:$0x1] }
 0x187   : > { %v5717_v16 = vor.u32 %v5716_v11, %v5712_v21  ;;  %v5732_v22 = vrot.slane %v5730_v25, 5  ;;  %v16223_v14 = vadd.f32 %v16089_v44, %v15785_v7  ;;  %v5703_v38 = vsel %vm14943_vm7, %v5698_v26, %v5702_v34  ;;  %v16238_v25 = vpop.f32.mrb[76].mxu0 }
 0x188   : > { %v5727_v0 = vor.u32 %v5726_v23, %v5722_v9  ;;  %v5735_v48 = vshrl.u32 %v12602_v53, 16  ;;  %v5738_v47 = vshll.u32 %v12602_v53, 16  ;;  %v5713_v13 = vsel %vm14943_vm7, %v5708_v8, %v5712_v21  ;;  %v16236_v21 = vpop.f32.mrb[76].mxu1 }
 0x189   : > { %18536 = vst [vmem:[#allocation52_spill] sm:$0xff] %v16223_v14  ;;  %v5718_v43 = vrot.slane %v5717_v16, 4  ;;  %v5744_v41 = vshll.u32 %v12603_v40, 16  ;;  %v5748_v7 = vshrl.u32 %v12603_v40, 16  ;;  %v12643_v44 = vcombine.low %v5703_v38, %v5713_v13  ;;  %v14762_v40 = vld [vmem:[%s14861_s23 + $0x15c] sm:$0xff]   ;;  %v14763_v16 = vld [vmem:[%s14861_s23 + $0x168] sm:$0xff]  }
 0x18a   : > { %v5728_v33 = vrot.slane %v5727_v0, 4  ;;  %v5737_v12 = vrot.slane %v5735_v48, 4  ;;  %v5740_v34 = vrot.slane %v5738_v47, 5  ;;  %v5754_v11 = vshll.u32 %v12604_v3, 16  ;;  %v16245_v38 = vpop.f32.mrb[77].mxu1 }
 0x18b   : > { %v5723_v52 = vsel %vm14943_vm7, %v5718_v43, %v5722_v9  ;;  %v5746_v53 = vrot.slane %v5744_v41, 5  ;;  %v5750_v10 = vrot.slane %v5748_v7, 4  ;;  %14361 = vmatprep.mubr.msk.bf16.mxu0 %vm569_vm1, %v12643_v44  ;;  %v5758_v23 = vshrl.u32 %v12604_v3, 16  ;;  %v16247_v9 = vpop.f32.mrb[77].mxu0  ;;  %v12607_v43 = vld [vmem:[%s14861_s23 + $0x168] sm:$0xf] }
 0x18c   : > { %v5733_v32 = vsel %vm14943_vm7, %v5728_v33, %v5732_v22  ;;  %v5741_v26 = vor.u32 %v5740_v34, %v5737_v12  ;;  %v5764_v8 = vshll.u32 %v12605_v2, 16  ;;  %v5756_v47 = vrot.slane %v5754_v11, 5  ;;  %v14122_v41 = vpop.f32.mrb[78].mxu1  ;;  %v14196_v7 = vpop.f32.mrb[78].mxu0 }
 0x18d   : > { %v12644_v0 = vcombine.low %v5723_v52, %v5733_v32  ;;  %v5751_v48 = vor.u32 %v5750_v10, %v5746_v53  ;;  %v5768_v13 = vshrl.u32 %v12605_v2, 16  ;;  %v5760_v14 = vrot.slane %v5758_v23, 4  ;;  %v16250_v3 = vpop.f32.mrb[79].mxu1  ;;  %v16252_v12 = vpop.f32.mrb[79].mxu0  ;;  %14292 = vmatmul.mubr.msk.bf16.gmra.mrb[172].mxu1 %vm569_vm1, %v14762_v40  ;;  %v12608_v23 = vld [vmem:[%s14861_s23 + $0x16c] sm:$0xf] }
 0x18e   : > { %v5742_v44 = vrot.slane %v5741_v26, 4  ;;  %v5766_v22 = vrot.slane %v5764_v8, 5  ;;  %v5774_v33 = vshll.u32 %v12606_v57, 16  ;;  %v2680_v2 = vadd.f32 %v16131_v30, %v15801_v27  ;;  %14295 = vmatprep.mubr.msk.bf16.mxu1 %vm569_vm1, %v14763_v16 }
 0x18f   : > { %14362 = vmatmul.mubr.msk.bf16.gmra.mrb[168].mxu0 %vm569_vm1, %v12644_v0  ;;  %v5752_v34 = vrot.slane %v5751_v48, 4  ;;  %v5770_v52 = vrot.slane %v5768_v13, 4  ;;  %v2678_v10 = vadd.f32 %v16141_v49, %v15806_v1  ;;  %v5761_v57 = vor.u32 %v5760_v14, %v5756_v47  ;;  %v12609_v49 = vld [vmem:[%s14861_s23 + $0x170] sm:$0xf]  ;;  %v12611_v0 = vld [vmem:[%s14861_s23 + $0x178] sm:$0x1] }
 0x190   : > { %v5747_v11 = vsel %vm14943_vm7, %v5742_v44, %v5746_v53  ;;  %v5776_v32 = vrot.slane %v5774_v33, 5  ;;  %v2679_v26 = vadd.f32 %v16153_v4, %v15811_v61  ;;  %v16268_v30 = vadd.f32 %v16133_v37, %v2680_v2  ;;  %v12610_v4 = vld [vmem:[%s14861_s23 + $0x174] sm:$0xf] }
 0x191   : > { %v5757_v8 = vsel %vm14943_vm7, %v5752_v34, %v5756_v47  ;;  %v5771_v27 = vor.u32 %v5770_v52, %v5766_v22  ;;  %v16271_v1 = vadd.f32 %v16143_v58, %v2678_v10  ;;  %v5762_v53 = vrot.slane %v5761_v57, 4  ;;  %v14764_v44 = vld [vmem:[%s14861_s23 + $0x170] sm:$0xff]  }
 0x192   : > { %18537 = vst [vmem:[#allocation53_spill] sm:$0xff] %v16268_v30  ;;  %v12645_v14 = vcombine.low %v5747_v11, %v5757_v8  ;;  %v16276_v40 = vadd.f32 %v16155_v28, %v2679_v26  ;;  %v5779_v61 = vshrl.u32 %v12607_v43, 16  ;;  %v5782_v47 = vshll.u32 %v12607_v43, 16  ;;  %v12685_v57 = vld [vmem:[%s14861_s23 + $0x14] sm:$0xe]  ;;  %v16287_v26 = vpop.f32.mrb[80].mxu1 }
 0x193   : > { %18538 = vst [vmem:[#allocation54_spill] sm:$0xff] %v16271_v1  ;;  %v5772_v48 = vrot.slane %v5771_v27, 4  ;;  %v5788_v13 = vshll.u32 %v12608_v23, 16  ;;  %v5792_v37 = vshrl.u32 %v12608_v23, 16  ;;  %v5767_v58 = vsel %vm14943_vm7, %v5762_v53, %v5766_v22  ;;  %v16292_v53 = vpop.f32.mrb[81].mxu1  ;;  %v18613_v1 = vld [vmem:[#allocation40_spill] sm:$0xff] }
 0x194   : > { %18539 = vst [vmem:[#allocation55_spill] sm:$0xff] %v16276_v40  ;;  %14365 = vmatprep.mubr.msk.bf16.mxu0 %vm569_vm1, %v12645_v14  ;;  %v5781_v16 = vrot.slane %v5779_v61, 4  ;;  %v5798_v41 = vshll.u32 %v12609_v49, 16  ;;  %v5802_v7 = vshrl.u32 %v12609_v49, 16  ;;  %v5784_v33 = vrot.slane %v5782_v47, 5  ;;  %v16290_v14 = vpop.f32.mrb[80].mxu0 }
 0x195   : > { %v5777_v28 = vsel %vm14943_vm7, %v5772_v48, %v5776_v32  ;;  %v5790_v34 = vrot.slane %v5788_v13, 5  ;;  %v5794_v52 = vrot.slane %v5792_v37, 4  ;;  %v5808_v11 = vshll.u32 %v12610_v4, 16  ;;  %v12686_v49 = vld [vmem:[%s14861_s23 + $0x18] sm:$0xf]  ;;  %14296 = vmatmul.mubr.msk.bf16.gmra.mrb[176].mxu1 %vm569_vm1, %v14764_v44  ;;  %v16301_v47 = vpop.f32.mrb[81].mxu0 }
 0x196   : > { %v12646_v43 = vcombine.low %v5767_v58, %v5777_v28  ;;  %v5800_v2 = vrot.slane %v5798_v41, 5  ;;  %v5804_v10 = vrot.slane %v5802_v7, 4  ;;  %v5785_v22 = vor.u32 %v5784_v33, %v5781_v16  ;;  %v14126_v13 = vpop.f32.mrb[82].mxu1  ;;  %v14200_v7 = vpop.f32.mrb[82].mxu0  ;;  %v12760_v30 = vld [vmem:[%s14861_s23 + $0x140] sm:$0xe] }
 0x197   : > { %v5795_v23 = vor.u32 %v5794_v52, %v5790_v34  ;;  %v5812_v8 = vshrl.u32 %v12610_v4, 16  ;;  %v5818_v27 = vshll.u32 %v12611_v0, 16  ;;  %v5810_v61 = vrot.slane %v5808_v11, 5  ;;  %v12687_v0 = vld [vmem:[%s14861_s23 + $0x1c] sm:$0xf]  ;;  %v16303_v44 = vpop.f32.mrb[83].mxu1 }
 0x198   : > { %14366 = vmatmul.mubr.msk.bf16.gmra.mrb[172].mxu0 %vm569_vm1, %v12646_v43  ;;  %v5805_v32 = vor.u32 %v5804_v10, %v5800_v2  ;;  %v2684_v48 = vadd.f32 %v16186_v39, %v15547_v45  ;;  %v2682_v4 = vadd.f32 %v16194_v6, %v15553_v54  ;;  %v5786_v37 = vrot.slane %v5785_v22, 4  ;;  %v12688_v39 = vld [vmem:[%s14861_s23 + $0x20] sm:$0xf]  ;;  %v12689_v6 = vld [vmem:[%s14861_s23 + $0x24] sm:$0x1]  ;;  %v16315_v52 = vpop.f32.mrb[83].mxu0 }
 0x199   : > { %v5796_v58 = vrot.slane %v5795_v23, 4  ;;  %v5814_v16 = vrot.slane %v5812_v8, 4  ;;  %v5820_v41 = vrot.slane %v5818_v27, 5  ;;  %v2683_v54 = vadd.f32 %v16201_v19, %v15557_v62 }
 0x19a   : > { %v5806_v28 = vrot.slane %v5805_v32, 4  ;;  %v16306_v33 = vadd.f32 %v16192_v50, %v2684_v48  ;;  %v16309_v45 = vadd.f32 %v16197_v18, %v2682_v4  ;;  %v5791_v43 = vsel %vm14943_vm7, %v5786_v37, %v5790_v34  ;;  %v12690_v32 = vld [vmem:[%s14861_s23 + $0x28] sm:$0xe] }
 0x19b   : > { %v5801_v10 = vsel %vm14943_vm7, %v5796_v58, %v5800_v2  ;;  %v5815_v50 = vor.u32 %v5814_v16, %v5810_v61  ;;  %v12775_v11 = vrot.slane %v12685_v57, 9  ;;  %v16324_v62 = vadd.f32 %v16206_v35, %v2683_v54  ;;  %v14765_v4 = vld [vmem:[%s14861_s23 + $0x28] sm:$0xff]   ;;  %v14802_v35 = vld [vmem:[%s18471_s1 + $0x1c] sm:$0xf] }
 0x19c   : > { %18540 = vst [vmem:[#allocation56_spill] sm:$0xff] %v16306_v33  ;;  %18541 = vst [vmem:[#allocation57_spill] sm:$0xff] %v16309_v45  ;;  %v12647_v22 = vcombine.low %v5791_v43, %v5801_v10  ;;  %v5811_v18 = vsel %vm14943_vm7, %v5806_v28, %v5810_v61  ;;  %v6762_v19 = vrot.slane %v12686_v49, 5  ;;  %v6765_v8 = vrot.slane %v12687_v0, 5  ;;  %v12691_v0 = vld [vmem:[%s14861_s23 + $0x2c] sm:$0xf] }
 0x19d   : > { %18542 = vst [vmem:[#allocation58_spill] sm:$0xff] %v16324_v62  ;;  %v5816_v23 = vrot.slane %v5815_v50, 4  ;;  %v6768_v27 = vrot.slane %v12688_v39, 5  ;;  %v6771_v34 = vrot.slane %v12689_v6, 5  ;;  %v9756_v49 = vsel %vm678_vm0, %v14802_v35, 0  ;;  %v18544_v16 = vld [vmem:[#allocation4_spill] sm:$0xff] }
 0x19e   : > { %14369 = vmatprep.mubr.msk.bf16.mxu0 %vm569_vm1, %v12647_v22  ;;  %v6763_v57 = vsel %vm14931_vm6, %v12775_v11, %v6762_v19  ;;  %v6764_v48 = vrot.slane %v6762_v19, 4  ;;  %v16337_v61 = vsel %vm678_vm0, %v15964_v17, 0  ;;  %v6767_v37 = vrot.slane %v6765_v8, 4  ;;  %v12692_v28 = vld [vmem:[%s14861_s23 + $0x30] sm:$0xf]  ;;  %v18546_v43 = vld [vmem:[#allocation6_spill] sm:$0xff] }
 0x19f   : > { %v5821_v13 = vsel %vm14943_vm7, %v5816_v23, %v5820_v41  ;;  %v6770_v58 = vrot.slane %v6768_v27, 4  ;;  %v2688_v7 = vadd.f32 %v16236_v21, %v18544_v16  ;;  %v18545_v6 = vld [vmem:[#allocation5_spill] sm:$0xff]  ;;  %v2687_v10 = vadd.f32 %v16250_v3, %v18546_v43  ;;  %v12694_v41 = vld [vmem:[%s14861_s23 + $0x38] sm:$0x1]  ;;  %v12695_v19 = vld [vmem:[%s14861_s23 + $0x3c] sm:$0xe] }
 0x1a0   : > { %v12648_v54 = vcombine.low %v5811_v18, %v5821_v13  ;;  %v6766_v39 = vsel %vm14931_vm6, %v6764_v48, %v6765_v8  ;;  %v2686_v17 = vadd.f32 %v16245_v38, %v18545_v6  ;;  %v12693_v50 = vld [vmem:[%s14861_s23 + $0x34] sm:$0xf]  ;;  %v6769_v22 = vsel %vm14931_vm6, %v6767_v37, %v6768_v27  ;;  %v12696_v23 = vld [vmem:[%s14861_s23 + $0x40] sm:$0xf]  ;;  %v12697_v48 = vld [vmem:[%s14861_s23 + $0x44] sm:$0xf] }
 0x1a1   : > { %v12794_v11 = vcombine.low %v6763_v57, %v6766_v39  ;;  %v6772_v21 = vsel %vm14931_vm6, %v6770_v58, %v6771_v34  ;;  %v16358_v18 = vadd.f32 %v16238_v25, %v2688_v7  ;;  %v16367_v3 = vadd.f32 %v16252_v12, %v2687_v10  ;;  %v14129_v27 = vpop.f32.mrb[84].mxu1  ;;  %v14203_v35 = vpop.f32.mrb[84].mxu0  ;;  %v18596_v62 = vld [vmem:[#allocation33_spill] sm:$0xff]  ;;  %v12747_v45 = vld [vmem:[%s14861_s23 + $0x10c] sm:$0xf] }
 0x1a2   : > { %14370 = vmatmul.mubr.msk.bf16.gmra.mrb[176].mxu0 %vm569_vm1, %v12648_v54  ;;  %v12795_v38 = vcombine.low %v6769_v22, %v6772_v21  ;;  %v16364_v8 = vadd.f32 %v16247_v9, %v2686_v17  ;;  %v12776_v57 = vrot.slane %v12690_v32, 9  ;;  %v6775_v25 = vrot.slane %v12691_v0, 5  ;;  %v2551_v58 = vpop.f32.mrb[85].mxu1  ;;  %v3726_v16 = vpop.f32.mrb[85].mxu0  ;;  %v18550_v9 = vld [vmem:[#allocation7_spill] sm:$0xff]  ;;  %v18551_v32 = vld [vmem:[#allocation8_spill] sm:$0xff] }
 0x1a3   : > { %18547 = vst [vmem:[#allocation3_spill] sm:$0xff] %v16358_v18  ;;  %18549 = vst [vmem:[#allocation5_spill] sm:$0xff] %v16367_v3  ;;  %14375 = vmatprep.mubr.msk.bf16.mxu1 %vm569_vm1, %v12794_v11  ;;  %14449 = vmatprep.mubr.msk.bf16.mxu0 %vm569_vm1, %v14765_v4  ;;  %v6778_v34 = vrot.slane %v12692_v28, 5  ;;  %v6781_v13 = vrot.slane %v12693_v50, 5  ;;  %v6784_v37 = vrot.slane %v12694_v41, 5  ;;  %v2692_v12 = vadd.f32 %v16287_v26, %v18550_v9  ;;  %v18552_v54 = vld [vmem:[#allocation9_spill] sm:$0xff] }
 0x1a4   : > { %18548 = vst [vmem:[#allocation4_spill] sm:$0xff] %v16364_v8  ;;  %14376 = vmatmul.mubr.msk.bf16.vlgmr.msra.gmra.mrb[180].mxu1 %vm569_vm1, %v12795_v38  ;;  %v2690_v7 = vadd.f32 %v16292_v53, %v18551_v32  ;;  %v2691_v39 = vadd.f32 %v16303_v44, %v18552_v54  ;;  %v12777_v6 = vrot.slane %v12695_v19, 9  ;;  %v12698_v4 = vld [vmem:[%s14861_s23 + $0x48] sm:$0xf]  ;;  %v14130_v0 = vpop.f32.mrb[86].mxu1  ;;  %v14204_v28 = vpop.f32.mrb[86].mxu0  ;;  %v6776_v17 = vsel %vm14931_vm6, %v12776_v57, %v6775_v25 }
 0x1a5   : > { %14522 = vmatpush3.bf16.msra.mxu1 %v9756_v49  ;;  %v6777_v43 = vrot.slane %v6775_v25, 4  ;;  %v6780_v10 = vrot.slane %v6778_v34, 4  ;;  %v6783_v26 = vrot.slane %v6781_v13, 4  ;;  %v2554_v53 = vpop.f32.mrb[87].mxu1  ;;  %v3729_v50 = vpop.f32.mrb[87].mxu0  ;;  %v14766_v41 = vld [vmem:[%s14861_s23 + $0x30] sm:$0xff]   ;;  %v16384_v44 = vadd.f32 %v16290_v14, %v2692_v12 }
 0x1a6   : > { %v16387_v11 = vadd.f32 %v16301_v47, %v2690_v7  ;;  %v16390_v49 = vadd.f32 %v16315_v52, %v2691_v39  ;;  %v6788_v22 = vrot.slane %v12696_v23, 5  ;;  %v12699_v21 = vld [vmem:[%s14861_s23 + $0x4c] sm:$0x1]  ;;  %v12700_v19 = vld [vmem:[%s14861_s23 + $0x50] sm:$0xe]  ;;  %v14767_v57 = vld [vmem:[%s14861_s23 + $0x3c] sm:$0xff]  }
 0x1a7   : > { %18553 = vst [vmem:[#allocation6_spill] sm:$0xff] %v16384_v44  ;;  %v6779_v38 = vsel %vm14931_vm6, %v6777_v43, %v6778_v34  ;;  %v6782_v14 = vsel %vm14931_vm6, %v6780_v10, %v6781_v13  ;;  %v6785_v47 = vsel %vm14931_vm6, %v6783_v26, %v6784_v37  ;;  %v6791_v25 = vrot.slane %v12697_v48, 5  ;;  %v12701_v9 = vld [vmem:[%s14861_s23 + $0x54] sm:$0xf]  ;;  %v12702_v12 = vld [vmem:[%s14861_s23 + $0x58] sm:$0xf] }
 0x1a8   : > { %18554 = vst [vmem:[#allocation7_spill] sm:$0xff] %v16387_v11  ;;  %18555 = vst [vmem:[#allocation8_spill] sm:$0xff] %v16390_v49  ;;  %v12796_v52 = vcombine.low %v6776_v17, %v6779_v38  ;;  %v12797_v32 = vcombine.low %v6782_v14, %v6785_v47  ;;  %v6789_v23 = vsel %vm14931_vm6, %v12777_v6, %v6788_v22  ;;  %v6790_v7 = vrot.slane %v6788_v22, 4  ;;  %v12703_v54 = vld [vmem:[%s14861_s23 + $0x5c] sm:$0xf]  ;;  %v18557_v37 = vld [vmem:[#allocation11_spill] sm:$0xff] }
 0x1a9   : > { %v12704_v39 = vld [vmem:[%s14861_s23 + $0x60] sm:$0x1]  ;;  %v6793_v34 = vrot.slane %v6791_v25, 4  ;;  %v6794_v0 = vrot.slane %v12698_v4, 5  ;;  %v6797_v28 = vrot.slane %v12699_v21, 5  ;;  %v18556_v43 = vld [vmem:[#allocation10_spill] sm:$0xff]  ;;  %v2694_v6 = vadd.f32 %v2551_v58, %v18557_v37 }
 0x1aa   : > { %v2696_v13 = vadd.f32 %v14129_v27, %v18556_v43  ;;  %v12705_v10 = vld [vmem:[%s14861_s23 + $0x64] sm:$0xe]  ;;  %14450 = vmatmul.mubr.msk.bf16.vlgmr.msra.gmra.mrb[180].mxu0 %vm569_vm1, %v14766_v41  ;;  %14379 = vmatprep.mubr.msk.bf16.mxu1 %vm569_vm1, %v12796_v52  ;;  %v6792_v48 = vsel %vm14931_vm6, %v6790_v7, %v6791_v25  ;;  %v18558_v17 = vld [vmem:[#allocation12_spill] sm:$0xff]  ;;  %v12778_v4 = vrot.slane %v12700_v19, 9  ;;  %v6804_v47 = vrot.slane %v12702_v12, 5  ;;  %v14769_v25 = vld [vmem:[%s14861_s23 + $0x50] sm:$0xff]  }
 0x1ab   : > { %v2695_v26 = vadd.f32 %v2554_v53, %v18558_v17  ;;  %14596 = vmatpush3.bf16.msra.mxu0 %v16337_v61  ;;  %14453 = vmatprep.mubr.msk.bf16.mxu0 %vm569_vm1, %v14767_v57  ;;  %v12798_v27 = vcombine.low %v6789_v23, %v6792_v48  ;;  %v6795_v41 = vsel %vm14931_vm6, %v6793_v34, %v6794_v0  ;;  %v6796_v22 = vrot.slane %v6794_v0, 4  ;;  %v12706_v38 = vld [vmem:[%s14861_s23 + $0x68] sm:$0xf]  ;;  %v12707_v14 = vld [vmem:[%s14861_s23 + $0x6c] sm:$0xf]  ;;  %v14133_v7 = vpop.f32.mrb[88].mxu1 }
 0x1ac   : > { %v16419_v21 = vadd.f32 %v14203_v35, %v2696_v13  ;;  %14380 = vmatmul.mubr.msk.bf16.gmra.mrb[184].mxu1 %vm569_vm1, %v12797_v32  ;;  %v14768_v58 = vld [vmem:[%s14861_s23 + $0x44] sm:$0xff]   ;;  %v16425_v53 = vadd.f32 %v3726_v16, %v2694_v6  ;;  %v6801_v61 = vrot.slane %v12701_v9, 5  ;;  %v12708_v57 = vld [vmem:[%s14861_s23 + $0x70] sm:$0xf]  ;;  %v6807_v52 = vrot.slane %v12703_v54, 5  ;;  %v14207_v34 = vpop.f32.mrb[88].mxu0 }
 0x1ad   : > { %v16427_v19 = vadd.f32 %v3729_v50, %v2695_v26  ;;  %14383 = vmatprep.mubr.msk.bf16.mxu1 %vm569_vm1, %v12798_v27  ;;  %v6798_v35 = vsel %vm14931_vm6, %v6796_v22, %v6797_v28  ;;  %v6810_v23 = vrot.slane %v12704_v39, 5  ;;  %v12779_v32 = vrot.slane %v12705_v10, 9  ;;  %v2567_v0 = vpop.f32.mrb[89].mxu1  ;;  %v12709_v43 = vld [vmem:[%s14861_s23 + $0x74] sm:$0x1]  ;;  %v18563_v28 = vld [vmem:[#allocation14_spill] sm:$0xff] }
 0x1ae   : > { %18559 = vst [vmem:[#allocation9_spill] sm:$0xff] %v16419_v21  ;;  %18560 = vst [vmem:[#allocation10_spill] sm:$0xff] %v16425_v53  ;;  %v12799_v16 = vcombine.low %v6795_v41, %v6798_v35  ;;  %v6802_v50 = vsel %vm14931_vm6, %v12778_v4, %v6801_v61  ;;  %v6803_v9 = vrot.slane %v6801_v61, 4  ;;  %v6806_v12 = vrot.slane %v6804_v47, 4  ;;  %v12710_v13 = vld [vmem:[%s14861_s23 + $0x78] sm:$0xe] }
 0x1af   : > { %18561 = vst [vmem:[#allocation11_spill] sm:$0xff] %v16427_v19  ;;  %v6809_v48 = vrot.slane %v6807_v52, 4  ;;  %v18562_v37 = vld [vmem:[#allocation13_spill] sm:$0xff]  ;;  %v2698_v54 = vadd.f32 %v2567_v0, %v18563_v28  ;;  %v3742_v39 = vpop.f32.mrb[89].mxu0  ;;  %v14134_v17 = vpop.f32.mrb[90].mxu1  ;;  %v6814_v10 = vrot.slane %v12706_v38, 5 }
 0x1b0   : > { %v2700_v6 = vadd.f32 %v14133_v7, %v18562_v37  ;;  %v12711_v26 = vld [vmem:[%s14861_s23 + $0x7c] sm:$0xf]  ;;  %v12712_v27 = vld [vmem:[%s14861_s23 + $0x80] sm:$0xf]  ;;  %v6805_v4 = vsel %vm14931_vm6, %v6803_v9, %v6804_v47  ;;  %v16446_v41 = vsel %vm14931_vm6, %v6806_v12, %v6807_v52  ;;  %v14208_v22 = vpop.f32.mrb[90].mxu0  ;;  %v2570_v61 = vpop.f32.mrb[91].mxu1 }
 0x1b1   : > { %v6817_v35 = vrot.slane %v12707_v14, 5  ;;  %v6820_v7 = vrot.slane %v12708_v57, 5  ;;  %v12800_v0 = vcombine.low %v6802_v50, %v6805_v4  ;;  %v16450_v38 = vsel %vm14931_vm6, %v6809_v48, %v6810_v23  ;;  %v3745_v47 = vpop.f32.mrb[91].mxu0  ;;  %v12713_v52 = vld [vmem:[%s14861_s23 + $0x84] sm:$0xf]  ;;  %v14770_v17 = vld [vmem:[%s14861_s23 + $0x58] sm:$0xff]  }
 0x1b2   : > { %v16452_v37 = vadd.f32 %v14207_v34, %v2700_v6  ;;  %v16454_v28 = vadd.f32 %v3742_v39, %v2698_v54  ;;  %14454 = vmatmul.mubr.msk.bf16.gmra.mrb[184].mxu0 %vm569_vm1, %v14768_v58  ;;  %v18566_v12 = vld [vmem:[#allocation15_spill] sm:$0xff]  ;;  %v16463_v57 = vsel %vm14931_vm6, %v12779_v32, %v6814_v10  ;;  %v6816_v23 = vrot.slane %v6814_v10, 4  ;;  %v12714_v50 = vld [vmem:[%s14861_s23 + $0x88] sm:$0x1]  ;;  %v12715_v34 = vld [vmem:[%s14861_s23 + $0x8c] sm:$0xe] }
 0x1b3   : > { %v2699_v14 = vadd.f32 %v2570_v61, %v18566_v12  ;;  %v12716_v48 = vld [vmem:[%s14861_s23 + $0x90] sm:$0xf]  ;;  %14457 = vmatprep.mubr.msk.bf16.mxu0 %vm569_vm1, %v14769_v25  ;;  %v6819_v6 = vrot.slane %v6817_v35, 4  ;;  %v6822_v54 = vrot.slane %v6820_v7, 4  ;;  %v6823_v58 = vrot.slane %v12709_v43, 5  ;;  %v14771_v25 = vld [vmem:[%s14861_s23 + $0x64] sm:$0xff]  }
 0x1b4   : > { %18564 = vst [vmem:[#allocation12_spill] sm:$0xff] %v16452_v37  ;;  %18565 = vst [vmem:[#allocation13_spill] sm:$0xff] %v16454_v28  ;;  %v12780_v39 = vrot.slane %v12710_v13, 9  ;;  %14384 = vmatmul.mubr.msk.bf16.gmra.mrb[188].mxu1 %vm569_vm1, %v12799_v16  ;;  %v6818_v32 = vsel %vm14931_vm6, %v6816_v23, %v6817_v35  ;;  %v6827_v10 = vrot.slane %v12711_v26, 5  ;;  %v6830_v22 = vrot.slane %v12712_v27, 5  ;;  %v14137_v9 = vpop.f32.mrb[92].mxu1 }
 0x1b5   : > { %v16471_v4 = vadd.f32 %v3745_v47, %v2699_v14  ;;  %v12717_v61 = vld [vmem:[%s14861_s23 + $0x94] sm:$0xf]  ;;  %14387 = vmatprep.mubr.msk.bf16.mxu1 %vm569_vm1, %v12800_v0  ;;  %v12802_v43 = vcombine.low %v16463_v57, %v6818_v32  ;;  %v16481_v16 = vsel %vm14931_vm6, %v6819_v6, %v6820_v7  ;;  %v16485_v13 = vsel %vm14931_vm6, %v6822_v54, %v6823_v58  ;;  %v12718_v35 = vld [vmem:[%s14861_s23 + $0x98] sm:$0xf]  ;;  %v12719_v14 = vld [vmem:[%s14861_s23 + $0x9c] sm:$0x1] }
 0x1b6   : > { %v6833_v47 = vrot.slane %v12713_v52, 5  ;;  %v16492_v27 = vsel %vm14931_vm6, %v12780_v39, %v6827_v10  ;;  %v6829_v0 = vrot.slane %v6827_v10, 4  ;;  %v6832_v12 = vrot.slane %v6830_v22, 4  ;;  %v12720_v57 = vld [vmem:[%s14861_s23 + $0xa0] sm:$0xe]  ;;  %v18580_v3 = vld [vmem:[#allocation25_spill] sm:$0xff] }
 0x1b7   : > { %18567 = vst [vmem:[#allocation14_spill] sm:$0xff] %v16471_v4  ;;  %v6836_v23 = vrot.slane %v12714_v50, 5  ;;  %v12781_v6 = vrot.slane %v12715_v34, 9  ;;  %v6840_v54 = vrot.slane %v12716_v48, 5  ;;  %v12721_v58 = vld [vmem:[%s14861_s23 + $0xa4] sm:$0xf]  ;;  %v18570_v49 = vcombine.low %v16446_v41, %v16450_v38 }
 0x1b8   : > { %v6835_v7 = vrot.slane %v6833_v47, 4  ;;  %v16499_v52 = vsel %vm14931_vm6, %v6829_v0, %v6830_v22  ;;  %v16503_v32 = vsel %vm14931_vm6, %v6832_v12, %v6833_v47  ;;  %v6843_v39 = vrot.slane %v12717_v61, 5  ;;  %v12722_v10 = vld [vmem:[%s14861_s23 + $0xa8] sm:$0xf]  ;;  %v14211_v4 = vpop.f32.mrb[92].mxu0  ;;  %v2583_v0 = vpop.f32.mrb[93].mxu1 }
 0x1b9   : > { %v6846_v26 = vrot.slane %v12718_v35, 5  ;;  %v16514_v48 = vsel %vm14931_vm6, %v12781_v6, %v6840_v54  ;;  %v6842_v22 = vrot.slane %v6840_v54, 4  ;;  %v12723_v47 = vld [vmem:[%s14861_s23 + $0xac] sm:$0xf]  ;;  %v3758_v12 = vpop.f32.mrb[93].mxu0  ;;  %v18569_v6 = vld [vmem:[#allocation17_spill] sm:$0xff] }
 0x1ba   : > { %v16510_v34 = vsel %vm14931_vm6, %v6835_v7, %v6836_v23  ;;  %14458 = vmatmul.mubr.msk.bf16.gmra.mrb[188].mxu0 %vm569_vm1, %v14770_v17  ;;  %v18568_v61 = vld [vmem:[#allocation16_spill] sm:$0xff]  ;;  %v6845_v28 = vrot.slane %v6843_v39, 4  ;;  %v12724_v23 = vld [vmem:[%s14861_s23 + $0xb0] sm:$0x1]  ;;  %v12725_v37 = vld [vmem:[%s14861_s23 + $0xb4] sm:$0xe]  ;;  %v2702_v54 = vadd.f32 %v2583_v0, %v18569_v6 }
 0x1bb   : > { %v2704_v35 = vadd.f32 %v14137_v9, %v18568_v61  ;;  %v6848_v7 = vrot.slane %v6846_v26, 4  ;;  %14461 = vmatprep.mubr.msk.bf16.mxu0 %vm569_vm1, %v14771_v25  ;;  %v14138_v17 = vpop.f32.mrb[94].mxu1  ;;  %v14212_v19 = vpop.f32.mrb[94].mxu0  ;;  %v16527_v9 = vsel %vm14931_vm6, %v6842_v22, %v6843_v39  ;;  %v6849_v61 = vrot.slane %v12719_v14, 5  ;;  %v12726_v21 = vld [vmem:[%s14861_s23 + $0xb8] sm:$0xf] }
 0x1bc   : > { %v12782_v53 = vrot.slane %v12720_v57, 9  ;;  %v12727_v50 = vld [vmem:[%s14861_s23 + $0xbc] sm:$0xf]  ;;  %14388 = vmatmul.mubr.msk.bf16.gmra.mrb[192].mxu1 %vm569_vm1, %v18570_v49  ;;  %v2586_v0 = vpop.f32.mrb[95].mxu1  ;;  %v3761_v6 = vpop.f32.mrb[95].mxu0  ;;  %v16541_v14 = vsel %vm14931_vm6, %v6845_v28, %v6846_v26  ;;  %v6853_v57 = vrot.slane %v12721_v58, 5  ;;  %v16546_v49 = vadd.f32 %v3758_v12, %v2702_v54 }
 0x1bd   : > { %v16535_v25 = vadd.f32 %v14211_v4, %v2704_v35  ;;  %v12728_v39 = vld [vmem:[%s14861_s23 + $0xc0] sm:$0xf]  ;;  %v14772_v22 = vld [vmem:[%s14861_s23 + $0x6c] sm:$0xff]   ;;  %14391 = vmatprep.mubr.msk.bf16.mxu1 %vm569_vm1, %v12802_v43  ;;  %v18573_v41 = vld [vmem:[#allocation18_spill] sm:$0xff]  ;;  %v16551_v4 = vsel %vm14931_vm6, %v6848_v7, %v6849_v61  ;;  %v6856_v35 = vrot.slane %v12722_v10, 5  ;;  %v6859_v19 = vrot.slane %v12723_v47, 5 }
 0x1be   : > { %18572 = vst [vmem:[#allocation16_spill] sm:$0xff] %v16546_v49  ;;  %v2703_v38 = vadd.f32 %v2586_v0, %v18573_v41  ;;  %v12729_v17 = vld [vmem:[%s14861_s23 + $0xc4] sm:$0x1]  ;;  %v16558_v26 = vsel %vm14931_vm6, %v12782_v53, %v6853_v57  ;;  %v6855_v58 = vrot.slane %v6853_v57, 4  ;;  %v12730_v43 = vld [vmem:[%s14861_s23 + $0xc8] sm:$0xe] }
 0x1bf   : > { %18571 = vst [vmem:[#allocation15_spill] sm:$0xff] %v16535_v25  ;;  %v12731_v12 = vld [vmem:[%s14861_s23 + $0xcc] sm:$0xf]  ;;  %v14773_v54 = vld [vmem:[%s14861_s23 + $0x78] sm:$0xff]   ;;  %v6858_v7 = vrot.slane %v6856_v35, 4  ;;  %v6862_v61 = vrot.slane %v12724_v23, 5 }
 0x1c0   : > { %v16563_v0 = vadd.f32 %v3761_v6, %v2703_v38  ;;  %v12783_v10 = vrot.slane %v12725_v37, 9  ;;  %v16567_v41 = vsel %vm14931_vm6, %v6855_v58, %v6856_v35  ;;  %v6861_v28 = vrot.slane %v6859_v19, 4  ;;  %v12733_v23 = vld [vmem:[%s14861_s23 + $0xd4] sm:$0xf]  ;;  %v12737_v25 = vld [vmem:[%s14861_s23 + $0xe4] sm:$0xf] }
 0x1c1   : > { %v6866_v49 = vrot.slane %v12726_v21, 5  ;;  %v6869_v53 = vrot.slane %v12727_v50, 5  ;;  %v16573_v57 = vsel %vm14931_vm6, %v6858_v7, %v6859_v19  ;;  %v6872_v6 = vrot.slane %v12728_v39, 5  ;;  %v14141_v7 = vpop.f32.mrb[96].mxu1  ;;  %v14215_v39 = vpop.f32.mrb[96].mxu0 }
 0x1c2   : > { %18574 = vst [vmem:[#allocation17_spill] sm:$0xff] %v16563_v0  ;;  %v6875_v38 = vrot.slane %v12729_v17, 5  ;;  %v12732_v0 = vld [vmem:[%s14861_s23 + $0xd0] sm:$0xf]  ;;  %14462 = vmatmul.mubr.msk.bf16.gmra.mrb[192].mxu0 %vm569_vm1, %v14772_v22  ;;  %v16580_v37 = vsel %vm14931_vm6, %v6861_v28, %v6862_v61  ;;  %v12784_v17 = vrot.slane %v12730_v43, 9  ;;  %v6879_v22 = vrot.slane %v12731_v12, 5 }
 0x1c3   : > { %v16584_v21 = vsel %vm14931_vm6, %v12783_v10, %v6866_v49  ;;  %v6868_v50 = vrot.slane %v6866_v49, 4  ;;  %v6871_v19 = vrot.slane %v6869_v53, 4  ;;  %14465 = vmatprep.mubr.msk.bf16.mxu0 %vm569_vm1, %v14773_v54  ;;  %v6874_v35 = vrot.slane %v6872_v6, 4  ;;  %v14774_v28 = vld [vmem:[%s14861_s23 + $0x80] sm:$0xff]   ;;  %v12734_v43 = vld [vmem:[%s14861_s23 + $0xd8] sm:$0x1] }
 0x1c4   : > { %v18575_v58 = vcombine.low %v16481_v16, %v16485_v13  ;;  %v6882_v61 = vrot.slane %v12732_v0, 5  ;;  %v6885_v12 = vrot.slane %v12733_v23, 5  ;;  %v18576_v16 = vcombine.low %v16492_v27, %v16499_v52  ;;  %v14775_v13 = vld [vmem:[%s14861_s23 + $0x8c] sm:$0xff]   ;;  %v18577_v10 = vld [vmem:[#allocation19_spill] sm:$0xff]  ;;  %v2599_v47 = vpop.f32.mrb[97].mxu1 }
 0x1c5   : > { %v16596_v49 = vsel %vm14931_vm6, %v6868_v50, %v6869_v53  ;;  %v16600_v54 = vsel %vm14931_vm6, %v6871_v19, %v6872_v6  ;;  %v16613_v6 = vsel %vm14931_vm6, %v6874_v35, %v6875_v38  ;;  %v16617_v0 = vsel %vm14931_vm6, %v12784_v17, %v6879_v22  ;;  %v12735_v27 = vld [vmem:[%s14861_s23 + $0xdc] sm:$0xe]  ;;  %v12736_v52 = vld [vmem:[%s14861_s23 + $0xe0] sm:$0xf]  ;;  %v18578_v23 = vld [vmem:[#allocation20_spill] sm:$0xff]  ;;  %v3774_v19 = vpop.f32.mrb[97].mxu0 }
 0x1c6   : > { %14392 = vmatmul.mubr.msk.bf16.gmra.mrb[196].mxu1 %vm569_vm1, %v18575_v58  ;;  %v2708_v58 = vadd.f32 %v14141_v7, %v18577_v10  ;;  %v2706_v50 = vadd.f32 %v2599_v47, %v18578_v23  ;;  %v14142_v7 = vpop.f32.mrb[98].mxu1  ;;  %v6881_v10 = vrot.slane %v6879_v22, 4  ;;  %v6884_v53 = vrot.slane %v6882_v61, 4  ;;  %v14216_v35 = vpop.f32.mrb[98].mxu0  ;;  %v12738_v23 = vld [vmem:[%s14861_s23 + $0xe8] sm:$0xf] }
 0x1c7   : > { %14395 = vmatprep.mubr.msk.bf16.mxu1 %vm569_vm1, %v18576_v16  ;;  %v2602_v17 = vpop.f32.mrb[99].mxu1  ;;  %v6887_v11 = vrot.slane %v6885_v12, 4  ;;  %v6888_v44 = vrot.slane %v12734_v43, 5  ;;  %v16629_v47 = vadd.f32 %v18580_v3, %v15957_v55  ;;  %v18582_v16 = vld [vmem:[#allocation21_spill] sm:$0xff]  ;;  %v3777_v22 = vpop.f32.mrb[99].mxu0 }
 0x1c8   : > { %v16625_v38 = vadd.f32 %v14215_v39, %v2708_v58  ;;  %v16632_v7 = vadd.f32 %v3774_v19, %v2706_v50  ;;  %v2707_v8 = vadd.f32 %v2602_v17, %v18582_v16  ;;  %v16637_v39 = vsel %vm14931_vm6, %v6881_v10, %v6882_v61  ;;  %v12739_v43 = vld [vmem:[%s14861_s23 + $0xec] sm:$0x1]  ;;  %v18583_v50 = vld [vmem:[#allocation26_spill] sm:$0xff]  ;;  %v18584_v16 = vld [vmem:[#allocation27_spill] sm:$0xff] }
 0x1c9   : > { %v16641_v58 = vsel %vm14931_vm6, %v6884_v53, %v6885_v12  ;;  %v16648_v3 = vsel %vm14931_vm6, %v6887_v11, %v6888_v44  ;;  %v16652_v19 = vadd.f32 %v18583_v50, %v15969_v42  ;;  %v16656_v61 = vadd.f32 %v18584_v16, %v15973_v24  ;;  %v12740_v10 = vld [vmem:[%s14861_s23 + $0xf0] sm:$0xe]  ;;  %v12741_v12 = vld [vmem:[%s14861_s23 + $0xf4] sm:$0xf]  ;;  %v12742_v17 = vld [vmem:[%s14861_s23 + $0xf8] sm:$0xf] }
 0x1ca   : > { %18579 = vst [vmem:[#allocation18_spill] sm:$0xff] %v16625_v38  ;;  %18581 = vst [vmem:[#allocation19_spill] sm:$0xff] %v16632_v7  ;;  %14466 = vmatmul.mubr.msk.bf16.gmra.mrb[196].mxu0 %vm569_vm1, %v14774_v28  ;;  %v16661_v53 = vadd.f32 %v3777_v22, %v2707_v8  ;;  %v12785_v44 = vrot.slane %v12735_v27, 9  ;;  %v6892_v11 = vrot.slane %v12736_v52, 5  ;;  %v12743_v55 = vld [vmem:[%s14861_s23 + $0xfc] sm:$0xf]  ;;  %v18587_v8 = vcombine.low %v16503_v32, %v16510_v34 }
 0x1cb   : > { %14469 = vmatprep.mubr.msk.bf16.mxu0 %vm569_vm1, %v14775_v13  ;;  %v6895_v42 = vrot.slane %v12737_v25, 5  ;;  %v6898_v50 = vrot.slane %v12738_v23, 5  ;;  %v6901_v24 = vrot.slane %v12739_v43, 5  ;;  %v18586_v16 = vld [vmem:[#allocation28_spill] sm:$0xff]  ;;  %v12744_v28 = vld [vmem:[%s14861_s23 + $0x100] sm:$0x1] }
 0x1cc   : > { %18585 = vst [vmem:[#allocation20_spill] sm:$0xff] %v16661_v53  ;;  %v16670_v7 = vadd.f32 %v18586_v16, %v16006_v31  ;;  %v16679_v27 = vsel %vm14931_vm6, %v12785_v44, %v6892_v11  ;;  %v6894_v13 = vrot.slane %v6892_v11, 4  ;;  %v18588_v52 = vld [vmem:[#allocation39_spill] sm:$0xff]  ;;  %v18589_v25 = vld [vmem:[#allocation29_spill] sm:$0xff]  ;;  %v18591_v43 = vld [vmem:[#allocation30_spill] sm:$0xff]  ;;  %v18592_v16 = vcombine.low %v16514_v48, %v16527_v9 }
 0x1cd   : > { %v16683_v23 = vadd.f32 %v18589_v25, %v18588_v52  ;;  %v18590_v22 = vld [vmem:[#allocation41_spill] sm:$0xff]  ;;  %v6897_v32 = vrot.slane %v6895_v42, 4  ;;  %v6900_v34 = vrot.slane %v6898_v50, 4  ;;  %v6905_v44 = vrot.slane %v12741_v12, 5  ;;  %v14145_v12 = vpop.f32.mrb[100].mxu1 }
 0x1ce   : > { %14396 = vmatmul.mubr.msk.bf16.gmra.mrb[200].mxu1 %vm569_vm1, %v18587_v8  ;;  %v16687_v31 = vadd.f32 %v18591_v43, %v18590_v22  ;;  %v12786_v8 = vrot.slane %v12740_v10, 9  ;;  %v14776_v35 = vld [vmem:[%s14861_s23 + $0x94] sm:$0xff]   ;;  %v16696_v11 = vsel %vm14931_vm6, %v6894_v13, %v6895_v42  ;;  %v6908_v52 = vrot.slane %v12742_v17, 5  ;;  %v14777_v22 = vld [vmem:[%s14861_s23 + $0xa0] sm:$0xff]   ;;  %v14219_v17 = vpop.f32.mrb[100].mxu0 }
 0x1cf   : > { %14399 = vmatprep.mubr.msk.bf16.mxu1 %vm569_vm1, %v18592_v16  ;;  %v6911_v25 = vrot.slane %v12743_v55, 5  ;;  %v6914_v53 = vrot.slane %v12744_v28, 5  ;;  %v16703_v48 = vsel %vm14931_vm6, %v6897_v32, %v6898_v50  ;;  %v16707_v9 = vsel %vm14931_vm6, %v6900_v34, %v6901_v24  ;;  %v12745_v55 = vld [vmem:[%s14861_s23 + $0x104] sm:$0xe]  ;;  %v18593_v16 = vld [vmem:[#allocation22_spill] sm:$0xff]  ;;  %v2615_v24 = vpop.f32.mrb[101].mxu1 }
 0x1d0   : > { %v16711_v10 = vsel %vm14931_vm6, %v12786_v8, %v6905_v44  ;;  %v6907_v28 = vrot.slane %v6905_v44, 4  ;;  %v6910_v13 = vrot.slane %v6908_v52, 4  ;;  %v2712_v32 = vadd.f32 %v14145_v12, %v18593_v16  ;;  %v3790_v34 = vpop.f32.mrb[101].mxu0  ;;  %v18594_v43 = vld [vmem:[#allocation31_spill] sm:$0xff]  ;;  %v18595_v8 = vld [vmem:[#allocation32_spill] sm:$0xff]  ;;  %v14146_v33 = vpop.f32.mrb[102].mxu1 }
 0x1d1   : > { %v6913_v50 = vrot.slane %v6911_v25, 4  ;;  %v16719_v38 = vadd.f32 %v18594_v43, %v16050_v20  ;;  %v16723_v18 = vadd.f32 %v18595_v8, %v16060_v51  ;;  %v16727_v42 = vadd.f32 %v18596_v62, %v16065_v46  ;;  %v12746_v44 = vld [vmem:[%s14861_s23 + $0x108] sm:$0xf]  ;;  %v18597_v12 = vld [vmem:[#allocation23_spill] sm:$0xff]  ;;  %v14220_v40 = vpop.f32.mrb[102].mxu0 }
 0x1d2   : > { %14470 = vmatmul.mubr.msk.bf16.gmra.mrb[200].mxu0 %vm569_vm1, %v14776_v35  ;;  %v2710_v16 = vadd.f32 %v2615_v24, %v18597_v12  ;;  %v16735_v20 = vsel %vm14931_vm6, %v6907_v28, %v6908_v52  ;;  %v16739_v51 = vsel %vm14931_vm6, %v6910_v13, %v6911_v25  ;;  %v12748_v62 = vld [vmem:[%s14861_s23 + $0x110] sm:$0xf]  ;;  %v12749_v35 = vld [vmem:[%s14861_s23 + $0x114] sm:$0x1]  ;;  %v16748_v33 = vadd.f32 %v14219_v17, %v2712_v32  ;;  %v2618_v40 = vpop.f32.mrb[103].mxu1  ;;  %v3793_v43 = vpop.f32.mrb[103].mxu0 }
 0x1d3   : > { %v16743_v46 = vsel %vm14931_vm6, %v6913_v50, %v6914_v53  ;;  %14473 = vmatprep.mubr.msk.bf16.mxu0 %vm569_vm1, %v14777_v22  ;;  %v12787_v53 = vrot.slane %v12745_v55, 9  ;;  %v18599_v28 = vcombine.low %v16541_v14, %v16551_v4  ;;  %v18601_v17 = vld [vmem:[#allocation24_spill] sm:$0xff]  ;;  %v6918_v50 = vrot.slane %v12746_v44, 5  ;;  %v12750_v24 = vld [vmem:[%s14861_s23 + $0x118] sm:$0xe] }
 0x1d4   : > { %18598 = vst [vmem:[#allocation25_spill] sm:$0xff] %v16748_v33  ;;  %v16758_v22 = vadd.f32 %v3790_v34, %v2710_v16  ;;  %v2711_v13 = vadd.f32 %v2618_v40, %v18601_v17  ;;  %v6921_v32 = vrot.slane %v12747_v45, 5  ;;  %v12751_v8 = vld [vmem:[%s14861_s23 + $0x11c] sm:$0xf]  ;;  %v18602_v12 = vcombine.low %v16558_v26, %v16567_v41  ;;  %v18604_v34 = vld [vmem:[#allocation35_spill] sm:$0xff]  ;;  %v14778_v40 = vld [vmem:[%s14861_s23 + $0xa8] sm:$0xff]  }
 0x1d5   : > { %v6924_v55 = vrot.slane %v12748_v62, 5  ;;  %v6927_v25 = vrot.slane %v12749_v35, 5  ;;  %v18603_v14 = vld [vmem:[#allocation34_spill] sm:$0xff]  ;;  %v16773_v16 = vadd.f32 %v18604_v34, %v16099_v15  ;;  %v12752_v44 = vld [vmem:[%s14861_s23 + $0x120] sm:$0xf]  ;;  %v16782_v26 = vsel %vm14931_vm6, %v12787_v53, %v6918_v50  ;;  %v18606_v17 = vld [vmem:[#allocation36_spill] sm:$0xff] }
 0x1d6   : > { %14400 = vmatmul.mubr.msk.bf16.gmra.mrb[204].mxu1 %vm569_vm1, %v18599_v28  ;;  %18600 = vst [vmem:[#allocation21_spill] sm:$0xff] %v16758_v22  ;;  %v16769_v4 = vadd.f32 %v18603_v14, %v16095_v60  ;;  %v12753_v45 = vld [vmem:[%s14861_s23 + $0x124] sm:$0xf]  ;;  %v16778_v28 = vadd.f32 %v3793_v43, %v2711_v13  ;;  %v6920_v41 = vrot.slane %v6918_v50, 4  ;;  %v6923_v62 = vrot.slane %v6921_v32, 4  ;;  %v14779_v35 = vld [vmem:[%s14861_s23 + $0xb4] sm:$0xff]  }
 0x1d7   : > { %14403 = vmatprep.mubr.msk.bf16.mxu1 %vm569_vm1, %v18602_v12  ;;  %v6926_v60 = vrot.slane %v6924_v55, 4  ;;  %v16787_v15 = vadd.f32 %v18606_v17, %v16107_v36  ;;  %v12788_v12 = vrot.slane %v12750_v24, 9  ;;  %v6931_v14 = vrot.slane %v12751_v8, 5  ;;  %v12754_v34 = vld [vmem:[%s14861_s23 + $0x128] sm:$0x1]  ;;  %v18610_v22 = vld [vmem:[#allocation38_spill] sm:$0xff] }
 0x1d8   : > { %18605 = vst [vmem:[#allocation26_spill] sm:$0xff] %v16778_v28  ;;  %v16792_v43 = vsel %vm14931_vm6, %v6920_v41, %v6921_v32  ;;  %v16796_v53 = vsel %vm14931_vm6, %v6923_v62, %v6924_v55  ;;  %v6934_v13 = vrot.slane %v12752_v44, 5  ;;  %v6937_v50 = vrot.slane %v12753_v45, 5  ;;  %v12755_v52 = vld [vmem:[%s14861_s23 + $0x12c] sm:$0xe]  ;;  %v18612_v45 = vld [vmem:[#allocation49_spill] sm:$0xff] }
 0x1d9   : > { %18607 = vst [vmem:[#allocation27_spill] sm:$0xff] %v16787_v15  ;;  %v12756_v28 = vld [vmem:[%s14861_s23 + $0x130] sm:$0xf]  ;;  %v16804_v24 = vsel %vm14931_vm6, %v6926_v60, %v6927_v25  ;;  %v16808_v32 = vsel %vm14931_vm6, %v12788_v12, %v6931_v14  ;;  %v6933_v8 = vrot.slane %v6931_v14, 4  ;;  %v12757_v55 = vld [vmem:[%s14861_s23 + $0x134] sm:$0xf] }
 0x1da   : > { %v12758_v44 = vld [vmem:[%s14861_s23 + $0x138] sm:$0xf]  ;;  %14474 = vmatmul.mubr.msk.bf16.gmra.mrb[204].mxu0 %vm569_vm1, %v14778_v40  ;;  %v6936_v41 = vrot.slane %v6934_v13, 4  ;;  %v6939_v62 = vrot.slane %v6937_v50, 4  ;;  %v6940_v17 = vrot.slane %v12754_v34, 5  ;;  %v14149_v60 = vpop.f32.mrb[104].mxu1  ;;  %v16831_v34 = vadd.f32 %v18613_v1, %v18612_v45 }
 0x1db   : > { %v12759_v25 = vld [vmem:[%s14861_s23 + $0x13c] sm:$0x1]  ;;  %14477 = vmatprep.mubr.msk.bf16.mxu0 %vm569_vm1, %v14779_v35  ;;  %v16819_v12 = vsel %vm14931_vm6, %v6933_v8, %v6934_v13  ;;  %v18608_v14 = vld [vmem:[#allocation37_spill] sm:$0xff]  ;;  %v18609_v40 = vld [vmem:[#allocation48_spill] sm:$0xff]  ;;  %v18615_v60 = vcombine.low %v16573_v57, %v16580_v37  ;;  %v14223_v13 = vpop.f32.mrb[104].mxu0  ;;  %v12789_v45 = vrot.slane %v12755_v52, 9 }
 0x1dc   : > { %v16823_v36 = vadd.f32 %v18608_v14, %v16127_v56  ;;  %v16827_v33 = vadd.f32 %v18610_v22, %v18609_v40  ;;  %18614 = vst [vmem:[#allocation39_spill] sm:$0xff] %v16831_v34  ;;  %v12761_v35 = vld [vmem:[%s14861_s23 + $0x144] sm:$0xf]  ;;  %v12762_v15 = vld [vmem:[%s14861_s23 + $0x148] sm:$0xf]  ;;  %v2631_v56 = vpop.f32.mrb[105].mxu1  ;;  %v16844_v22 = vsel %vm14931_vm6, %v6936_v41, %v6937_v50  ;;  %v16848_v1 = vsel %vm14931_vm6, %v6939_v62, %v6940_v17 }
 0x1dd   : > { %v12763_v14 = vld [vmem:[%s14861_s23 + $0x14c] sm:$0xf]  ;;  %v3806_v57 = vpop.f32.mrb[105].mxu0  ;;  %v14150_v37 = vpop.f32.mrb[106].mxu1  ;;  %v18616_v40 = vcombine.low %v16584_v21, %v16596_v49  ;;  %v6944_v50 = vrot.slane %v12756_v28, 5  ;;  %v6947_v41 = vrot.slane %v12757_v55, 5 }
 0x1de   : > { %18611 = vst [vmem:[#allocation28_spill] sm:$0xff] %v16827_v33  ;;  %14404 = vmatmul.mubr.msk.bf16.gmra.mrb[208].mxu1 %vm569_vm1, %v18615_v60  ;;  %v6950_v13 = vrot.slane %v12758_v44, 5  ;;  %v14780_v56 = vld [vmem:[%s14861_s23 + $0xbc] sm:$0xff]   ;;  %v14224_v62 = vpop.f32.mrb[106].mxu0  ;;  %v2634_v17 = vpop.f32.mrb[107].mxu1  ;;  %v6953_v52 = vrot.slane %v12759_v25, 5 }
 0x1df   : > { %14407 = vmatprep.mubr.msk.bf16.mxu1 %vm569_vm1, %v18616_v40  ;;  %v18617_v57 = vld [vmem:[#allocation42_spill] sm:$0xff]  ;;  %v18620_v34 = vld [vmem:[#allocation43_spill] sm:$0xff]  ;;  %v18623_v40 = vld [vmem:[#allocation44_spill] sm:$0xff]  ;;  %v3809_v55 = vpop.f32.mrb[107].mxu0  ;;  %v16874_v25 = vsel %vm14931_vm6, %v12789_v45, %v6944_v50  ;;  %v6946_v62 = vrot.slane %v6944_v50, 4  ;;  %v6963_v60 = vrot.slane %v12763_v14, 5 }
 0x1e0   : > { %v16860_v8 = vadd.f32 %v18617_v57, %v16170_v5  ;;  %v18619_v37 = vld [vmem:[#allocation50_spill] sm:$0xff]  ;;  %v18622_v49 = vld [vmem:[#allocation51_spill] sm:$0xff]  ;;  %v12764_v28 = vld [vmem:[%s14861_s23 + $0x150] sm:$0x1]  ;;  %v6949_v5 = vrot.slane %v6947_v41, 4  ;;  %v6952_v17 = vrot.slane %v6950_v13, 4 }
 0x1e1   : > { %v16864_v21 = vadd.f32 %v18620_v34, %v18619_v37  ;;  %v16868_v33 = vadd.f32 %v18623_v40, %v18622_v49  ;;  %v14781_v44 = vld [vmem:[%s14861_s23 + $0xc8] sm:$0xff]   ;;  %v12790_v57 = vrot.slane %v12760_v30, 9  ;;  %v6957_v34 = vrot.slane %v12761_v35, 5  ;;  %v12765_v49 = vld [vmem:[%s14861_s23 + $0x154] sm:$0xe] }
 0x1e2   : > { %18618 = vst [vmem:[#allocation29_spill] sm:$0xff] %v16860_v8  ;;  %v6960_v37 = vrot.slane %v12762_v15, 5  ;;  %v16879_v40 = vsel %vm14931_vm6, %v6946_v62, %v6947_v41  ;;  %v16883_v55 = vsel %vm14931_vm6, %v6949_v5, %v6950_v13  ;;  %v16887_v45 = vsel %vm14931_vm6, %v6952_v17, %v6953_v52  ;;  %v12766_v30 = vld [vmem:[%s14861_s23 + $0x158] sm:$0xf]  ;;  %v12767_v35 = vld [vmem:[%s14861_s23 + $0x15c] sm:$0xf]  ;;  %14478 = vmatmul.mubr.msk.bf16.gmra.mrb[208].mxu0 %vm569_vm1, %v14780_v56 }
 0x1e3   : > { %18621 = vst [vmem:[#allocation41_spill] sm:$0xff] %v16864_v21  ;;  %18624 = vst [vmem:[#allocation30_spill] sm:$0xff] %v16868_v33  ;;  %v6966_v50 = vrot.slane %v12764_v28, 5  ;;  %v16898_v41 = vsel %vm14931_vm6, %v12790_v57, %v6957_v34  ;;  %v6959_v13 = vrot.slane %v6957_v34, 4  ;;  %v12768_v52 = vld [vmem:[%s14861_s23 + $0x160] sm:$0xf]  ;;  %14481 = vmatprep.mubr.msk.bf16.mxu0 %vm569_vm1, %v14781_v44  ;;  %v18629_v34 = vcombine.low %v16600_v54, %v16613_v6 }
 0x1e4   : > { %v12769_v28 = vld [vmem:[%s14861_s23 + $0x164] sm:$0x1]  ;;  %v14229_v62 = vpop.f32.mrb[108].mxu1  ;;  %v6962_v5 = vrot.slane %v6960_v37, 4  ;;  %v6965_v17 = vrot.slane %v6963_v60, 4  ;;  %v18625_v56 = vld [vmem:[#allocation45_spill] sm:$0xff]  ;;  %v18633_v54 = vcombine.low %v16617_v0, %v16637_v39 }
 0x1e5   : > { %v16905_v33 = vadd.f32 %v18625_v56, %v16214_v29  ;;  %v18627_v15 = vld [vmem:[#allocation46_spill] sm:$0xff]  ;;  %v12770_v57 = vld [vmem:[%s14861_s23 + $0x168] sm:$0xe]  ;;  %v14782_v44 = vld [vmem:[%s14861_s23 + $0xd0] sm:$0xff]   ;;  %v4437_v62 = vpop.f32.mrb[109].mxu1  ;;  %v16919_v21 = vsel %vm14931_vm6, %v6959_v13, %v6960_v37 }
 0x1e6   : > { %v16909_v14 = vadd.f32 %v18627_v15, %v16218_v59  ;;  %14408 = vmatmul.mubr.msk.bf16.gmra.mrb[212].mxu1 %vm569_vm1, %v18629_v34  ;;  %v18630_v29 = vld [vmem:[#allocation52_spill] sm:$0xff]  ;;  %v18631_v56 = vld [vmem:[#allocation47_spill] sm:$0xff]  ;;  %v12791_v59 = vrot.slane %v12765_v49, 9  ;;  %v6970_v15 = vrot.slane %v12766_v30, 5  ;;  %v14230_v8 = vpop.f32.mrb[110].mxu1  ;;  %v16934_v37 = vsel %vm14931_vm6, %v6962_v5, %v6963_v60  ;;  %v14303_v34 = vpop.f32.mrb[108].mxu0 }
 0x1e7   : > { %18626 = vst [vmem:[#allocation22_spill] sm:$0xff] %v16905_v33  ;;  %v16923_v33 = vadd.f32 %v18631_v56, %v18630_v29  ;;  %14411 = vmatprep.mubr.msk.bf16.mxu1 %vm569_vm1, %v18633_v54  ;;  %v16938_v49 = vsel %vm14931_vm6, %v6965_v17, %v6966_v50  ;;  %v6973_v30 = vrot.slane %v12767_v35, 5  ;;  %v12772_v13 = vld [vmem:[%s14861_s23 + $0x170] sm:$0xf]  ;;  %v12773_v8 = vld [vmem:[%s14861_s23 + $0x174] sm:$0xf] }
 0x1e8   : > { %18628 = vst [vmem:[#allocation31_spill] sm:$0xff] %v16909_v14  ;;  %v12771_v14 = vld [vmem:[%s14861_s23 + $0x16c] sm:$0xf]  ;;  %18634 = vst [vmem:[#allocation33_spill] sm:$0xff] %v16938_v49  ;;  %v4440_v62 = vpop.f32.mrb[111].mxu1  ;;  %v16946_v39 = vsel %vm14931_vm6, %v12791_v59, %v6970_v15  ;;  %v6972_v29 = vrot.slane %v6970_v15, 4 }
 0x1e9   : > { %18632 = vst [vmem:[#allocation32_spill] sm:$0xff] %v16923_v33  ;;  %v6976_v60 = vrot.slane %v12768_v52, 5  ;;  %v12774_v5 = vld [vmem:[%s14861_s23 + $0x178] sm:$0x1]  ;;  %v6077_v56 = vpop.f32.mrb[109].mxu0  ;;  %v14783_v54 = vld [vmem:[%s14861_s23 + $0xdc] sm:$0xff]  }
 0x1ea   : > { %v6975_v50 = vrot.slane %v6973_v30, 4  ;;  %v6979_v17 = vrot.slane %v12769_v28, 5  ;;  %v12792_v35 = vrot.slane %v12770_v57, 9  ;;  %v6983_v6 = vrot.slane %v12771_v14, 5  ;;  %v14304_v33 = vpop.f32.mrb[110].mxu0  ;;  %14482 = vmatmul.mubr.msk.bf16.gmra.mrb[212].mxu0 %vm569_vm1, %v14782_v44 }
 0x1eb   : > { %v16952_v34 = vsel %vm14931_vm6, %v6972_v29, %v6973_v30  ;;  %v6978_v62 = vrot.slane %v6976_v60, 4  ;;  %v6986_v0 = vrot.slane %v12772_v13, 5  ;;  %v6989_v49 = vrot.slane %v12773_v8, 5  ;;  %v13011_v59 = vld [vmem:[%s14861_s23 + $0x28] sm:$0xf]  ;;  %v6080_v15 = vpop.f32.mrb[111].mxu0  ;;  %14485 = vmatprep.mubr.msk.bf16.mxu0 %vm569_vm1, %v14783_v54 }
 0x1ec   : > { %v16959_v28 = vsel %vm14931_vm6, %v6975_v50, %v6976_v60  ;;  %v16963_v33 = vsel %vm14931_vm6, %v12792_v35, %v6983_v6  ;;  %v6985_v14 = vrot.slane %v6983_v6, 4  ;;  %v6992_v8 = vrot.slane %v12774_v5, 5  ;;  %v13012_v29 = vld [vmem:[%s14861_s23 + $0x2c] sm:$0xf]  ;;  %v14233_v60 = vpop.f32.mrb[112].mxu1 }
 0x1ed   : > { %18635 = vst [vmem:[#allocation23_spill] sm:$0xff] %v16959_v28  ;;  %18636 = vst [vmem:[#allocation24_spill] sm:$0xff] %v16963_v33  ;;  %v16968_v57 = vsel %vm14931_vm6, %v6978_v62, %v6979_v17  ;;  %v6988_v30 = vrot.slane %v6986_v0, 4  ;;  %v6991_v13 = vrot.slane %v6989_v49, 4  ;;  %v13013_v6 = vld [vmem:[%s14861_s23 + $0x30] sm:$0xf]  ;;  %v18639_v35 = vcombine.low %v16641_v58, %v16648_v3 }
 0x1ee   : > { %18637 = vst [vmem:[#allocation34_spill] sm:$0xff] %v16968_v57  ;;  %v16976_v44 = vsel %vm14931_vm6, %v6985_v14, %v6986_v0  ;;  %v8746_v50 = vshrl.u32 %v13011_v59, 16  ;;  %v8749_v17 = vshll.u32 %v13011_v59, 16  ;;  %v4730_v5 = vadd.f32 %v14233_v60, %v16629_v47  ;;  %v4453_v54 = vpop.f32.mrb[113].mxu1  ;;  %v13174_v59 = vld [vmem:[%s14861_s23 + $0x28] sm:$0xe] }
 0x1ef   : > { %18638 = vst [vmem:[#allocation35_spill] sm:$0xff] %v16976_v44  ;;  %14412 = vmatmul.mubr.msk.bf16.gmra.mrb[216].mxu1 %vm569_vm1, %v18639_v35  ;;  %v16988_v15 = vsel %vm14931_vm6, %v6988_v30, %v6989_v49  ;;  %v16992_v0 = vsel %vm14931_vm6, %v6991_v13, %v6992_v8  ;;  %v13175_v14 = vld [vmem:[%s14861_s23 + $0x2c] sm:$0xf]  ;;  %v14784_v58 = vld [vmem:[%s14861_s23 + $0xe4] sm:$0xff]   ;;  %v4728_v3 = vadd.f32 %v4453_v54, %v16652_v19  ;;  %v14234_v35 = vpop.f32.mrb[114].mxu1  ;;  %v14307_v8 = vpop.f32.mrb[112].mxu0 }
 0x1f0   : > { %18640 = vst [vmem:[#allocation36_spill] sm:$0xff] %v16988_v15  ;;  %18641 = vst [vmem:[#allocation37_spill] sm:$0xff] %v16992_v0  ;;  %v18642_v47 = vcombine.low %v16679_v27, %v16696_v11  ;;  %v8748_v30 = vrot.slane %v8746_v50, 4  ;;  %v8751_v60 = vrot.slane %v8749_v17, 5  ;;  %v13176_v13 = vld [vmem:[%s14861_s23 + $0x30] sm:$0xf]  ;;  %v17005_v54 = vadd.f32 %v14307_v8, %v4730_v5 }
 0x1f1   : > { %v4456_v62 = vpop.f32.mrb[115].mxu1  ;;  %v8755_v56 = vshll.u32 %v13012_v29, 16  ;;  %v8759_v52 = vshrl.u32 %v13012_v29, 16  ;;  %v8765_v44 = vshll.u32 %v13013_v6, 16  ;;  %v8769_v19 = vshrl.u32 %v13013_v6, 16  ;;  %v6093_v35 = vpop.f32.mrb[113].mxu0 }
 0x1f2   : > { %14415 = vmatprep.mubr.msk.bf16.mxu1 %vm569_vm1, %v18642_v47  ;;  %v4729_v27 = vadd.f32 %v4456_v62, %v16656_v61  ;;  %v14785_v11 = vld [vmem:[%s14861_s23 + $0xf0] sm:$0xff]   ;;  %v8752_v47 = vor.u32 %v8751_v60, %v8748_v30  ;;  %v13264_v33 = vrot.slane %v13174_v59, 9  ;;  %v17010_v49 = vadd.f32 %v6093_v35, %v4728_v3  ;;  %v14308_v50 = vpop.f32.mrb[114].mxu0  ;;  %14486 = vmatmul.mubr.msk.bf16.gmra.mrb[216].mxu0 %vm569_vm1, %v14784_v58  ;;  %v13015_v58 = vld [vmem:[%s14861_s23 + $0x38] sm:$0x1] }
 0x1f3   : > { %v13014_v57 = vld [vmem:[%s14861_s23 + $0x34] sm:$0xf]  ;;  %v8757_v17 = vrot.slane %v8755_v56, 5  ;;  %v8761_v0 = vrot.slane %v8759_v52, 4  ;;  %v8767_v15 = vrot.slane %v8765_v44, 5  ;;  %v6096_v28 = vpop.f32.mrb[115].mxu0  ;;  %14489 = vmatprep.mubr.msk.bf16.mxu0 %vm569_vm1, %v14785_v11 }
 0x1f4   : > { %v8753_v29 = vrot.slane %v8752_v47, 4  ;;  %v8771_v6 = vrot.slane %v8769_v19, 4  ;;  %v10477_v5 = vrot.slane %v13175_v14, 5  ;;  %v10480_v8 = vrot.slane %v13176_v13, 5  ;;  %v14237_v56 = vpop.f32.mrb[116].mxu1 }
 0x1f5   : > { %v17013_v61 = vadd.f32 %v6096_v28, %v4729_v27  ;;  %v8762_v62 = vor.u32 %v8761_v0, %v8757_v17  ;;  %v8775_v59 = vshll.u32 %v13014_v57, 16  ;;  %v8779_v3 = vshrl.u32 %v13014_v57, 16  ;;  %v13177_v28 = vld [vmem:[%s14861_s23 + $0x34] sm:$0xf]  ;;  %v4469_v60 = vpop.f32.mrb[117].mxu1  ;;  %v14786_v27 = vld [vmem:[%s14861_s23 + $0xf8] sm:$0xff]  }
 0x1f6   : > { %v8758_v52 = vsel %vm14943_vm7, %v8753_v29, %v8757_v17  ;;  %v8772_v44 = vor.u32 %v8771_v6, %v8767_v15  ;;  %v17020_v30 = vsel %vm14931_vm6, %v13264_v33, %v10477_v5  ;;  %v10479_v14 = vrot.slane %v10477_v5, 4  ;;  %v14238_v11 = vpop.f32.mrb[118].mxu1  ;;  %v13178_v50 = vld [vmem:[%s14861_s23 + $0x38] sm:$0x1]  ;;  %v14311_v17 = vpop.f32.mrb[116].mxu0 }
 0x1f7   : > { %v18643_v0 = vcombine.low %v16703_v48, %v16707_v9  ;;  %v4734_v57 = vadd.f32 %v14237_v56, %v16670_v7  ;;  %v8763_v13 = vrot.slane %v8762_v62, 4  ;;  %v10482_v19 = vrot.slane %v10480_v8, 4  ;;  %v4472_v29 = vpop.f32.mrb[119].mxu1  ;;  %v13016_v5 = vld [vmem:[%s14861_s23 + $0x3c] sm:$0xf]  ;;  %v14787_v56 = vld [vmem:[%s14861_s23 + $0x104] sm:$0xff]  }
 0x1f8   : > { %v8777_v35 = vrot.slane %v8775_v59, 5  ;;  %v4732_v33 = vadd.f32 %v4469_v60, %v16683_v23  ;;  %v18644_v47 = vcombine.low %v16711_v10, %v16735_v20  ;;  %v8773_v48 = vrot.slane %v8772_v44, 4  ;;  %v6109_v59 = vpop.f32.mrb[117].mxu0 }
 0x1f9   : > { %14416 = vmatmul.mubr.msk.bf16.gmra.mrb[220].mxu1 %vm569_vm1, %v18643_v0  ;;  %v17037_v9 = vsel %vm14931_vm6, %v10479_v14, %v10480_v8  ;;  %v8781_v7 = vrot.slane %v8779_v3, 4  ;;  %v8768_v23 = vsel %vm14943_vm7, %v8763_v13, %v8767_v15  ;;  %v8785_v10 = vshll.u32 %v13015_v58, 16  ;;  %v13017_v14 = vld [vmem:[%s14861_s23 + $0x40] sm:$0xf]  ;;  %v14312_v0 = vpop.f32.mrb[118].mxu0 }
 0x1fa   : > { %14419 = vmatprep.mubr.msk.bf16.mxu1 %vm569_vm1, %v18644_v47  ;;  %v10483_v20 = vrot.slane %v13177_v28, 5  ;;  %v17045_v62 = vadd.f32 %v14311_v17, %v4734_v57  ;;  %v4733_v8 = vadd.f32 %v4472_v29, %v16687_v31  ;;  %v17049_v3 = vcombine.low %v8758_v52, %v8768_v23  ;;  %v13018_v28 = vld [vmem:[%s14861_s23 + $0x44] sm:$0xf]  ;;  %v6112_v57 = vpop.f32.mrb[119].mxu0  ;;  %14490 = vmatmul.mubr.msk.bf16.gmra.mrb[220].mxu0 %vm569_vm1, %v14786_v27  ;;  %v13019_v29 = vld [vmem:[%s14861_s23 + $0x48] sm:$0xf] }
 0x1fb   : > { %v8778_v44 = vsel %vm14943_vm7, %v8773_v48, %v8777_v35  ;;  %v17054_v15 = vadd.f32 %v6109_v59, %v4732_v33  ;;  %v8782_v60 = vor.u32 %v8781_v7, %v8777_v35  ;;  %v8787_v13 = vrot.slane %v8785_v10, 5  ;;  %14493 = vmatprep.mubr.msk.bf16.mxu0 %vm569_vm1, %v14787_v56  ;;  %v14241_v7 = vpop.f32.mrb[120].mxu1 }
 0x1fc   : > { %v17058_v58 = vsel %vm14931_vm6, %v10482_v19, %v10483_v20  ;;  %v10485_v31 = vrot.slane %v10483_v20, 4  ;;  %v10486_v11 = vrot.slane %v13178_v50, 5  ;;  %v8790_v52 = vshrl.u32 %v13016_v5, 16  ;;  %v14788_v20 = vld [vmem:[%s14861_s23 + $0x10c] sm:$0xff]   ;;  %v4485_v59 = vpop.f32.mrb[121].mxu1 }
 0x1fd   : > { %v8793_v47 = vshll.u32 %v13016_v5, 16  ;;  %v17062_v48 = vadd.f32 %v6112_v57, %v4733_v8  ;;  %v8783_v33 = vrot.slane %v8782_v60, 4  ;;  %v8799_v17 = vshll.u32 %v13017_v14, 16  ;;  %v14242_v60 = vpop.f32.mrb[122].mxu1 }
 0x1fe   : > { %v8803_v35 = vshrl.u32 %v13017_v14, 16  ;;  %v17067_v19 = vsel %vm14931_vm6, %v10485_v31, %v10486_v11  ;;  %v8792_v50 = vrot.slane %v8790_v52, 4  ;;  %v8809_v10 = vshll.u32 %v13018_v28, 16  ;;  %v13179_v11 = vld [vmem:[%s14861_s23 + $0x3c] sm:$0xe]  ;;  %v14315_v52 = vpop.f32.mrb[120].mxu0 }
 0x1ff   : > { %v8795_v23 = vrot.slane %v8793_v47, 5  ;;  %v18645_v27 = vcombine.low %v16739_v51, %v16743_v46  ;;  %v4738_v5 = vadd.f32 %v14241_v7, %v16719_v38  ;;  %v8788_v8 = vsel %vm14943_vm7, %v8783_v33, %v8787_v13  ;;  %v14789_v46 = vld [vmem:[%s14861_s23 + $0x118] sm:$0xff]   ;;  %v13020_v38 = vld [vmem:[%s14861_s23 + $0x4c] sm:$0x1]  ;;  %v4488_v47 = vpop.f32.mrb[123].mxu1 }
 0x200   : > { %v8801_v14 = vrot.slane %v8799_v17, 5  ;;  %v4736_v0 = vadd.f32 %v4485_v59, %v16723_v18  ;;  %v18646_v51 = vcombine.low %v16782_v26, %v16792_v43  ;;  %v17086_v57 = vcombine.low %v8778_v44, %v8788_v8  ;;  %v6125_v26 = vpop.f32.mrb[121].mxu0  ;;  %v13180_v8 = vld [vmem:[%s14861_s23 + $0x40] sm:$0xf]  ;;  %v13181_v60 = vld [vmem:[%s14861_s23 + $0x44] sm:$0xf] }
 0x201   : > { %14420 = vmatmul.mubr.msk.bf16.gmra.mrb[224].mxu1 %vm569_vm1, %v18645_v27  ;;  %v8796_v31 = vor.u32 %v8795_v23, %v8792_v50  ;;  %v8805_v13 = vrot.slane %v8803_v35, 4  ;;  %v8811_v33 = vrot.slane %v8809_v10, 5  ;;  %v8813_v18 = vshrl.u32 %v13018_v28, 16  ;;  %v14316_v35 = vpop.f32.mrb[122].mxu0  ;;  %v13182_v10 = vld [vmem:[%s14861_s23 + $0x48] sm:$0xf] }
 0x202   : > { %14423 = vmatprep.mubr.msk.bf16.mxu1 %vm569_vm1, %v18646_v51  ;;  %v8819_v17 = vshll.u32 %v13019_v29, 16  ;;  %v8823_v7 = vshrl.u32 %v13019_v29, 16  ;;  %v17090_v27 = vadd.f32 %v14315_v52, %v4738_v5  ;;  %v4737_v43 = vadd.f32 %v4488_v47, %v16727_v42  ;;  %v6128_v28 = vpop.f32.mrb[123].mxu0  ;;  %14494 = vmatmul.mubr.msk.bf16.gmra.mrb[224].mxu0 %vm569_vm1, %v14788_v20  ;;  %v14245_v47 = vpop.f32.mrb[124].mxu1 }
 0x203   : > { %v8797_v44 = vrot.slane %v8796_v31, 4  ;;  %v8806_v59 = vor.u32 %v8805_v13, %v8801_v14  ;;  %v17095_v51 = vadd.f32 %v6125_v26, %v4736_v0  ;;  %v8815_v50 = vrot.slane %v8813_v18, 4  ;;  %14497 = vmatprep.mubr.msk.bf16.mxu0 %vm569_vm1, %v14789_v46  ;;  %v14319_v35 = vpop.f32.mrb[124].mxu0 }
 0x204   : > { %v8821_v23 = vrot.slane %v8819_v17, 5  ;;  %v8825_v56 = vrot.slane %v8823_v7, 4  ;;  %v8829_v52 = vshll.u32 %v13020_v38, 16  ;;  %v13265_v6 = vrot.slane %v13179_v11, 9  ;;  %v13183_v7 = vld [vmem:[%s14861_s23 + $0x4c] sm:$0x1] }
 0x205   : > { %18647 = vst [vmem:[#allocation48_spill] sm:$0xff] %v17095_v51  ;;  %v8802_v29 = vsel %vm14943_vm7, %v8797_v44, %v8801_v14  ;;  %v8807_v5 = vrot.slane %v8806_v59, 4  ;;  %v17101_v42 = vadd.f32 %v6128_v28, %v4737_v43  ;;  %v8816_v31 = vor.u32 %v8815_v50, %v8811_v33  ;;  %v14790_v44 = vld [vmem:[%s14861_s23 + $0x120] sm:$0xff]   ;;  %v13022_v28 = vld [vmem:[%s14861_s23 + $0x54] sm:$0xf] }
 0x206   : > { %v8826_v0 = vor.u32 %v8825_v56, %v8821_v23  ;;  %v10490_v13 = vrot.slane %v13180_v8, 5  ;;  %v8831_v17 = vrot.slane %v8829_v52, 5  ;;  %v10493_v14 = vrot.slane %v13181_v60, 5  ;;  %v4501_v56 = vpop.f32.mrb[125].mxu1  ;;  %v13021_v60 = vld [vmem:[%s14861_s23 + $0x50] sm:$0xf] }
 0x207   : > { %18648 = vst [vmem:[#allocation38_spill] sm:$0xff] %v17101_v42  ;;  %v8812_v18 = vsel %vm14943_vm7, %v8807_v5, %v8811_v33  ;;  %v10496_v38 = vrot.slane %v13182_v10, 5  ;;  %v18649_v20 = vcombine.low %v16796_v53, %v16804_v24  ;;  %v4742_v11 = vadd.f32 %v14245_v47, %v16769_v4  ;;  %v14246_v59 = vpop.f32.mrb[126].mxu1  ;;  %v18652_v5 = vld [vmem:[#allocation27_spill] sm:$0xff]  ;;  %v13201_v51 = vld [vmem:[%s14861_s23 + $0x94] sm:$0xf] }
 0x208   : > { %v8817_v26 = vrot.slane %v8816_v31, 4  ;;  %v8827_v43 = vrot.slane %v8826_v0, 4  ;;  %v17112_v46 = vcombine.low %v8802_v29, %v8812_v18  ;;  %v4740_v33 = vadd.f32 %v4501_v56, %v16773_v16  ;;  %v4504_v50 = vpop.f32.mrb[127].mxu1  ;;  %v14791_v31 = vld [vmem:[%s14861_s23 + $0x12c] sm:$0xff]   ;;  %v14800_v42 = vld [vmem:[%s14861_s23 + $0x184] sm:$0xff]  }
 0x209   : > { %14424 = vmatmul.mubr.msk.bf16.gmra.mrb[228].mxu1 %vm569_vm1, %v18649_v20  ;;  %v18650_v8 = vcombine.low %v16808_v32, %v16819_v12  ;;  %v17122_v53 = vsel %vm14931_vm6, %v13265_v6, %v10490_v13  ;;  %v10492_v4 = vrot.slane %v10490_v13, 4  ;;  %v10495_v24 = vrot.slane %v10493_v14, 4  ;;  %v6141_v6 = vpop.f32.mrb[125].mxu0 }
 0x20a   : > { %v8822_v16 = vsel %vm14943_vm7, %v8817_v26, %v8821_v23  ;;  %v8832_v10 = vsel %vm14943_vm7, %v8827_v43, %v8831_v17  ;;  %v10498_v32 = vrot.slane %v10496_v38, 4  ;;  %v10499_v12 = vrot.slane %v13183_v7, 5  ;;  %v13023_v23 = vld [vmem:[%s14861_s23 + $0x58] sm:$0xf]  ;;  %v14320_v18 = vpop.f32.mrb[126].mxu0  ;;  %14498 = vmatmul.mubr.msk.bf16.gmra.mrb[228].mxu0 %vm569_vm1, %v14790_v44 }
 0x20b   : > { %14427 = vmatprep.mubr.msk.bf16.mxu1 %vm569_vm1, %v18650_v8  ;;  %v17130_v29 = vadd.f32 %v14319_v35, %v4742_v11  ;;  %v4741_v52 = vadd.f32 %v4504_v50, %v18652_v5  ;;  %v17134_v0 = vcombine.low %v8822_v16, %v8832_v10  ;;  %v17138_v13 = vsel %vm14931_vm6, %v10492_v4, %v10493_v14  ;;  %v13024_v11 = vld [vmem:[%s14861_s23 + $0x5c] sm:$0xf]  ;;  %v6144_v56 = vpop.f32.mrb[127].mxu0  ;;  %v13025_v26 = vld [vmem:[%s14861_s23 + $0x60] sm:$0x1]  ;;  %v14249_v50 = vpop.f32.mrb[128].mxu1 }
 0x20c   : > { %v17141_v47 = vadd.f32 %v6141_v6, %v4740_v33  ;;  %v17145_v17 = vsel %vm14931_vm6, %v10495_v24, %v10496_v38  ;;  %v17149_v7 = vsel %vm14931_vm6, %v10498_v32, %v10499_v12  ;;  %v8834_v43 = vshrl.u32 %v13021_v60, 16  ;;  %v13184_v35 = vld [vmem:[%s14861_s23 + $0x50] sm:$0xe]  ;;  %14501 = vmatprep.mubr.msk.bf16.mxu0 %vm569_vm1, %v14791_v31  ;;  %v18656_v31 = vld [vmem:[#allocation28_spill] sm:$0xff] }
 0x20d   : > { %18651 = vst [vmem:[#allocation49_spill] sm:$0xff] %v17130_v29  ;;  %v8837_v33 = vshll.u32 %v13021_v60, 16  ;;  %v8843_v59 = vshll.u32 %v13022_v28, 16  ;;  %v17158_v38 = vadd.f32 %v6144_v56, %v4741_v52  ;;  %v8847_v8 = vshrl.u32 %v13022_v28, 16  ;;  %v4517_v28 = vpop.f32.mrb[129].mxu1 }
 0x20e   : > { %18653 = vst [vmem:[#allocation40_spill] sm:$0xff] %v17141_v47  ;;  %v8853_v4 = vshll.u32 %v13023_v23, 16  ;;  %v8857_v24 = vshrl.u32 %v13023_v23, 16  ;;  %v8836_v16 = vrot.slane %v8834_v43, 4  ;;  %v8863_v12 = vshll.u32 %v13024_v11, 16  ;;  %v14792_v23 = vld [vmem:[%s14861_s23 + $0x134] sm:$0xff]  }
 0x20f   : > { %18654 = vst [vmem:[#allocation42_spill] sm:$0xff] %v17158_v38  ;;  %v8839_v10 = vrot.slane %v8837_v33, 5  ;;  %v8845_v32 = vrot.slane %v8843_v59, 5  ;;  %v18655_v60 = vcombine.low %v16844_v22, %v16848_v1  ;;  %v4746_v44 = vadd.f32 %v14249_v50, %v16823_v36  ;;  %v14250_v56 = vpop.f32.mrb[130].mxu1  ;;  %v13185_v36 = vld [vmem:[%s14861_s23 + $0x54] sm:$0xf] }
 0x210   : > { %v8849_v6 = vrot.slane %v8847_v8, 4  ;;  %v8855_v5 = vrot.slane %v8853_v4, 5  ;;  %v8859_v52 = vrot.slane %v8857_v24, 4  ;;  %v4744_v18 = vadd.f32 %v4517_v28, %v18656_v31  ;;  %v14323_v59 = vpop.f32.mrb[128].mxu0  ;;  %v4520_v8 = vpop.f32.mrb[131].mxu1  ;;  %v14793_v56 = vld [vmem:[%s14861_s23 + $0x140] sm:$0xff]  }
 0x211   : > { %14428 = vmatmul.mubr.msk.bf16.gmra.mrb[232].mxu1 %vm569_vm1, %v18655_v60  ;;  %v18657_v43 = vcombine.low %v16874_v25, %v16879_v40  ;;  %v8840_v22 = vor.u32 %v8839_v10, %v8836_v16  ;;  %v8865_v1 = vrot.slane %v8863_v12, 5  ;;  %v8867_v33 = vshrl.u32 %v13024_v11, 16  ;;  %v13186_v60 = vld [vmem:[%s14861_s23 + $0x58] sm:$0xf]  ;;  %v6157_v31 = vpop.f32.mrb[129].mxu0  ;;  %v18659_v25 = vld [vmem:[#allocation39_spill] sm:$0xff] }
 0x212   : > { %v8850_v50 = vor.u32 %v8849_v6, %v8845_v32  ;;  %v8860_v4 = vor.u32 %v8859_v52, %v8855_v5  ;;  %v8873_v24 = vshll.u32 %v13025_v26, 16  ;;  %v13266_v14 = vrot.slane %v13184_v35, 9  ;;  %v13187_v10 = vld [vmem:[%s14861_s23 + $0x5c] sm:$0xf]  ;;  %v14324_v11 = vpop.f32.mrb[130].mxu0  ;;  %14502 = vmatmul.mubr.msk.bf16.gmra.mrb[232].mxu0 %vm569_vm1, %v14792_v23  ;;  %v18695_v47 = vld [vmem:[#allocation57_spill] sm:$0xff] }
 0x213   : > { %14431 = vmatprep.mubr.msk.bf16.mxu1 %vm569_vm1, %v18657_v43  ;;  %v17175_v28 = vadd.f32 %v14323_v59, %v4746_v44  ;;  %v4745_v40 = vadd.f32 %v4520_v8, %v18659_v25  ;;  %v8841_v43 = vrot.slane %v8840_v22, 4  ;;  %v8869_v16 = vrot.slane %v8867_v33, 4  ;;  %v6160_v26 = vpop.f32.mrb[131].mxu0  ;;  %v13188_v59 = vld [vmem:[%s14861_s23 + $0x60] sm:$0x1]  ;;  %14505 = vmatprep.mubr.msk.bf16.mxu0 %vm569_vm1, %v14793_v56  ;;  %v14794_v56 = vld [vmem:[%s14861_s23 + $0x148] sm:$0xff]  }
 0x214   : > { %v17180_v12 = vadd.f32 %v6157_v31, %v4744_v18  ;;  %v8851_v20 = vrot.slane %v8850_v50, 4  ;;  %v8861_v6 = vrot.slane %v8860_v4, 4  ;;  %v8875_v52 = vrot.slane %v8873_v24, 5  ;;  %v13026_v50 = vld [vmem:[%s14861_s23 + $0x64] sm:$0xf] }
 0x215   : > { %18658 = vst [vmem:[#allocation50_spill] sm:$0xff] %v17175_v28  ;;  %v8846_v35 = vsel %vm14943_vm7, %v8841_v43, %v8845_v32  ;;  %v8870_v44 = vor.u32 %v8869_v16, %v8865_v1  ;;  %v10503_v28 = vrot.slane %v13185_v36, 5  ;;  %v10506_v38 = vrot.slane %v13186_v60, 5  ;;  %v14253_v32 = vpop.f32.mrb[132].mxu1  ;;  %v18664_v43 = vld [vmem:[#allocation41_spill] sm:$0xff] }
 0x216   : > { %18660 = vst [vmem:[#allocation43_spill] sm:$0xff] %v17180_v12  ;;  %v17186_v22 = vadd.f32 %v6160_v26, %v4745_v40  ;;  %v8856_v18 = vsel %vm14943_vm7, %v8851_v20, %v8855_v5  ;;  %v8866_v33 = vsel %vm14943_vm7, %v8861_v6, %v8865_v1  ;;  %v10509_v8 = vrot.slane %v13187_v10, 5  ;;  %v18663_v5 = vld [vmem:[#allocation29_spill] sm:$0xff]  ;;  %v4533_v60 = vpop.f32.mrb[133].mxu1  ;;  %v14327_v6 = vpop.f32.mrb[132].mxu0 }
 0x217   : > { %v8871_v4 = vrot.slane %v8870_v44, 4  ;;  %v17194_v36 = vcombine.low %v8846_v35, %v8856_v18  ;;  %v17198_v23 = vsel %vm14931_vm6, %v13266_v14, %v10503_v28  ;;  %v10505_v24 = vrot.slane %v10503_v28, 4  ;;  %v14254_v10 = vpop.f32.mrb[134].mxu1  ;;  %v13027_v28 = vld [vmem:[%s14861_s23 + $0x68] sm:$0xf]  ;;  %v6173_v18 = vpop.f32.mrb[133].mxu0 }
 0x218   : > { %18661 = vst [vmem:[#allocation51_spill] sm:$0xff] %v17186_v22  ;;  %v18662_v20 = vcombine.low %v16883_v55, %v16887_v45  ;;  %v4750_v1 = vadd.f32 %v14253_v32, %v18663_v5  ;;  %v10508_v31 = vrot.slane %v10506_v38, 4  ;;  %v10511_v25 = vrot.slane %v10509_v8, 4  ;;  %v4536_v26 = vpop.f32.mrb[135].mxu1  ;;  %v13029_v44 = vld [vmem:[%s14861_s23 + $0x70] sm:$0xf] }
 0x219   : > { %v10512_v40 = vrot.slane %v13188_v59, 5  ;;  %v4748_v16 = vadd.f32 %v4533_v60, %v18664_v43  ;;  %v18665_v14 = vcombine.low %v16898_v41, %v16919_v21  ;;  %v8876_v55 = vsel %vm14943_vm7, %v8871_v4, %v8875_v52  ;;  %v13028_v52 = vld [vmem:[%s14861_s23 + $0x6c] sm:$0xf]  ;;  %v18667_v32 = vld [vmem:[#allocation30_spill] sm:$0xff]  ;;  %v14328_v60 = vpop.f32.mrb[134].mxu0 }
 0x21a   : > { %14432 = vmatmul.mubr.msk.bf16.gmra.mrb[236].mxu1 %vm569_vm1, %v18662_v20  ;;  %v17215_v45 = vsel %vm14931_vm6, %v10505_v24, %v10506_v38  ;;  %v8878_v11 = vshrl.u32 %v13026_v50, 16  ;;  %v17218_v35 = vcombine.low %v8866_v33, %v8876_v55  ;;  %v17222_v21 = vsel %vm14931_vm6, %v10508_v31, %v10509_v8  ;;  %v14795_v4 = vld [vmem:[%s14861_s23 + $0x154] sm:$0xff]   ;;  %v13189_v43 = vld [vmem:[%s14861_s23 + $0x64] sm:$0xe]  ;;  %v6176_v10 = vpop.f32.mrb[135].mxu0  ;;  %14506 = vmatmul.mubr.msk.bf16.gmra.mrb[236].mxu0 %vm569_vm1, %v14794_v56  ;;  %v14796_v56 = vld [vmem:[%s14861_s23 + $0x15c] sm:$0xff]  }
 0x21b   : > { %14435 = vmatprep.mubr.msk.bf16.mxu1 %vm569_vm1, %v18665_v14  ;;  %v17226_v41 = vsel %vm14931_vm6, %v10511_v25, %v10512_v40  ;;  %v17232_v59 = vadd.f32 %v14327_v6, %v4750_v1  ;;  %v4749_v33 = vadd.f32 %v4536_v26, %v18667_v32  ;;  %v13030_v24 = vld [vmem:[%s14861_s23 + $0x74] sm:$0x1]  ;;  %v17239_v5 = vadd.f32 %v6173_v18, %v4748_v16  ;;  %v13190_v18 = vld [vmem:[%s14861_s23 + $0x68] sm:$0xf] }
 0x21c   : > { %v8880_v20 = vrot.slane %v8878_v11, 4  ;;  %v8881_v31 = vshll.u32 %v13026_v50, 16  ;;  %v8887_v25 = vshll.u32 %v13027_v28, 16  ;;  %v8891_v40 = vshrl.u32 %v13027_v28, 16  ;;  %14509 = vmatprep.mubr.msk.bf16.mxu0 %vm569_vm1, %v14795_v4  ;;  %v14257_v50 = vpop.f32.mrb[136].mxu1  ;;  %v18670_v38 = vld [vmem:[#allocation33_spill] sm:$0xff] }
 0x21d   : > { %18666 = vst [vmem:[#allocation44_spill] sm:$0xff] %v17232_v59  ;;  %18668 = vst [vmem:[#allocation45_spill] sm:$0xff] %v17239_v5  ;;  %v8897_v1 = vshll.u32 %v13028_v52, 16  ;;  %v8901_v14 = vshrl.u32 %v13028_v52, 16  ;;  %v8907_v55 = vshll.u32 %v13029_v44, 16  ;;  %v8911_v6 = vshrl.u32 %v13029_v44, 16 }
 0x21e   : > { %v17243_v26 = vadd.f32 %v6176_v10, %v4749_v33  ;;  %v8883_v32 = vrot.slane %v8881_v31, 5  ;;  %v8889_v11 = vrot.slane %v8887_v25, 5  ;;  %v8893_v16 = vrot.slane %v8891_v40, 4  ;;  %v18672_v33 = vld [vmem:[#allocation22_spill] sm:$0xff]  ;;  %v4549_v25 = vpop.f32.mrb[137].mxu1  ;;  %v18673_v4 = vld [vmem:[#allocation31_spill] sm:$0xff] }
 0x21f   : > { %v8899_v60 = vrot.slane %v8897_v1, 5  ;;  %v8903_v28 = vrot.slane %v8901_v14, 4  ;;  %v8909_v8 = vrot.slane %v8907_v55, 5  ;;  %v8913_v52 = vrot.slane %v8911_v6, 4  ;;  %v14258_v1 = vpop.f32.mrb[138].mxu1 }
 0x220   : > { %18669 = vst [vmem:[#allocation46_spill] sm:$0xff] %v17243_v26  ;;  %v18671_v44 = vcombine.low %v16934_v37, %v18670_v38  ;;  %v4754_v31 = vadd.f32 %v14257_v50, %v18672_v33  ;;  %v8884_v40 = vor.u32 %v8883_v32, %v8880_v20  ;;  %v8894_v10 = vor.u32 %v8893_v16, %v8889_v11  ;;  %v13191_v38 = vld [vmem:[%s14861_s23 + $0x6c] sm:$0xf]  ;;  %v13192_v6 = vld [vmem:[%s14861_s23 + $0x70] sm:$0xf]  ;;  %v14331_v50 = vpop.f32.mrb[136].mxu0 }
 0x221   : > { %v8917_v26 = vshll.u32 %v13030_v24, 16  ;;  %v4752_v5 = vadd.f32 %v4549_v25, %v18673_v4  ;;  %v18674_v14 = vcombine.low %v16946_v39, %v16952_v34  ;;  %v8904_v55 = vor.u32 %v8903_v28, %v8899_v60  ;;  %v4552_v33 = vpop.f32.mrb[139].mxu1  ;;  %v6189_v39 = vpop.f32.mrb[137].mxu0  ;;  %v18676_v34 = vld [vmem:[#allocation32_spill] sm:$0xff] }
 0x222   : > { %14436 = vmatmul.mubr.msk.bf16.gmra.mrb[240].mxu1 %vm569_vm1, %v18671_v44  ;;  %v8914_v37 = vor.u32 %v8913_v52, %v8909_v8  ;;  %v13267_v44 = vrot.slane %v13189_v43, 9  ;;  %v8885_v20 = vrot.slane %v8884_v40, 4  ;;  %v8895_v24 = vrot.slane %v8894_v10, 4  ;;  %v14797_v1 = vld [vmem:[%s14861_s23 + $0x168] sm:$0xff]   ;;  %v14332_v43 = vpop.f32.mrb[138].mxu0  ;;  %14510 = vmatmul.mubr.msk.bf16.gmra.mrb[240].mxu0 %vm569_vm1, %v14796_v56  ;;  %v18682_v56 = vld [vmem:[#allocation53_spill] sm:$0xff] }
 0x223   : > { %14439 = vmatprep.mubr.msk.bf16.mxu1 %vm569_vm1, %v18674_v14  ;;  %v8919_v32 = vrot.slane %v8917_v26, 5  ;;  %v10516_v16 = vrot.slane %v13190_v18, 5  ;;  %v17260_v25 = vadd.f32 %v14331_v50, %v4754_v31  ;;  %v4753_v4 = vadd.f32 %v4552_v33, %v18676_v34  ;;  %v13193_v14 = vld [vmem:[%s14861_s23 + $0x74] sm:$0x1]  ;;  %v13031_v18 = vld [vmem:[%s14861_s23 + $0x78] sm:$0xf]  ;;  %14513 = vmatprep.mubr.msk.bf16.mxu0 %vm569_vm1, %v14797_v1 }
 0x224   : > { %v8905_v28 = vrot.slane %v8904_v55, 4  ;;  %v8915_v52 = vrot.slane %v8914_v37, 4  ;;  %v17265_v59 = vadd.f32 %v6189_v39, %v4752_v5  ;;  %v8890_v40 = vsel %vm14943_vm7, %v8885_v20, %v8889_v11  ;;  %v13032_v31 = vld [vmem:[%s14861_s23 + $0x7c] sm:$0xf]  ;;  %v6192_v50 = vpop.f32.mrb[139].mxu0 }
 0x225   : > { %18675 = vst [vmem:[#allocation52_spill] sm:$0xff] %v17260_v25  ;;  %v8900_v10 = vsel %vm14943_vm7, %v8895_v24, %v8899_v60  ;;  %v17273_v26 = vsel %vm14931_vm6, %v13267_v44, %v10516_v16  ;;  %v10518_v33 = vrot.slane %v10516_v16, 4  ;;  %v17284_v11 = vadd.f32 %v6192_v50, %v4753_v4  ;;  %v14261_v24 = vpop.f32.mrb[140].mxu1  ;;  %v18680_v16 = vld [vmem:[#allocation34_spill] sm:$0xff] }
 0x226   : > { %18677 = vst [vmem:[#allocation47_spill] sm:$0xff] %v17265_v59  ;;  %v8910_v55 = vsel %vm14943_vm7, %v8905_v28, %v8909_v8  ;;  %v8920_v5 = vsel %vm14943_vm7, %v8915_v52, %v8919_v32  ;;  %v17281_v37 = vcombine.low %v8890_v40, %v8900_v10  ;;  %v10519_v44 = vrot.slane %v13191_v38, 5  ;;  %v18679_v28 = vld [vmem:[#allocation23_spill] sm:$0xff]  ;;  %v4565_v43 = vpop.f32.mrb[141].mxu1  ;;  %v14798_v40 = vld [vmem:[%s14861_s23 + $0x170] sm:$0xff]   ;;  %v18683_v10 = vld [vmem:[#allocation54_spill] sm:$0xff] }
 0x227   : > { %18678 = vst [vmem:[#allocation27_spill] sm:$0xff] %v17284_v11  ;;  %v17286_v60 = vcombine.low %v8910_v55, %v8920_v5  ;;  %v10522_v20 = vrot.slane %v13192_v6, 5  ;;  %v10525_v8 = vrot.slane %v13193_v14, 5  ;;  %v8922_v39 = vshrl.u32 %v13031_v18, 16  ;;  %v13033_v14 = vld [vmem:[%s14861_s23 + $0x80] sm:$0xf] }
 0x228   : > { %v8925_v32 = vshll.u32 %v13031_v18, 16  ;;  %v8931_v34 = vshll.u32 %v13032_v31, 16  ;;  %v18681_v52 = vcombine.low %v18679_v28, %v18680_v16  ;;  %v4758_v4 = vadd.f32 %v14261_v24, %v18682_v56  ;;  %v14262_v50 = vpop.f32.mrb[142].mxu1  ;;  %v18684_v55 = vld [vmem:[#allocation24_spill] sm:$0xff]  ;;  %v18685_v5 = vld [vmem:[#allocation35_spill] sm:$0xff] }
 0x229   : > { %v17296_v38 = vsel %vm14931_vm6, %v10518_v33, %v10519_v44  ;;  %v10521_v6 = vrot.slane %v10519_v44, 4  ;;  %v10524_v1 = vrot.slane %v10522_v20, 4  ;;  %v4756_v18 = vadd.f32 %v4565_v43, %v18683_v10  ;;  %v13034_v16 = vld [vmem:[%s14861_s23 + $0x84] sm:$0xf]  ;;  %v14335_v44 = vpop.f32.mrb[140].mxu0  ;;  %v4568_v56 = vpop.f32.mrb[143].mxu1 }
 0x22a   : > { %14440 = vmatmul.mubr.msk.bf16.gmra.mrb[244].mxu1 %vm569_vm1, %v18681_v52  ;;  %v18686_v28 = vcombine.low %v18684_v55, %v18685_v5  ;;  %v8924_v33 = vrot.slane %v8922_v39, 4  ;;  %v8927_v52 = vrot.slane %v8925_v32, 5  ;;  %v13035_v10 = vld [vmem:[%s14861_s23 + $0x88] sm:$0x1]  ;;  %v8933_v50 = vrot.slane %v8931_v34, 5  ;;  %v18688_v24 = vld [vmem:[#allocation55_spill] sm:$0xff]  ;;  %14514 = vmatmul.mubr.msk.bf16.gmra.mrb[244].mxu0 %vm569_vm1, %v14798_v40 }
 0x22b   : > { %v17310_v11 = vsel %vm14931_vm6, %v10521_v6, %v10522_v20  ;;  %v17314_v43 = vsel %vm14931_vm6, %v10524_v1, %v10525_v8  ;;  %v8935_v55 = vshrl.u32 %v13032_v31, 16  ;;  %v17317_v5 = vadd.f32 %v14335_v44, %v4758_v4  ;;  %v14799_v32 = vld [vmem:[%s14861_s23 + $0x17c] sm:$0xff]   ;;  %v13194_v20 = vld [vmem:[%s14861_s23 + $0x78] sm:$0xe]  ;;  %v18691_v40 = vld [vmem:[#allocation36_spill] sm:$0xff] }
 0x22c   : > { %14443 = vmatprep.mubr.msk.bf16.mxu1 %vm569_vm1, %v18686_v28  ;;  %v6205_v28 = vpop.f32.mrb[141].mxu0  ;;  %v4757_v39 = vadd.f32 %v4568_v56, %v18688_v24  ;;  %v8928_v25 = vor.u32 %v8927_v52, %v8924_v33  ;;  %v8941_v22 = vshll.u32 %v13033_v14, 16  ;;  %v8945_v34 = vshrl.u32 %v13033_v14, 16  ;;  %v13195_v31 = vld [vmem:[%s14861_s23 + $0x7c] sm:$0xf]  ;;  %14517 = vmatprep.mubr.msk.bf16.mxu0 %vm569_vm1, %v14799_v32 }
 0x22d   : > { %18687 = vst [vmem:[#allocation28_spill] sm:$0xff] %v17317_v5  ;;  %v17324_v6 = vadd.f32 %v6205_v28, %v4756_v18  ;;  %v14336_v8 = vpop.f32.mrb[142].mxu0  ;;  %v8937_v1 = vrot.slane %v8935_v55, 4  ;;  %v8951_v5 = vshll.u32 %v13034_v16, 16  ;;  %v8955_v24 = vshrl.u32 %v13034_v16, 16  ;;  %v14265_v55 = vpop.f32.mrb[144].mxu1 }
 0x22e   : > { %v6208_v4 = vpop.f32.mrb[143].mxu0  ;;  %v8929_v44 = vrot.slane %v8928_v25, 4  ;;  %v8961_v56 = vshll.u32 %v13035_v10, 16  ;;  %v8943_v18 = vrot.slane %v8941_v22, 5  ;;  %v8947_v52 = vrot.slane %v8945_v34, 4  ;;  %v18694_v22 = vld [vmem:[#allocation56_spill] sm:$0xff] }
 0x22f   : > { %18689 = vst [vmem:[#allocation39_spill] sm:$0xff] %v17324_v6  ;;  %v17328_v59 = vadd.f32 %v6208_v4, %v4757_v39  ;;  %v8938_v33 = vor.u32 %v8937_v1, %v8933_v50  ;;  %v13196_v28 = vld [vmem:[%s14861_s23 + $0x80] sm:$0xf]  ;;  %v13197_v8 = vld [vmem:[%s14861_s23 + $0x84] sm:$0xf]  ;;  %v8953_v25 = vrot.slane %v8951_v5, 5  ;;  %v4762_v1 = vadd.f32 %v14265_v55, %v18694_v22 }
 0x230   : > { %v8934_v14 = vsel %vm14943_vm7, %v8929_v44, %v8933_v50  ;;  %v8957_v6 = vrot.slane %v8955_v24, 4  ;;  %v8963_v16 = vrot.slane %v8961_v56, 5  ;;  %v13198_v10 = vld [vmem:[%s14861_s23 + $0x88] sm:$0x1]  ;;  %v18692_v39 = vld [vmem:[#allocation37_spill] sm:$0xff]  ;;  %v4581_v34 = vpop.f32.mrb[145].mxu1  ;;  %v8948_v32 = vor.u32 %v8947_v52, %v8943_v18 }
 0x231   : > { %18690 = vst [vmem:[#allocation29_spill] sm:$0xff] %v17328_v59  ;;  %v18693_v4 = vcombine.low %v18691_v40, %v18692_v39  ;;  %v8939_v59 = vrot.slane %v8938_v33, 4  ;;  %v13268_v12 = vrot.slane %v13194_v20, 9  ;;  %v4760_v29 = vadd.f32 %v4581_v34, %v18695_v47  ;;  %v14266_v50 = vpop.f32.mrb[146].mxu1  ;;  %v13036_v56 = vld [vmem:[%s14861_s23 + $0x8c] sm:$0xf] }
 0x232   : > { %v8958_v5 = vor.u32 %v8957_v6, %v8953_v25  ;;  %v10529_v44 = vrot.slane %v13195_v31, 5  ;;  %v10532_v24 = vrot.slane %v13196_v28, 5  ;;  %v14339_v40 = vpop.f32.mrb[144].mxu0  ;;  %v4584_v39 = vpop.f32.mrb[147].mxu1  ;;  %v10535_v33 = vrot.slane %v13197_v8, 5  ;;  %v18697_v22 = vld [vmem:[#allocation58_spill] sm:$0xff]  ;;  %14518 = vmatmul.mubr.msk.bf16.gmra.mrb[248].mxu0 %vm569_vm1, %v14800_v42 }
 0x233   : > { %14444 = vmatmul.mubr.msk.bf16.gmra.mrb[248].mxu1 %vm569_vm1, %v18693_v4  ;;  %v8944_v55 = vsel %vm14943_vm7, %v8939_v59, %v8943_v18  ;;  %v8949_v4 = vrot.slane %v8948_v32, 4  ;;  %v10538_v20 = vrot.slane %v13198_v10, 5  ;;  %v17348_v52 = vadd.f32 %v14339_v40, %v4762_v1  ;;  %v6221_v47 = vpop.f32.mrb[145].mxu0  ;;  %v13037_v32 = vld [vmem:[%s14861_s23 + $0x90] sm:$0xf] }
 0x234   : > { %14523 = vmatprep.mubr.msk.bf16.mxu1 %vm569_vm1, %v17049_v3  ;;  %v4761_v34 = vadd.f32 %v4584_v39, %v18697_v22  ;;  %v8959_v3 = vrot.slane %v8958_v5, 4  ;;  %v17351_v6 = vcombine.low %v8934_v14, %v8944_v55  ;;  %v17353_v31 = vadd.f32 %v6221_v47, %v4760_v29  ;;  %v14340_v28 = vpop.f32.mrb[146].mxu0  ;;  %v14269_v39 = vpop.f32.mrb[148].mxu1 }
 0x235   : > { %18696 = vst [vmem:[#allocation41_spill] sm:$0xff] %v17348_v52  ;;  %v8954_v50 = vsel %vm14943_vm7, %v8949_v4, %v8953_v25  ;;  %v17359_v59 = vsel %vm14931_vm6, %v13268_v12, %v10529_v44  ;;  %v10531_v18 = vrot.slane %v10529_v44, 4  ;;  %v6224_v8 = vpop.f32.mrb[147].mxu0  ;;  %v10534_v1 = vrot.slane %v10532_v24, 4  ;;  %v13038_v25 = vld [vmem:[%s14861_s23 + $0x94] sm:$0xf] }
 0x236   : > { %18698 = vst [vmem:[#allocation30_spill] sm:$0xff] %v17353_v31  ;;  %v8964_v10 = vsel %vm14943_vm7, %v8959_v3, %v8963_v16  ;;  %v10537_v14 = vrot.slane %v10535_v33, 4  ;;  %v8966_v5 = vshrl.u32 %v13036_v56, 16  ;;  %v17365_v29 = vadd.f32 %v6224_v8, %v4761_v34  ;;  %v13039_v4 = vld [vmem:[%s14861_s23 + $0x98] sm:$0xf]  ;;  %v4597_v47 = vpop.f32.mrb[149].mxu1 }
 0x237   : > { %v17367_v40 = vcombine.low %v8954_v50, %v8964_v10  ;;  %v17371_v12 = vsel %vm14931_vm6, %v10531_v18, %v10532_v24  ;;  %v8969_v44 = vshll.u32 %v13036_v56, 16  ;;  %v18700_v16 = vcombine.low %v17020_v30, %v17037_v9  ;;  %v18701_v30 = vld [vmem:[#allocation3_spill] sm:$0xff]  ;;  %v18702_v3 = vld [vmem:[#allocation4_spill] sm:$0xff]  ;;  %v14270_v28 = vpop.f32.mrb[150].mxu1  ;;  %v13040_v50 = vld [vmem:[%s14861_s23 + $0x9c] sm:$0x1] }
 0x238   : > { %18699 = vst [vmem:[#allocation33_spill] sm:$0xff] %v17365_v29  ;;  %v17380_v42 = vsel %vm14931_vm6, %v10534_v1, %v10535_v33  ;;  %v17384_v55 = vsel %vm14931_vm6, %v10537_v14, %v10538_v20  ;;  %v8968_v56 = vrot.slane %v8966_v5, 4  ;;  %v4766_v9 = vadd.f32 %v14269_v39, %v18701_v30  ;;  %v4600_v10 = vpop.f32.mrb[151].mxu1  ;;  %v13199_v39 = vld [vmem:[%s14861_s23 + $0x8c] sm:$0xe]  ;;  %v14343_v30 = vpop.f32.mrb[148].mxu0 }
 0x239   : > { %14597 = vmatprep.mubr.msk.bf16.mxu0 %vm569_vm1, %v18700_v16  ;;  %v8971_v22 = vrot.slane %v8969_v44, 5  ;;  %v8975_v34 = vshll.u32 %v13037_v32, 16  ;;  %v4764_v20 = vadd.f32 %v4597_v47, %v18702_v3  ;;  %v8979_v18 = vshrl.u32 %v13037_v32, 16  ;;  %v18703_v44 = vld [vmem:[#allocation5_spill] sm:$0xff]  ;;  %v6237_v32 = vpop.f32.mrb[149].mxu0 }
 0x23a   : > { %v8985_v8 = vshll.u32 %v13038_v25, 16  ;;  %v8995_v5 = vshll.u32 %v13039_v4, 16  ;;  %v8999_v16 = vshrl.u32 %v13039_v4, 16  ;;  %v4765_v33 = vadd.f32 %v4600_v10, %v18703_v44  ;;  %v13200_v24 = vld [vmem:[%s14861_s23 + $0x90] sm:$0xf] }
 0x23b   : > { %14524 = vmatmul.mubr.msk.bf16.vlgmr.msra.gmra.mrb[252].mxu1 %vm569_vm1, %v17086_v57  ;;  %v8989_v57 = vshrl.u32 %v13038_v25, 16  ;;  %v8972_v1 = vor.u32 %v8971_v22, %v8968_v56  ;;  %v8977_v14 = vrot.slane %v8975_v34, 5  ;;  %v8981_v47 = vrot.slane %v8979_v18, 4  ;;  %v14344_v22 = vpop.f32.mrb[150].mxu0  ;;  %v13202_v10 = vld [vmem:[%s14861_s23 + $0x98] sm:$0xf] }
 0x23c   : > { %14527 = vmatprep.mubr.msk.bf16.mxu1 %vm569_vm1, %v17112_v46  ;;  %v8987_v3 = vrot.slane %v8985_v8, 5  ;;  %v17401_v46 = vadd.f32 %v14343_v30, %v4766_v9  ;;  %v8997_v25 = vrot.slane %v8995_v5, 5  ;;  %v9001_v31 = vrot.slane %v8999_v16, 4  ;;  %v6240_v8 = vpop.f32.mrb[151].mxu0  ;;  %v13203_v44 = vld [vmem:[%s14861_s23 + $0x9c] sm:$0x1] }
 0x23d   : > { %v8991_v28 = vrot.slane %v8989_v57, 4  ;;  %v8973_v29 = vrot.slane %v8972_v1, 4  ;;  %v17403_v56 = vadd.f32 %v6237_v32, %v4764_v20  ;;  %v8982_v4 = vor.u32 %v8981_v47, %v8977_v14  ;;  %v13041_v32 = vld [vmem:[%s14861_s23 + $0xa0] sm:$0xf] }
 0x23e   : > { %v9005_v52 = vshll.u32 %v13040_v50, 16  ;;  %v18704_v18 = vcombine.low %v17058_v58, %v17067_v19  ;;  %v9002_v57 = vor.u32 %v9001_v31, %v8997_v25  ;;  %v13269_v1 = vrot.slane %v13199_v39, 9  ;;  %v14273_v50 = vpop.f32.mrb[152].mxu1  ;;  %v18706_v31 = vld [vmem:[#allocation6_spill] sm:$0xff] }
 0x23f   : > { %v8992_v34 = vor.u32 %v8991_v28, %v8987_v3  ;;  %v8978_v9 = vsel %vm14943_vm7, %v8973_v29, %v8977_v14  ;;  %v10542_v20 = vrot.slane %v13200_v24, 5  ;;  %v17413_v5 = vadd.f32 %v6240_v8, %v4765_v33  ;;  %v4613_v14 = vpop.f32.mrb[153].mxu1 }
 0x240   : > { %14598 = vmatmul.mubr.msk.bf16.vlgmr.msra.gmra.mrb[252].mxu0 %vm569_vm1, %v18704_v18  ;;  %v18705_v16 = vcombine.low %v17122_v53, %v17138_v13  ;;  %v8983_v30 = vrot.slane %v8982_v4, 4  ;;  %v9007_v19 = vrot.slane %v9005_v52, 5  ;;  %v4770_v29 = vadd.f32 %v14273_v50, %v18706_v31  ;;  %v18707_v13 = vld [vmem:[#allocation7_spill] sm:$0xff]  ;;  %v14274_v47 = vpop.f32.mrb[154].mxu1 }
 0x241   : > { %v8993_v58 = vrot.slane %v8992_v34, 4  ;;  %v9003_v24 = vrot.slane %v9002_v57, 4  ;;  %v17425_v33 = vsel %vm14931_vm6, %v13269_v1, %v10542_v20  ;;  %v10544_v53 = vrot.slane %v10542_v20, 4  ;;  %v4616_v22 = vpop.f32.mrb[155].mxu1  ;;  %v13042_v57 = vld [vmem:[%s14861_s23 + $0xa4] sm:$0xf] }
 0x242   : > { %14601 = vmatprep.mubr.msk.bf16.mxu0 %vm569_vm1, %v18705_v16  ;;  %v4768_v39 = vadd.f32 %v4613_v14, %v18707_v13  ;;  %v10545_v28 = vrot.slane %v13201_v51, 5  ;;  %v10548_v18 = vrot.slane %v13202_v10, 5  ;;  %v10551_v8 = vrot.slane %v13203_v44, 5  ;;  %v18708_v1 = vld [vmem:[#allocation8_spill] sm:$0xff] }
 0x243   : > { %14528 = vmatmul.mubr.msk.bf16.gmra.mrb[0].mxu1 %vm569_vm1, %v17134_v0  ;;  %v8988_v0 = vsel %vm14943_vm7, %v8983_v30, %v8987_v3  ;;  %v8998_v52 = vsel %vm14943_vm7, %v8993_v58, %v8997_v25  ;;  %v9008_v4 = vsel %vm14943_vm7, %v9003_v24, %v9007_v19  ;;  %v4769_v20 = vadd.f32 %v4616_v22, %v18708_v1  ;;  %v13043_v25 = vld [vmem:[%s14861_s23 + $0xa8] sm:$0xf]  ;;  %v13044_v14 = vld [vmem:[%s14861_s23 + $0xac] sm:$0xf] }
 0x244   : > { %14531 = vmatprep.mubr.msk.bf16.mxu1 %vm569_vm1, %v17194_v36  ;;  %v17437_v34 = vcombine.low %v8978_v9, %v8988_v0  ;;  %v14347_v36 = vpop.f32.mrb[152].mxu0  ;;  %v17441_v16 = vcombine.low %v8998_v52, %v9008_v4  ;;  %v17445_v3 = vsel %vm14931_vm6, %v10544_v53, %v10545_v28  ;;  %v10547_v51 = vrot.slane %v10545_v28, 4  ;;  %v14277_v4 = vpop.f32.mrb[156].mxu1 }
 0x245   : > { %v17448_v50 = vadd.f32 %v14347_v36, %v4770_v29  ;;  %v6253_v9 = vpop.f32.mrb[153].mxu0  ;;  %v10550_v30 = vrot.slane %v10548_v18, 4  ;;  %v9010_v58 = vshrl.u32 %v13041_v32, 16  ;;  %v9013_v24 = vshll.u32 %v13041_v32, 16  ;;  %v4629_v1 = vpop.f32.mrb[157].mxu1 }
 0x246   : > { %v17452_v19 = vadd.f32 %v6253_v9, %v4768_v39  ;;  %v14348_v44 = vpop.f32.mrb[154].mxu0  ;;  %v17456_v31 = vsel %vm14931_vm6, %v10547_v51, %v10548_v18  ;;  %v9019_v53 = vshll.u32 %v13042_v57, 16  ;;  %v18709_v29 = vcombine.low %v17145_v17, %v17149_v7  ;;  %v13045_v39 = vld [vmem:[%s14861_s23 + $0xb0] sm:$0x1] }
 0x247   : > { %v6256_v13 = vpop.f32.mrb[155].mxu0  ;;  %v17465_v47 = vsel %vm14931_vm6, %v10550_v30, %v10551_v8  ;;  %v9012_v0 = vrot.slane %v9010_v58, 4  ;;  %v9023_v52 = vshrl.u32 %v13042_v57, 16  ;;  %v9029_v28 = vshll.u32 %v13043_v25, 16  ;;  %v13204_v8 = vld [vmem:[%s14861_s23 + $0xa0] sm:$0xe] }
 0x248   : > { %14602 = vmatmul.mubr.msk.bf16.gmra.mrb[0].mxu0 %vm569_vm1, %v18709_v29  ;;  %v17468_v22 = vadd.f32 %v6256_v13, %v4769_v20  ;;  %v18710_v32 = vcombine.low %v17198_v23, %v17215_v45  ;;  %v9015_v7 = vrot.slane %v9013_v24, 5  ;;  %v9021_v18 = vrot.slane %v9019_v53, 5  ;;  %v18711_v57 = vld [vmem:[#allocation9_spill] sm:$0xff]  ;;  %v18712_v45 = vld [vmem:[#allocation10_spill] sm:$0xff]  ;;  %v14278_v30 = vpop.f32.mrb[158].mxu1 }
 0x249   : > { %v4774_v36 = vadd.f32 %v14277_v4, %v18711_v57  ;;  %v9025_v20 = vrot.slane %v9023_v52, 4  ;;  %v9031_v51 = vrot.slane %v9029_v28, 5  ;;  %v9033_v23 = vshrl.u32 %v13043_v25, 16  ;;  %v13205_v53 = vld [vmem:[%s14861_s23 + $0xa4] sm:$0xf]  ;;  %v4632_v29 = vpop.f32.mrb[159].mxu1 }
 0x24a   : > { %14605 = vmatprep.mubr.msk.bf16.mxu0 %vm569_vm1, %v18710_v32  ;;  %v4772_v9 = vadd.f32 %v4629_v1, %v18712_v45  ;;  %v9016_v58 = vor.u32 %v9015_v7, %v9012_v0  ;;  %v9039_v44 = vshll.u32 %v13044_v14, 16  ;;  %v9043_v24 = vshrl.u32 %v13044_v14, 16  ;;  %v13206_v4 = vld [vmem:[%s14861_s23 + $0xa8] sm:$0xf]  ;;  %v18713_v52 = vld [vmem:[#allocation11_spill] sm:$0xff]  ;;  %v14351_v45 = vpop.f32.mrb[156].mxu0 }
 0x24b   : > { %14532 = vmatmul.mubr.msk.bf16.gmra.mrb[4].mxu1 %vm569_vm1, %v17218_v35  ;;  %v9026_v13 = vor.u32 %v9025_v20, %v9021_v18  ;;  %v9035_v35 = vrot.slane %v9033_v23, 4  ;;  %v9049_v32 = vshll.u32 %v13045_v39, 16  ;;  %v13270_v57 = vrot.slane %v13204_v8, 9  ;;  %v6269_v10 = vpop.f32.mrb[157].mxu0  ;;  %v13207_v23 = vld [vmem:[%s14861_s23 + $0xac] sm:$0xf] }
 0x24c   : > { %14535 = vmatprep.mubr.msk.bf16.mxu1 %vm569_vm1, %v17281_v37  ;;  %v4773_v28 = vadd.f32 %v4632_v29, %v18713_v52  ;;  %v9017_v25 = vrot.slane %v9016_v58, 4  ;;  %v9041_v17 = vrot.slane %v9039_v44, 5  ;;  %v9045_v1 = vrot.slane %v9043_v24, 4  ;;  %v14352_v24 = vpop.f32.mrb[158].mxu0  ;;  %v13208_v29 = vld [vmem:[%s14861_s23 + $0xb0] sm:$0x1] }
 0x24d   : > { %v9027_v30 = vrot.slane %v9026_v13, 4  ;;  %v9036_v37 = vor.u32 %v9035_v35, %v9031_v51  ;;  %v9051_v0 = vrot.slane %v9049_v32, 5  ;;  %v10555_v7 = vrot.slane %v13205_v53, 5  ;;  %v6272_v13 = vpop.f32.mrb[159].mxu0  ;;  %v18718_v24 = vld [vmem:[#allocation14_spill] sm:$0xff] }
 0x24e   : > { %v17486_v14 = vadd.f32 %v14351_v45, %v4774_v36  ;;  %v9022_v39 = vsel %vm14943_vm7, %v9017_v25, %v9021_v18  ;;  %v9046_v20 = vor.u32 %v9045_v1, %v9041_v17  ;;  %v10558_v8 = vrot.slane %v13206_v4, 5  ;;  %v18716_v4 = vld [vmem:[#allocation12_spill] sm:$0xff]  ;;  %v13046_v25 = vld [vmem:[%s14861_s23 + $0xb4] sm:$0xf]  ;;  %v13047_v1 = vld [vmem:[%s14861_s23 + $0xb8] sm:$0xf] }
 0x24f   : > { %v18714_v58 = vcombine.low %v17222_v21, %v17226_v41  ;;  %v17495_v44 = vadd.f32 %v6269_v10, %v4772_v9  ;;  %v9032_v53 = vsel %vm14943_vm7, %v9027_v30, %v9031_v51  ;;  %v9037_v36 = vrot.slane %v9036_v37, 4  ;;  %v14281_v41 = vpop.f32.mrb[160].mxu1  ;;  %v18717_v45 = vld [vmem:[#allocation13_spill] sm:$0xff] }
 0x250   : > { %v17502_v18 = vsel %vm14931_vm6, %v13270_v57, %v10555_v7  ;;  %v18715_v21 = vcombine.low %v17273_v26, %v17296_v38  ;;  %v9047_v10 = vrot.slane %v9046_v20, 4  ;;  %v17508_v9 = vcombine.low %v9022_v39, %v9032_v53  ;;  %v4645_v52 = vpop.f32.mrb[161].mxu1  ;;  %v13048_v39 = vld [vmem:[%s14861_s23 + $0xbc] sm:$0xf] }
 0x251   : > { %14606 = vmatmul.mubr.msk.bf16.gmra.mrb[4].mxu0 %vm569_vm1, %v18714_v58  ;;  %v10557_v35 = vrot.slane %v10555_v7, 4  ;;  %v10560_v51 = vrot.slane %v10558_v8, 4  ;;  %v17510_v32 = vadd.f32 %v6272_v13, %v4773_v28  ;;  %v4778_v57 = vadd.f32 %v14281_v41, %v18716_v4  ;;  %v14282_v37 = vpop.f32.mrb[162].mxu1  ;;  %v13049_v13 = vld [vmem:[%s14861_s23 + $0xc0] sm:$0xf] }
 0x252   : > { %14609 = vmatprep.mubr.msk.bf16.mxu0 %vm569_vm1, %v18715_v21  ;;  %v9042_v26 = vsel %vm14943_vm7, %v9037_v36, %v9041_v17  ;;  %v10561_v38 = vrot.slane %v13207_v23, 5  ;;  %v4776_v30 = vadd.f32 %v4645_v52, %v18717_v45  ;;  %v9052_v28 = vsel %vm14943_vm7, %v9047_v10, %v9051_v0  ;;  %v4648_v17 = vpop.f32.mrb[163].mxu1  ;;  %v13050_v4 = vld [vmem:[%s14861_s23 + $0xc4] sm:$0x1] }
 0x253   : > { %14536 = vmatmul.mubr.msk.bf16.gmra.mrb[8].mxu1 %vm569_vm1, %v17286_v60  ;;  %v17526_v60 = vsel %vm14931_vm6, %v10557_v35, %v10558_v8  ;;  %v10564_v7 = vrot.slane %v13208_v29, 5  ;;  %v17529_v20 = vcombine.low %v9042_v26, %v9052_v28  ;;  %v4777_v0 = vadd.f32 %v4648_v17, %v18718_v24  ;;  %v14355_v35 = vpop.f32.mrb[160].mxu0 }
 0x254   : > { %14539 = vmatprep.mubr.msk.bf16.mxu1 %vm569_vm1, %v17351_v6  ;;  %v17533_v23 = vsel %vm14931_vm6, %v10560_v51, %v10561_v38  ;;  %v10563_v58 = vrot.slane %v10561_v38, 4  ;;  %v9054_v53 = vshrl.u32 %v13046_v25, 16  ;;  %v9057_v36 = vshll.u32 %v13046_v25, 16  ;;  %v6285_v37 = vpop.f32.mrb[161].mxu0 }
 0x255   : > { %v9063_v8 = vshll.u32 %v13047_v1, 16  ;;  %v9067_v21 = vshrl.u32 %v13047_v1, 16  ;;  %v9073_v41 = vshll.u32 %v13048_v39, 16  ;;  %v9077_v10 = vshrl.u32 %v13048_v39, 16  ;;  %v13209_v39 = vld [vmem:[%s14861_s23 + $0xb4] sm:$0xe] }
 0x256   : > { %v17540_v29 = vsel %vm14931_vm6, %v10563_v58, %v10564_v7  ;;  %v9056_v52 = vrot.slane %v9054_v53, 4  ;;  %v9059_v26 = vrot.slane %v9057_v36, 5  ;;  %v18719_v25 = vcombine.low %v17310_v11, %v17314_v43  ;;  %v14356_v58 = vpop.f32.mrb[162].mxu0  ;;  %v14285_v53 = vpop.f32.mrb[164].mxu1 }
 0x257   : > { %v9065_v38 = vrot.slane %v9063_v8, 5  ;;  %v17550_v45 = vadd.f32 %v14355_v35, %v4778_v57  ;;  %v9069_v1 = vrot.slane %v9067_v21, 4  ;;  %v9075_v28 = vrot.slane %v9073_v41, 5  ;;  %v13210_v57 = vld [vmem:[%s14861_s23 + $0xb8] sm:$0xf]  ;;  %v6288_v8 = vpop.f32.mrb[163].mxu0 }
 0x258   : > { %v9079_v7 = vrot.slane %v9077_v10, 4  ;;  %v17553_v17 = vadd.f32 %v6285_v37, %v4776_v30  ;;  %v18720_v24 = vcombine.low %v17359_v59, %v17371_v12  ;;  %v9060_v11 = vor.u32 %v9059_v26, %v9056_v52  ;;  %v18721_v21 = vld [vmem:[#allocation15_spill] sm:$0xff]  ;;  %v4661_v30 = vpop.f32.mrb[165].mxu1  ;;  %v13211_v59 = vld [vmem:[%s14861_s23 + $0xbc] sm:$0xf]  ;;  %v18722_v37 = vld [vmem:[#allocation16_spill] sm:$0xff] }
 0x259   : > { %14610 = vmatmul.mubr.msk.bf16.gmra.mrb[8].mxu0 %vm569_vm1, %v18719_v25  ;;  %v9083_v43 = vshll.u32 %v13049_v13, 16  ;;  %v9087_v36 = vshrl.u32 %v13049_v13, 16  ;;  %v4782_v41 = vadd.f32 %v14285_v53, %v18721_v21  ;;  %v9070_v10 = vor.u32 %v9069_v1, %v9065_v38  ;;  %v14286_v26 = vpop.f32.mrb[166].mxu1 }
 0x25a   : > { %14613 = vmatprep.mubr.msk.bf16.mxu0 %vm569_vm1, %v18720_v24  ;;  %v9080_v35 = vor.u32 %v9079_v7, %v9075_v28  ;;  %v9093_v25 = vshll.u32 %v13050_v4, 16  ;;  %v17564_v12 = vadd.f32 %v6288_v8, %v4777_v0  ;;  %v4780_v52 = vadd.f32 %v4661_v30, %v18722_v37  ;;  %v4664_v24 = vpop.f32.mrb[167].mxu1  ;;  %v18723_v4 = vld [vmem:[#allocation17_spill] sm:$0xff]  ;;  %v13213_v8 = vld [vmem:[%s14861_s23 + $0xc4] sm:$0x1] }
 0x25b   : > { %14540 = vmatmul.mubr.msk.bf16.gmra.mrb[12].mxu1 %vm569_vm1, %v17367_v40  ;;  %v9061_v13 = vrot.slane %v9060_v11, 4  ;;  %v9085_v58 = vrot.slane %v9083_v43, 5  ;;  %v13212_v40 = vld [vmem:[%s14861_s23 + $0xc0] sm:$0xf]  ;;  %v9071_v53 = vrot.slane %v9070_v10, 4  ;;  %v9089_v1 = vrot.slane %v9087_v36, 4 }
 0x25c   : > { %14543 = vmatprep.mubr.msk.bf16.mxu1 %vm569_vm1, %v17437_v34  ;;  %v9081_v21 = vrot.slane %v9080_v35, 4  ;;  %v9095_v7 = vrot.slane %v9093_v25, 5  ;;  %v4781_v51 = vadd.f32 %v4664_v24, %v18723_v4  ;;  %v13271_v30 = vrot.slane %v13209_v39, 9  ;;  %v13051_v10 = vld [vmem:[%s14861_s23 + $0xc8] sm:$0xf]  ;;  %v14359_v35 = vpop.f32.mrb[164].mxu0 }
 0x25d   : > { %v9066_v0 = vsel %vm14943_vm7, %v9061_v13, %v9065_v38  ;;  %v10568_v37 = vrot.slane %v13210_v57, 5  ;;  %v9076_v34 = vsel %vm14943_vm7, %v9071_v53, %v9075_v28  ;;  %v9090_v43 = vor.u32 %v9089_v1, %v9085_v58  ;;  %v6301_v13 = vpop.f32.mrb[165].mxu0 }
 0x25e   : > { %v9086_v11 = vsel %vm14943_vm7, %v9081_v21, %v9085_v58  ;;  %v10571_v26 = vrot.slane %v13211_v59, 5  ;;  %v17579_v36 = vcombine.low %v9066_v0, %v9076_v34  ;;  %v10574_v39 = vrot.slane %v13212_v40, 5  ;;  %v14360_v21 = vpop.f32.mrb[166].mxu0  ;;  %v14289_v40 = vpop.f32.mrb[168].mxu1  ;;  %v13053_v34 = vld [vmem:[%s14861_s23 + $0xd0] sm:$0xf] }
 0x25f   : > { %v17583_v25 = vsel %vm14931_vm6, %v13271_v30, %v10568_v37  ;;  %v10570_v38 = vrot.slane %v10568_v37, 4  ;;  %v18724_v57 = vcombine.low %v17380_v42, %v17384_v55  ;;  %v17589_v28 = vadd.f32 %v14359_v35, %v4782_v41  ;;  %v13052_v41 = vld [vmem:[%s14861_s23 + $0xcc] sm:$0xf]  ;;  %v6304_v0 = vpop.f32.mrb[167].mxu0  ;;  %v4677_v30 = vpop.f32.mrb[169].mxu1 }
 0x260   : > { %v9091_v59 = vrot.slane %v9090_v43, 4  ;;  %v10573_v58 = vrot.slane %v10571_v26, 4  ;;  %v10577_v24 = vrot.slane %v13213_v8, 5  ;;  %v17591_v53 = vadd.f32 %v6301_v13, %v4780_v52  ;;  %v18726_v52 = vld [vmem:[#allocation18_spill] sm:$0xff] }
 0x261   : > { %14614 = vmatmul.mubr.msk.bf16.gmra.mrb[12].mxu0 %vm569_vm1, %v18724_v57  ;;  %v18725_v1 = vcombine.low %v17425_v33, %v17445_v3  ;;  %v17599_v42 = vsel %vm14931_vm6, %v10570_v38, %v10571_v26  ;;  %v10576_v55 = vrot.slane %v10574_v39, 4  ;;  %v9098_v4 = vshrl.u32 %v13051_v10, 16  ;;  %v18728_v26 = vld [vmem:[#allocation19_spill] sm:$0xff] }
 0x262   : > { %v4786_v8 = vadd.f32 %v14289_v40, %v18726_v52  ;;  %v9096_v33 = vsel %vm14943_vm7, %v9091_v59, %v9095_v7  ;;  %v17609_v3 = vsel %vm14931_vm6, %v10573_v58, %v10574_v39  ;;  %v17614_v43 = vadd.f32 %v6304_v0, %v4781_v51  ;;  %v13054_v39 = vld [vmem:[%s14861_s23 + $0xd4] sm:$0xf]  ;;  %v13055_v51 = vld [vmem:[%s14861_s23 + $0xd8] sm:$0x1] }
 0x263   : > { %14617 = vmatprep.mubr.msk.bf16.mxu0 %vm569_vm1, %v18725_v1  ;;  %14544 = vmatmul.mubr.msk.bf16.gmra.mrb[16].mxu1 %vm569_vm1, %v17441_v16  ;;  %v4784_v35 = vadd.f32 %v4677_v30, %v18728_v26  ;;  %v14290_v16 = vpop.f32.mrb[170].mxu1  ;;  %v17619_v38 = vcombine.low %v9086_v11, %v9096_v33  ;;  %v17623_v7 = vsel %vm14931_vm6, %v10576_v55, %v10577_v24  ;;  %v9100_v59 = vrot.slane %v9098_v4, 4  ;;  %v18729_v1 = vld [vmem:[#allocation20_spill] sm:$0xff]  ;;  %v14363_v4 = vpop.f32.mrb[168].mxu0 }
 0x264   : > { %18727 = vst [vmem:[#allocation22_spill] sm:$0xff] %v17614_v43  ;;  %14547 = vmatprep.mubr.msk.bf16.mxu1 %vm569_vm1, %v17508_v9  ;;  %v4680_v57 = vpop.f32.mrb[171].mxu1  ;;  %v9101_v58 = vshll.u32 %v13051_v10, 16  ;;  %v9107_v21 = vshll.u32 %v13052_v41, 16  ;;  %v9111_v0 = vshrl.u32 %v13052_v41, 16  ;;  %v9117_v52 = vshll.u32 %v13053_v34, 16 }
 0x265   : > { %v4785_v40 = vadd.f32 %v4680_v57, %v18729_v1  ;;  %v9121_v9 = vshrl.u32 %v13053_v34, 16  ;;  %v13214_v11 = vld [vmem:[%s14861_s23 + $0xc8] sm:$0xe]  ;;  %v9127_v24 = vshll.u32 %v13054_v39, 16  ;;  %v9131_v55 = vshrl.u32 %v13054_v39, 16  ;;  %v6317_v39 = vpop.f32.mrb[169].mxu0 }
 0x266   : > { %v9103_v30 = vrot.slane %v9101_v58, 5  ;;  %v9109_v33 = vrot.slane %v9107_v21, 5  ;;  %v9113_v26 = vrot.slane %v9111_v0, 4  ;;  %v9119_v16 = vrot.slane %v9117_v52, 5  ;;  %v13215_v34 = vld [vmem:[%s14861_s23 + $0xcc] sm:$0xf] }
 0x267   : > { %v9123_v37 = vrot.slane %v9121_v9, 4  ;;  %v9137_v13 = vshll.u32 %v13055_v51, 16  ;;  %v18730_v10 = vcombine.low %v17456_v31, %v17465_v47  ;;  %v9129_v57 = vrot.slane %v9127_v24, 5  ;;  %v14293_v51 = vpop.f32.mrb[172].mxu1  ;;  %v13216_v52 = vld [vmem:[%s14861_s23 + $0xd0] sm:$0xf] }
 0x268   : > { %v9104_v41 = vor.u32 %v9103_v30, %v9100_v59  ;;  %v9133_v1 = vrot.slane %v9131_v55, 4  ;;  %v13272_v6 = vrot.slane %v13214_v11, 9  ;;  %v17636_v58 = vadd.f32 %v14363_v4, %v4786_v8  ;;  %v14364_v9 = vpop.f32.mrb[170].mxu0  ;;  %v18734_v8 = vld [vmem:[#allocation25_spill] sm:$0xff]  ;;  %v4693_v30 = vpop.f32.mrb[173].mxu1 }
 0x269   : > { %14618 = vmatmul.mubr.msk.bf16.gmra.mrb[16].mxu0 %vm569_vm1, %v18730_v10  ;;  %v18732_v21 = vcombine.low %v17502_v18, %v17526_v60  ;;  %v9114_v31 = vor.u32 %v9113_v26, %v9109_v33  ;;  %v9124_v47 = vor.u32 %v9123_v37, %v9119_v16  ;;  %v9139_v0 = vrot.slane %v9137_v13, 5  ;;  %v13217_v18 = vld [vmem:[%s14861_s23 + $0xd4] sm:$0xf]  ;;  %v13218_v60 = vld [vmem:[%s14861_s23 + $0xd8] sm:$0x1]  ;;  %v6320_v10 = vpop.f32.mrb[171].mxu0 }
 0x26a   : > { %18731 = vst [vmem:[#allocation31_spill] sm:$0xff] %v17636_v58  ;;  %v17643_v59 = vadd.f32 %v6317_v39, %v4784_v35  ;;  %v4790_v11 = vadd.f32 %v14293_v51, %v18734_v8  ;;  %v9105_v24 = vrot.slane %v9104_v41, 4  ;;  %v9134_v55 = vor.u32 %v9133_v1, %v9129_v57  ;;  %v18735_v4 = vld [vmem:[#allocation21_spill] sm:$0xff]  ;;  %v14294_v37 = vpop.f32.mrb[174].mxu1  ;;  %v13056_v9 = vld [vmem:[%s14861_s23 + $0xdc] sm:$0xf] }
 0x26b   : > { %14621 = vmatprep.mubr.msk.bf16.mxu0 %vm569_vm1, %v18732_v21  ;;  %14548 = vmatmul.mubr.msk.bf16.gmra.mrb[20].mxu1 %vm569_vm1, %v17529_v20  ;;  %v4788_v26 = vadd.f32 %v4693_v30, %v18735_v4  ;;  %v9115_v35 = vrot.slane %v9114_v31, 4  ;;  %v9125_v13 = vrot.slane %v9124_v47, 4  ;;  %v10581_v39 = vrot.slane %v13215_v34, 5  ;;  %v4696_v21 = vpop.f32.mrb[175].mxu1  ;;  %v18737_v8 = vld [vmem:[#allocation26_spill] sm:$0xff] }
 0x26c   : > { %18733 = vst [vmem:[#allocation32_spill] sm:$0xff] %v17643_v59  ;;  %14551 = vmatprep.mubr.msk.bf16.mxu1 %vm569_vm1, %v17579_v36  ;;  %v17653_v20 = vadd.f32 %v6320_v10, %v4785_v40  ;;  %v9110_v41 = vsel %vm14943_vm7, %v9105_v24, %v9109_v33  ;;  %v9135_v1 = vrot.slane %v9134_v55, 4  ;;  %v10584_v51 = vrot.slane %v13216_v52, 5  ;;  %v13057_v34 = vld [vmem:[%s14861_s23 + $0xe0] sm:$0xf] }
 0x26d   : > { %v4789_v30 = vadd.f32 %v4696_v21, %v18737_v8  ;;  %v9120_v4 = vsel %vm14943_vm7, %v9115_v35, %v9119_v16  ;;  %v9130_v36 = vsel %vm14943_vm7, %v9125_v13, %v9129_v57  ;;  %v17665_v40 = vsel %vm14931_vm6, %v13272_v6, %v10581_v39  ;;  %v13058_v16 = vld [vmem:[%s14861_s23 + $0xe4] sm:$0xf]  ;;  %v13059_v35 = vld [vmem:[%s14861_s23 + $0xe8] sm:$0xf]  ;;  %v14367_v21 = vpop.f32.mrb[172].mxu0 }
 0x26e   : > { %18736 = vst [vmem:[#allocation23_spill] sm:$0xff] %v17653_v20  ;;  %v9140_v33 = vsel %vm14943_vm7, %v9135_v1, %v9139_v0  ;;  %v13118_v31 = vcombine.low %v9110_v41, %v9120_v4  ;;  %v10583_v47 = vrot.slane %v10581_v39, 4  ;;  %v10586_v52 = vrot.slane %v10584_v51, 4  ;;  %v13060_v1 = vld [vmem:[%s14861_s23 + $0xec] sm:$0x1]  ;;  %v6333_v8 = vpop.f32.mrb[173].mxu0 }
 0x26f   : > { %v17670_v24 = vcombine.low %v9130_v36, %v9140_v33  ;;  %v10587_v55 = vrot.slane %v13217_v18, 5  ;;  %v10590_v10 = vrot.slane %v13218_v60, 5  ;;  %v9142_v37 = vshrl.u32 %v13056_v9, 16  ;;  %v14297_v60 = vpop.f32.mrb[176].mxu1  ;;  %v14368_v33 = vpop.f32.mrb[174].mxu0 }
 0x270   : > { %v18738_v57 = vcombine.low %v17533_v23, %v17540_v29  ;;  %v10585_v6 = vsel %vm14931_vm6, %v10583_v47, %v10584_v51  ;;  %v9145_v0 = vshll.u32 %v13056_v9, 16  ;;  %v9151_v13 = vshll.u32 %v13057_v34, 16 }
 0x271   : > { %v9155_v39 = vshrl.u32 %v13057_v34, 16  ;;  %v18739_v18 = vcombine.low %v17583_v25, %v17599_v42  ;;  %v17686_v41 = vsel %vm14931_vm6, %v10586_v52, %v10587_v55  ;;  %v10589_v23 = vrot.slane %v10587_v55, 4  ;;  %v4709_v25 = vpop.f32.mrb[177].mxu1  ;;  %v13219_v55 = vld [vmem:[%s14861_s23 + $0xdc] sm:$0xe] }
 0x272   : > { %14622 = vmatmul.mubr.msk.bf16.gmra.mrb[20].mxu0 %vm569_vm1, %v18738_v57  ;;  %v13299_v29 = vcombine.low %v17665_v40, %v10585_v6  ;;  %v9144_v51 = vrot.slane %v9142_v37, 4  ;;  %v17690_v9 = vadd.f32 %v14367_v21, %v4790_v11  ;;  %v9147_v42 = vrot.slane %v9145_v0, 5  ;;  %v14298_v47 = vpop.f32.mrb[178].mxu1  ;;  %v13222_v25 = vld [vmem:[%s14861_s23 + $0xe8] sm:$0xf] }
 0x273   : > { %14625 = vmatprep.mubr.msk.bf16.mxu0 %vm569_vm1, %v18739_v18  ;;  %14552 = vmatmul.mubr.msk.bf16.gmra.mrb[24].mxu1 %vm569_vm1, %v17619_v38  ;;  %v9153_v4 = vrot.slane %v9151_v13, 5  ;;  %v9157_v36 = vrot.slane %v9155_v39, 4  ;;  %v17694_v34 = vadd.f32 %v6333_v8, %v4788_v26  ;;  %v17699_v11 = vsel %vm14931_vm6, %v10589_v23, %v10590_v10  ;;  %v6336_v38 = vpop.f32.mrb[175].mxu0  ;;  %v4712_v37 = vpop.f32.mrb[179].mxu1  ;;  %v13220_v13 = vld [vmem:[%s14861_s23 + $0xe0] sm:$0xf] }
 0x274   : > { %18740 = vst [vmem:[#allocation34_spill] sm:$0xff] %v17690_v9  ;;  %14555 = vmatprep.mubr.msk.bf16.mxu1 %vm569_vm1, %v13118_v31  ;;  %v9161_v40 = vshll.u32 %v13058_v16, 16  ;;  %v9165_v52 = vshrl.u32 %v13058_v16, 16  ;;  %v13300_v57 = vcombine.low %v17686_v41, %v17699_v11  ;;  %v9148_v26 = vor.u32 %v9147_v42, %v9144_v51  ;;  %v13221_v18 = vld [vmem:[%s14861_s23 + $0xe4] sm:$0xf] }
 0x275   : > { %18741 = vst [vmem:[#allocation53_spill] sm:$0xff] %v17694_v34  ;;  %v9158_v6 = vor.u32 %v9157_v36, %v9153_v4  ;;  %v9171_v0 = vshll.u32 %v13059_v35, 16  ;;  %v17705_v31 = vadd.f32 %v6336_v38, %v4789_v30  ;;  %v9175_v10 = vshrl.u32 %v13059_v35, 16  ;;  %v13223_v51 = vld [vmem:[%s14861_s23 + $0xec] sm:$0x1] }
 0x276   : > { %v9163_v39 = vrot.slane %v9161_v40, 5  ;;  %v9167_v21 = vrot.slane %v9165_v52, 4  ;;  %v9149_v16 = vrot.slane %v9148_v26, 4  ;;  %v9181_v8 = vshll.u32 %v13060_v1, 16  ;;  %v13061_v38 = vld [vmem:[%s14861_s23 + $0xf0] sm:$0xf] }
 0x277   : > { %18742 = vst [vmem:[#allocation54_spill] sm:$0xff] %v17705_v31  ;;  %v9159_v60 = vrot.slane %v9158_v6, 4  ;;  %v9173_v23 = vrot.slane %v9171_v0, 5  ;;  %v9177_v47 = vrot.slane %v9175_v10, 4  ;;  %v13273_v42 = vrot.slane %v13219_v55, 9 }
 0x278   : > { %v9168_v33 = vor.u32 %v9167_v21, %v9163_v39  ;;  %v10594_v36 = vrot.slane %v13220_v13, 5  ;;  %v18743_v30 = vcombine.low %v17609_v3, %v17623_v7  ;;  %v9154_v35 = vsel %vm14943_vm7, %v9149_v16, %v9153_v4  ;;  %v13062_v7 = vld [vmem:[%s14861_s23 + $0xf4] sm:$0xf]  ;;  %v14371_v21 = vpop.f32.mrb[176].mxu0 }
 0x279   : > { %v9164_v40 = vsel %vm14943_vm7, %v9159_v60, %v9163_v39  ;;  %v9183_v1 = vrot.slane %v9181_v8, 5  ;;  %v10597_v52 = vrot.slane %v13221_v18, 5  ;;  %v9178_v37 = vor.u32 %v9177_v47, %v9173_v23  ;;  %v13063_v39 = vld [vmem:[%s14861_s23 + $0xf8] sm:$0xf]  ;;  %v13064_v18 = vld [vmem:[%s14861_s23 + $0xfc] sm:$0xf] }
 0x27a   : > { %14626 = vmatmul.mubr.msk.bf16.gmra.mrb[24].mxu0 %vm569_vm1, %v18743_v30  ;;  %v9169_v55 = vrot.slane %v9168_v33, 4  ;;  %v13120_v26 = vcombine.low %v9154_v35, %v9164_v40  ;;  %v10595_v3 = vsel %vm14931_vm6, %v13273_v42, %v10594_v36  ;;  %v10596_v4 = vrot.slane %v10594_v36, 4  ;;  %v6349_v8 = vpop.f32.mrb[177].mxu0  ;;  %v13065_v47 = vld [vmem:[%s14861_s23 + $0x100] sm:$0x1]  ;;  %v14377_v42 = vpop.f32.mrb[180].mxu1 }
 0x27b   : > { %14629 = vmatprep.mubr.msk.bf16.mxu0 %vm569_vm1, %v13299_v29  ;;  %14556 = vmatmul.mubr.msk.bf16.gmra.mrb[28].mxu1 %vm569_vm1, %v17670_v24  ;;  %v10599_v6 = vrot.slane %v10597_v52, 4  ;;  %v10600_v0 = vrot.slane %v13222_v25, 5  ;;  %v10603_v13 = vrot.slane %v13223_v51, 5  ;;  %v9179_v10 = vrot.slane %v9178_v37, 4  ;;  %v14372_v51 = vpop.f32.mrb[178].mxu0 }
 0x27c   : > { %v9174_v29 = vsel %vm14943_vm7, %v9169_v55, %v9173_v23  ;;  %14559 = vmatprep.mubr.msk.bf16.mxu1 %vm569_vm1, %v13120_v26  ;;  %v9186_v16 = vshrl.u32 %v13061_v38, 16  ;;  %v9189_v60 = vshll.u32 %v13061_v38, 16  ;;  %v10598_v24 = vsel %vm14931_vm6, %v10596_v4, %v10597_v52  ;;  %v13224_v38 = vld [vmem:[%s14861_s23 + $0xf0] sm:$0xe]  ;;  %v6352_v52 = vpop.f32.mrb[179].mxu0  ;;  %v7249_v55 = vpop.f32.mrb[181].mxu1 }
 0x27d   : > { %v17734_v25 = vsel %vm14931_vm6, %v10599_v6, %v10600_v0  ;;  %v10602_v33 = vrot.slane %v10600_v0, 4  ;;  %v9195_v23 = vshll.u32 %v13062_v7, 16  ;;  %v9184_v36 = vsel %vm14943_vm7, %v9179_v10, %v9183_v1  ;;  %v13225_v0 = vld [vmem:[%s14861_s23 + $0xf4] sm:$0xf]  ;;  %v13226_v21 = vld [vmem:[%s14861_s23 + $0xf8] sm:$0xf] }
 0x27e   : > { %v13301_v30 = vcombine.low %v10595_v3, %v10598_v24  ;;  %v9188_v35 = vrot.slane %v9186_v16, 4  ;;  %v9191_v40 = vrot.slane %v9189_v60, 5  ;;  %v13121_v37 = vcombine.low %v9174_v29, %v9184_v36  ;;  %v14378_v8 = vpop.f32.mrb[182].mxu1  ;;  %v13227_v16 = vld [vmem:[%s14861_s23 + $0xfc] sm:$0xf]  ;;  %v14451_v11 = vpop.f32.mrb[180].mxu0 }
 0x27f   : > { %v10604_v26 = vsel %vm14931_vm6, %v10602_v33, %v10603_v13  ;;  %v9197_v4 = vrot.slane %v9195_v23, 5  ;;  %v9199_v6 = vshrl.u32 %v13062_v7, 16  ;;  %v9205_v3 = vshll.u32 %v13063_v39, 16  ;;  %v7252_v29 = vpop.f32.mrb[183].mxu1  ;;  %v8152_v55 = vpop.f32.mrb[181].mxu0 }
 0x280   : > { %v13302_v51 = vcombine.low %v17734_v25, %v10604_v26  ;;  %v9192_v1 = vor.u32 %v9191_v40, %v9188_v35  ;;  %v9209_v10 = vshrl.u32 %v13063_v39, 16  ;;  %v9215_v13 = vshll.u32 %v13064_v18, 16  ;;  %v13228_v25 = vld [vmem:[%s14861_s23 + $0x100] sm:$0x1] }
 0x281   : > { %v9201_v60 = vrot.slane %v9199_v6, 4  ;;  %v9219_v24 = vshrl.u32 %v13064_v18, 16  ;;  %v9225_v7 = vshll.u32 %v13065_v47, 16  ;;  %v9207_v23 = vrot.slane %v9205_v3, 5 }
 0x282   : > { %14630 = vmatmul.mubr.msk.bf16.gmra.mrb[28].mxu0 %vm569_vm1, %v13300_v57  ;;  %v9193_v33 = vrot.slane %v9192_v1, 4  ;;  %v9211_v42 = vrot.slane %v9209_v10, 4  ;;  %v13274_v36 = vrot.slane %v13224_v38, 9  ;;  %v9217_v35 = vrot.slane %v9215_v13, 5  ;;  %v14452_v38 = vpop.f32.mrb[182].mxu0  ;;  %v14381_v1 = vpop.f32.mrb[184].mxu1 }
 0x283   : > { %14633 = vmatprep.mubr.msk.bf16.mxu0 %vm569_vm1, %v13301_v30  ;;  %14560 = vmatmul.mubr.msk.bf16.gmra.mrb[32].mxu1 %vm569_vm1, %v13121_v37  ;;  %v9202_v39 = vor.u32 %v9201_v60, %v9197_v4  ;;  %v9221_v40 = vrot.slane %v9219_v24, 4  ;;  %v9227_v41 = vrot.slane %v9225_v7, 5  ;;  %v10607_v18 = vrot.slane %v13225_v0, 5  ;;  %v13066_v24 = vld [vmem:[%s14861_s23 + $0x104] sm:$0xf] }
 0x284   : > { %v9198_v57 = vsel %vm14943_vm7, %v9193_v33, %v9197_v4  ;;  %v9212_v52 = vor.u32 %v9211_v42, %v9207_v23  ;;  %v10610_v47 = vrot.slane %v13226_v21, 5  ;;  %v10613_v6 = vrot.slane %v13227_v16, 5  ;;  %v8155_v4 = vpop.f32.mrb[183].mxu0  ;;  %v7265_v21 = vpop.f32.mrb[185].mxu1 }
 0x285   : > { %v9203_v30 = vrot.slane %v9202_v39, 4  ;;  %v9222_v26 = vor.u32 %v9221_v40, %v9217_v35  ;;  %v10616_v8 = vrot.slane %v13228_v25, 5  ;;  %v10608_v3 = vsel %vm14931_vm6, %v13274_v36, %v10607_v18  ;;  %v14382_v33 = vpop.f32.mrb[186].mxu1  ;;  %v13068_v39 = vld [vmem:[%s14861_s23 + $0x10c] sm:$0xf]  ;;  %v14455_v38 = vpop.f32.mrb[184].mxu0 }
 0x286   : > { %v9213_v37 = vrot.slane %v9212_v52, 4  ;;  %v10609_v10 = vrot.slane %v10607_v18, 4  ;;  %v10612_v29 = vrot.slane %v10610_v47, 4  ;;  %v7542_v0 = vadd.f32 %v14381_v1, %v17005_v54  ;;  %v13067_v54 = vld [vmem:[%s14861_s23 + $0x108] sm:$0xf] }
 0x287   : > { %v9208_v60 = vsel %vm14943_vm7, %v9203_v30, %v9207_v23  ;;  %v9223_v13 = vrot.slane %v9222_v26, 4  ;;  %v10615_v16 = vrot.slane %v10613_v6, 4  ;;  %v7540_v7 = vadd.f32 %v7265_v21, %v17010_v49  ;;  %v7268_v23 = vpop.f32.mrb[187].mxu1 }
 0x288   : > { %v9218_v42 = vsel %vm14943_vm7, %v9213_v37, %v9217_v35  ;;  %v13122_v25 = vcombine.low %v9198_v57, %v9208_v60  ;;  %v10611_v36 = vsel %vm14931_vm6, %v10609_v10, %v10610_v47  ;;  %v10614_v49 = vsel %vm14931_vm6, %v10612_v29, %v10613_v6  ;;  %v13069_v57 = vld [vmem:[%s14861_s23 + $0x110] sm:$0xf]  ;;  %v8168_v10 = vpop.f32.mrb[185].mxu0  ;;  %v13229_v60 = vld [vmem:[%s14861_s23 + $0x104] sm:$0xe] }
 0x289   : > { %v9228_v40 = vsel %vm14943_vm7, %v9223_v13, %v9227_v41  ;;  %v10617_v11 = vsel %vm14931_vm6, %v10615_v16, %v10616_v8  ;;  %v13303_v35 = vcombine.low %v10608_v3, %v10611_v36  ;;  %v7541_v52 = vadd.f32 %v7268_v23, %v17013_v61  ;;  %v14456_v16 = vpop.f32.mrb[186].mxu0 }
 0x28a   : > { %14634 = vmatmul.mubr.msk.bf16.gmra.mrb[32].mxu0 %vm569_vm1, %v13302_v51  ;;  %v13123_v18 = vcombine.low %v9218_v42, %v9228_v40  ;;  %14563 = vmatprep.mubr.msk.bf16.mxu1 %vm569_vm1, %v13122_v25  ;;  %v13304_v47 = vcombine.low %v10614_v49, %v10617_v11  ;;  %v9230_v55 = vshrl.u32 %v13066_v24, 16  ;;  %v13070_v51 = vld [vmem:[%s14861_s23 + $0x114] sm:$0x1]  ;;  %v9233_v41 = vshll.u32 %v13066_v24, 16  ;;  %v14385_v24 = vpop.f32.mrb[188].mxu1  ;;  %v8171_v36 = vpop.f32.mrb[187].mxu0 }
 0x28b   : > { %14637 = vmatprep.mubr.msk.bf16.mxu0 %vm569_vm1, %v13303_v35  ;;  %v9239_v30 = vshll.u32 %v13067_v54, 16  ;;  %v9243_v26 = vshrl.u32 %v13067_v54, 16  ;;  %v9249_v6 = vshll.u32 %v13068_v39, 16  ;;  %v9253_v1 = vshrl.u32 %v13068_v39, 16  ;;  %v7281_v39 = vpop.f32.mrb[189].mxu1 }
 0x28c   : > { %14564 = vmatmul.mubr.msk.bf16.gmra.mrb[36].mxu1 %vm569_vm1, %v13123_v18  ;;  %v9232_v8 = vrot.slane %v9230_v55, 4  ;;  %v9259_v37 = vshll.u32 %v13069_v57, 16  ;;  %v9263_v61 = vshrl.u32 %v13069_v57, 16  ;;  %v17781_v3 = vadd.f32 %v14455_v38, %v7542_v0  ;;  %v13230_v49 = vld [vmem:[%s14861_s23 + $0x108] sm:$0xf]  ;;  %v14386_v35 = vpop.f32.mrb[190].mxu1 }
 0x28d   : > { %v9235_v29 = vrot.slane %v9233_v41, 5  ;;  %v9241_v4 = vrot.slane %v9239_v30, 5  ;;  %v9245_v21 = vrot.slane %v9243_v26, 4  ;;  %v17784_v13 = vadd.f32 %v8168_v10, %v7540_v7  ;;  %v13231_v55 = vld [vmem:[%s14861_s23 + $0x10c] sm:$0xf]  ;;  %v7284_v41 = vpop.f32.mrb[191].mxu1 }
 0x28e   : > { %18744 = vst [vmem:[#allocation24_spill] sm:$0xff] %v17781_v3  ;;  %v9251_v33 = vrot.slane %v9249_v6, 5  ;;  %v9255_v42 = vrot.slane %v9253_v1, 4  ;;  %v9261_v25 = vrot.slane %v9259_v37, 5  ;;  %v7546_v54 = vadd.f32 %v14385_v24, %v17045_v62  ;;  %v13232_v1 = vld [vmem:[%s14861_s23 + $0x110] sm:$0xf] }
 0x28f   : > { %18745 = vst [vmem:[#allocation35_spill] sm:$0xff] %v17784_v13  ;;  %v9236_v0 = vor.u32 %v9235_v29, %v9232_v8  ;;  %v9246_v23 = vor.u32 %v9245_v21, %v9241_v4  ;;  %v9265_v40 = vrot.slane %v9263_v61, 4  ;;  %v17788_v11 = vadd.f32 %v8171_v36, %v7541_v52  ;;  %v13233_v61 = vld [vmem:[%s14861_s23 + $0x114] sm:$0x1]  ;;  %v14459_v29 = vpop.f32.mrb[188].mxu0 }
 0x290   : > { %v7544_v7 = vadd.f32 %v7281_v39, %v17054_v15  ;;  %v9256_v57 = vor.u32 %v9255_v42, %v9251_v33  ;;  %v9269_v18 = vshll.u32 %v13070_v51, 16  ;;  %v13275_v6 = vrot.slane %v13229_v60, 9  ;;  %v13071_v24 = vld [vmem:[%s14861_s23 + $0x118] sm:$0xf] }
 0x291   : > { %18746 = vst [vmem:[#allocation55_spill] sm:$0xff] %v17788_v11  ;;  %v9237_v30 = vrot.slane %v9236_v0, 4  ;;  %v9247_v62 = vrot.slane %v9246_v23, 4  ;;  %v9266_v26 = vor.u32 %v9265_v40, %v9261_v25  ;;  %v7545_v38 = vadd.f32 %v7284_v41, %v17062_v48  ;;  %v13072_v0 = vld [vmem:[%s14861_s23 + $0x11c] sm:$0xf] }
 0x292   : > { %14638 = vmatmul.mubr.msk.bf16.gmra.mrb[36].mxu0 %vm569_vm1, %v13304_v47  ;;  %v9257_v8 = vrot.slane %v9256_v57, 4  ;;  %v9271_v52 = vrot.slane %v9269_v18, 5  ;;  %v10620_v37 = vrot.slane %v13230_v49, 5  ;;  %v10623_v10 = vrot.slane %v13231_v55, 5  ;;  %v13073_v57 = vld [vmem:[%s14861_s23 + $0x120] sm:$0xf] }
 0x293   : > { %v9242_v15 = vsel %vm14943_vm7, %v9237_v30, %v9241_v4  ;;  %v9252_v51 = vsel %vm14943_vm7, %v9247_v62, %v9251_v33  ;;  %v9267_v47 = vrot.slane %v9266_v26, 4  ;;  %v17805_v42 = vadd.f32 %v14459_v29, %v7546_v54  ;;  %v8184_v4 = vpop.f32.mrb[189].mxu0  ;;  %v14389_v54 = vpop.f32.mrb[192].mxu1 }
 0x294   : > { %v9262_v21 = vsel %vm14943_vm7, %v9257_v8, %v9261_v25  ;;  %v13124_v60 = vcombine.low %v9242_v15, %v9252_v51  ;;  %v10621_v48 = vsel %vm14931_vm6, %v13275_v6, %v10620_v37  ;;  %v10622_v16 = vrot.slane %v10620_v37, 4  ;;  %v14460_v40 = vpop.f32.mrb[190].mxu0  ;;  %v7297_v62 = vpop.f32.mrb[193].mxu1  ;;  %v18750_v6 = vld [vmem:[#allocation48_spill] sm:$0xff] }
 0x295   : > { %18747 = vst [vmem:[#allocation36_spill] sm:$0xff] %v17805_v42  ;;  %v9272_v33 = vsel %vm14943_vm7, %v9267_v47, %v9271_v52  ;;  %v10625_v36 = vrot.slane %v10623_v10, 4  ;;  %v10626_v39 = vrot.slane %v13232_v1, 5  ;;  %v17810_v23 = vadd.f32 %v8184_v4, %v7544_v7  ;;  %v8187_v18 = vpop.f32.mrb[191].mxu0  ;;  %v14390_v52 = vpop.f32.mrb[194].mxu1 }
 0x296   : > { %v13125_v25 = vcombine.low %v9262_v21, %v9272_v33  ;;  %14567 = vmatprep.mubr.msk.bf16.mxu1 %vm569_vm1, %v13124_v60  ;;  %v10624_v49 = vsel %vm14931_vm6, %v10622_v16, %v10623_v10  ;;  %v10629_v35 = vrot.slane %v13233_v61, 5  ;;  %v7550_v7 = vadd.f32 %v14389_v54, %v17090_v27  ;;  %v13074_v1 = vld [vmem:[%s14861_s23 + $0x124] sm:$0xf]  ;;  %v7300_v47 = vpop.f32.mrb[195].mxu1  ;;  %v13075_v27 = vld [vmem:[%s14861_s23 + $0x128] sm:$0x1] }
 0x297   : > { %18748 = vst [vmem:[#allocation37_spill] sm:$0xff] %v17810_v23  ;;  %v10627_v55 = vsel %vm14931_vm6, %v10625_v36, %v10626_v39  ;;  %v10628_v41 = vrot.slane %v10626_v39, 4  ;;  %v13305_v30 = vcombine.low %v10621_v48, %v10624_v49  ;;  %v17819_v26 = vadd.f32 %v8187_v18, %v7545_v38  ;;  %v18751_v21 = vld [vmem:[#allocation38_spill] sm:$0xff]  ;;  %v13236_v18 = vld [vmem:[%s14861_s23 + $0x120] sm:$0xf] }
 0x298   : > { %14568 = vmatmul.mubr.msk.bf16.gmra.mrb[40].mxu1 %vm569_vm1, %v13125_v25  ;;  %v7548_v8 = vadd.f32 %v7297_v62, %v18750_v6  ;;  %v9274_v37 = vshrl.u32 %v13071_v24, 16  ;;  %v9277_v15 = vshll.u32 %v13071_v24, 16  ;;  %v9283_v61 = vshll.u32 %v13072_v0, 16  ;;  %v13234_v4 = vld [vmem:[%s14861_s23 + $0x118] sm:$0xe]  ;;  %v14463_v25 = vpop.f32.mrb[192].mxu0 }
 0x299   : > { %18749 = vst [vmem:[#allocation56_spill] sm:$0xff] %v17819_v26  ;;  %v10630_v51 = vsel %vm14931_vm6, %v10628_v41, %v10629_v35  ;;  %14641 = vmatprep.mubr.msk.bf16.mxu0 %vm569_vm1, %v13305_v30  ;;  %v9287_v38 = vshrl.u32 %v13072_v0, 16  ;;  %v9293_v10 = vshll.u32 %v13073_v57, 16  ;;  %v7549_v60 = vadd.f32 %v7300_v47, %v18751_v21  ;;  %v13235_v40 = vld [vmem:[%s14861_s23 + $0x11c] sm:$0xf]  ;;  %v8200_v41 = vpop.f32.mrb[193].mxu0 }
 0x29a   : > { %v13306_v29 = vcombine.low %v10627_v55, %v10630_v51  ;;  %v9276_v48 = vrot.slane %v9274_v37, 4  ;;  %v9279_v16 = vrot.slane %v9277_v15, 5  ;;  %v9285_v33 = vrot.slane %v9283_v61, 5  ;;  %v13237_v6 = vld [vmem:[%s14861_s23 + $0x124] sm:$0xf]  ;;  %v14393_v61 = vpop.f32.mrb[196].mxu1 }
 0x29b   : > { %v9289_v24 = vrot.slane %v9287_v38, 4  ;;  %v9295_v36 = vrot.slane %v9293_v10, 5  ;;  %v9297_v39 = vshrl.u32 %v13073_v57, 16  ;;  %v9303_v35 = vshll.u32 %v13074_v1, 16  ;;  %v14464_v57 = vpop.f32.mrb[194].mxu0 }
 0x29c   : > { %14642 = vmatmul.mubr.msk.bf16.gmra.mrb[40].mxu0 %vm569_vm1, %v13306_v29  ;;  %v9280_v49 = vor.u32 %v9279_v16, %v9276_v48  ;;  %v9307_v0 = vshrl.u32 %v13074_v1, 16  ;;  %v9313_v54 = vshll.u32 %v13075_v27, 16  ;;  %v17833_v55 = vadd.f32 %v14463_v25, %v7550_v7  ;;  %v8203_v38 = vpop.f32.mrb[195].mxu0  ;;  %v7313_v7 = vpop.f32.mrb[197].mxu1  ;;  %v13076_v57 = vld [vmem:[%s14861_s23 + $0x12c] sm:$0xf] }
 0x29d   : > { %v9290_v30 = vor.u32 %v9289_v24, %v9285_v33  ;;  %v9299_v62 = vrot.slane %v9297_v39, 4  ;;  %v13276_v52 = vrot.slane %v13234_v4, 9  ;;  %v17836_v37 = vadd.f32 %v8200_v41, %v7548_v8  ;;  %v13238_v4 = vld [vmem:[%s14861_s23 + $0x128] sm:$0x1]  ;;  %v14394_v24 = vpop.f32.mrb[198].mxu1 }
 0x29e   : > { %18752 = vst [vmem:[#allocation57_spill] sm:$0xff] %v17833_v55  ;;  %v9281_v15 = vrot.slane %v9280_v49, 4  ;;  %v9305_v51 = vrot.slane %v9303_v35, 5  ;;  %v9309_v47 = vrot.slane %v9307_v0, 4  ;;  %v9315_v27 = vrot.slane %v9313_v54, 5  ;;  %v7316_v35 = vpop.f32.mrb[199].mxu1 }
 0x29f   : > { %18753 = vst [vmem:[#allocation58_spill] sm:$0xff] %v17836_v37  ;;  %v9291_v10 = vrot.slane %v9290_v30, 4  ;;  %v9300_v1 = vor.u32 %v9299_v62, %v9295_v36  ;;  %v10633_v29 = vrot.slane %v13235_v40, 5  ;;  %v17838_v21 = vadd.f32 %v8203_v38, %v7549_v60  ;;  %v14467_v38 = vpop.f32.mrb[196].mxu0 }
 0x2a0   : > { %v9286_v48 = vsel %vm14943_vm7, %v9281_v15, %v9285_v33  ;;  %v9310_v16 = vor.u32 %v9309_v47, %v9305_v51  ;;  %v10636_v8 = vrot.slane %v13236_v18, 5  ;;  %v10639_v54 = vrot.slane %v13237_v6, 5 }
 0x2a1   : > { %18754 = vst [vmem:[#allocation3_spill] sm:$0xff] %v17838_v21  ;;  %v9296_v39 = vsel %vm14943_vm7, %v9291_v10, %v9295_v36  ;;  %v9301_v25 = vrot.slane %v9300_v1, 4  ;;  %v10634_v49 = vsel %vm14931_vm6, %v13276_v52, %v10633_v29  ;;  %v10635_v40 = vrot.slane %v10633_v29, 4  ;;  %v18755_v36 = vld [vmem:[#allocation49_spill] sm:$0xff]  ;;  %v13079_v1 = vld [vmem:[%s14861_s23 + $0x138] sm:$0xf] }
 0x2a2   : > { %v9311_v60 = vrot.slane %v9310_v16, 4  ;;  %v13126_v0 = vcombine.low %v9286_v48, %v9296_v39  ;;  %v10638_v33 = vrot.slane %v10636_v8, 4  ;;  %v10642_v30 = vrot.slane %v13238_v4, 5  ;;  %v13077_v52 = vld [vmem:[%s14861_s23 + $0x130] sm:$0xf]  ;;  %v8216_v4 = vpop.f32.mrb[197].mxu0 }
 0x2a3   : > { %v9306_v18 = vsel %vm14943_vm7, %v9301_v25, %v9305_v51  ;;  %v10637_v41 = vsel %vm14931_vm6, %v10635_v40, %v10636_v8  ;;  %v7554_v62 = vadd.f32 %v14393_v61, %v18755_v36  ;;  %v10641_v47 = vrot.slane %v10639_v54, 4  ;;  %v13078_v10 = vld [vmem:[%s14861_s23 + $0x134] sm:$0xf]  ;;  %v18757_v61 = vld [vmem:[#allocation40_spill] sm:$0xff]  ;;  %v18758_v8 = vld [vmem:[#allocation42_spill] sm:$0xff] }
 0x2a4   : > { %v9316_v15 = vsel %vm14943_vm7, %v9311_v60, %v9315_v27  ;;  %14571 = vmatprep.mubr.msk.bf16.mxu1 %vm569_vm1, %v13126_v0  ;;  %v10640_v6 = vsel %vm14931_vm6, %v10638_v33, %v10639_v54  ;;  %v13307_v51 = vcombine.low %v10634_v49, %v10637_v41  ;;  %v7552_v16 = vadd.f32 %v7313_v7, %v18757_v61  ;;  %v13080_v27 = vld [vmem:[%s14861_s23 + $0x13c] sm:$0x1]  ;;  %v13239_v39 = vld [vmem:[%s14861_s23 + $0x12c] sm:$0xe]  ;;  %v14468_v49 = vpop.f32.mrb[198].mxu0  ;;  %v14397_v33 = vpop.f32.mrb[200].mxu1 }
 0x2a5   : > { %v13127_v29 = vcombine.low %v9306_v18, %v9316_v15  ;;  %v17861_v48 = vadd.f32 %v14467_v38, %v7554_v62  ;;  %v7553_v24 = vadd.f32 %v7316_v35, %v18758_v8  ;;  %v10643_v25 = vsel %vm14931_vm6, %v10641_v47, %v10642_v30  ;;  %v8219_v35 = vpop.f32.mrb[199].mxu0  ;;  %v13240_v36 = vld [vmem:[%s14861_s23 + $0x130] sm:$0xf]  ;;  %v7329_v62 = vpop.f32.mrb[201].mxu1  ;;  %v13241_v38 = vld [vmem:[%s14861_s23 + $0x134] sm:$0xf] }
 0x2a6   : > { %14645 = vmatprep.mubr.msk.bf16.mxu0 %vm569_vm1, %v13307_v51  ;;  %v9318_v40 = vshrl.u32 %v13076_v57, 16  ;;  %v9321_v60 = vshll.u32 %v13076_v57, 16  ;;  %v9327_v0 = vshll.u32 %v13077_v52, 16  ;;  %v13308_v54 = vcombine.low %v10640_v6, %v10643_v25  ;;  %v14398_v57 = vpop.f32.mrb[202].mxu1  ;;  %v13242_v49 = vld [vmem:[%s14861_s23 + $0x138] sm:$0xf] }
 0x2a7   : > { %18756 = vst [vmem:[#allocation4_spill] sm:$0xff] %v17861_v48  ;;  %14572 = vmatmul.mubr.msk.bf16.gmra.mrb[44].mxu1 %vm569_vm1, %v13127_v29  ;;  %v17871_v7 = vadd.f32 %v8216_v4, %v7552_v16  ;;  %v9331_v18 = vshrl.u32 %v13077_v52, 16  ;;  %v9337_v41 = vshll.u32 %v13078_v10, 16  ;;  %v17874_v30 = vadd.f32 %v8219_v35, %v7553_v24  ;;  %v7332_v4 = vpop.f32.mrb[203].mxu1 }
 0x2a8   : > { %v9320_v15 = vrot.slane %v9318_v40, 4  ;;  %v9323_v47 = vrot.slane %v9321_v60, 5  ;;  %v9329_v51 = vrot.slane %v9327_v0, 5  ;;  %14646 = vmatmul.mubr.msk.bf16.gmra.mrb[44].mxu0 %vm569_vm1, %v13308_v54  ;;  %v9341_v61 = vshrl.u32 %v13078_v10, 16  ;;  %v13243_v60 = vld [vmem:[%s14861_s23 + $0x13c] sm:$0x1] }
 0x2a9   : > { %18759 = vst [vmem:[#allocation5_spill] sm:$0xff] %v17871_v7  ;;  %18760 = vst [vmem:[#allocation6_spill] sm:$0xff] %v17874_v30  ;;  %v9333_v6 = vrot.slane %v9331_v18, 4  ;;  %v9339_v29 = vrot.slane %v9337_v41, 5  ;;  %v9347_v16 = vshll.u32 %v13079_v1, 16  ;;  %v9351_v8 = vshrl.u32 %v13079_v1, 16 }
 0x2aa   : > { %v9324_v52 = vor.u32 %v9323_v47, %v9320_v15  ;;  %v9357_v25 = vshll.u32 %v13080_v27, 16  ;;  %v13277_v7 = vrot.slane %v13239_v39, 9  ;;  %v9343_v35 = vrot.slane %v9341_v61, 4  ;;  %v14471_v54 = vpop.f32.mrb[200].mxu0  ;;  %v17884_v61 = vpop.f32.mrb[204].mxu1 }
 0x2ab   : > { %v9334_v24 = vor.u32 %v9333_v6, %v9329_v51  ;;  %v9349_v40 = vrot.slane %v9347_v16, 5  ;;  %v10646_v0 = vrot.slane %v13240_v36, 5  ;;  %v9353_v48 = vrot.slane %v9351_v8, 4  ;;  %v8232_v27 = vpop.f32.mrb[201].mxu0 }
 0x2ac   : > { %v9325_v30 = vrot.slane %v9324_v52, 4  ;;  %v9359_v57 = vrot.slane %v9357_v25, 5  ;;  %v10649_v21 = vrot.slane %v13241_v38, 5  ;;  %v9344_v10 = vor.u32 %v9343_v35, %v9339_v29  ;;  %v14472_v36 = vpop.f32.mrb[202].mxu0  ;;  %v13081_v25 = vld [vmem:[%s14861_s23 + $0x140] sm:$0xf] }
 0x2ad   : > { %v9335_v18 = vrot.slane %v9334_v24, 4  ;;  %v10647_v41 = vsel %vm14931_vm6, %v13277_v7, %v10646_v0  ;;  %v10648_v1 = vrot.slane %v10646_v0, 4  ;;  %v9354_v15 = vor.u32 %v9353_v48, %v9349_v40  ;;  %v8235_v8 = vpop.f32.mrb[203].mxu0  ;;  %v17891_v24 = vpop.f32.mrb[205].mxu1 }
 0x2ae   : > { %v9330_v39 = vsel %vm14943_vm7, %v9325_v30, %v9329_v51  ;;  %v10651_v47 = vrot.slane %v10649_v21, 4  ;;  %v10652_v6 = vrot.slane %v13242_v49, 5  ;;  %v9345_v16 = vrot.slane %v9344_v10, 4  ;;  %v14402_v35 = vpop.f32.mrb[206].mxu1 }
 0x2af   : > { %v9340_v38 = vsel %vm14943_vm7, %v9335_v18, %v9339_v29  ;;  %v10650_v52 = vsel %vm14931_vm6, %v10648_v1, %v10649_v21  ;;  %v10655_v7 = vrot.slane %v13243_v60, 5  ;;  %v9355_v48 = vrot.slane %v9354_v15, 4  ;;  %v18761_v18 = vld [vmem:[#allocation50_spill] sm:$0xff]  ;;  %v18762_v60 = vld [vmem:[#allocation43_spill] sm:$0xff]  ;;  %v17900_v36 = vpop.f32.mrb[207].mxu1 }
 0x2b0   : > { %v13128_v30 = vcombine.low %v9330_v39, %v9340_v38  ;;  %v10653_v51 = vsel %vm14931_vm6, %v10651_v47, %v10652_v6  ;;  %v10654_v49 = vrot.slane %v10652_v6, 4  ;;  %v9350_v29 = vsel %vm14943_vm7, %v9345_v16, %v9349_v40  ;;  %v13082_v1 = vld [vmem:[%s14861_s23 + $0x144] sm:$0xf] }
 0x2b1   : > { %v13309_v0 = vcombine.low %v10647_v41, %v10650_v52  ;;  %v7558_v21 = vadd.f32 %v14397_v33, %v18761_v18  ;;  %v7556_v10 = vadd.f32 %v7329_v62, %v18762_v60  ;;  %v9360_v39 = vsel %vm14943_vm7, %v9355_v48, %v9359_v57  ;;  %v18763_v47 = vld [vmem:[#allocation51_spill] sm:$0xff]  ;;  %v13083_v33 = vld [vmem:[%s14861_s23 + $0x148] sm:$0xf]  ;;  %v13084_v41 = vld [vmem:[%s14861_s23 + $0x14c] sm:$0xf]  ;;  %v14475_v60 = vpop.f32.mrb[204].mxu0 }
 0x2b2   : > { %14575 = vmatprep.mubr.msk.bf16.mxu1 %vm569_vm1, %v13128_v30  ;;  %v10656_v15 = vsel %vm14931_vm6, %v10654_v49, %v10655_v7  ;;  %v7557_v40 = vadd.f32 %v7332_v4, %v18763_v47  ;;  %v9362_v6 = vshrl.u32 %v13081_v25, 16  ;;  %v13129_v62 = vcombine.low %v9350_v29, %v9360_v39  ;;  %v13085_v57 = vld [vmem:[%s14861_s23 + $0x150] sm:$0x1]  ;;  %v13244_v48 = vld [vmem:[%s14861_s23 + $0x140] sm:$0xe] }
 0x2b3   : > { %v13310_v38 = vcombine.low %v10653_v51, %v10656_v15  ;;  %14649 = vmatprep.mubr.msk.bf16.mxu0 %vm569_vm1, %v13309_v0  ;;  %v17911_v16 = vadd.f32 %v14471_v54, %v7558_v21  ;;  %v17913_v52 = vadd.f32 %v8232_v27, %v7556_v10  ;;  %v9365_v4 = vshll.u32 %v13081_v25, 16  ;;  %v13245_v35 = vld [vmem:[%s14861_s23 + $0x144] sm:$0xf]  ;;  %v13246_v18 = vld [vmem:[%s14861_s23 + $0x148] sm:$0xf]  ;;  %v17925_v10 = vpop.f32.mrb[205].mxu0 }
 0x2b4   : > { %v17917_v7 = vadd.f32 %v8235_v8, %v7557_v40  ;;  %v9364_v30 = vrot.slane %v9362_v6, 4  ;;  %v9371_v49 = vshll.u32 %v13082_v1, 16  ;;  %14576 = vmatmul.mubr.msk.bf16.gmra.mrb[48].mxu1 %vm569_vm1, %v13129_v62  ;;  %v9375_v54 = vshrl.u32 %v13082_v1, 16  ;;  %v13247_v0 = vld [vmem:[%s14861_s23 + $0x14c] sm:$0xf]  ;;  %v14476_v47 = vpop.f32.mrb[206].mxu0 }
 0x2b5   : > { %18764 = vst [vmem:[#allocation7_spill] sm:$0xff] %v17911_v16  ;;  %18765 = vst [vmem:[#allocation8_spill] sm:$0xff] %v17913_v52  ;;  %14650 = vmatmul.mubr.msk.bf16.gmra.mrb[48].mxu0 %vm569_vm1, %v13310_v38  ;;  %v9381_v51 = vshll.u32 %v13083_v33, 16  ;;  %v9385_v27 = vshrl.u32 %v13083_v33, 16  ;;  %v9391_v29 = vshll.u32 %v13084_v41, 16  ;;  %v9367_v8 = vrot.slane %v9365_v4, 5 }
 0x2b6   : > { %18766 = vst [vmem:[#allocation9_spill] sm:$0xff] %v17917_v7  ;;  %v13248_v21 = vld [vmem:[%s14861_s23 + $0x150] sm:$0x1]  ;;  %v9373_v39 = vrot.slane %v9371_v49, 5  ;;  %v9395_v15 = vshrl.u32 %v13084_v41, 16  ;;  %v9401_v25 = vshll.u32 %v13085_v57, 16 }
 0x2b7   : > { %v17927_v40 = vpop.f32.mrb[208].mxu1  ;;  %v9377_v6 = vrot.slane %v9375_v54, 4  ;;  %v9383_v7 = vrot.slane %v9381_v51, 5  ;;  %v9387_v62 = vrot.slane %v9385_v27, 4  ;;  %v9393_v52 = vrot.slane %v9391_v29, 5  ;;  %v8251_v38 = vpop.f32.mrb[207].mxu0 }
 0x2b8   : > { %v17929_v1 = vpop.f32.mrb[209].mxu1  ;;  %v9368_v33 = vor.u32 %v9367_v8, %v9364_v30  ;;  %v9397_v16 = vrot.slane %v9395_v15, 4  ;;  %v9403_v37 = vrot.slane %v9401_v25, 5  ;;  %v13278_v55 = vrot.slane %v13244_v48, 9  ;;  %v17937_v15 = vpop.f32.mrb[208].mxu0 }
 0x2b9   : > { %v14406_v26 = vpop.f32.mrb[210].mxu1  ;;  %v9378_v23 = vor.u32 %v9377_v6, %v9373_v39  ;;  %v9388_v4 = vor.u32 %v9387_v62, %v9383_v7  ;;  %v10659_v49 = vrot.slane %v13245_v35, 5  ;;  %v10662_v41 = vrot.slane %v13246_v18, 5  ;;  %v17948_v25 = vpop.f32.mrb[209].mxu0  ;;  %v13087_v62 = vld [vmem:[%s14861_s23 + $0x158] sm:$0xf] }
 0x2ba   : > { %v17931_v57 = vpop.f32.mrb[211].mxu1  ;;  %v9369_v47 = vrot.slane %v9368_v33, 4  ;;  %v9398_v42 = vor.u32 %v9397_v16, %v9393_v52  ;;  %v10665_v54 = vrot.slane %v13247_v0, 5  ;;  %v10668_v51 = vrot.slane %v13248_v21, 5  ;;  %v18767_v0 = vld [vmem:[#allocation44_spill] sm:$0xff] }
 0x2bb   : > { %v9379_v27 = vrot.slane %v9378_v23, 4  ;;  %v9389_v29 = vrot.slane %v9388_v4, 4  ;;  %v10660_v30 = vsel %vm14931_vm6, %v13278_v55, %v10659_v49  ;;  %v10661_v8 = vrot.slane %v10659_v49, 4  ;;  %v13088_v33 = vld [vmem:[%s14861_s23 + $0x15c] sm:$0xf]  ;;  %v14480_v4 = vpop.f32.mrb[210].mxu0 }
 0x2bc   : > { %v9374_v26 = vsel %vm14943_vm7, %v9369_v47, %v9373_v39  ;;  %v9399_v48 = vrot.slane %v9398_v42, 4  ;;  %v10664_v35 = vrot.slane %v10662_v41, 4  ;;  %v10667_v18 = vrot.slane %v10665_v54, 4  ;;  %v13086_v39 = vld [vmem:[%s14861_s23 + $0x154] sm:$0xf]  ;;  %v17958_v49 = vpop.f32.mrb[212].mxu1 }
 0x2bd   : > { %v9384_v16 = vsel %vm14943_vm7, %v9379_v27, %v9383_v7  ;;  %v9394_v23 = vsel %vm14943_vm7, %v9389_v29, %v9393_v52  ;;  %v10663_v55 = vsel %vm14931_vm6, %v10661_v8, %v10662_v41  ;;  %v7562_v21 = vadd.f32 %v17884_v61, %v18767_v0  ;;  %v13089_v29 = vld [vmem:[%s14861_s23 + $0x160] sm:$0xf]  ;;  %v17965_v8 = vpop.f32.mrb[213].mxu1 }
 0x2be   : > { %v9404_v42 = vsel %vm14943_vm7, %v9399_v48, %v9403_v37  ;;  %v13130_v6 = vcombine.low %v9374_v26, %v9384_v16  ;;  %v10666_v7 = vsel %vm14931_vm6, %v10664_v35, %v10665_v54  ;;  %v10669_v52 = vsel %vm14931_vm6, %v10667_v18, %v10668_v51  ;;  %v17963_v37 = vpop.f32.mrb[211].mxu0  ;;  %v18769_v54 = vld [vmem:[#allocation45_spill] sm:$0xff]  ;;  %v18770_v26 = vld [vmem:[#allocation46_spill] sm:$0xff]  ;;  %v13090_v35 = vld [vmem:[%s14861_s23 + $0x164] sm:$0x1] }
 0x2bf   : > { %v13131_v61 = vcombine.low %v9394_v23, %v9404_v42  ;;  %v13311_v41 = vcombine.low %v10660_v30, %v10663_v55  ;;  %v13312_v47 = vcombine.low %v10666_v7, %v10669_v52  ;;  %v17960_v27 = vadd.f32 %v14475_v60, %v7562_v21  ;;  %v14410_v60 = vpop.f32.mrb[214].mxu1  ;;  %v13250_v7 = vld [vmem:[%s14861_s23 + $0x158] sm:$0xf] }
 0x2c0   : > { %14579 = vmatprep.mubr.msk.bf16.mxu1 %vm569_vm1, %v13130_v6  ;;  %v7560_v51 = vadd.f32 %v17891_v24, %v18769_v54  ;;  %v7561_v48 = vadd.f32 %v17900_v36, %v18770_v26  ;;  %v9406_v18 = vshrl.u32 %v13086_v39, 16  ;;  %v9409_v30 = vshll.u32 %v13086_v39, 16  ;;  %v17975_v21 = vpop.f32.mrb[215].mxu1  ;;  %v13249_v6 = vld [vmem:[%s14861_s23 + $0x154] sm:$0xe] }
 0x2c1   : > { %18768 = vst [vmem:[#allocation10_spill] sm:$0xff] %v17960_v27  ;;  %14653 = vmatprep.mubr.msk.bf16.mxu0 %vm569_vm1, %v13311_v41  ;;  %14580 = vmatmul.mubr.msk.bf16.gmra.mrb[52].mxu1 %vm569_vm1, %v13131_v61  ;;  %v9415_v16 = vshll.u32 %v13087_v62, 16  ;;  %v9419_v23 = vshrl.u32 %v13087_v62, 16  ;;  %v9425_v55 = vshll.u32 %v13088_v33, 16  ;;  %v9429_v0 = vshrl.u32 %v13088_v33, 16  ;;  %v17987_v27 = vpop.f32.mrb[212].mxu0 }
 0x2c2   : > { %14654 = vmatmul.mubr.msk.bf16.gmra.mrb[52].mxu0 %vm569_vm1, %v13312_v47  ;;  %v17979_v24 = vadd.f32 %v17925_v10, %v7560_v51  ;;  %v17981_v36 = vadd.f32 %v8251_v38, %v7561_v48  ;;  %v9408_v39 = vrot.slane %v9406_v18, 4  ;;  %v9411_v42 = vrot.slane %v9409_v30, 5  ;;  %v13251_v33 = vld [vmem:[%s14861_s23 + $0x15c] sm:$0xf]  ;;  %v13252_v60 = vld [vmem:[%s14861_s23 + $0x160] sm:$0xf] }
 0x2c3   : > { %v9417_v52 = vrot.slane %v9415_v16, 5  ;;  %v9421_v4 = vrot.slane %v9419_v23, 4  ;;  %v9427_v62 = vrot.slane %v9425_v55, 5  ;;  %v9431_v61 = vrot.slane %v9429_v0, 4  ;;  %v13253_v51 = vld [vmem:[%s14861_s23 + $0x164] sm:$0x1] }
 0x2c4   : > { %18771 = vst [vmem:[#allocation11_spill] sm:$0xff] %v17979_v24  ;;  %18772 = vst [vmem:[#allocation12_spill] sm:$0xff] %v17981_v36  ;;  %v9412_v41 = vor.u32 %v9411_v42, %v9408_v39  ;;  %v9435_v54 = vshll.u32 %v13089_v29, 16  ;;  %v9439_v26 = vshrl.u32 %v13089_v29, 16  ;;  %v9445_v47 = vshll.u32 %v13090_v35, 16  ;;  %v17990_v30 = vpop.f32.mrb[213].mxu0 }
 0x2c5   : > { %v9422_v10 = vor.u32 %v9421_v4, %v9417_v52  ;;  %v9432_v38 = vor.u32 %v9431_v61, %v9427_v62  ;;  %v13279_v48 = vrot.slane %v13249_v6, 9  ;;  %v10672_v18 = vrot.slane %v13250_v7, 5  ;;  %v14484_v0 = vpop.f32.mrb[214].mxu0  ;;  %v17992_v24 = vpop.f32.mrb[216].mxu1 }
 0x2c6   : > { %v9413_v36 = vrot.slane %v9412_v41, 4  ;;  %v9437_v16 = vrot.slane %v9435_v54, 5  ;;  %v9441_v23 = vrot.slane %v9439_v26, 4  ;;  %v9447_v55 = vrot.slane %v9445_v47, 5  ;;  %v17996_v4 = vpop.f32.mrb[215].mxu0  ;;  %v17998_v6 = vpop.f32.mrb[217].mxu1 }
 0x2c7   : > { %v9423_v29 = vrot.slane %v9422_v10, 4  ;;  %v9433_v35 = vrot.slane %v9432_v38, 4  ;;  %v10673_v39 = vsel %vm14931_vm6, %v13279_v48, %v10672_v18  ;;  %v10674_v42 = vrot.slane %v10672_v18, 4  ;;  %v14414_v26 = vpop.f32.mrb[218].mxu1  ;;  %v18773_v48 = vld [vmem:[#allocation52_spill] sm:$0xff] }
 0x2c8   : > { %v9418_v7 = vsel %vm14943_vm7, %v9413_v36, %v9417_v52  ;;  %v9442_v61 = vor.u32 %v9441_v23, %v9437_v16  ;;  %v10675_v41 = vrot.slane %v13251_v33, 5  ;;  %v10678_v54 = vrot.slane %v13252_v60, 5  ;;  %v13091_v0 = vld [vmem:[%s14861_s23 + $0x168] sm:$0xf]  ;;  %v18009_v11 = vpop.f32.mrb[219].mxu1  ;;  %v18028_v26 = vpop.f32.mrb[216].mxu0 }
 0x2c9   : > { %v9428_v47 = vsel %vm14943_vm7, %v9423_v29, %v9427_v62  ;;  %v9438_v10 = vsel %vm14943_vm7, %v9433_v35, %v9437_v16  ;;  %v10681_v38 = vrot.slane %v13253_v51, 5  ;;  %v7566_v18 = vadd.f32 %v17927_v40, %v18773_v48  ;;  %v18775_v51 = vld [vmem:[#allocation47_spill] sm:$0xff]  ;;  %v13092_v29 = vld [vmem:[%s14861_s23 + $0x16c] sm:$0xf]  ;;  %v13095_v48 = vld [vmem:[%s14861_s23 + $0x178] sm:$0x1] }
 0x2ca   : > { %v9443_v36 = vrot.slane %v9442_v61, 4  ;;  %v13132_v52 = vcombine.low %v9418_v7, %v9428_v47  ;;  %v10676_v33 = vsel %vm14931_vm6, %v10674_v42, %v10675_v41  ;;  %v10677_v60 = vrot.slane %v10675_v41, 4  ;;  %v18776_v7 = vld [vmem:[#allocation27_spill] sm:$0xff]  ;;  %v13093_v61 = vld [vmem:[%s14861_s23 + $0x170] sm:$0xf] }
 0x2cb   : > { %v10680_v23 = vrot.slane %v10678_v54, 4  ;;  %v13313_v62 = vcombine.low %v10673_v39, %v10676_v33  ;;  %v18014_v16 = vadd.f32 %v17937_v15, %v7566_v18  ;;  %v7564_v40 = vadd.f32 %v17929_v1, %v18775_v51  ;;  %v13094_v15 = vld [vmem:[%s14861_s23 + $0x174] sm:$0xf]  ;;  %v18038_v18 = vpop.f32.mrb[217].mxu0 }
 0x2cc   : > { %v9448_v35 = vsel %vm14943_vm7, %v9443_v36, %v9447_v55  ;;  %14583 = vmatprep.mubr.msk.bf16.mxu1 %vm569_vm1, %v13132_v52  ;;  %v10679_v42 = vsel %vm14931_vm6, %v10677_v60, %v10678_v54  ;;  %v7565_v39 = vadd.f32 %v17931_v57, %v18776_v7  ;;  %v9450_v41 = vshrl.u32 %v13091_v0, 16  ;;  %v13254_v57 = vld [vmem:[%s14861_s23 + $0x168] sm:$0xe]  ;;  %v13255_v60 = vld [vmem:[%s14861_s23 + $0x16c] sm:$0xf] }
 0x2cd   : > { %18774 = vst [vmem:[#allocation13_spill] sm:$0xff] %v18014_v16  ;;  %v13133_v1 = vcombine.low %v9438_v10, %v9448_v35  ;;  %v10682_v47 = vsel %vm14931_vm6, %v10680_v23, %v10681_v38  ;;  %14657 = vmatprep.mubr.msk.bf16.mxu0 %vm569_vm1, %v13313_v62  ;;  %v18034_v55 = vadd.f32 %v17948_v25, %v7564_v40  ;;  %v9453_v54 = vshll.u32 %v13091_v0, 16  ;;  %v14488_v38 = vpop.f32.mrb[218].mxu0  ;;  %v18044_v23 = vpop.f32.mrb[220].mxu1  ;;  %v13256_v40 = vld [vmem:[%s14861_s23 + $0x170] sm:$0xf] }
 0x2ce   : > { %v13314_v36 = vcombine.low %v10679_v42, %v10682_v47  ;;  %v18041_v52 = vadd.f32 %v17963_v37, %v7565_v39  ;;  %v9452_v10 = vrot.slane %v9450_v41, 4  ;;  %v9459_v33 = vshll.u32 %v13092_v29, 16  ;;  %v13257_v35 = vld [vmem:[%s14861_s23 + $0x174] sm:$0xf]  ;;  %v18049_v7 = vpop.f32.mrb[219].mxu0  ;;  %v18051_v42 = vpop.f32.mrb[221].mxu1 }
 0x2cf   : > { %18777 = vst [vmem:[#allocation14_spill] sm:$0xff] %v18034_v55  ;;  %14584 = vmatmul.mubr.msk.bf16.gmra.mrb[56].mxu1 %vm569_vm1, %v13133_v1  ;;  %v9455_v25 = vrot.slane %v9453_v54, 5  ;;  %v9463_v62 = vshrl.u32 %v13092_v29, 16  ;;  %v9469_v51 = vshll.u32 %v13093_v61, 16  ;;  %v9473_v0 = vshrl.u32 %v13093_v61, 16  ;;  %v14418_v38 = vpop.f32.mrb[222].mxu1 }
 0x2d0   : > { %18778 = vst [vmem:[#allocation15_spill] sm:$0xff] %v18041_v52  ;;  %14658 = vmatmul.mubr.msk.bf16.gmra.mrb[56].mxu0 %vm569_vm1, %v13314_v36  ;;  %v9461_v37 = vrot.slane %v9459_v33, 5  ;;  %v9479_v39 = vshll.u32 %v13094_v15, 16  ;;  %v9483_v41 = vshrl.u32 %v13094_v15, 16  ;;  %v9489_v47 = vshll.u32 %v13095_v48, 16  ;;  %v18055_v16 = vpop.f32.mrb[223].mxu1 }
 0x2d1   : > { %v9456_v52 = vor.u32 %v9455_v25, %v9452_v10  ;;  %v9465_v1 = vrot.slane %v9463_v62, 4  ;;  %v9471_v54 = vrot.slane %v9469_v51, 5  ;;  %v9475_v29 = vrot.slane %v9473_v0, 4  ;;  %v13258_v55 = vld [vmem:[%s14861_s23 + $0x178] sm:$0x1]  ;;  %v18057_v38 = vpop.f32.mrb[220].mxu0 }
 0x2d2   : > { %v9481_v61 = vrot.slane %v9479_v39, 5  ;;  %v9485_v13 = vrot.slane %v9483_v41, 4  ;;  %v9491_v3 = vrot.slane %v9489_v47, 5  ;;  %v13280_v31 = vrot.slane %v13254_v57, 9  ;;  %v18063_v57 = vpop.f32.mrb[221].mxu0 }
 0x2d3   : > { %v9457_v34 = vrot.slane %v9456_v52, 4  ;;  %v9466_v9 = vor.u32 %v9465_v1, %v9461_v37  ;;  %v9476_v20 = vor.u32 %v9475_v29, %v9471_v54  ;;  %v10685_v36 = vrot.slane %v13255_v60, 5  ;;  %v13096_v39 = vld [vmem:[%s14861_s23 + $0x17c] sm:$0xf] }
 0x2d4   : > { %v9486_v33 = vor.u32 %v9485_v13, %v9481_v61  ;;  %v10688_v59 = vrot.slane %v13256_v40, 5  ;;  %v10691_v15 = vrot.slane %v13257_v35, 5  ;;  %v10694_v48 = vrot.slane %v13258_v55, 5  ;;  %v14492_v55 = vpop.f32.mrb[222].mxu0  ;;  %v18065_v40 = vpop.f32.mrb[224].mxu1 }
 0x2d5   : > { %v9462_v10 = vsel %vm14943_vm7, %v9457_v34, %v9461_v37  ;;  %v9467_v25 = vrot.slane %v9466_v9, 4  ;;  %v9477_v62 = vrot.slane %v9476_v20, 4  ;;  %v10686_v51 = vsel %vm14931_vm6, %v13280_v31, %v10685_v36  ;;  %v18779_v9 = vld [vmem:[#allocation28_spill] sm:$0xff]  ;;  %v18780_v31 = vld [vmem:[#allocation39_spill] sm:$0xff]  ;;  %v18076_v41 = vpop.f32.mrb[223].mxu0  ;;  %v18078_v47 = vpop.f32.mrb[225].mxu1 }
 0x2d6   : > { %v9487_v52 = vrot.slane %v9486_v33, 4  ;;  %v10687_v0 = vrot.slane %v10685_v36, 4  ;;  %v10690_v13 = vrot.slane %v10688_v59, 4  ;;  %v10693_v60 = vrot.slane %v10691_v15, 4  ;;  %v13098_v36 = vld [vmem:[%s14861_s23 + $0x184] sm:$0xf] }
 0x2d7   : > { %v9472_v35 = vsel %vm14943_vm7, %v9467_v25, %v9471_v54  ;;  %v9482_v20 = vsel %vm14943_vm7, %v9477_v62, %v9481_v61  ;;  %v7570_v34 = vadd.f32 %v17958_v49, %v18779_v9  ;;  %v7568_v37 = vadd.f32 %v17965_v8, %v18780_v31  ;;  %v13097_v61 = vld [vmem:[%s14861_s23 + $0x180] sm:$0xf]  ;;  %v14422_v8 = vpop.f32.mrb[226].mxu1 }
 0x2d8   : > { %v9492_v1 = vsel %vm14943_vm7, %v9487_v52, %v9491_v3  ;;  %v13134_v29 = vcombine.low %v9462_v10, %v9472_v35  ;;  %v10689_v54 = vsel %vm14931_vm6, %v10687_v0, %v10688_v59  ;;  %v10692_v49 = vsel %vm14931_vm6, %v10690_v13, %v10691_v15  ;;  %v13099_v3 = vld [vmem:[%s14861_s23 + $0x188] sm:$0xf]  ;;  %v18094_v10 = vpop.f32.mrb[227].mxu1  ;;  %v18783_v52 = vld [vmem:[#allocation29_spill] sm:$0xff]  ;;  %v13100_v13 = vld [vmem:[%s14861_s23 + $0x18c] sm:$0x1] }
 0x2d9   : > { %v13135_v33 = vcombine.low %v9482_v20, %v9492_v1  ;;  %v10695_v25 = vsel %vm14931_vm6, %v10693_v60, %v10694_v48  ;;  %v13315_v62 = vcombine.low %v10686_v51, %v10689_v54  ;;  %v18091_v55 = vadd.f32 %v17987_v27, %v7570_v34  ;;  %v13259_v51 = vld [vmem:[%s14861_s23 + $0x17c] sm:$0xe]  ;;  %v13260_v9 = vld [vmem:[%s14861_s23 + $0x180] sm:$0xf]  ;;  %v18112_v1 = vpop.f32.mrb[224].mxu0 }
 0x2da   : > { %14587 = vmatprep.mubr.msk.bf16.mxu1 %vm569_vm1, %v13134_v29  ;;  %v13316_v59 = vcombine.low %v10692_v49, %v10695_v25  ;;  %v18098_v15 = vadd.f32 %v17990_v30, %v7568_v37  ;;  %v7569_v0 = vadd.f32 %v17975_v21, %v18783_v52  ;;  %v9494_v48 = vshrl.u32 %v13096_v39, 16  ;;  %v13261_v37 = vld [vmem:[%s14861_s23 + $0x184] sm:$0xf]  ;;  %v18114_v8 = vpop.f32.mrb[225].mxu0 }
 0x2db   : > { %18781 = vst [vmem:[#allocation16_spill] sm:$0xff] %v18091_v55  ;;  %14661 = vmatprep.mubr.msk.bf16.mxu0 %vm569_vm1, %v13315_v62  ;;  %14588 = vmatmul.mubr.msk.bf16.gmra.mrb[60].mxu1 %vm569_vm1, %v13135_v33  ;;  %v9497_v27 = vshll.u32 %v13096_v39, 16  ;;  %v9503_v60 = vshll.u32 %v13097_v61, 16  ;;  %v9507_v35 = vshrl.u32 %v13097_v61, 16  ;;  %v9513_v20 = vshll.u32 %v13098_v36, 16 }
 0x2dc   : > { %18782 = vst [vmem:[#allocation17_spill] sm:$0xff] %v18098_v15  ;;  %14662 = vmatmul.mubr.msk.bf16.gmra.mrb[60].mxu0 %vm569_vm1, %v13316_v59  ;;  %v18109_v30 = vadd.f32 %v17996_v4, %v7569_v0  ;;  %v9496_v34 = vrot.slane %v9494_v48, 4  ;;  %v9517_v21 = vshrl.u32 %v13098_v36, 16  ;;  %v9523_v31 = vshll.u32 %v13099_v3, 16  ;;  %v14496_v4 = vpop.f32.mrb[226].mxu0  ;;  %v18116_v59 = vpop.f32.mrb[228].mxu1 }
 0x2dd   : > { %v9499_v29 = vrot.slane %v9497_v27, 5  ;;  %v9505_v54 = vrot.slane %v9503_v60, 5  ;;  %v9509_v49 = vrot.slane %v9507_v35, 4  ;;  %v9515_v39 = vrot.slane %v9513_v20, 5  ;;  %v13262_v0 = vld [vmem:[%s14861_s23 + $0x188] sm:$0xf] }
 0x2de   : > { %18784 = vst [vmem:[#allocation18_spill] sm:$0xff] %v18109_v30  ;;  %v9519_v61 = vrot.slane %v9517_v21, 4  ;;  %v9525_v33 = vrot.slane %v9523_v31, 5  ;;  %v9527_v25 = vshrl.u32 %v13099_v3, 16  ;;  %v9533_v62 = vshll.u32 %v13100_v13, 16  ;;  %v18119_v15 = vpop.f32.mrb[227].mxu0 }
 0x2df   : > { %v9500_v36 = vor.u32 %v9499_v29, %v9496_v34  ;;  %v9510_v52 = vor.u32 %v9509_v49, %v9505_v54  ;;  %v13281_v48 = vrot.slane %v13259_v51, 9  ;;  %v10698_v30 = vrot.slane %v13260_v9, 5  ;;  %v7441_v27 = vpop.f32.mrb[229].mxu1  ;;  %v13263_v55 = vld [vmem:[%s14861_s23 + $0x18c] sm:$0x1] }
 0x2e0   : > { %v9520_v60 = vor.u32 %v9519_v61, %v9515_v39  ;;  %v9529_v35 = vrot.slane %v9527_v25, 4  ;;  %v9535_v20 = vrot.slane %v9533_v62, 5  ;;  %v10701_v21 = vrot.slane %v13261_v37, 5  ;;  %v14426_v58 = vpop.f32.mrb[230].mxu1 }
 0x2e1   : > { %v9501_v31 = vrot.slane %v9500_v36, 4  ;;  %v9511_v3 = vrot.slane %v9510_v52, 4  ;;  %v10699_v13 = vsel %vm14931_vm6, %v13281_v48, %v10698_v30  ;;  %v10700_v4 = vrot.slane %v10698_v30, 4  ;;  %v7444_v34 = vpop.f32.mrb[231].mxu1  ;;  %v14499_v52 = vpop.f32.mrb[228].mxu0 }
 0x2e2   : > { %v9521_v29 = vrot.slane %v9520_v60, 4  ;;  %v9530_v49 = vor.u32 %v9529_v35, %v9525_v33  ;;  %v10703_v51 = vrot.slane %v10701_v21, 4  ;;  %v10704_v9 = vrot.slane %v13262_v0, 5  ;;  %v18785_v60 = vld [vmem:[#allocation41_spill] sm:$0xff]  ;;  %v18786_v35 = vld [vmem:[#allocation30_spill] sm:$0xff] }
 0x2e3   : > { %v9506_v43 = vsel %vm14943_vm7, %v9501_v31, %v9505_v54  ;;  %v9516_v61 = vsel %vm14943_vm7, %v9511_v3, %v9515_v39  ;;  %v10702_v58 = vsel %vm14931_vm6, %v10700_v4, %v10701_v21  ;;  %v10707_v37 = vrot.slane %v13263_v55, 5  ;;  %v8344_v31 = vpop.f32.mrb[229].mxu0 }
 0x2e4   : > { %v9526_v25 = vsel %vm14943_vm7, %v9521_v29, %v9525_v33  ;;  %v9531_v62 = vrot.slane %v9530_v49, 4  ;;  %v13136_v30 = vcombine.low %v9506_v43, %v9516_v61  ;;  %v10705_v36 = vsel %vm14931_vm6, %v10703_v51, %v10704_v9  ;;  %v18787_v33 = vld [vmem:[#allocation33_spill] sm:$0xff] }
 0x2e5   : > { %v10706_v0 = vrot.slane %v10704_v9, 4  ;;  %v13317_v48 = vcombine.low %v10699_v13, %v10702_v58  ;;  %v7574_v54 = vadd.f32 %v17992_v24, %v18785_v60  ;;  %v7572_v39 = vadd.f32 %v17998_v6, %v18786_v35  ;;  %v14500_v13 = vpop.f32.mrb[230].mxu0  ;;  %v14429_v24 = vpop.f32.mrb[232].mxu1 }
 0x2e6   : > { %v9536_v55 = vsel %vm14943_vm7, %v9531_v62, %v9535_v20  ;;  %14591 = vmatprep.mubr.msk.bf16.mxu1 %vm569_vm1, %v13136_v30  ;;  %v7573_v43 = vadd.f32 %v18009_v11, %v18787_v33  ;;  %v7578_v21 = vadd.f32 %v18044_v23, %v17401_v46  ;;  %v7576_v3 = vadd.f32 %v18051_v42, %v17403_v56  ;;  %v8347_v11 = vpop.f32.mrb[231].mxu0  ;;  %v7457_v29 = vpop.f32.mrb[233].mxu1 }
 0x2e7   : > { %v13137_v4 = vcombine.low %v9526_v25, %v9536_v55  ;;  %v10708_v6 = vsel %vm14931_vm6, %v10706_v0, %v10707_v37  ;;  %14665 = vmatprep.mubr.msk.bf16.mxu0 %vm569_vm1, %v13317_v48  ;;  %v18151_v63 = vadd.f32 %v18028_v26, %v7574_v54  ;;  %v18154_v20 = vadd.f32 %v18038_v18, %v7572_v39  ;;  %v14430_v42 = vpop.f32.mrb[234].mxu1  ;;  %v18789_v54 = vld [vmem:[#allocation31_spill] sm:$0xff] }
 0x2e8   : > { %v13318_v46 = vcombine.low %v10705_v36, %v10708_v6  ;;  %v18157_v23 = vadd.f32 %v18049_v7, %v7573_v43  ;;  %v18160_v56 = vadd.f32 %v18057_v38, %v7578_v21  ;;  %v18163_v2 = vadd.f32 %v18063_v57, %v7576_v3  ;;  %v7460_v38 = vpop.f32.mrb[235].mxu1  ;;  %v18791_v43 = vld [vmem:[#allocation23_spill] sm:$0xff] }
 0x2e9   : > { %14592 = vmatmul.mubr.msk.bf16.gmra.mrb[64].mxu1 %vm569_vm1, %v13137_v4  ;;  %v7577_v26 = vadd.f32 %v18055_v16, %v17413_v5  ;;  %v7582_v18 = vadd.f32 %v18065_v40, %v17448_v50  ;;  %v7580_v49 = vadd.f32 %v18078_v47, %v17452_v19  ;;  %v7581_v7 = vadd.f32 %v18094_v10, %v17468_v22 }
 0x2ea   : > { %14666 = vmatmul.mubr.msk.bf16.gmra.mrb[64].mxu0 %vm569_vm1, %v13318_v46  ;;  %v7586_v57 = vadd.f32 %v18116_v59, %v17486_v14  ;;  %v7584_v51 = vadd.f32 %v7441_v27, %v17495_v44  ;;  %v7585_v9 = vadd.f32 %v7444_v34, %v17510_v32  ;;  %v7590_v5 = vadd.f32 %v14429_v24, %v17550_v45  ;;  %v14503_v32 = vpop.f32.mrb[232].mxu0  ;;  %v18792_v46 = vld [vmem:[#allocation34_spill] sm:$0xff] }
 0x2eb   : > { %v18181_v50 = vadd.f32 %v18076_v41, %v7577_v26  ;;  %v18184_v19 = vadd.f32 %v18112_v1, %v7582_v18  ;;  %v18187_v22 = vadd.f32 %v18114_v8, %v7580_v49  ;;  %v18190_v16 = vadd.f32 %v18119_v15, %v7581_v7  ;;  %v8360_v47 = vpop.f32.mrb[233].mxu0  ;;  %v18793_v49 = vld [vmem:[#allocation53_spill] sm:$0xff] }
 0x2ec   : > { %v18192_v40 = vadd.f32 %v14499_v52, %v7586_v57  ;;  %v18194_v14 = vadd.f32 %v8344_v31, %v7584_v51  ;;  %v18196_v44 = vadd.f32 %v8347_v11, %v7585_v9  ;;  %v7588_v45 = vadd.f32 %v7457_v29, %v17553_v17  ;;  %v14504_v8 = vpop.f32.mrb[234].mxu0  ;;  %v18788_v17 = vld [vmem:[#allocation22_spill] sm:$0xff]  ;;  %v18790_v31 = vld [vmem:[#allocation32_spill] sm:$0xff] }
 0x2ed   : > { %v18199_v41 = vadd.f32 %v14503_v32, %v7590_v5  ;;  %v7589_v10 = vadd.f32 %v7460_v38, %v17564_v12  ;;  %v14433_v59 = vpop.f32.mrb[236].mxu1  ;;  %v8363_v15 = vpop.f32.mrb[235].mxu0  ;;  %v18794_v51 = vld [vmem:[#allocation54_spill] sm:$0xff] }
 0x2ee   : > { %v18202_v1 = vadd.f32 %v8360_v47, %v7588_v45  ;;  %v7594_v27 = vadd.f32 %v14433_v59, %v17589_v28  ;;  %v7473_v34 = vpop.f32.mrb[237].mxu1  ;;  %v14507_v30 = vpop.f32.mrb[236].mxu0 }
 0x2ef   : > { %v18205_v61 = vadd.f32 %v8363_v15, %v7589_v10  ;;  %v7592_v58 = vadd.f32 %v7473_v34, %v17591_v53  ;;  %v14434_v37 = vpop.f32.mrb[238].mxu1  ;;  %v8376_v12 = vpop.f32.mrb[237].mxu0 }
 0x2f0   : > { %v7476_v25 = vpop.f32.mrb[239].mxu1  ;;  %v18209_v36 = vadd.f32 %v14507_v30, %v7594_v27  ;;  %v14508_v0 = vpop.f32.mrb[238].mxu0 }
 0x2f1   : > { %v7593_v62 = vadd.f32 %v7476_v25, %v18788_v17  ;;  %v18211_v52 = vadd.f32 %v8376_v12, %v7592_v58  ;;  %v8379_v60 = vpop.f32.mrb[239].mxu0 }
 0x2f3   : > { %v18214_v39 = vadd.f32 %v8379_v60, %v7593_v62 }
 0x2f5   : > { %v14437_v48 = vpop.f32.mrb[240].mxu1  ;;  %v14511_v3 = vpop.f32.mrb[240].mxu0 }
 0x2f6   : > { %v7598_v28 = vadd.f32 %v14437_v48, %v18789_v54  ;;  %v7489_v35 = vpop.f32.mrb[241].mxu1  ;;  %v8392_v24 = vpop.f32.mrb[241].mxu0  ;;  %v11618_v54 = vlaneseq }
 0x2f7   : > { %v7596_v53 = vadd.f32 %v7489_v35, %v18790_v31  ;;  %v14438_v55 = vpop.f32.mrb[242].mxu1  ;;  %v14512_v6 = vpop.f32.mrb[242].mxu0 }
 0x2f8   : > { %v7492_v33 = vpop.f32.mrb[243].mxu1  ;;  %v18218_v13 = vadd.f32 %v14511_v3, %v7598_v28  ;;  %v8395_v29 = vpop.f32.mrb[243].mxu0  ;;  %v18795_v55 = vld [vmem:[#allocation24_spill] sm:$0xff]  ;;  %v18796_v3 = vld [vmem:[#allocation35_spill] sm:$0xff] }
 0x2f9   : > { %v7597_v21 = vadd.f32 %v7492_v33, %v18791_v43  ;;  %v18220_v4 = vadd.f32 %v8392_v24, %v7596_v53 }
 0x2fb   : > { %v18223_v18 = vadd.f32 %v8395_v29, %v7597_v21  ;;  %v18234_v21 = vshrl.u32 %v11618_v54, 7  ;;  %v18797_v29 = vld [vmem:[#allocation55_spill] sm:$0xff]  ;;  %v14811_v54 = vmov 0.0  }
 0x2fd   : > { %v14441_v11 = vpop.f32.mrb[244].mxu1  ;;  %v14515_v5 = vpop.f32.mrb[244].mxu0  ;;  %vm11623_vm9 = vcmp.ge.s32.totalorder %v18234_v21, 1 }
 0x2fe   : > { %v7602_v42 = vadd.f32 %v14441_v11, %v18792_v46  ;;  %v7505_v26 = vpop.f32.mrb[245].mxu1  ;;  %v8408_v45 = vpop.f32.mrb[245].mxu0 }
 0x2ff   : > { %v7600_v7 = vadd.f32 %v7505_v26, %v18793_v49  ;;  %v14442_v38 = vpop.f32.mrb[246].mxu1  ;;  %v14516_v10 = vpop.f32.mrb[246].mxu0  ;;  %v18241_v26 = vld [vmem:[%s18472_s2] ss:$0 sm:$0xff]  ;;  %v18244_v49 = vadd.s32 16, %v18234_v21 }
 0x300   : > { %v7508_v57 = vpop.f32.mrb[247].mxu1  ;;  %v18227_v32 = vadd.f32 %v14515_v5, %v7602_v42  ;;  %v8411_v59 = vpop.f32.mrb[247].mxu0  ;;  %v18798_v10 = vld [vmem:[#allocation36_spill] sm:$0xff] }
 0x301   : > { %v7601_v9 = vadd.f32 %v7508_v57, %v18794_v51  ;;  %v18229_v47 = vadd.f32 %v8408_v45, %v7600_v7  ;;  %vm11637_vm8 = vcmp.le.s32.totalorder %v18244_v49, 16 }
 0x303   : > { %v18231_v27 = vadd.f32 %v8411_v59, %v7601_v9 }
 0x305   : > { %v14519_v37 = vpop.f32.mrb[248].mxu0 }
 0x306   : > { %v14445_v8 = vpop.f32.mrb[248].mxu1  ;;  %v8424_v25 = vpop.f32.mrb[249].mxu0 }
 0x307   : > { %v7521_v15 = vpop.f32.mrb[249].mxu1  ;;  %v14520_v17 = vpop.f32.mrb[250].mxu0 }
 0x308   : > { %v14446_v34 = vpop.f32.mrb[250].mxu1  ;;  %v8427_v30 = vpop.f32.mrb[251].mxu0 }
 0x309   : > { %v7524_v58 = vpop.f32.mrb[251].mxu1 }
 0x30a   : > { %v18799_v58 = vld [vmem:[#allocation37_spill] sm:$0xff] }
 0x30e   : > { %v14525_v62 = vpop.f32.mrb[252].mxu1 }
 0x30f   : > { %v9792_v12 = vpop.f32.mrb[253].mxu1 }
 0x310   : > { %v14526_v0 = vpop.f32.mrb[254].mxu1 }
 0x311   : > { %v9795_v48 = vpop.f32.mrb[255].mxu1  ;;  %v18800_v0 = vld [vmem:[#allocation56_spill] sm:$0xff] }
 0x313   : > { %v14599_v60 = vpop.f32.mrb[252].mxu0 }
 0x314   : > { %v10964_v28 = vpop.f32.mrb[253].mxu0 }
 0x315   : > { %v14600_v35 = vpop.f32.mrb[254].mxu0 }
 0x316   : > { %v14529_v31 = vpop.f32.mrb[0].mxu1  ;;  %v10967_v53 = vpop.f32.mrb[255].mxu0 }
 0x317   : > { %v10085_v33 = vadd.f32 %v14529_v31, %v18795_v55  ;;  %v9808_v43 = vpop.f32.mrb[1].mxu1 }
 0x318   : > { %v10083_v24 = vadd.f32 %v9808_v43, %v18796_v3  ;;  %v14530_v6 = vpop.f32.mrb[2].mxu1 }
 0x319   : > { %v9811_v11 = vpop.f32.mrb[3].mxu1 }
 0x31a   : > { %v10084_v46 = vadd.f32 %v9811_v11, %v18797_v29 }
 0x31b   : > { %v14603_v42 = vpop.f32.mrb[0].mxu0 }
 0x31c   : > { %v11257_v7 = vadd.f32 %v14603_v42, %v10085_v33  ;;  %v10980_v38 = vpop.f32.mrb[1].mxu0 }
 0x31d   : > { %v11255_v57 = vadd.f32 %v10980_v38, %v10083_v24  ;;  %v14604_v51 = vpop.f32.mrb[2].mxu0 }
 0x31e   : > { %v14533_v9 = vpop.f32.mrb[4].mxu1  ;;  %v11480_v5 = vadd.f32 %v18241_v26, %v11257_v7  ;;  %v10983_v45 = vpop.f32.mrb[3].mxu0  ;;  %v18802_v51 = vld [vmem:[#allocation58_spill] sm:$0xff] }
 0x31f   : > { %v10089_v8 = vadd.f32 %v14533_v9, %v18798_v10  ;;  %v9824_v59 = vpop.f32.mrb[5].mxu1  ;;  %v11478_v15 = vadd.f32 %v18241_v26, %v11255_v57  ;;  %v11256_v34 = vadd.f32 %v10983_v45, %v10084_v46  ;;  %v18801_v46 = vld [vmem:[#allocation57_spill] sm:$0xff] }
 0x320   : > { %v10087_v37 = vadd.f32 %v9824_v59, %v18799_v58  ;;  %v14534_v25 = vpop.f32.mrb[6].mxu1  ;;  %v11552_v17 = vmax.f32 %v11480_v5, 0.0 }
 0x321   : > { %v9827_v62 = vpop.f32.mrb[7].mxu1  ;;  %v11550_v30 = vmax.f32 %v11478_v15, 0.0  ;;  %v11479_v12 = vadd.f32 %v18241_v26, %v11256_v34  ;;  %v18803_v15 = vld [vmem:[#allocation3_spill] sm:$0xff] }
 0x322   : > { %v10088_v48 = vadd.f32 %v9827_v62, %v18800_v0  ;;  %v11653_v60 = vsel %vm11637_vm8, %v11552_v17, 0.0 }
 0x323   : > { %v13501_v28 = vpack.c.bf16 %v14811_v54, %v11653_v60  ;;  %v11651_v35 = vsel %vm11623_vm9, %v11550_v30, 0.0  ;;  %v11551_v31 = vmax.f32 %v11479_v12, 0.0 }
 0x324   : > { %v14607_v53 = vpop.f32.mrb[4].mxu0 }
 0x325   : > { %v11261_v55 = vadd.f32 %v14607_v53, %v10089_v8  ;;  %v10996_v33 = vpop.f32.mrb[5].mxu0  ;;  %13639 = vst [vmem:[%s18258_s19 + $0x18] sm:$0xff] %v13501_v28   ;;  %v13497_v43 = vpack.c.bf16 %v11551_v31, %v11651_v35  ;;  %v18804_v53 = vld [vmem:[#allocation4_spill] sm:$0xff] }
 0x326   : > { %v11259_v3 = vadd.f32 %v10996_v33, %v10087_v37  ;;  %v14608_v24 = vpop.f32.mrb[6].mxu0  ;;  %v14537_v6 = vpop.f32.mrb[8].mxu1 }
 0x327   : > { %v11484_v11 = vadd.f32 %v18241_v26, %v11261_v55  ;;  %v10999_v29 = vpop.f32.mrb[7].mxu0  ;;  %v10093_v42 = vadd.f32 %v14537_v6, %v18801_v46  ;;  %v9840_v7 = vpop.f32.mrb[9].mxu1  ;;  %13638 = vst [vmem:[%s18258_s19 + $0x10] sm:$0xff] %v13497_v43   ;;  %v18805_v24 = vld [vmem:[#allocation5_spill] sm:$0xff] }
 0x328   : > { %v11482_v38 = vadd.f32 %v18241_v26, %v11259_v3  ;;  %v11260_v57 = vadd.f32 %v10999_v29, %v10088_v48  ;;  %v10091_v9 = vadd.f32 %v9840_v7, %v18802_v51  ;;  %v14538_v5 = vpop.f32.mrb[10].mxu1 }
 0x329   : > { %v11556_v45 = vmax.f32 %v11484_v11, 0.0  ;;  %v9843_v10 = vpop.f32.mrb[11].mxu1 }
 0x32a   : > { %v11554_v8 = vmax.f32 %v11482_v38, 0.0  ;;  %v11483_v59 = vadd.f32 %v18241_v26, %v11260_v57  ;;  %v10092_v34 = vadd.f32 %v9843_v10, %v18803_v15  ;;  %v18806_v38 = vld [vmem:[#allocation6_spill] sm:$0xff] }
 0x32b   : > { %v11657_v58 = vsel %vm11637_vm8, %v11556_v45, 0.0 }
 0x32c   : > { %v13510_v37 = vpack.c.bf16 %v14811_v54, %v11657_v58  ;;  %v11655_v25 = vsel %vm11623_vm9, %v11554_v8, 0.0  ;;  %v11555_v17 = vmax.f32 %v11483_v59, 0.0  ;;  %v14611_v62 = vpop.f32.mrb[8].mxu0 }
 0x32d   : > { %v11265_v30 = vadd.f32 %v14611_v62, %v10093_v42  ;;  %v11012_v12 = vpop.f32.mrb[9].mxu0  ;;  %v18807_v62 = vld [vmem:[#allocation7_spill] sm:$0xff] }
 0x32e   : > { %13641 = vst [vmem:[%s18258_s19 + $0x28] sm:$0xff] %v13510_v37   ;;  %v13506_v0 = vpack.c.bf16 %v11555_v17, %v11655_v25  ;;  %v11263_v48 = vadd.f32 %v11012_v12, %v10091_v9  ;;  %v14612_v60 = vpop.f32.mrb[10].mxu0  ;;  %v14541_v28 = vpop.f32.mrb[12].mxu1 }
 0x32f   : > { %v11488_v35 = vadd.f32 %v18241_v26, %v11265_v30  ;;  %v11015_v31 = vpop.f32.mrb[11].mxu0  ;;  %v10097_v55 = vadd.f32 %v14541_v28, %v18804_v53  ;;  %v9856_v33 = vpop.f32.mrb[13].mxu1  ;;  %v18808_v60 = vld [vmem:[#allocation8_spill] sm:$0xff] }
 0x330   : > { %13640 = vst [vmem:[%s18258_s19 + $0x20] sm:$0xff] %v13506_v0   ;;  %v11486_v43 = vadd.f32 %v18241_v26, %v11263_v48  ;;  %v11264_v3 = vadd.f32 %v11015_v31, %v10092_v34  ;;  %v10095_v6 = vadd.f32 %v9856_v33, %v18805_v24  ;;  %v14542_v11 = vpop.f32.mrb[14].mxu1 }
 0x331   : > { %v11560_v29 = vmax.f32 %v11488_v35, 0.0  ;;  %v9859_v46 = vpop.f32.mrb[15].mxu1 }
 0x332   : > { %v11558_v42 = vmax.f32 %v11486_v43, 0.0  ;;  %v11487_v7 = vadd.f32 %v18241_v26, %v11264_v3  ;;  %v10096_v57 = vadd.f32 %v9859_v46, %v18806_v38  ;;  %v18809_v43 = vld [vmem:[#allocation9_spill] sm:$0xff] }
 0x333   : > { %v11661_v51 = vsel %vm11637_vm8, %v11560_v29, 0.0 }
 0x334   : > { %v13519_v9 = vpack.c.bf16 %v14811_v54, %v11661_v51  ;;  %v11659_v5 = vsel %vm11623_vm9, %v11558_v42, 0.0  ;;  %v11559_v45 = vmax.f32 %v11487_v7, 0.0  ;;  %v14615_v10 = vpop.f32.mrb[12].mxu0 }
 0x335   : > { %v11269_v8 = vadd.f32 %v14615_v10, %v10097_v55  ;;  %v11028_v59 = vpop.f32.mrb[13].mxu0  ;;  %v18810_v10 = vld [vmem:[#allocation10_spill] sm:$0xff] }
 0x336   : > { %13643 = vst [vmem:[%s18258_s19 + $0x38] sm:$0xff] %v13519_v9   ;;  %v13515_v15 = vpack.c.bf16 %v11559_v45, %v11659_v5  ;;  %v11267_v34 = vadd.f32 %v11028_v59, %v10095_v6  ;;  %v14616_v58 = vpop.f32.mrb[14].mxu0  ;;  %v14545_v37 = vpop.f32.mrb[16].mxu1 }
 0x337   : > { %v11492_v25 = vadd.f32 %v18241_v26, %v11269_v8  ;;  %v11031_v17 = vpop.f32.mrb[15].mxu0  ;;  %v10101_v30 = vadd.f32 %v14545_v37, %v18807_v62  ;;  %v9872_v12 = vpop.f32.mrb[17].mxu1  ;;  %v18811_v58 = vld [vmem:[#allocation11_spill] sm:$0xff] }
 0x338   : > { %13642 = vst [vmem:[%s18258_s19 + $0x30] sm:$0xff] %v13515_v15   ;;  %v11490_v0 = vadd.f32 %v18241_v26, %v11267_v34  ;;  %v11268_v48 = vadd.f32 %v11031_v17, %v10096_v57  ;;  %v10099_v28 = vadd.f32 %v9872_v12, %v18808_v60  ;;  %v14546_v35 = vpop.f32.mrb[18].mxu1 }
 0x339   : > { %v11564_v31 = vmax.f32 %v11492_v25, 0.0  ;;  %v9875_v53 = vpop.f32.mrb[19].mxu1 }
 0x33a   : > { %v11562_v55 = vmax.f32 %v11490_v0, 0.0  ;;  %v11491_v33 = vadd.f32 %v18241_v26, %v11268_v48  ;;  %v10100_v3 = vadd.f32 %v9875_v53, %v18809_v43 }
 0x33b   : > { %v11665_v24 = vsel %vm11637_vm8, %v11564_v31, 0.0 }
 0x33c   : > { %v13528_v6 = vpack.c.bf16 %v14811_v54, %v11665_v24  ;;  %v11663_v11 = vsel %vm11623_vm9, %v11562_v55, 0.0  ;;  %v11563_v29 = vmax.f32 %v11491_v33, 0.0  ;;  %v14619_v46 = vpop.f32.mrb[16].mxu0 }
 0x33d   : > { %v11273_v42 = vadd.f32 %v14619_v46, %v10101_v30  ;;  %v11044_v7 = vpop.f32.mrb[17].mxu0  ;;  %v14812_v30 = vmov 0.0|0.0  }
 0x33e   : > { %13645 = vst [vmem:[%s18258_s19 + $0x48] sm:$0xff] %v13528_v6   ;;  %v13524_v38 = vpack.c.bf16 %v11563_v29, %v11663_v11  ;;  %v11271_v57 = vadd.f32 %v11044_v7, %v10099_v28  ;;  %v14620_v51 = vpop.f32.mrb[18].mxu0  ;;  %v14549_v9 = vpop.f32.mrb[20].mxu1  ;;  %v13356_v12 = vcombine.low %v14812_v30, %v14812_v30  ;;  %v13357_v0 = vcombine.high %v14812_v30, %v14812_v30  ;;  %v18812_v28 = vld [vmem:[#allocation12_spill] sm:$0xff] }
 0x33f   : > { %v11496_v5 = vadd.f32 %v18241_v26, %v11273_v42  ;;  %v11047_v45 = vpop.f32.mrb[19].mxu0  ;;  %v10105_v8 = vadd.f32 %v14549_v9, %v18810_v10  ;;  %v9888_v59 = vpop.f32.mrb[21].mxu1 }
 0x340   : > { %13644 = vst [vmem:[%s18258_s19 + $0x40] sm:$0xff] %v13524_v38   ;;  %v11494_v15 = vadd.f32 %v18241_v26, %v11271_v57  ;;  %v11272_v34 = vadd.f32 %v11047_v45, %v10100_v3  ;;  %v10103_v37 = vadd.f32 %v9888_v59, %v18811_v58  ;;  %v14550_v25 = vpop.f32.mrb[22].mxu1  ;;  %12007 = vst [vmem:[%s18258_s19] sm:$0xf] %v13356_v12  ;;  %v18813_v38 = vld [vmem:[#allocation13_spill] sm:$0xff]  ;;  %v18814_v45 = vld [vmem:[#allocation14_spill] sm:$0xff] }
 0x341   : > { %v11568_v17 = vmax.f32 %v11496_v5, 0.0  ;;  %v9891_v62 = vpop.f32.mrb[23].mxu1  ;;  %12008 = vst [vmem:[%s18258_s19 + $0x4] sm:$0xf] %v13357_v0  ;;  %12009 = vst [vmem:[%s18258_s19 + $0x8] sm:$0xf] %v13356_v12 }
 0x342   : > { %v11566_v48 = vmax.f32 %v11494_v15, 0.0  ;;  %v11495_v60 = vadd.f32 %v18241_v26, %v11272_v34  ;;  %v10104_v35 = vadd.f32 %v9891_v62, %v18812_v28  ;;  %12010 = vst [vmem:[%s18258_s19 + $0xc] sm:$0xf] %v13357_v0  ;;  %12075 = vst [vmem:[%s18258_s19 + $0x110] sm:$0xf] %v13356_v12 }
 0x343   : > { %v11669_v31 = vsel %vm11637_vm8, %v11568_v17, 0.0  ;;  %12076 = vst [vmem:[%s18258_s19 + $0x114] sm:$0xf] %v13357_v0  ;;  %12077 = vst [vmem:[%s18258_s19 + $0x118] sm:$0xf] %v13356_v12 }
 0x344   : > { %12078 = vst [vmem:[%s18258_s19 + $0x11c] sm:$0xf] %v13357_v0  ;;  %v13537_v53 = vpack.c.bf16 %v14811_v54, %v11669_v31  ;;  %v11667_v55 = vsel %vm11623_vm9, %v11566_v48, 0.0  ;;  %v11567_v33 = vmax.f32 %v11495_v60, 0.0 }
 0x345   : > { %v14623_v43 = vpop.f32.mrb[20].mxu0 }
 0x346   : > { %v11277_v3 = vadd.f32 %v14623_v43, %v10105_v8  ;;  %v11060_v24 = vpop.f32.mrb[21].mxu0  ;;  %13647 = vst [vmem:[%s18258_s19 + $0x58] sm:$0xff] %v13537_v53   ;;  %v13533_v6 = vpack.c.bf16 %v11567_v33, %v11667_v55  ;;  %v14553_v46 = vpop.f32.mrb[24].mxu1  ;;  %v18816_v43 = vld [vmem:[#allocation16_spill] sm:$0xff] }
 0x347   : > { %v11275_v11 = vadd.f32 %v11060_v24, %v10103_v37  ;;  %v14624_v29 = vpop.f32.mrb[22].mxu0  ;;  %v10109_v57 = vadd.f32 %v14553_v46, %v18813_v38  ;;  %v9904_v51 = vpop.f32.mrb[25].mxu1  ;;  %v18815_v37 = vld [vmem:[#allocation15_spill] sm:$0xff] }
 0x348   : > { %v11500_v42 = vadd.f32 %v18241_v26, %v11277_v3  ;;  %v11063_v7 = vpop.f32.mrb[23].mxu0  ;;  %13646 = vst [vmem:[%s18258_s19 + $0x50] sm:$0xff] %v13533_v6   ;;  %v10107_v10 = vadd.f32 %v9904_v51, %v18814_v45  ;;  %v14554_v8 = vpop.f32.mrb[26].mxu1  ;;  %v18817_v29 = vld [vmem:[#allocation17_spill] sm:$0xff] }
 0x349   : > { %v11498_v9 = vadd.f32 %v18241_v26, %v11275_v11  ;;  %v11276_v5 = vadd.f32 %v11063_v7, %v10104_v35  ;;  %v9907_v15 = vpop.f32.mrb[27].mxu1 }
 0x34a   : > { %v11572_v59 = vmax.f32 %v11500_v42, 0.0  ;;  %v10108_v25 = vadd.f32 %v9907_v15, %v18815_v37 }
 0x34b   : > { %v11570_v34 = vmax.f32 %v11498_v9, 0.0  ;;  %v11499_v58 = vadd.f32 %v18241_v26, %v11276_v5  ;;  %v18818_v9 = vld [vmem:[#allocation18_spill] sm:$0xff] }
 0x34c   : > { %v11673_v17 = vsel %vm11637_vm8, %v11572_v59, 0.0 }
 0x34d   : > { %v13546_v62 = vpack.c.bf16 %v14811_v54, %v11673_v17  ;;  %v11671_v30 = vsel %vm11623_vm9, %v11570_v34, 0.0  ;;  %v11571_v12 = vmax.f32 %v11499_v58, 0.0  ;;  %v14627_v0 = vpop.f32.mrb[24].mxu0 }
 0x34e   : > { %v11281_v48 = vadd.f32 %v14627_v0, %v10109_v57  ;;  %v11076_v60 = vpop.f32.mrb[25].mxu0  ;;  %v14557_v53 = vpop.f32.mrb[28].mxu1 }
 0x34f   : > { %13649 = vst [vmem:[%s18258_s19 + $0x68] sm:$0xff] %v13546_v62   ;;  %v13542_v28 = vpack.c.bf16 %v11571_v12, %v11671_v30  ;;  %v11279_v35 = vadd.f32 %v11076_v60, %v10107_v10  ;;  %v14628_v31 = vpop.f32.mrb[26].mxu0  ;;  %v10113_v3 = vadd.f32 %v14557_v53, %v18816_v43  ;;  %v9920_v24 = vpop.f32.mrb[29].mxu1 }
 0x350   : > { %v11504_v55 = vadd.f32 %v18241_v26, %v11281_v48  ;;  %v11079_v33 = vpop.f32.mrb[27].mxu0  ;;  %v10111_v46 = vadd.f32 %v9920_v24, %v18817_v29  ;;  %v14558_v42 = vpop.f32.mrb[30].mxu1 }
 0x351   : > { %13648 = vst [vmem:[%s18258_s19 + $0x60] sm:$0xff] %v13542_v28   ;;  %v11502_v6 = vadd.f32 %v18241_v26, %v11279_v35  ;;  %v11280_v11 = vadd.f32 %v11079_v33, %v10108_v25  ;;  %v9923_v38 = vpop.f32.mrb[31].mxu1 }
 0x352   : > { %v11576_v7 = vmax.f32 %v11504_v55, 0.0  ;;  %v10112_v5 = vadd.f32 %v9923_v38, %v18818_v9 }
 0x353   : > { %v11574_v57 = vmax.f32 %v11502_v6, 0.0  ;;  %v11503_v51 = vadd.f32 %v18241_v26, %v11280_v11 }
 0x354   : > { %v11677_v45 = vsel %vm11637_vm8, %v11576_v7, 0.0 }
 0x355   : > { %v13555_v10 = vpack.c.bf16 %v14811_v54, %v11677_v45  ;;  %v11675_v8 = vsel %vm11623_vm9, %v11574_v57, 0.0  ;;  %v11575_v59 = vmax.f32 %v11503_v51, 0.0  ;;  %v14631_v15 = vpop.f32.mrb[28].mxu0 }
 0x356   : > { %v11285_v34 = vadd.f32 %v14631_v15, %v10113_v3  ;;  %v11092_v58 = vpop.f32.mrb[29].mxu0  ;;  %v14561_v62 = vpop.f32.mrb[32].mxu1 }
 0x357   : > { %13651 = vst [vmem:[%s18258_s19 + $0x78] sm:$0xff] %v13555_v10   ;;  %v13551_v37 = vpack.c.bf16 %v11575_v59, %v11675_v8  ;;  %v11283_v25 = vadd.f32 %v11092_v58, %v10111_v46  ;;  %v14632_v17 = vpop.f32.mrb[30].mxu0  ;;  %v10117_v0 = vadd.f32 %v14561_v62, %v18151_v63  ;;  %v9936_v48 = vpop.f32.mrb[33].mxu1 }
 0x358   : > { %v11508_v30 = vadd.f32 %v18241_v26, %v11285_v34  ;;  %v11095_v12 = vpop.f32.mrb[31].mxu0  ;;  %v10115_v35 = vadd.f32 %v9936_v48, %v18154_v20  ;;  %v14562_v31 = vpop.f32.mrb[34].mxu1 }
 0x359   : > { %13650 = vst [vmem:[%s18258_s19 + $0x70] sm:$0xff] %v13551_v37   ;;  %v11506_v60 = vadd.f32 %v18241_v26, %v11283_v25  ;;  %v11284_v28 = vadd.f32 %v11095_v12, %v10112_v5  ;;  %v9939_v55 = vpop.f32.mrb[35].mxu1 }
 0x35a   : > { %v11580_v53 = vmax.f32 %v11508_v30, 0.0  ;;  %v10116_v3 = vadd.f32 %v9939_v55, %v18157_v23 }
 0x35b   : > { %v11578_v33 = vmax.f32 %v11506_v60, 0.0  ;;  %v11507_v43 = vadd.f32 %v18241_v26, %v11284_v28 }
 0x35c   : > { %v11681_v63 = vsel %vm11637_vm8, %v11580_v53, 0.0 }
 0x35d   : > { %v13564_v24 = vpack.c.bf16 %v14811_v54, %v11681_v63  ;;  %v11679_v6 = vsel %vm11623_vm9, %v11578_v33, 0.0  ;;  %v11579_v11 = vmax.f32 %v11507_v43, 0.0  ;;  %v14635_v29 = vpop.f32.mrb[32].mxu0 }
 0x35e   : > { %v11289_v20 = vadd.f32 %v14635_v29, %v10117_v0  ;;  %v11108_v46 = vpop.f32.mrb[33].mxu0 }
 0x35f   : > { %13653 = vst [vmem:[%s18258_s19 + $0x88] sm:$0xff] %v13564_v24   ;;  %v13560_v42 = vpack.c.bf16 %v11579_v11, %v11679_v6  ;;  %v11287_v7 = vadd.f32 %v11108_v46, %v10115_v35  ;;  %v14636_v38 = vpop.f32.mrb[34].mxu0  ;;  %v14565_v23 = vpop.f32.mrb[36].mxu1 }
 0x360   : > { %v11512_v57 = vadd.f32 %v18241_v26, %v11289_v20  ;;  %v11111_v51 = vpop.f32.mrb[35].mxu0  ;;  %v10121_v45 = vadd.f32 %v14565_v23, %v18160_v56  ;;  %v9952_v10 = vpop.f32.mrb[37].mxu1 }
 0x361   : > { %13652 = vst [vmem:[%s18258_s19 + $0x80] sm:$0xff] %v13560_v42   ;;  %v11510_v9 = vadd.f32 %v18241_v26, %v11287_v7  ;;  %v11288_v5 = vadd.f32 %v11111_v51, %v10116_v3  ;;  %v10119_v59 = vadd.f32 %v9952_v10, %v18163_v2  ;;  %v14566_v15 = vpop.f32.mrb[38].mxu1 }
 0x362   : > { %v11584_v8 = vmax.f32 %v11512_v57, 0.0  ;;  %v9955_v37 = vpop.f32.mrb[39].mxu1 }
 0x363   : > { %v11582_v34 = vmax.f32 %v11510_v9, 0.0  ;;  %v11511_v58 = vadd.f32 %v18241_v26, %v11288_v5  ;;  %v10120_v17 = vadd.f32 %v9955_v37, %v18181_v50 }
 0x364   : > { %v11685_v25 = vsel %vm11637_vm8, %v11584_v8, 0.0 }
 0x365   : > { %v13573_v62 = vpack.c.bf16 %v14811_v54, %v11685_v25  ;;  %v11683_v56 = vsel %vm11623_vm9, %v11582_v34, 0.0  ;;  %v11583_v30 = vmax.f32 %v11511_v58, 0.0  ;;  %v14639_v12 = vpop.f32.mrb[36].mxu0 }
 0x366   : > { %v11293_v0 = vadd.f32 %v14639_v12, %v10121_v45  ;;  %v11124_v2 = vpop.f32.mrb[37].mxu0 }
 0x367   : > { %13655 = vst [vmem:[%s18258_s19 + $0x98] sm:$0xff] %v13573_v62   ;;  %v13569_v48 = vpack.c.bf16 %v11583_v30, %v11683_v56  ;;  %v11291_v60 = vadd.f32 %v11124_v2, %v10119_v59  ;;  %v14640_v28 = vpop.f32.mrb[38].mxu0 }
 0x368   : > { %v11516_v35 = vadd.f32 %v18241_v26, %v11293_v0  ;;  %v11127_v31 = vpop.f32.mrb[39].mxu0 }
 0x369   : > { %13654 = vst [vmem:[%s18258_s19 + $0x90] sm:$0xff] %v13569_v48   ;;  %v11514_v50 = vadd.f32 %v18241_v26, %v11291_v60  ;;  %v11292_v53 = vadd.f32 %v11127_v31, %v10120_v17 }
 0x36a   : > { %v11588_v55 = vmax.f32 %v11516_v35, 0.0 }
 0x36b   : > { %v11586_v33 = vmax.f32 %v11514_v50, 0.0  ;;  %v11515_v43 = vadd.f32 %v18241_v26, %v11292_v53  ;;  %v14569_v63 = vpop.f32.mrb[40].mxu1 }
 0x36c   : > { %v11689_v3 = vsel %vm11637_vm8, %v11588_v55, 0.0  ;;  %v10125_v29 = vadd.f32 %v14569_v63, %v18184_v19  ;;  %v9968_v20 = vpop.f32.mrb[41].mxu1 }
 0x36d   : > { %v13582_v24 = vpack.c.bf16 %v14811_v54, %v11689_v3  ;;  %v11687_v6 = vsel %vm11623_vm9, %v11586_v33, 0.0  ;;  %v11587_v11 = vmax.f32 %v11515_v43, 0.0  ;;  %v10123_v46 = vadd.f32 %v9968_v20, %v18187_v22  ;;  %v14570_v42 = vpop.f32.mrb[42].mxu1 }
 0x36e   : > { %v9971_v38 = vpop.f32.mrb[43].mxu1 }
 0x36f   : > { %13657 = vst [vmem:[%s18258_s19 + $0xa8] sm:$0xff] %v13582_v24   ;;  %v13578_v7 = vpack.c.bf16 %v11587_v11, %v11687_v6  ;;  %v14643_v57 = vpop.f32.mrb[40].mxu0  ;;  %v10124_v51 = vadd.f32 %v9971_v38, %v18190_v16 }
 0x370   : > { %v11297_v23 = vadd.f32 %v14643_v57, %v10125_v29  ;;  %v11140_v9 = vpop.f32.mrb[41].mxu0 }
 0x371   : > { %13656 = vst [vmem:[%s18258_s19 + $0xa0] sm:$0xff] %v13578_v7   ;;  %v11295_v5 = vadd.f32 %v11140_v9, %v10123_v46  ;;  %v14644_v45 = vpop.f32.mrb[42].mxu0 }
 0x372   : > { %v11520_v10 = vadd.f32 %v18241_v26, %v11297_v23  ;;  %v11143_v19 = vpop.f32.mrb[43].mxu0 }
 0x373   : > { %v11518_v8 = vadd.f32 %v18241_v26, %v11295_v5  ;;  %v11296_v22 = vadd.f32 %v11143_v19, %v10124_v51 }
 0x374   : > { %v11592_v59 = vmax.f32 %v11520_v10, 0.0 }
 0x375   : > { %v11590_v15 = vmax.f32 %v11518_v8, 0.0  ;;  %v11519_v34 = vadd.f32 %v18241_v26, %v11296_v22 }
 0x376   : > { %v11693_v16 = vsel %vm11637_vm8, %v11592_v59, 0.0 }
 0x377   : > { %v13591_v58 = vpack.c.bf16 %v14811_v54, %v11693_v16  ;;  %v11691_v37 = vsel %vm11623_vm9, %v11590_v15, 0.0  ;;  %v11591_v25 = vmax.f32 %v11519_v34, 0.0 }
 0x379   : > { %13659 = vst [vmem:[%s18258_s19 + $0xb8] sm:$0xff] %v13591_v58   ;;  %v13587_v17 = vpack.c.bf16 %v11591_v25, %v11691_v37 }
 0x37a   : > { %v14573_v62 = vpop.f32.mrb[44].mxu1 }
 0x37b   : > { %13658 = vst [vmem:[%s18258_s19 + $0xb0] sm:$0xff] %v13587_v17   ;;  %v10129_v56 = vadd.f32 %v14573_v62, %v18192_v40  ;;  %v9984_v30 = vpop.f32.mrb[45].mxu1  ;;  %v14647_v12 = vpop.f32.mrb[44].mxu0 }
 0x37c   : > { %v10127_v0 = vadd.f32 %v9984_v30, %v18194_v14  ;;  %v14574_v2 = vpop.f32.mrb[46].mxu1  ;;  %v11156_v60 = vpop.f32.mrb[45].mxu0 }
 0x37d   : > { %v11301_v48 = vadd.f32 %v14647_v12, %v10129_v56  ;;  %v9987_v28 = vpop.f32.mrb[47].mxu1  ;;  %v14648_v31 = vpop.f32.mrb[46].mxu0 }
 0x37e   : > { %v11299_v35 = vadd.f32 %v11156_v60, %v10127_v0  ;;  %v10128_v50 = vadd.f32 %v9987_v28, %v18196_v44  ;;  %v11159_v55 = vpop.f32.mrb[47].mxu0 }
 0x37f   : > { %v11524_v53 = vadd.f32 %v18241_v26, %v11301_v48 }
 0x380   : > { %v11522_v33 = vadd.f32 %v18241_v26, %v11299_v35  ;;  %v11300_v40 = vadd.f32 %v11159_v55, %v10128_v50 }
 0x381   : > { %v11596_v43 = vmax.f32 %v11524_v53, 0.0 }
 0x382   : > { %v11594_v3 = vmax.f32 %v11522_v33, 0.0  ;;  %v11523_v14 = vadd.f32 %v18241_v26, %v11300_v40 }
 0x383   : > { %v11697_v63 = vsel %vm11637_vm8, %v11596_v43, 0.0 }
 0x384   : > { %v13600_v24 = vpack.c.bf16 %v14811_v54, %v11697_v63  ;;  %v11695_v6 = vsel %vm11623_vm9, %v11594_v3, 0.0  ;;  %v11595_v11 = vmax.f32 %v11523_v14, 0.0 }
 0x386   : > { %13661 = vst [vmem:[%s18258_s19 + $0xc8] sm:$0xff] %v13600_v24   ;;  %v13596_v44 = vpack.c.bf16 %v11595_v11, %v11695_v6 }
 0x387   : > { %v14577_v29 = vpop.f32.mrb[48].mxu1 }
 0x388   : > { %13660 = vst [vmem:[%s18258_s19 + $0xc0] sm:$0xff] %v13596_v44   ;;  %v14651_v20 = vpop.f32.mrb[48].mxu0  ;;  %v10133_v46 = vadd.f32 %v14577_v29, %v18199_v41  ;;  %v10000_v42 = vpop.f32.mrb[49].mxu1 }
 0x389   : > { %v11172_v7 = vpop.f32.mrb[49].mxu0  ;;  %v10131_v38 = vadd.f32 %v10000_v42, %v18202_v1  ;;  %v14578_v57 = vpop.f32.mrb[50].mxu1 }
 0x38a   : > { %v14652_v51 = vpop.f32.mrb[50].mxu0  ;;  %v11305_v23 = vadd.f32 %v14651_v20, %v10133_v46  ;;  %v10003_v9 = vpop.f32.mrb[51].mxu1 }
 0x38b   : > { %v11175_v5 = vpop.f32.mrb[51].mxu0  ;;  %v11303_v45 = vadd.f32 %v11172_v7, %v10131_v38  ;;  %v10132_v10 = vadd.f32 %v10003_v9, %v18205_v61 }
 0x38c   : > { %v11528_v19 = vadd.f32 %v18241_v26, %v11305_v23 }
 0x38d   : > { %v11526_v8 = vadd.f32 %v18241_v26, %v11303_v45  ;;  %v11304_v22 = vadd.f32 %v11175_v5, %v10132_v10 }
 0x38e   : > { %v11600_v41 = vmax.f32 %v11528_v19, 0.0 }
 0x38f   : > { %v11598_v59 = vmax.f32 %v11526_v8, 0.0  ;;  %v11527_v15 = vadd.f32 %v18241_v26, %v11304_v22 }
 0x390   : > { %v11701_v1 = vsel %vm11637_vm8, %v11600_v41, 0.0 }
 0x391   : > { %v13609_v34 = vpack.c.bf16 %v14811_v54, %v11701_v1  ;;  %v11699_v16 = vsel %vm11623_vm9, %v11598_v59, 0.0  ;;  %v11599_v58 = vmax.f32 %v11527_v15, 0.0 }
 0x393   : > { %13663 = vst [vmem:[%s18258_s19 + $0xd8] sm:$0xff] %v13609_v34   ;;  %v13605_v61 = vpack.c.bf16 %v11599_v58, %v11699_v16 }
 0x394   : > { %v14581_v37 = vpop.f32.mrb[52].mxu1 }
 0x395   : > { %v10137_v25 = vadd.f32 %v14581_v37, %v18209_v36  ;;  %v14655_v17 = vpop.f32.mrb[52].mxu0  ;;  %v10016_v62 = vpop.f32.mrb[53].mxu1  ;;  %13662 = vst [vmem:[%s18258_s19 + $0xd0] sm:$0xff] %v13605_v61  }
 0x396   : > { %v10135_v56 = vadd.f32 %v10016_v62, %v18211_v52  ;;  %v11188_v30 = vpop.f32.mrb[53].mxu0  ;;  %v14582_v12 = vpop.f32.mrb[54].mxu1 }
 0x397   : > { %v11309_v0 = vadd.f32 %v14655_v17, %v10137_v25  ;;  %v14656_v2 = vpop.f32.mrb[54].mxu0  ;;  %v10019_v48 = vpop.f32.mrb[55].mxu1 }
 0x398   : > { %v11307_v60 = vadd.f32 %v11188_v30, %v10135_v56  ;;  %v10136_v28 = vadd.f32 %v10019_v48, %v18214_v39  ;;  %v11191_v35 = vpop.f32.mrb[55].mxu0 }
 0x399   : > { %v11532_v31 = vadd.f32 %v18241_v26, %v11309_v0 }
 0x39a   : > { %v11530_v36 = vadd.f32 %v18241_v26, %v11307_v60  ;;  %v11308_v50 = vadd.f32 %v11191_v35, %v10136_v28 }
 0x39b   : > { %v11604_v53 = vmax.f32 %v11532_v31, 0.0 }
 0x39c   : > { %v11602_v55 = vmax.f32 %v11530_v36, 0.0  ;;  %v11531_v52 = vadd.f32 %v18241_v26, %v11308_v50 }
 0x39d   : > { %v11705_v33 = vsel %vm11637_vm8, %v11604_v53, 0.0 }
 0x39e   : > { %v13618_v40 = vpack.c.bf16 %v14811_v54, %v11705_v33  ;;  %v11703_v43 = vsel %vm11623_vm9, %v11602_v55, 0.0  ;;  %v11603_v3 = vmax.f32 %v11531_v52, 0.0 }
 0x3a0   : > { %13665 = vst [vmem:[%s18258_s19 + $0xe8] sm:$0xff] %v13618_v40   ;;  %v13614_v39 = vpack.c.bf16 %v11603_v3, %v11703_v43 }
 0x3a2   : > { %13664 = vst [vmem:[%s18258_s19 + $0xe0] sm:$0xff] %v13614_v39   ;;  %v14585_v14 = vpop.f32.mrb[56].mxu1 }
 0x3a3   : > { %v10141_v63 = vadd.f32 %v14585_v14, %v18218_v13  ;;  %v14659_v24 = vpop.f32.mrb[56].mxu0  ;;  %v10032_v6 = vpop.f32.mrb[57].mxu1 }
 0x3a4   : > { %v10139_v11 = vadd.f32 %v10032_v6, %v18220_v4  ;;  %v11204_v44 = vpop.f32.mrb[57].mxu0  ;;  %v14586_v29 = vpop.f32.mrb[58].mxu1 }
 0x3a5   : > { %v11313_v20 = vadd.f32 %v14659_v24, %v10141_v63  ;;  %v14660_v46 = vpop.f32.mrb[58].mxu0  ;;  %v10035_v42 = vpop.f32.mrb[59].mxu1 }
 0x3a6   : > { %v11311_v7 = vadd.f32 %v11204_v44, %v10139_v11  ;;  %v10140_v38 = vadd.f32 %v10035_v42, %v18223_v18  ;;  %v11207_v57 = vpop.f32.mrb[59].mxu0 }
 0x3a7   : > { %v11536_v51 = vadd.f32 %v18241_v26, %v11313_v20 }
 0x3a8   : > { %v11534_v23 = vadd.f32 %v18241_v26, %v11311_v7  ;;  %v11312_v13 = vadd.f32 %v11207_v57, %v10140_v38 }
 0x3a9   : > { %v11608_v9 = vmax.f32 %v11536_v51, 0.0 }
 0x3aa   : > { %v11606_v5 = vmax.f32 %v11534_v23, 0.0  ;;  %v11535_v4 = vadd.f32 %v18241_v26, %v11312_v13 }
 0x3ab   : > { %v11709_v45 = vsel %vm11637_vm8, %v11608_v9, 0.0 }
 0x3ac   : > { %v13627_v10 = vpack.c.bf16 %v14811_v54, %v11709_v45  ;;  %v11707_v19 = vsel %vm11623_vm9, %v11606_v5, 0.0  ;;  %v11607_v18 = vmax.f32 %v11535_v4, 0.0 }
 0x3ae   : > { %13667 = vst [vmem:[%s18258_s19 + $0xf8] sm:$0xff] %v13627_v10   ;;  %v13623_v8 = vpack.c.bf16 %v11607_v18, %v11707_v19  ;;  %v14589_v22 = vpop.f32.mrb[60].mxu1 }
 0x3af   : > { %v10145_v41 = vadd.f32 %v14589_v22, %v18227_v32  ;;  %v14663_v59 = vpop.f32.mrb[60].mxu0  ;;  %v10048_v15 = vpop.f32.mrb[61].mxu1 }
 0x3b0   : > { %13666 = vst [vmem:[%s18258_s19 + $0xf0] sm:$0xff] %v13623_v8   ;;  %v10143_v1 = vadd.f32 %v10048_v15, %v18229_v47  ;;  %v11220_v34 = vpop.f32.mrb[61].mxu0  ;;  %v14590_v16 = vpop.f32.mrb[62].mxu1 }
 0x3b1   : > { %v11317_v58 = vadd.f32 %v14663_v59, %v10145_v41  ;;  %v14664_v61 = vpop.f32.mrb[62].mxu0  ;;  %v10051_v37 = vpop.f32.mrb[63].mxu1 }
 0x3b2   : > { %v11315_v25 = vadd.f32 %v11220_v34, %v10143_v1  ;;  %v10144_v17 = vadd.f32 %v10051_v37, %v18231_v27  ;;  %v11223_v62 = vpop.f32.mrb[63].mxu0 }
 0x3b3   : > { %v11540_v56 = vadd.f32 %v18241_v26, %v11317_v58 }
 0x3b4   : > { %v11538_v32 = vadd.f32 %v18241_v26, %v11315_v25  ;;  %v11316_v30 = vadd.f32 %v11223_v62, %v10144_v17 }
 0x3b5   : > { %v11612_v12 = vmax.f32 %v11540_v56, 0.0 }
 0x3b6   : > { %v11610_v0 = vmax.f32 %v11538_v32, 0.0  ;;  %v11539_v47 = vadd.f32 %v18241_v26, %v11316_v30 }
 0x3b7   : > { %v11713_v2 = vsel %vm11637_vm8, %v11612_v12, 0.0 }
 0x3b8   : > { %v13636_v48 = vpack.c.bf16 %v14811_v54, %v11713_v2  ;;  %v11711_v60 = vsel %vm11623_vm9, %v11610_v0, 0.0  ;;  %v11611_v28 = vmax.f32 %v11539_v47, 0.0 }
 0x3ba   : > { %13669 = vst [vmem:[%s18258_s19 + $0x108] sm:$0xff] %v13636_v48   ;;  %v13632_v27 = vpack.c.bf16 %v11611_v28, %v11711_v60 }
 0x3bc   : > { %13668 = vst [vmem:[%s18258_s19 + $0x100] sm:$0xff] %v13632_v27   ;;  %v14593_v35 = vpop.f32.mrb[64].mxu1 }
 0x3bd   : > { %v14667_v31 = vpop.f32.mrb[64].mxu0  ;;  %v10064_v36 = vpop.f32.mrb[65].mxu1 }
 0x3be   : > { %v11236_v50 = vpop.f32.mrb[65].mxu0  ;;  %v14594_v53 = vpop.f32.mrb[66].mxu1 }
 0x3bf   : > { %v14668_v55 = vpop.f32.mrb[66].mxu0  ;;  %v10067_v52 = vpop.f32.mrb[67].mxu1 }
 0x3c0   : > { %v11239_v26 = vpop.f32.mrb[67].mxu0 }
 0x3c1 PF: > { %s13_s12 = sadd.s32 1, %s14809_s12  }
 0x3c2   : > { %p10_p4 = scmp.ge.s32.totalorder %s13_s12, 4  }
 0x3c4   :  { %12 = sbr.rel (!%p10_p4) target bundleno = 1 (0x1), region = 72 }

</bundles_post_ra>
